<compile_context>
chip_gen: v7x
topology: tpu7x:2x2x1
jax: 0.10.0
libtpu: 0.0.40
codegen_flags: <defaults>
</compile_context>

<pallas_src>
import math

import jax
import jax.numpy as jnp
from jax.experimental import pallas as pl
from jax.experimental.pallas import tpu as pltpu

CP = 128           # lane-dense padded channel width
NEG_SLOPE = 0.1    # LeakyReLU slope from the PyTorch module


def mfe_kernel(x_ref, w1, b1, w2, b2, w3, b3, w4, b4, o_ref, pad_ref):
    # x_ref:  (1, H, W, CP)    bf16
    # w*:     (9, CP, CP)      bf16  (tap-major weight layout, tap k = ky*3+kx)
    # b*:     (1, CP)          f32
    # o_ref:  (1, COP, H*W)    f32   (channels-major, COP = Cout padded to 8)
    # pad_ref: (H+2, W+2, CP)  bf16 scratch (zero halo + activation interior)
    _, H, W, C = x_ref.shape
    HW = H * W
    COP = o_ref.shape[1]

    # --- zero ONLY the 1-wide halo; interior is fully overwritten before each
    # conv, so the halo stays zero for all four convs of this grid step.
    pad_ref[0:1, :, :] = jnp.zeros((1, W + 2, C), pad_ref.dtype)
    pad_ref[H + 1:H + 2, :, :] = jnp.zeros((1, W + 2, C), pad_ref.dtype)
    pad_ref[:, 0:1, :] = jnp.zeros((H + 2, 1, C), pad_ref.dtype)
    pad_ref[:, W + 1:W + 2, :] = jnp.zeros((H + 2, 1, C), pad_ref.dtype)

    def conv3x3(a_bf16, w_ref, b_ref):
        # a_bf16: (H, W, C) bf16 activation (channels zero-padded to C=128).
        pad_ref[1:H + 1, 1:W + 1, :] = a_bf16
        acc = None
        # One W-shifted load per kx; ky shifts are cheap leading-axis slices.
        for kx in range(3):
            col = pad_ref[:, kx:kx + W, :]                 # (H+2, W, C) bf16
            for ky in range(3):
                xk = col[ky:ky + H].reshape(HW, C)         # (HW, C) bf16
                zk = jnp.dot(xk, w_ref[ky * 3 + kx],
                             preferred_element_type=jnp.float32)
                acc = zk if acc is None else acc + zk      # f32 accumulation
        return acc + b_ref[...]                            # (HW, C) f32

    def lrelu(z):
        return jnp.where(z >= 0.0, z, NEG_SLOPE * z)

    a = x_ref[0]                                            # (H, W, CP) bf16
    z = lrelu(conv3x3(a, w1, b1))
    z = lrelu(conv3x3(z.reshape(H, W, C).astype(jnp.bfloat16), w2, b2))
    z = lrelu(conv3x3(z.reshape(H, W, C).astype(jnp.bfloat16), w3, b3))
    z = conv3x3(z.reshape(H, W, C).astype(jnp.bfloat16), w4, b4)   # (HW, C) f32

    # Lane-dense epilogue: transpose to channels-major and write only the
    # 8-padded real output channels -> tiny, unmasked HBM writeback.
    zT = z.T                                                # (CP, HW) f32
    o_ref[0] = zT[:COP, :]


def mfe_block_pallas(x_nchw, params):
    """x_nchw: (N, Cin, H, W). params: list of 4 (weight(O,I,3,3), bias(O,)) PyTorch-layout pairs."""
    assert len(params) == 4, "kernel is specialized to the default 4-conv MFEBlock"
    N, Cin, H, W = x_nchw.shape
    Cout = params[-1][0].shape[0]
    assert Cin <= CP and all(p[0].shape[0] <= CP and p[0].shape[1] <= CP for p in params)
    COP = max(8, -(-Cout // 8) * 8)          # output channels padded to sublane tile
    HW = H * W

    # NCHW -> NHWC, zero-pad channels to 128, bf16 for HBM/MXU.
    x = jnp.transpose(x_nchw, (0, 2, 3, 1)).astype(jnp.float32)
    x = jnp.pad(x, ((0, 0), (0, 0), (0, 0), (0, CP - Cin))).astype(jnp.bfloat16)

    ws, bs = [], []
    for (w, b) in params:
        ci, co = w.shape[1], w.shape[0]
        wt = jnp.transpose(w, (2, 3, 1, 0)).astype(jnp.float32)        # (3,3,ci,co)
        wt = jnp.pad(wt, ((0, 0), (0, 0), (0, CP - ci), (0, CP - co)))
        ws.append(wt.reshape(9, CP, CP).astype(jnp.bfloat16))          # (9, CP, CP)
        bs.append(jnp.pad(b.astype(jnp.float32), (0, CP - co)).reshape(1, CP))

    act_spec = pl.BlockSpec((1, H, W, CP), lambda n: (n, 0, 0, 0))
    w_spec = pl.BlockSpec((9, CP, CP), lambda n: (0, 0, 0))   # constant -> fetched once
    b_spec = pl.BlockSpec((1, CP), lambda n: (0, 0))
    out_spec = pl.BlockSpec((1, COP, HW), lambda n: (n, 0, 0))

    def _nbytes(shape, dtype):
        return math.prod(shape) * jnp.dtype(dtype).itemsize

    # VMEM budget derived from the actual buffers (double-buffered pipelined
    # operands) plus headroom for spilled f32 accumulators / compiler scratch.
    vmem_bytes = (
        2 * _nbytes((1, H, W, CP), jnp.bfloat16)            # input block
        + 2 * 4 * _nbytes((9, CP, CP), jnp.bfloat16)        # 4 weights
        + 2 * 4 * _nbytes((8, CP), jnp.float32)             # 4 biases (tile-padded)
        + 2 * _nbytes((1, COP, HW), jnp.float32)            # output block
        + 2 * _nbytes((H + 2, W + 2, CP), jnp.bfloat16)     # pad scratch (+tile pad)
        + 4 * _nbytes((HW, CP), jnp.float32)                # accumulator spill room
    )
    vmem_limit = int(min(vmem_bytes + 8 * 1024 * 1024, 100 * 1024 * 1024))

    out = pl.pallas_call(
        mfe_kernel,
        out_shape=jax.ShapeDtypeStruct((N, COP, HW), jnp.float32),
        grid=(N,),
        in_specs=[act_spec,
                  w_spec, b_spec, w_spec, b_spec,
                  w_spec, b_spec, w_spec, b_spec],
        out_specs=out_spec,
        scratch_shapes=[pltpu.VMEM((H + 2, W + 2, CP), jnp.bfloat16)],
        compiler_params=pltpu.CompilerParams(
            dimension_semantics=("parallel",),       # megacore sharding on v7x
            vmem_limit_bytes=vmem_limit),
    )(x, ws[0], bs[0], ws[1], bs[1], ws[2], bs[2], ws[3], bs[3])

    # Channels-major (N, COP, HW) -> NCHW via slice + reshape (no host transpose).
    return out[:, :Cout, :].reshape(N, Cout, H, W)


def mfe_ref(x, params):
    """Pure-JAX f32 NCHW reference matching the PyTorch MFEBlock forward."""
    h = x
    n_layers = len(params)
    for i, (w, b) in enumerate(params):
        h = jax.lax.conv_general_dilated(
            h, w, window_strides=(1, 1), padding=((1, 1), (1, 1)),
            dimension_numbers=('NCHW', 'OIHW', 'NCHW'),
            precision=jax.lax.Precision.HIGHEST)
        h = h + b.reshape(1, -1, 1, 1)
        if i < n_layers - 1:
            h = jnp.where(h >= 0.0, h, NEG_SLOPE * h)
    return h


if __name__ == "__main__":
    key = jax.random.PRNGKey(0)
    N, in_ch, H, W = 2, 4, 16, 16
    out_ch = 2
    num_filters = [128, 64, 32]                  # MFEBlock defaults
    chans = [in_ch] + num_filters + [out_ch]

    keys = jax.random.split(key, 1 + 2 * 4)
    x = jax.random.normal(keys[0], (N, in_ch, H, W), dtype=jnp.float32)

    params = []
    for i in range(4):
        ci, co = chans[i], chans[i + 1]
        bound = 1.0 / float((ci * 9) ** 0.5)     # PyTorch-style uniform init scale
        wk = jax.random.uniform(keys[1 + 2 * i], (co, ci, 3, 3),
                                jnp.float32, -bound, bound)
        bk = jax.random.uniform(keys[2 + 2 * i], (co,),
                                jnp.float32, -bound, bound)
        params.append((wk, bk))

    out = jax.block_until_ready(mfe_block_pallas(x, params))
    ref = jax.block_until_ready(mfe_ref(x, params))

    assert out.shape == (N, out_ch, H, W)
    max_err = float(jnp.max(jnp.abs(out - ref)))
    assert jnp.allclose(out, ref, atol=2e-2, rtol=2e-2), f"mismatch vs reference, max_err={max_err}"

    print("KERNEL_OK")
</pallas_src>

<mosaic_0001>
module attributes {stable_mosaic.version = 11 : i64} {
  func.func @mfe_kernel(%arg0: i32, %arg1: memref<1x16x16x128xbf16, #tpu.memory_space<vmem>>, %arg2: memref<9x128x128xbf16, #tpu.memory_space<vmem>>, %arg3: memref<1x128xf32, #tpu.memory_space<vmem>>, %arg4: memref<9x128x128xbf16, #tpu.memory_space<vmem>>, %arg5: memref<1x128xf32, #tpu.memory_space<vmem>>, %arg6: memref<9x128x128xbf16, #tpu.memory_space<vmem>>, %arg7: memref<1x128xf32, #tpu.memory_space<vmem>>, %arg8: memref<9x128x128xbf16, #tpu.memory_space<vmem>>, %arg9: memref<1x128xf32, #tpu.memory_space<vmem>>, %arg10: memref<1x8x256xf32, #tpu.memory_space<vmem>>, %arg11: memref<18x18x128xbf16, #tpu.memory_space<vmem>>) attributes {dimension_semantics = [#tpu.dimension_semantics<parallel>], iteration_bounds = array<i64: 2>, scalar_prefetch = 0 : i64, scratch_operands = 1 : i64, tpu.core_type = #tpu.core_type<tc>, window_params = [{transform_indices = @transform_0, window_bounds = array<i64: 1, 16, 16, 128>}, {pipeline_mode = #tpu.pipeline_mode<synchronous>, transform_indices = @transform_1, window_bounds = array<i64: 9, 128, 128>}, {pipeline_mode = #tpu.pipeline_mode<synchronous>, transform_indices = @transform_2, window_bounds = array<i64: 1, 128>}, {pipeline_mode = #tpu.pipeline_mode<synchronous>, transform_indices = @transform_3, window_bounds = array<i64: 9, 128, 128>}, {pipeline_mode = #tpu.pipeline_mode<synchronous>, transform_indices = @transform_4, window_bounds = array<i64: 1, 128>}, {pipeline_mode = #tpu.pipeline_mode<synchronous>, transform_indices = @transform_5, window_bounds = array<i64: 9, 128, 128>}, {pipeline_mode = #tpu.pipeline_mode<synchronous>, transform_indices = @transform_6, window_bounds = array<i64: 1, 128>}, {pipeline_mode = #tpu.pipeline_mode<synchronous>, transform_indices = @transform_7, window_bounds = array<i64: 9, 128, 128>}, {pipeline_mode = #tpu.pipeline_mode<synchronous>, transform_indices = @transform_8, window_bounds = array<i64: 1, 128>}, {transform_indices = @transform_9, window_bounds = array<i64: 1, 8, 256>}]} {
    %cst = arith.constant 0.000000e+00 : bf16
    %0 = vector.broadcast %cst : bf16 to vector<1x18x128xbf16>
    %c0 = arith.constant 0 : index
    %c0_0 = arith.constant 0 : index
    %c0_1 = arith.constant 0 : index
    %1 = vector.load %arg11[%c0, %c0_0, %c0_1] : memref<18x18x128xbf16, #tpu.memory_space<vmem>>, vector<1x18x128xbf16>
    tpu.vector_store %arg11[%c0, %c0_0, %c0_1], %0 {strides = array<i32>} : memref<18x18x128xbf16, #tpu.memory_space<vmem>>, vector<1x18x128xbf16>,
    %cst_2 = arith.constant 0.000000e+00 : bf16
    %2 = vector.broadcast %cst_2 : bf16 to vector<1x18x128xbf16>
    %c17 = arith.constant 17 : index
    %c0_3 = arith.constant 0 : index
    %c0_4 = arith.constant 0 : index
    %3 = vector.load %arg11[%c17, %c0_3, %c0_4] : memref<18x18x128xbf16, #tpu.memory_space<vmem>>, vector<1x18x128xbf16>
    tpu.vector_store %arg11[%c17, %c0_3, %c0_4], %2 {strides = array<i32>} : memref<18x18x128xbf16, #tpu.memory_space<vmem>>, vector<1x18x128xbf16>,
    %cst_5 = arith.constant 0.000000e+00 : bf16
    %4 = vector.broadcast %cst_5 : bf16 to vector<18x1x128xbf16>
    %c0_6 = arith.constant 0 : index
    %c0_7 = arith.constant 0 : index
    %c0_8 = arith.constant 0 : index
    %5 = vector.load %arg11[%c0_6, %c0_7, %c0_8] : memref<18x18x128xbf16, #tpu.memory_space<vmem>>, vector<18x1x128xbf16>
    tpu.vector_store %arg11[%c0_6, %c0_7, %c0_8], %4 {strides = array<i32>} : memref<18x18x128xbf16, #tpu.memory_space<vmem>>, vector<18x1x128xbf16>,
    %cst_9 = arith.constant 0.000000e+00 : bf16
    %6 = vector.broadcast %cst_9 : bf16 to vector<18x1x128xbf16>
    %c0_10 = arith.constant 0 : index
    %c17_11 = arith.constant 17 : index
    %c0_12 = arith.constant 0 : index
    %7 = vector.load %arg11[%c0_10, %c17_11, %c0_12] : memref<18x18x128xbf16, #tpu.memory_space<vmem>>, vector<18x1x128xbf16>
    tpu.vector_store %arg11[%c0_10, %c17_11, %c0_12], %6 {strides = array<i32>} : memref<18x18x128xbf16, #tpu.memory_space<vmem>>, vector<18x1x128xbf16>,
    %c0_13 = arith.constant 0 : index
    %c0_14 = arith.constant 0 : index
    %c0_15 = arith.constant 0 : index
    %c0_16 = arith.constant 0 : index
    %8 = vector.load %arg1[%c0_13, %c0_14, %c0_15, %c0_16] : memref<1x16x16x128xbf16, #tpu.memory_space<vmem>>, vector<1x16x16x128xbf16>
    %9 = vector.shape_cast %8 : vector<1x16x16x128xbf16> to vector<16x16x128xbf16>
    %c1 = arith.constant 1 : index
    %c1_17 = arith.constant 1 : index
    %c0_18 = arith.constant 0 : index
    %10 = vector.load %arg11[%c1, %c1_17, %c0_18] : memref<18x18x128xbf16, #tpu.memory_space<vmem>>, vector<16x16x128xbf16>
    tpu.vector_store %arg11[%c1, %c1_17, %c0_18], %9 {strides = array<i32>} : memref<18x18x128xbf16, #tpu.memory_space<vmem>>, vector<16x16x128xbf16>,
    %c0_19 = arith.constant 0 : index
    %c0_20 = arith.constant 0 : index
    %c0_21 = arith.constant 0 : index
    %11 = vector.load %arg11[%c0_19, %c0_20, %c0_21] : memref<18x18x128xbf16, #tpu.memory_space<vmem>>, vector<18x16x128xbf16>
    %12 = vector.extract_strided_slice %11 {offsets = [0, 0, 0], sizes = [16, 16, 128], strides = [1, 1, 1]} : vector<18x16x128xbf16> to vector<16x16x128xbf16>
    %13 = vector.shape_cast %12 : vector<16x16x128xbf16> to vector<256x128xbf16>
    %c0_22 = arith.constant 0 : index
    %c0_23 = arith.constant 0 : index
    %c0_24 = arith.constant 0 : index
    %14 = vector.load %arg2[%c0_22, %c0_23, %c0_24] : memref<9x128x128xbf16, #tpu.memory_space<vmem>>, vector<1x128x128xbf16>
    %15 = vector.shape_cast %14 : vector<1x128x128xbf16> to vector<128x128xbf16>
    %cst_25 = arith.constant dense<0.000000e+00> : vector<256x128xf32>
    %16 = tpu.matmul %13, %15, %cst_25 {dimension_numbers = #tpu.dot_dimension_numbers<[1], [0], [0], [1], [0, 0, 1, 1], [], []>} : vector<256x128xbf16>, vector<128x128xbf16>, vector<256x128xf32> -> vector<256x128xf32>
    %17 = vector.extract_strided_slice %11 {offsets = [1, 0, 0], sizes = [16, 16, 128], strides = [1, 1, 1]} : vector<18x16x128xbf16> to vector<16x16x128xbf16>
    %18 = vector.shape_cast %17 : vector<16x16x128xbf16> to vector<256x128xbf16>
    %c3 = arith.constant 3 : index
    %c0_26 = arith.constant 0 : index
    %c0_27 = arith.constant 0 : index
    %19 = vector.load %arg2[%c3, %c0_26, %c0_27] : memref<9x128x128xbf16, #tpu.memory_space<vmem>>, vector<1x128x128xbf16>
    %20 = vector.shape_cast %19 : vector<1x128x128xbf16> to vector<128x128xbf16>
    %cst_28 = arith.constant dense<0.000000e+00> : vector<256x128xf32>
    %21 = tpu.matmul %18, %20, %cst_28 {dimension_numbers = #tpu.dot_dimension_numbers<[1], [0], [0], [1], [0, 0, 1, 1], [], []>} : vector<256x128xbf16>, vector<128x128xbf16>, vector<256x128xf32> -> vector<256x128xf32>
    %22 = arith.addf %16, %21 : vector<256x128xf32>
    %23 = vector.extract_strided_slice %11 {offsets = [2, 0, 0], sizes = [16, 16, 128], strides = [1, 1, 1]} : vector<18x16x128xbf16> to vector<16x16x128xbf16>
    %24 = vector.shape_cast %23 : vector<16x16x128xbf16> to vector<256x128xbf16>
    %c6 = arith.constant 6 : index
    %c0_29 = arith.constant 0 : index
    %c0_30 = arith.constant 0 : index
    %25 = vector.load %arg2[%c6, %c0_29, %c0_30] : memref<9x128x128xbf16, #tpu.memory_space<vmem>>, vector<1x128x128xbf16>
    %26 = vector.shape_cast %25 : vector<1x128x128xbf16> to vector<128x128xbf16>
    %cst_31 = arith.constant dense<0.000000e+00> : vector<256x128xf32>
    %27 = tpu.matmul %24, %26, %cst_31 {dimension_numbers = #tpu.dot_dimension_numbers<[1], [0], [0], [1], [0, 0, 1, 1], [], []>} : vector<256x128xbf16>, vector<128x128xbf16>, vector<256x128xf32> -> vector<256x128xf32>
    %28 = arith.addf %22, %27 : vector<256x128xf32>
    %c0_32 = arith.constant 0 : index
    %c1_33 = arith.constant 1 : index
    %c0_34 = arith.constant 0 : index
    %29 = vector.load %arg11[%c0_32, %c1_33, %c0_34] : memref<18x18x128xbf16, #tpu.memory_space<vmem>>, vector<18x16x128xbf16>
    %30 = vector.extract_strided_slice %29 {offsets = [0, 0, 0], sizes = [16, 16, 128], strides = [1, 1, 1]} : vector<18x16x128xbf16> to vector<16x16x128xbf16>
    %31 = vector.shape_cast %30 : vector<16x16x128xbf16> to vector<256x128xbf16>
    %c1_35 = arith.constant 1 : index
    %c0_36 = arith.constant 0 : index
    %c0_37 = arith.constant 0 : index
    %32 = vector.load %arg2[%c1_35, %c0_36, %c0_37] : memref<9x128x128xbf16, #tpu.memory_space<vmem>>, vector<1x128x128xbf16>
    %33 = vector.shape_cast %32 : vector<1x128x128xbf16> to vector<128x128xbf16>
    %cst_38 = arith.constant dense<0.000000e+00> : vector<256x128xf32>
    %34 = tpu.matmul %31, %33, %cst_38 {dimension_numbers = #tpu.dot_dimension_numbers<[1], [0], [0], [1], [0, 0, 1, 1], [], []>} : vector<256x128xbf16>, vector<128x128xbf16>, vector<256x128xf32> -> vector<256x128xf32>
    %35 = arith.addf %28, %34 : vector<256x128xf32>
    %36 = vector.extract_strided_slice %29 {offsets = [1, 0, 0], sizes = [16, 16, 128], strides = [1, 1, 1]} : vector<18x16x128xbf16> to vector<16x16x128xbf16>
    %37 = vector.shape_cast %36 : vector<16x16x128xbf16> to vector<256x128xbf16>
    %c4 = arith.constant 4 : index
    %c0_39 = arith.constant 0 : index
    %c0_40 = arith.constant 0 : index
    %38 = vector.load %arg2[%c4, %c0_39, %c0_40] : memref<9x128x128xbf16, #tpu.memory_space<vmem>>, vector<1x128x128xbf16>
    %39 = vector.shape_cast %38 : vector<1x128x128xbf16> to vector<128x128xbf16>
    %cst_41 = arith.constant dense<0.000000e+00> : vector<256x128xf32>
    %40 = tpu.matmul %37, %39, %cst_41 {dimension_numbers = #tpu.dot_dimension_numbers<[1], [0], [0], [1], [0, 0, 1, 1], [], []>} : vector<256x128xbf16>, vector<128x128xbf16>, vector<256x128xf32> -> vector<256x128xf32>
    %41 = arith.addf %35, %40 : vector<256x128xf32>
    %42 = vector.extract_strided_slice %29 {offsets = [2, 0, 0], sizes = [16, 16, 128], strides = [1, 1, 1]} : vector<18x16x128xbf16> to vector<16x16x128xbf16>
    %43 = vector.shape_cast %42 : vector<16x16x128xbf16> to vector<256x128xbf16>
    %c7 = arith.constant 7 : index
    %c0_42 = arith.constant 0 : index
    %c0_43 = arith.constant 0 : index
    %44 = vector.load %arg2[%c7, %c0_42, %c0_43] : memref<9x128x128xbf16, #tpu.memory_space<vmem>>, vector<1x128x128xbf16>
    %45 = vector.shape_cast %44 : vector<1x128x128xbf16> to vector<128x128xbf16>
    %cst_44 = arith.constant dense<0.000000e+00> : vector<256x128xf32>
    %46 = tpu.matmul %43, %45, %cst_44 {dimension_numbers = #tpu.dot_dimension_numbers<[1], [0], [0], [1], [0, 0, 1, 1], [], []>} : vector<256x128xbf16>, vector<128x128xbf16>, vector<256x128xf32> -> vector<256x128xf32>
    %47 = arith.addf %41, %46 : vector<256x128xf32>
    %c0_45 = arith.constant 0 : index
    %c2 = arith.constant 2 : index
    %c0_46 = arith.constant 0 : index
    %48 = vector.load %arg11[%c0_45, %c2, %c0_46] : memref<18x18x128xbf16, #tpu.memory_space<vmem>>, vector<18x16x128xbf16>
    %49 = vector.extract_strided_slice %48 {offsets = [0, 0, 0], sizes = [16, 16, 128], strides = [1, 1, 1]} : vector<18x16x128xbf16> to vector<16x16x128xbf16>
    %50 = vector.shape_cast %49 : vector<16x16x128xbf16> to vector<256x128xbf16>
    %c2_47 = arith.constant 2 : index
    %c0_48 = arith.constant 0 : index
    %c0_49 = arith.constant 0 : index
    %51 = vector.load %arg2[%c2_47, %c0_48, %c0_49] : memref<9x128x128xbf16, #tpu.memory_space<vmem>>, vector<1x128x128xbf16>
    %52 = vector.shape_cast %51 : vector<1x128x128xbf16> to vector<128x128xbf16>
    %cst_50 = arith.constant dense<0.000000e+00> : vector<256x128xf32>
    %53 = tpu.matmul %50, %52, %cst_50 {dimension_numbers = #tpu.dot_dimension_numbers<[1], [0], [0], [1], [0, 0, 1, 1], [], []>} : vector<256x128xbf16>, vector<128x128xbf16>, vector<256x128xf32> -> vector<256x128xf32>
    %54 = arith.addf %47, %53 : vector<256x128xf32>
    %55 = vector.extract_strided_slice %48 {offsets = [1, 0, 0], sizes = [16, 16, 128], strides = [1, 1, 1]} : vector<18x16x128xbf16> to vector<16x16x128xbf16>
    %56 = vector.shape_cast %55 : vector<16x16x128xbf16> to vector<256x128xbf16>
    %c5 = arith.constant 5 : index
    %c0_51 = arith.constant 0 : index
    %c0_52 = arith.constant 0 : index
    %57 = vector.load %arg2[%c5, %c0_51, %c0_52] : memref<9x128x128xbf16, #tpu.memory_space<vmem>>, vector<1x128x128xbf16>
    %58 = vector.shape_cast %57 : vector<1x128x128xbf16> to vector<128x128xbf16>
    %cst_53 = arith.constant dense<0.000000e+00> : vector<256x128xf32>
    %59 = tpu.matmul %56, %58, %cst_53 {dimension_numbers = #tpu.dot_dimension_numbers<[1], [0], [0], [1], [0, 0, 1, 1], [], []>} : vector<256x128xbf16>, vector<128x128xbf16>, vector<256x128xf32> -> vector<256x128xf32>
    %60 = arith.addf %54, %59 : vector<256x128xf32>
    %61 = vector.extract_strided_slice %48 {offsets = [2, 0, 0], sizes = [16, 16, 128], strides = [1, 1, 1]} : vector<18x16x128xbf16> to vector<16x16x128xbf16>
    %62 = vector.shape_cast %61 : vector<16x16x128xbf16> to vector<256x128xbf16>
    %c8 = arith.constant 8 : index
    %c0_54 = arith.constant 0 : index
    %c0_55 = arith.constant 0 : index
    %63 = vector.load %arg2[%c8, %c0_54, %c0_55] : memref<9x128x128xbf16, #tpu.memory_space<vmem>>, vector<1x128x128xbf16>
    %64 = vector.shape_cast %63 : vector<1x128x128xbf16> to vector<128x128xbf16>
    %cst_56 = arith.constant dense<0.000000e+00> : vector<256x128xf32>
    %65 = tpu.matmul %62, %64, %cst_56 {dimension_numbers = #tpu.dot_dimension_numbers<[1], [0], [0], [1], [0, 0, 1, 1], [], []>} : vector<256x128xbf16>, vector<128x128xbf16>, vector<256x128xf32> -> vector<256x128xf32>
    %66 = arith.addf %60, %65 : vector<256x128xf32>
    %c0_57 = arith.constant 0 : index
    %c0_58 = arith.constant 0 : index
    %67 = vector.load %arg3[%c0_57, %c0_58] : memref<1x128xf32, #tpu.memory_space<vmem>>, vector<1x128xf32>
    %68 = vector.broadcast %67 : vector<1x128xf32> to vector<256x128xf32>
    %69 = arith.addf %66, %68 : vector<256x128xf32>
    %cst_59 = arith.constant 0.000000e+00 : f32
    %70 = vector.broadcast %cst_59 : f32 to vector<256x128xf32>
    %71 = arith.cmpf oge, %69, %70 : vector<256x128xf32>
    %cst_60 = arith.constant 1.000000e-01 : f32
    %72 = vector.broadcast %cst_60 : f32 to vector<256x128xf32>
    %73 = arith.mulf %72, %69 : vector<256x128xf32>
    %74 = arith.select %71, %69, %73 : vector<256x128xi1>, vector<256x128xf32>
    %75 = vector.shape_cast %74 : vector<256x128xf32> to vector<16x16x128xf32>
    %76 = arith.truncf %75 : vector<16x16x128xf32> to vector<16x16x128xbf16>
    %c1_61 = arith.constant 1 : index
    %c1_62 = arith.constant 1 : index
    %c0_63 = arith.constant 0 : index
    %77 = vector.load %arg11[%c1_61, %c1_62, %c0_63] : memref<18x18x128xbf16, #tpu.memory_space<vmem>>, vector<16x16x128xbf16>
    tpu.vector_store %arg11[%c1_61, %c1_62, %c0_63], %76 {strides = array<i32>} : memref<18x18x128xbf16, #tpu.memory_space<vmem>>, vector<16x16x128xbf16>,
    %c0_64 = arith.constant 0 : index
    %c0_65 = arith.constant 0 : index
    %c0_66 = arith.constant 0 : index
    %78 = vector.load %arg11[%c0_64, %c0_65, %c0_66] : memref<18x18x128xbf16, #tpu.memory_space<vmem>>, vector<18x16x128xbf16>
    %79 = vector.extract_strided_slice %78 {offsets = [0, 0, 0], sizes = [16, 16, 128], strides = [1, 1, 1]} : vector<18x16x128xbf16> to vector<16x16x128xbf16>
    %80 = vector.shape_cast %79 : vector<16x16x128xbf16> to vector<256x128xbf16>
    %c0_67 = arith.constant 0 : index
    %c0_68 = arith.constant 0 : index
    %c0_69 = arith.constant 0 : index
    %81 = vector.load %arg4[%c0_67, %c0_68, %c0_69] : memref<9x128x128xbf16, #tpu.memory_space<vmem>>, vector<1x128x128xbf16>
    %82 = vector.shape_cast %81 : vector<1x128x128xbf16> to vector<128x128xbf16>
    %cst_70 = arith.constant dense<0.000000e+00> : vector<256x128xf32>
    %83 = tpu.matmul %80, %82, %cst_70 {dimension_numbers = #tpu.dot_dimension_numbers<[1], [0], [0], [1], [0, 0, 1, 1], [], []>} : vector<256x128xbf16>, vector<128x128xbf16>, vector<256x128xf32> -> vector<256x128xf32>
    %84 = vector.extract_strided_slice %78 {offsets = [1, 0, 0], sizes = [16, 16, 128], strides = [1, 1, 1]} : vector<18x16x128xbf16> to vector<16x16x128xbf16>
    %85 = vector.shape_cast %84 : vector<16x16x128xbf16> to vector<256x128xbf16>
    %c3_71 = arith.constant 3 : index
    %c0_72 = arith.constant 0 : index
    %c0_73 = arith.constant 0 : index
    %86 = vector.load %arg4[%c3_71, %c0_72, %c0_73] : memref<9x128x128xbf16, #tpu.memory_space<vmem>>, vector<1x128x128xbf16>
    %87 = vector.shape_cast %86 : vector<1x128x128xbf16> to vector<128x128xbf16>
    %cst_74 = arith.constant dense<0.000000e+00> : vector<256x128xf32>
    %88 = tpu.matmul %85, %87, %cst_74 {dimension_numbers = #tpu.dot_dimension_numbers<[1], [0], [0], [1], [0, 0, 1, 1], [], []>} : vector<256x128xbf16>, vector<128x128xbf16>, vector<256x128xf32> -> vector<256x128xf32>
    %89 = arith.addf %83, %88 : vector<256x128xf32>
    %90 = vector.extract_strided_slice %78 {offsets = [2, 0, 0], sizes = [16, 16, 128], strides = [1, 1, 1]} : vector<18x16x128xbf16> to vector<16x16x128xbf16>
    %91 = vector.shape_cast %90 : vector<16x16x128xbf16> to vector<256x128xbf16>
    %c6_75 = arith.constant 6 : index
    %c0_76 = arith.constant 0 : index
    %c0_77 = arith.constant 0 : index
    %92 = vector.load %arg4[%c6_75, %c0_76, %c0_77] : memref<9x128x128xbf16, #tpu.memory_space<vmem>>, vector<1x128x128xbf16>
    %93 = vector.shape_cast %92 : vector<1x128x128xbf16> to vector<128x128xbf16>
    %cst_78 = arith.constant dense<0.000000e+00> : vector<256x128xf32>
    %94 = tpu.matmul %91, %93, %cst_78 {dimension_numbers = #tpu.dot_dimension_numbers<[1], [0], [0], [1], [0, 0, 1, 1], [], []>} : vector<256x128xbf16>, vector<128x128xbf16>, vector<256x128xf32> -> vector<256x128xf32>
    %95 = arith.addf %89, %94 : vector<256x128xf32>
    %c0_79 = arith.constant 0 : index
    %c1_80 = arith.constant 1 : index
    %c0_81 = arith.constant 0 : index
    %96 = vector.load %arg11[%c0_79, %c1_80, %c0_81] : memref<18x18x128xbf16, #tpu.memory_space<vmem>>, vector<18x16x128xbf16>
    %97 = vector.extract_strided_slice %96 {offsets = [0, 0, 0], sizes = [16, 16, 128], strides = [1, 1, 1]} : vector<18x16x128xbf16> to vector<16x16x128xbf16>
    %98 = vector.shape_cast %97 : vector<16x16x128xbf16> to vector<256x128xbf16>
    %c1_82 = arith.constant 1 : index
    %c0_83 = arith.constant 0 : index
    %c0_84 = arith.constant 0 : index
    %99 = vector.load %arg4[%c1_82, %c0_83, %c0_84] : memref<9x128x128xbf16, #tpu.memory_space<vmem>>, vector<1x128x128xbf16>
    %100 = vector.shape_cast %99 : vector<1x128x128xbf16> to vector<128x128xbf16>
    %cst_85 = arith.constant dense<0.000000e+00> : vector<256x128xf32>
    %101 = tpu.matmul %98, %100, %cst_85 {dimension_numbers = #tpu.dot_dimension_numbers<[1], [0], [0], [1], [0, 0, 1, 1], [], []>} : vector<256x128xbf16>, vector<128x128xbf16>, vector<256x128xf32> -> vector<256x128xf32>
    %102 = arith.addf %95, %101 : vector<256x128xf32>
    %103 = vector.extract_strided_slice %96 {offsets = [1, 0, 0], sizes = [16, 16, 128], strides = [1, 1, 1]} : vector<18x16x128xbf16> to vector<16x16x128xbf16>
    %104 = vector.shape_cast %103 : vector<16x16x128xbf16> to vector<256x128xbf16>
    %c4_86 = arith.constant 4 : index
    %c0_87 = arith.constant 0 : index
    %c0_88 = arith.constant 0 : index
    %105 = vector.load %arg4[%c4_86, %c0_87, %c0_88] : memref<9x128x128xbf16, #tpu.memory_space<vmem>>, vector<1x128x128xbf16>
    %106 = vector.shape_cast %105 : vector<1x128x128xbf16> to vector<128x128xbf16>
    %cst_89 = arith.constant dense<0.000000e+00> : vector<256x128xf32>
    %107 = tpu.matmul %104, %106, %cst_89 {dimension_numbers = #tpu.dot_dimension_numbers<[1], [0], [0], [1], [0, 0, 1, 1], [], []>} : vector<256x128xbf16>, vector<128x128xbf16>, vector<256x128xf32> -> vector<256x128xf32>
    %108 = arith.addf %102, %107 : vector<256x128xf32>
    %109 = vector.extract_strided_slice %96 {offsets = [2, 0, 0], sizes = [16, 16, 128], strides = [1, 1, 1]} : vector<18x16x128xbf16> to vector<16x16x128xbf16>
    %110 = vector.shape_cast %109 : vector<16x16x128xbf16> to vector<256x128xbf16>
    %c7_90 = arith.constant 7 : index
    %c0_91 = arith.constant 0 : index
    %c0_92 = arith.constant 0 : index
    %111 = vector.load %arg4[%c7_90, %c0_91, %c0_92] : memref<9x128x128xbf16, #tpu.memory_space<vmem>>, vector<1x128x128xbf16>
    %112 = vector.shape_cast %111 : vector<1x128x128xbf16> to vector<128x128xbf16>
    %cst_93 = arith.constant dense<0.000000e+00> : vector<256x128xf32>
    %113 = tpu.matmul %110, %112, %cst_93 {dimension_numbers = #tpu.dot_dimension_numbers<[1], [0], [0], [1], [0, 0, 1, 1], [], []>} : vector<256x128xbf16>, vector<128x128xbf16>, vector<256x128xf32> -> vector<256x128xf32>
    %114 = arith.addf %108, %113 : vector<256x128xf32>
    %c0_94 = arith.constant 0 : index
    %c2_95 = arith.constant 2 : index
    %c0_96 = arith.constant 0 : index
    %115 = vector.load %arg11[%c0_94, %c2_95, %c0_96] : memref<18x18x128xbf16, #tpu.memory_space<vmem>>, vector<18x16x128xbf16>
    %116 = vector.extract_strided_slice %115 {offsets = [0, 0, 0], sizes = [16, 16, 128], strides = [1, 1, 1]} : vector<18x16x128xbf16> to vector<16x16x128xbf16>
    %117 = vector.shape_cast %116 : vector<16x16x128xbf16> to vector<256x128xbf16>
    %c2_97 = arith.constant 2 : index
    %c0_98 = arith.constant 0 : index
    %c0_99 = arith.constant 0 : index
    %118 = vector.load %arg4[%c2_97, %c0_98, %c0_99] : memref<9x128x128xbf16, #tpu.memory_space<vmem>>, vector<1x128x128xbf16>
    %119 = vector.shape_cast %118 : vector<1x128x128xbf16> to vector<128x128xbf16>
    %cst_100 = arith.constant dense<0.000000e+00> : vector<256x128xf32>
    %120 = tpu.matmul %117, %119, %cst_100 {dimension_numbers = #tpu.dot_dimension_numbers<[1], [0], [0], [1], [0, 0, 1, 1], [], []>} : vector<256x128xbf16>, vector<128x128xbf16>, vector<256x128xf32> -> vector<256x128xf32>
    %121 = arith.addf %114, %120 : vector<256x128xf32>
    %122 = vector.extract_strided_slice %115 {offsets = [1, 0, 0], sizes = [16, 16, 128], strides = [1, 1, 1]} : vector<18x16x128xbf16> to vector<16x16x128xbf16>
    %123 = vector.shape_cast %122 : vector<16x16x128xbf16> to vector<256x128xbf16>
    %c5_101 = arith.constant 5 : index
    %c0_102 = arith.constant 0 : index
    %c0_103 = arith.constant 0 : index
    %124 = vector.load %arg4[%c5_101, %c0_102, %c0_103] : memref<9x128x128xbf16, #tpu.memory_space<vmem>>, vector<1x128x128xbf16>
    %125 = vector.shape_cast %124 : vector<1x128x128xbf16> to vector<128x128xbf16>
    %cst_104 = arith.constant dense<0.000000e+00> : vector<256x128xf32>
    %126 = tpu.matmul %123, %125, %cst_104 {dimension_numbers = #tpu.dot_dimension_numbers<[1], [0], [0], [1], [0, 0, 1, 1], [], []>} : vector<256x128xbf16>, vector<128x128xbf16>, vector<256x128xf32> -> vector<256x128xf32>
    %127 = arith.addf %121, %126 : vector<256x128xf32>
    %128 = vector.extract_strided_slice %115 {offsets = [2, 0, 0], sizes = [16, 16, 128], strides = [1, 1, 1]} : vector<18x16x128xbf16> to vector<16x16x128xbf16>
    %129 = vector.shape_cast %128 : vector<16x16x128xbf16> to vector<256x128xbf16>
    %c8_105 = arith.constant 8 : index
    %c0_106 = arith.constant 0 : index
    %c0_107 = arith.constant 0 : index
    %130 = vector.load %arg4[%c8_105, %c0_106, %c0_107] : memref<9x128x128xbf16, #tpu.memory_space<vmem>>, vector<1x128x128xbf16>
    %131 = vector.shape_cast %130 : vector<1x128x128xbf16> to vector<128x128xbf16>
    %cst_108 = arith.constant dense<0.000000e+00> : vector<256x128xf32>
    %132 = tpu.matmul %129, %131, %cst_108 {dimension_numbers = #tpu.dot_dimension_numbers<[1], [0], [0], [1], [0, 0, 1, 1], [], []>} : vector<256x128xbf16>, vector<128x128xbf16>, vector<256x128xf32> -> vector<256x128xf32>
    %133 = arith.addf %127, %132 : vector<256x128xf32>
    %c0_109 = arith.constant 0 : index
    %c0_110 = arith.constant 0 : index
    %134 = vector.load %arg5[%c0_109, %c0_110] : memref<1x128xf32, #tpu.memory_space<vmem>>, vector<1x128xf32>
    %135 = vector.broadcast %134 : vector<1x128xf32> to vector<256x128xf32>
    %136 = arith.addf %133, %135 : vector<256x128xf32>
    %cst_111 = arith.constant 0.000000e+00 : f32
    %137 = vector.broadcast %cst_111 : f32 to vector<256x128xf32>
    %138 = arith.cmpf oge, %136, %137 : vector<256x128xf32>
    %cst_112 = arith.constant 1.000000e-01 : f32
    %139 = vector.broadcast %cst_112 : f32 to vector<256x128xf32>
    %140 = arith.mulf %139, %136 : vector<256x128xf32>
    %141 = arith.select %138, %136, %140 : vector<256x128xi1>, vector<256x128xf32>
    %142 = vector.shape_cast %141 : vector<256x128xf32> to vector<16x16x128xf32>
    %143 = arith.truncf %142 : vector<16x16x128xf32> to vector<16x16x128xbf16>
    %c1_113 = arith.constant 1 : index
    %c1_114 = arith.constant 1 : index
    %c0_115 = arith.constant 0 : index
    %144 = vector.load %arg11[%c1_113, %c1_114, %c0_115] : memref<18x18x128xbf16, #tpu.memory_space<vmem>>, vector<16x16x128xbf16>
    tpu.vector_store %arg11[%c1_113, %c1_114, %c0_115], %143 {strides = array<i32>} : memref<18x18x128xbf16, #tpu.memory_space<vmem>>, vector<16x16x128xbf16>,
    %c0_116 = arith.constant 0 : index
    %c0_117 = arith.constant 0 : index
    %c0_118 = arith.constant 0 : index
    %145 = vector.load %arg11[%c0_116, %c0_117, %c0_118] : memref<18x18x128xbf16, #tpu.memory_space<vmem>>, vector<18x16x128xbf16>
    %146 = vector.extract_strided_slice %145 {offsets = [0, 0, 0], sizes = [16, 16, 128], strides = [1, 1, 1]} : vector<18x16x128xbf16> to vector<16x16x128xbf16>
    %147 = vector.shape_cast %146 : vector<16x16x128xbf16> to vector<256x128xbf16>
    %c0_119 = arith.constant 0 : index
    %c0_120 = arith.constant 0 : index
    %c0_121 = arith.constant 0 : index
    %148 = vector.load %arg6[%c0_119, %c0_120, %c0_121] : memref<9x128x128xbf16, #tpu.memory_space<vmem>>, vector<1x128x128xbf16>
    %149 = vector.shape_cast %148 : vector<1x128x128xbf16> to vector<128x128xbf16>
    %cst_122 = arith.constant dense<0.000000e+00> : vector<256x128xf32>
    %150 = tpu.matmul %147, %149, %cst_122 {dimension_numbers = #tpu.dot_dimension_numbers<[1], [0], [0], [1], [0, 0, 1, 1], [], []>} : vector<256x128xbf16>, vector<128x128xbf16>, vector<256x128xf32> -> vector<256x128xf32>
    %151 = vector.extract_strided_slice %145 {offsets = [1, 0, 0], sizes = [16, 16, 128], strides = [1, 1, 1]} : vector<18x16x128xbf16> to vector<16x16x128xbf16>
    %152 = vector.shape_cast %151 : vector<16x16x128xbf16> to vector<256x128xbf16>
    %c3_123 = arith.constant 3 : index
    %c0_124 = arith.constant 0 : index
    %c0_125 = arith.constant 0 : index
    %153 = vector.load %arg6[%c3_123, %c0_124, %c0_125] : memref<9x128x128xbf16, #tpu.memory_space<vmem>>, vector<1x128x128xbf16>
    %154 = vector.shape_cast %153 : vector<1x128x128xbf16> to vector<128x128xbf16>
    %cst_126 = arith.constant dense<0.000000e+00> : vector<256x128xf32>
    %155 = tpu.matmul %152, %154, %cst_126 {dimension_numbers = #tpu.dot_dimension_numbers<[1], [0], [0], [1], [0, 0, 1, 1], [], []>} : vector<256x128xbf16>, vector<128x128xbf16>, vector<256x128xf32> -> vector<256x128xf32>
    %156 = arith.addf %150, %155 : vector<256x128xf32>
    %157 = vector.extract_strided_slice %145 {offsets = [2, 0, 0], sizes = [16, 16, 128], strides = [1, 1, 1]} : vector<18x16x128xbf16> to vector<16x16x128xbf16>
    %158 = vector.shape_cast %157 : vector<16x16x128xbf16> to vector<256x128xbf16>
    %c6_127 = arith.constant 6 : index
    %c0_128 = arith.constant 0 : index
    %c0_129 = arith.constant 0 : index
    %159 = vector.load %arg6[%c6_127, %c0_128, %c0_129] : memref<9x128x128xbf16, #tpu.memory_space<vmem>>, vector<1x128x128xbf16>
    %160 = vector.shape_cast %159 : vector<1x128x128xbf16> to vector<128x128xbf16>
    %cst_130 = arith.constant dense<0.000000e+00> : vector<256x128xf32>
    %161 = tpu.matmul %158, %160, %cst_130 {dimension_numbers = #tpu.dot_dimension_numbers<[1], [0], [0], [1], [0, 0, 1, 1], [], []>} : vector<256x128xbf16>, vector<128x128xbf16>, vector<256x128xf32> -> vector<256x128xf32>
    %162 = arith.addf %156, %161 : vector<256x128xf32>
    %c0_131 = arith.constant 0 : index
    %c1_132 = arith.constant 1 : index
    %c0_133 = arith.constant 0 : index
    %163 = vector.load %arg11[%c0_131, %c1_132, %c0_133] : memref<18x18x128xbf16, #tpu.memory_space<vmem>>, vector<18x16x128xbf16>
    %164 = vector.extract_strided_slice %163 {offsets = [0, 0, 0], sizes = [16, 16, 128], strides = [1, 1, 1]} : vector<18x16x128xbf16> to vector<16x16x128xbf16>
    %165 = vector.shape_cast %164 : vector<16x16x128xbf16> to vector<256x128xbf16>
    %c1_134 = arith.constant 1 : index
    %c0_135 = arith.constant 0 : index
    %c0_136 = arith.constant 0 : index
    %166 = vector.load %arg6[%c1_134, %c0_135, %c0_136] : memref<9x128x128xbf16, #tpu.memory_space<vmem>>, vector<1x128x128xbf16>
    %167 = vector.shape_cast %166 : vector<1x128x128xbf16> to vector<128x128xbf16>
    %cst_137 = arith.constant dense<0.000000e+00> : vector<256x128xf32>
    %168 = tpu.matmul %165, %167, %cst_137 {dimension_numbers = #tpu.dot_dimension_numbers<[1], [0], [0], [1], [0, 0, 1, 1], [], []>} : vector<256x128xbf16>, vector<128x128xbf16>, vector<256x128xf32> -> vector<256x128xf32>
    %169 = arith.addf %162, %168 : vector<256x128xf32>
    %170 = vector.extract_strided_slice %163 {offsets = [1, 0, 0], sizes = [16, 16, 128], strides = [1, 1, 1]} : vector<18x16x128xbf16> to vector<16x16x128xbf16>
    %171 = vector.shape_cast %170 : vector<16x16x128xbf16> to vector<256x128xbf16>
    %c4_138 = arith.constant 4 : index
    %c0_139 = arith.constant 0 : index
    %c0_140 = arith.constant 0 : index
    %172 = vector.load %arg6[%c4_138, %c0_139, %c0_140] : memref<9x128x128xbf16, #tpu.memory_space<vmem>>, vector<1x128x128xbf16>
    %173 = vector.shape_cast %172 : vector<1x128x128xbf16> to vector<128x128xbf16>
    %cst_141 = arith.constant dense<0.000000e+00> : vector<256x128xf32>
    %174 = tpu.matmul %171, %173, %cst_141 {dimension_numbers = #tpu.dot_dimension_numbers<[1], [0], [0], [1], [0, 0, 1, 1], [], []>} : vector<256x128xbf16>, vector<128x128xbf16>, vector<256x128xf32> -> vector<256x128xf32>
    %175 = arith.addf %169, %174 : vector<256x128xf32>
    %176 = vector.extract_strided_slice %163 {offsets = [2, 0, 0], sizes = [16, 16, 128], strides = [1, 1, 1]} : vector<18x16x128xbf16> to vector<16x16x128xbf16>
    %177 = vector.shape_cast %176 : vector<16x16x128xbf16> to vector<256x128xbf16>
    %c7_142 = arith.constant 7 : index
    %c0_143 = arith.constant 0 : index
    %c0_144 = arith.constant 0 : index
    %178 = vector.load %arg6[%c7_142, %c0_143, %c0_144] : memref<9x128x128xbf16, #tpu.memory_space<vmem>>, vector<1x128x128xbf16>
    %179 = vector.shape_cast %178 : vector<1x128x128xbf16> to vector<128x128xbf16>
    %cst_145 = arith.constant dense<0.000000e+00> : vector<256x128xf32>
    %180 = tpu.matmul %177, %179, %cst_145 {dimension_numbers = #tpu.dot_dimension_numbers<[1], [0], [0], [1], [0, 0, 1, 1], [], []>} : vector<256x128xbf16>, vector<128x128xbf16>, vector<256x128xf32> -> vector<256x128xf32>
    %181 = arith.addf %175, %180 : vector<256x128xf32>
    %c0_146 = arith.constant 0 : index
    %c2_147 = arith.constant 2 : index
    %c0_148 = arith.constant 0 : index
    %182 = vector.load %arg11[%c0_146, %c2_147, %c0_148] : memref<18x18x128xbf16, #tpu.memory_space<vmem>>, vector<18x16x128xbf16>
    %183 = vector.extract_strided_slice %182 {offsets = [0, 0, 0], sizes = [16, 16, 128], strides = [1, 1, 1]} : vector<18x16x128xbf16> to vector<16x16x128xbf16>
    %184 = vector.shape_cast %183 : vector<16x16x128xbf16> to vector<256x128xbf16>
    %c2_149 = arith.constant 2 : index
    %c0_150 = arith.constant 0 : index
    %c0_151 = arith.constant 0 : index
    %185 = vector.load %arg6[%c2_149, %c0_150, %c0_151] : memref<9x128x128xbf16, #tpu.memory_space<vmem>>, vector<1x128x128xbf16>
    %186 = vector.shape_cast %185 : vector<1x128x128xbf16> to vector<128x128xbf16>
    %cst_152 = arith.constant dense<0.000000e+00> : vector<256x128xf32>
    %187 = tpu.matmul %184, %186, %cst_152 {dimension_numbers = #tpu.dot_dimension_numbers<[1], [0], [0], [1], [0, 0, 1, 1], [], []>} : vector<256x128xbf16>, vector<128x128xbf16>, vector<256x128xf32> -> vector<256x128xf32>
    %188 = arith.addf %181, %187 : vector<256x128xf32>
    %189 = vector.extract_strided_slice %182 {offsets = [1, 0, 0], sizes = [16, 16, 128], strides = [1, 1, 1]} : vector<18x16x128xbf16> to vector<16x16x128xbf16>
    %190 = vector.shape_cast %189 : vector<16x16x128xbf16> to vector<256x128xbf16>
    %c5_153 = arith.constant 5 : index
    %c0_154 = arith.constant 0 : index
    %c0_155 = arith.constant 0 : index
    %191 = vector.load %arg6[%c5_153, %c0_154, %c0_155] : memref<9x128x128xbf16, #tpu.memory_space<vmem>>, vector<1x128x128xbf16>
    %192 = vector.shape_cast %191 : vector<1x128x128xbf16> to vector<128x128xbf16>
    %cst_156 = arith.constant dense<0.000000e+00> : vector<256x128xf32>
    %193 = tpu.matmul %190, %192, %cst_156 {dimension_numbers = #tpu.dot_dimension_numbers<[1], [0], [0], [1], [0, 0, 1, 1], [], []>} : vector<256x128xbf16>, vector<128x128xbf16>, vector<256x128xf32> -> vector<256x128xf32>
    %194 = arith.addf %188, %193 : vector<256x128xf32>
    %195 = vector.extract_strided_slice %182 {offsets = [2, 0, 0], sizes = [16, 16, 128], strides = [1, 1, 1]} : vector<18x16x128xbf16> to vector<16x16x128xbf16>
    %196 = vector.shape_cast %195 : vector<16x16x128xbf16> to vector<256x128xbf16>
    %c8_157 = arith.constant 8 : index
    %c0_158 = arith.constant 0 : index
    %c0_159 = arith.constant 0 : index
    %197 = vector.load %arg6[%c8_157, %c0_158, %c0_159] : memref<9x128x128xbf16, #tpu.memory_space<vmem>>, vector<1x128x128xbf16>
    %198 = vector.shape_cast %197 : vector<1x128x128xbf16> to vector<128x128xbf16>
    %cst_160 = arith.constant dense<0.000000e+00> : vector<256x128xf32>
    %199 = tpu.matmul %196, %198, %cst_160 {dimension_numbers = #tpu.dot_dimension_numbers<[1], [0], [0], [1], [0, 0, 1, 1], [], []>} : vector<256x128xbf16>, vector<128x128xbf16>, vector<256x128xf32> -> vector<256x128xf32>
    %200 = arith.addf %194, %199 : vector<256x128xf32>
    %c0_161 = arith.constant 0 : index
    %c0_162 = arith.constant 0 : index
    %201 = vector.load %arg7[%c0_161, %c0_162] : memref<1x128xf32, #tpu.memory_space<vmem>>, vector<1x128xf32>
    %202 = vector.broadcast %201 : vector<1x128xf32> to vector<256x128xf32>
    %203 = arith.addf %200, %202 : vector<256x128xf32>
    %cst_163 = arith.constant 0.000000e+00 : f32
    %204 = vector.broadcast %cst_163 : f32 to vector<256x128xf32>
    %205 = arith.cmpf oge, %203, %204 : vector<256x128xf32>
    %cst_164 = arith.constant 1.000000e-01 : f32
    %206 = vector.broadcast %cst_164 : f32 to vector<256x128xf32>
    %207 = arith.mulf %206, %203 : vector<256x128xf32>
    %208 = arith.select %205, %203, %207 : vector<256x128xi1>, vector<256x128xf32>
    %209 = vector.shape_cast %208 : vector<256x128xf32> to vector<16x16x128xf32>
    %210 = arith.truncf %209 : vector<16x16x128xf32> to vector<16x16x128xbf16>
    %c1_165 = arith.constant 1 : index
    %c1_166 = arith.constant 1 : index
    %c0_167 = arith.constant 0 : index
    %211 = vector.load %arg11[%c1_165, %c1_166, %c0_167] : memref<18x18x128xbf16, #tpu.memory_space<vmem>>, vector<16x16x128xbf16>
    tpu.vector_store %arg11[%c1_165, %c1_166, %c0_167], %210 {strides = array<i32>} : memref<18x18x128xbf16, #tpu.memory_space<vmem>>, vector<16x16x128xbf16>,
    %c0_168 = arith.constant 0 : index
    %c0_169 = arith.constant 0 : index
    %c0_170 = arith.constant 0 : index
    %212 = vector.load %arg11[%c0_168, %c0_169, %c0_170] : memref<18x18x128xbf16, #tpu.memory_space<vmem>>, vector<18x16x128xbf16>
    %213 = vector.extract_strided_slice %212 {offsets = [0, 0, 0], sizes = [16, 16, 128], strides = [1, 1, 1]} : vector<18x16x128xbf16> to vector<16x16x128xbf16>
    %214 = vector.shape_cast %213 : vector<16x16x128xbf16> to vector<256x128xbf16>
    %c0_171 = arith.constant 0 : index
    %c0_172 = arith.constant 0 : index
    %c0_173 = arith.constant 0 : index
    %215 = vector.load %arg8[%c0_171, %c0_172, %c0_173] : memref<9x128x128xbf16, #tpu.memory_space<vmem>>, vector<1x128x128xbf16>
    %216 = vector.shape_cast %215 : vector<1x128x128xbf16> to vector<128x128xbf16>
    %cst_174 = arith.constant dense<0.000000e+00> : vector<256x128xf32>
    %217 = tpu.matmul %214, %216, %cst_174 {dimension_numbers = #tpu.dot_dimension_numbers<[1], [0], [0], [1], [0, 0, 1, 1], [], []>} : vector<256x128xbf16>, vector<128x128xbf16>, vector<256x128xf32> -> vector<256x128xf32>
    %218 = vector.extract_strided_slice %212 {offsets = [1, 0, 0], sizes = [16, 16, 128], strides = [1, 1, 1]} : vector<18x16x128xbf16> to vector<16x16x128xbf16>
    %219 = vector.shape_cast %218 : vector<16x16x128xbf16> to vector<256x128xbf16>
    %c3_175 = arith.constant 3 : index
    %c0_176 = arith.constant 0 : index
    %c0_177 = arith.constant 0 : index
    %220 = vector.load %arg8[%c3_175, %c0_176, %c0_177] : memref<9x128x128xbf16, #tpu.memory_space<vmem>>, vector<1x128x128xbf16>
    %221 = vector.shape_cast %220 : vector<1x128x128xbf16> to vector<128x128xbf16>
    %cst_178 = arith.constant dense<0.000000e+00> : vector<256x128xf32>
    %222 = tpu.matmul %219, %221, %cst_178 {dimension_numbers = #tpu.dot_dimension_numbers<[1], [0], [0], [1], [0, 0, 1, 1], [], []>} : vector<256x128xbf16>, vector<128x128xbf16>, vector<256x128xf32> -> vector<256x128xf32>
    %223 = arith.addf %217, %222 : vector<256x128xf32>
    %224 = vector.extract_strided_slice %212 {offsets = [2, 0, 0], sizes = [16, 16, 128], strides = [1, 1, 1]} : vector<18x16x128xbf16> to vector<16x16x128xbf16>
    %225 = vector.shape_cast %224 : vector<16x16x128xbf16> to vector<256x128xbf16>
    %c6_179 = arith.constant 6 : index
    %c0_180 = arith.constant 0 : index
    %c0_181 = arith.constant 0 : index
    %226 = vector.load %arg8[%c6_179, %c0_180, %c0_181] : memref<9x128x128xbf16, #tpu.memory_space<vmem>>, vector<1x128x128xbf16>
    %227 = vector.shape_cast %226 : vector<1x128x128xbf16> to vector<128x128xbf16>
    %cst_182 = arith.constant dense<0.000000e+00> : vector<256x128xf32>
    %228 = tpu.matmul %225, %227, %cst_182 {dimension_numbers = #tpu.dot_dimension_numbers<[1], [0], [0], [1], [0, 0, 1, 1], [], []>} : vector<256x128xbf16>, vector<128x128xbf16>, vector<256x128xf32> -> vector<256x128xf32>
    %229 = arith.addf %223, %228 : vector<256x128xf32>
    %c0_183 = arith.constant 0 : index
    %c1_184 = arith.constant 1 : index
    %c0_185 = arith.constant 0 : index
    %230 = vector.load %arg11[%c0_183, %c1_184, %c0_185] : memref<18x18x128xbf16, #tpu.memory_space<vmem>>, vector<18x16x128xbf16>
    %231 = vector.extract_strided_slice %230 {offsets = [0, 0, 0], sizes = [16, 16, 128], strides = [1, 1, 1]} : vector<18x16x128xbf16> to vector<16x16x128xbf16>
    %232 = vector.shape_cast %231 : vector<16x16x128xbf16> to vector<256x128xbf16>
    %c1_186 = arith.constant 1 : index
    %c0_187 = arith.constant 0 : index
    %c0_188 = arith.constant 0 : index
    %233 = vector.load %arg8[%c1_186, %c0_187, %c0_188] : memref<9x128x128xbf16, #tpu.memory_space<vmem>>, vector<1x128x128xbf16>
    %234 = vector.shape_cast %233 : vector<1x128x128xbf16> to vector<128x128xbf16>
    %cst_189 = arith.constant dense<0.000000e+00> : vector<256x128xf32>
    %235 = tpu.matmul %232, %234, %cst_189 {dimension_numbers = #tpu.dot_dimension_numbers<[1], [0], [0], [1], [0, 0, 1, 1], [], []>} : vector<256x128xbf16>, vector<128x128xbf16>, vector<256x128xf32> -> vector<256x128xf32>
    %236 = arith.addf %229, %235 : vector<256x128xf32>
    %237 = vector.extract_strided_slice %230 {offsets = [1, 0, 0], sizes = [16, 16, 128], strides = [1, 1, 1]} : vector<18x16x128xbf16> to vector<16x16x128xbf16>
    %238 = vector.shape_cast %237 : vector<16x16x128xbf16> to vector<256x128xbf16>
    %c4_190 = arith.constant 4 : index
    %c0_191 = arith.constant 0 : index
    %c0_192 = arith.constant 0 : index
    %239 = vector.load %arg8[%c4_190, %c0_191, %c0_192] : memref<9x128x128xbf16, #tpu.memory_space<vmem>>, vector<1x128x128xbf16>
    %240 = vector.shape_cast %239 : vector<1x128x128xbf16> to vector<128x128xbf16>
    %cst_193 = arith.constant dense<0.000000e+00> : vector<256x128xf32>
    %241 = tpu.matmul %238, %240, %cst_193 {dimension_numbers = #tpu.dot_dimension_numbers<[1], [0], [0], [1], [0, 0, 1, 1], [], []>} : vector<256x128xbf16>, vector<128x128xbf16>, vector<256x128xf32> -> vector<256x128xf32>
    %242 = arith.addf %236, %241 : vector<256x128xf32>
    %243 = vector.extract_strided_slice %230 {offsets = [2, 0, 0], sizes = [16, 16, 128], strides = [1, 1, 1]} : vector<18x16x128xbf16> to vector<16x16x128xbf16>
    %244 = vector.shape_cast %243 : vector<16x16x128xbf16> to vector<256x128xbf16>
    %c7_194 = arith.constant 7 : index
    %c0_195 = arith.constant 0 : index
    %c0_196 = arith.constant 0 : index
    %245 = vector.load %arg8[%c7_194, %c0_195, %c0_196] : memref<9x128x128xbf16, #tpu.memory_space<vmem>>, vector<1x128x128xbf16>
    %246 = vector.shape_cast %245 : vector<1x128x128xbf16> to vector<128x128xbf16>
    %cst_197 = arith.constant dense<0.000000e+00> : vector<256x128xf32>
    %247 = tpu.matmul %244, %246, %cst_197 {dimension_numbers = #tpu.dot_dimension_numbers<[1], [0], [0], [1], [0, 0, 1, 1], [], []>} : vector<256x128xbf16>, vector<128x128xbf16>, vector<256x128xf32> -> vector<256x128xf32>
    %248 = arith.addf %242, %247 : vector<256x128xf32>
    %c0_198 = arith.constant 0 : index
    %c2_199 = arith.constant 2 : index
    %c0_200 = arith.constant 0 : index
    %249 = vector.load %arg11[%c0_198, %c2_199, %c0_200] : memref<18x18x128xbf16, #tpu.memory_space<vmem>>, vector<18x16x128xbf16>
    %250 = vector.extract_strided_slice %249 {offsets = [0, 0, 0], sizes = [16, 16, 128], strides = [1, 1, 1]} : vector<18x16x128xbf16> to vector<16x16x128xbf16>
    %251 = vector.shape_cast %250 : vector<16x16x128xbf16> to vector<256x128xbf16>
    %c2_201 = arith.constant 2 : index
    %c0_202 = arith.constant 0 : index
    %c0_203 = arith.constant 0 : index
    %252 = vector.load %arg8[%c2_201, %c0_202, %c0_203] : memref<9x128x128xbf16, #tpu.memory_space<vmem>>, vector<1x128x128xbf16>
    %253 = vector.shape_cast %252 : vector<1x128x128xbf16> to vector<128x128xbf16>
    %cst_204 = arith.constant dense<0.000000e+00> : vector<256x128xf32>
    %254 = tpu.matmul %251, %253, %cst_204 {dimension_numbers = #tpu.dot_dimension_numbers<[1], [0], [0], [1], [0, 0, 1, 1], [], []>} : vector<256x128xbf16>, vector<128x128xbf16>, vector<256x128xf32> -> vector<256x128xf32>
    %255 = arith.addf %248, %254 : vector<256x128xf32>
    %256 = vector.extract_strided_slice %249 {offsets = [1, 0, 0], sizes = [16, 16, 128], strides = [1, 1, 1]} : vector<18x16x128xbf16> to vector<16x16x128xbf16>
    %257 = vector.shape_cast %256 : vector<16x16x128xbf16> to vector<256x128xbf16>
    %c5_205 = arith.constant 5 : index
    %c0_206 = arith.constant 0 : index
    %c0_207 = arith.constant 0 : index
    %258 = vector.load %arg8[%c5_205, %c0_206, %c0_207] : memref<9x128x128xbf16, #tpu.memory_space<vmem>>, vector<1x128x128xbf16>
    %259 = vector.shape_cast %258 : vector<1x128x128xbf16> to vector<128x128xbf16>
    %cst_208 = arith.constant dense<0.000000e+00> : vector<256x128xf32>
    %260 = tpu.matmul %257, %259, %cst_208 {dimension_numbers = #tpu.dot_dimension_numbers<[1], [0], [0], [1], [0, 0, 1, 1], [], []>} : vector<256x128xbf16>, vector<128x128xbf16>, vector<256x128xf32> -> vector<256x128xf32>
    %261 = arith.addf %255, %260 : vector<256x128xf32>
    %262 = vector.extract_strided_slice %249 {offsets = [2, 0, 0], sizes = [16, 16, 128], strides = [1, 1, 1]} : vector<18x16x128xbf16> to vector<16x16x128xbf16>
    %263 = vector.shape_cast %262 : vector<16x16x128xbf16> to vector<256x128xbf16>
    %c8_209 = arith.constant 8 : index
    %c0_210 = arith.constant 0 : index
    %c0_211 = arith.constant 0 : index
    %264 = vector.load %arg8[%c8_209, %c0_210, %c0_211] : memref<9x128x128xbf16, #tpu.memory_space<vmem>>, vector<1x128x128xbf16>
    %265 = vector.shape_cast %264 : vector<1x128x128xbf16> to vector<128x128xbf16>
    %cst_212 = arith.constant dense<0.000000e+00> : vector<256x128xf32>
    %266 = tpu.matmul %263, %265, %cst_212 {dimension_numbers = #tpu.dot_dimension_numbers<[1], [0], [0], [1], [0, 0, 1, 1], [], []>} : vector<256x128xbf16>, vector<128x128xbf16>, vector<256x128xf32> -> vector<256x128xf32>
    %267 = arith.addf %261, %266 : vector<256x128xf32>
    %c0_213 = arith.constant 0 : index
    %c0_214 = arith.constant 0 : index
    %268 = vector.load %arg9[%c0_213, %c0_214] : memref<1x128xf32, #tpu.memory_space<vmem>>, vector<1x128xf32>
    %269 = vector.broadcast %268 : vector<1x128xf32> to vector<256x128xf32>
    %270 = arith.addf %267, %269 : vector<256x128xf32>
    %271 = tpu.transpose %270, [1, 0] : vector<256x128xf32> -> vector<128x256xf32>
    %272 = vector.extract_strided_slice %271 {offsets = [0, 0], sizes = [8, 256], strides = [1, 1]} : vector<128x256xf32> to vector<8x256xf32>
    %c0_215 = arith.constant 0 : index
    %c0_216 = arith.constant 0 : index
    %c0_217 = arith.constant 0 : index
    %273 = vector.load %arg10[%c0_215, %c0_216, %c0_217] : memref<1x8x256xf32, #tpu.memory_space<vmem>>, vector<1x8x256xf32>
    %274 = vector.shape_cast %273 : vector<1x8x256xf32> to vector<8x256xf32>
    %275 = vector.shape_cast %272 : vector<8x256xf32> to vector<1x8x256xf32>
    tpu.vector_store %arg10[%c0_215, %c0_216, %c0_217], %275 {strides = array<i32>} : memref<1x8x256xf32, #tpu.memory_space<vmem>>, vector<1x8x256xf32>,
    return
  }
  func.func @transform_0(%arg0: i32) -> (i32, i32, i32, i32) {
    %c0_i32 = arith.constant 0 : i32
    %c0_i32_0 = arith.constant 0 : i32
    %c0_i32_1 = arith.constant 0 : i32
    %c0_i32_2 = arith.constant 0 : i32
    return %arg0, %c0_i32, %c0_i32_0, %c0_i32_1 : i32, i32, i32, i32
  }
  func.func @transform_1(%arg0: i32) -> (i32, i32, i32) {
    %c0_i32 = arith.constant 0 : i32
    %c0_i32_0 = arith.constant 0 : i32
    %c0_i32_1 = arith.constant 0 : i32
    %c0_i32_2 = arith.constant 0 : i32
    return %c0_i32, %c0_i32_0, %c0_i32_1 : i32, i32, i32
  }
  func.func @transform_2(%arg0: i32) -> (i32, i32) {
    %c0_i32 = arith.constant 0 : i32
    %c0_i32_0 = arith.constant 0 : i32
    %c0_i32_1 = arith.constant 0 : i32
    return %c0_i32, %c0_i32_0 : i32, i32
  }
  func.func @transform_3(%arg0: i32) -> (i32, i32, i32) {
    %c0_i32 = arith.constant 0 : i32
    %c0_i32_0 = arith.constant 0 : i32
    %c0_i32_1 = arith.constant 0 : i32
    %c0_i32_2 = arith.constant 0 : i32
    return %c0_i32, %c0_i32_0, %c0_i32_1 : i32, i32, i32
  }
  func.func @transform_4(%arg0: i32) -> (i32, i32) {
    %c0_i32 = arith.constant 0 : i32
    %c0_i32_0 = arith.constant 0 : i32
    %c0_i32_1 = arith.constant 0 : i32
    return %c0_i32, %c0_i32_0 : i32, i32
  }
  func.func @transform_5(%arg0: i32) -> (i32, i32, i32) {
    %c0_i32 = arith.constant 0 : i32
    %c0_i32_0 = arith.constant 0 : i32
    %c0_i32_1 = arith.constant 0 : i32
    %c0_i32_2 = arith.constant 0 : i32
    return %c0_i32, %c0_i32_0, %c0_i32_1 : i32, i32, i32
  }
  func.func @transform_6(%arg0: i32) -> (i32, i32) {
    %c0_i32 = arith.constant 0 : i32
    %c0_i32_0 = arith.constant 0 : i32
    %c0_i32_1 = arith.constant 0 : i32
    return %c0_i32, %c0_i32_0 : i32, i32
  }
  func.func @transform_7(%arg0: i32) -> (i32, i32, i32) {
    %c0_i32 = arith.constant 0 : i32
    %c0_i32_0 = arith.constant 0 : i32
    %c0_i32_1 = arith.constant 0 : i32
    %c0_i32_2 = arith.constant 0 : i32
    return %c0_i32, %c0_i32_0, %c0_i32_1 : i32, i32, i32
  }
  func.func @transform_8(%arg0: i32) -> (i32, i32) {
    %c0_i32 = arith.constant 0 : i32
    %c0_i32_0 = arith.constant 0 : i32
    %c0_i32_1 = arith.constant 0 : i32
    return %c0_i32, %c0_i32_0 : i32, i32
  }
  func.func @transform_9(%arg0: i32) -> (i32, i32, i32) {
    %c0_i32 = arith.constant 0 : i32
    %c0_i32_0 = arith.constant 0 : i32
    %c0_i32_1 = arith.constant 0 : i32
    return %arg0, %c0_i32, %c0_i32_0 : i32, i32, i32
  }
}

</mosaic_0001>

<bundles_post_ra>
// kernel: tpu_custom_call.1
= control target key start
LH: loop header
LB: loop body
LE: loop exit
PB: predicated region body
PF: predicated region fallthrough
CT: control target
= control target key end

     0   :  { %s24937_s0 = inlined_call_operand.hbm [shape: bf16[2,16,16,128], index: 0, kind: input, shape index: {}]   ;;  %s24938_s1 = inlined_call_operand.hbm [shape: bf16[9,128,128], index: 1, kind: input, shape index: {}]   ;;  %s24939_s2 = inlined_call_operand.vmem [shape: f32[1,128], index: 2, kind: input, shape index: {}]   ;;  %s24940_s3 = inlined_call_operand.hbm [shape: bf16[9,128,128], index: 3, kind: input, shape index: {}]   ;;  %s24941_s4 = inlined_call_operand.vmem [shape: f32[1,128], index: 4, kind: input, shape index: {}]   ;;  %s24942_s5 = inlined_call_operand.hbm [shape: bf16[9,128,128], index: 5, kind: input, shape index: {}]   ;;  %s24943_s6 = inlined_call_operand.vmem [shape: f32[1,128], index: 6, kind: input, shape index: {}]   ;;  %s24944_s7 = inlined_call_operand.hbm [shape: bf16[9,128,128], index: 7, kind: input, shape index: {}]   ;;  %s24945_s8 = inlined_call_operand.vmem [shape: f32[1,128], index: 8, kind: input, shape index: {}]   ;;  %s24946_s9 = inlined_call_operand.hbm [shape: f32[2,8,256], index: 9, kind: output, shape index: {}]  }
   0x1   :  { %25008 = sst [smem:[#allocation38_spill]] %s24946_s9 }
   0x2   :  { %14 = vsyncpa [#allocation4], 0 }
   0x3   :  { %16 = vsyncpa [#allocation4 + $0x1], 0 }
   0x4   :  { %17 = vsyncpa [#allocation7], 0 }
   0x5   :  { %18 = vsyncpa [#allocation10], 0 }
   0x6   :  { %19 = vsyncpa [#allocation5], 0 }
   0x7   :  { %21 = vsyncpa [#allocation5 + $0x1], 0  ;;  %s21324_s30 = smov 0   ;;  %s21326_s10 = smov 0  }
   0x8   :  { %s21328_s11 = smov 0   ;;  %s21330_s12 = smov 0  }
   0x9 LB: > { %25009 = sst [smem:[#allocation17_spill]] %s21251_s30  ;;  %s21345_s13 = sadd.s32 4294967295, %s21263_s12   ;;  %s21263_s12 = sphi %s21330_s12, %s25161_s12   ;;  %s21259_s11 = sphi %s21328_s11, %s25160_s11   ;;  %s21255_s10 = sphi %s21326_s10, %s25159_s10   ;;  %s21251_s30 = sphi %s21324_s30, %s25158_s30  }
   0xa   : > { %s16138_s14 = sadd.s32 4294967294, %s21263_s12   ;;  %p47_p0 = scmp.ne.s32.totalorder %s21255_s10, %s21251_s30 }
   0xb   : > { %p24947_p1 = scmp.eq.s32.totalorder %s21345_s13, 0  ;;  %p245_p3 = scmp.eq.s32.totalorder %s16138_s14, 1 }
   0xc   : > { %p16139_p5 = scmp.ge.s32.totalorder %s21263_s12, 1  ;;  %p252_p7 = scmp.lt.s32.totalorder %s21263_s12, 3 }
   0xd   : > { %p21354_p4 = por %p24947_p1, %p47_p0  ;;  %p21359_p6 = por %p245_p3, %p47_p0 }
   0xe   : > { %p21364_p8 = pnand %p16139_p5, %p252_p7  ;;  %s21265_s18 = smov [#allocation6]  }
   0xf   : > { %s25010_s15 = scalar_select %p21354_p4, 1, 0 }
  0x10   : > { %s25011_s16 = scalar_select %p21359_p6, 1, 0 }
  0x11   : > { %s25013_s17 = scalar_select %p21364_p8, 1, 0 }
  0x12   : > { %25012 = sst [smem:[#allocation18_spill]] %s25011_s16  ;;  %s264_s19 = sshll.u32 %s21265_s18, 4  ;;  %s21368_s19 = int_to_ptr.vmem [resolvable:$true] %s264_s19 }
  0x13   : > { %p20570_p9 = pneg %p21364_p8  ;;  %s21266_s21 = smov [#allocation9]  }
  0x14   : > { %s296_s22 = sshll.u32 %s21266_s21, 4  ;;  %s21267_s23 = smov [#allocation8]   ;;  %s21379_s22 = int_to_ptr.vmem [resolvable:$true] %s296_s22 }
  0x15   : > { %p21375_p11 = pnand %p20570_p9, %p24947_p1  ;;  %s21381_s24 = sshll.u32 %s21267_s23, 4  ;;  %s281_s24 = int_to_ptr.vmem [resolvable:$true] %s21381_s24 }
  0x16   : > { %s21047_s27 = scalar_lea.hbm %s24938_s1, 9216 }
  0x17   : > { %p21048_p12 = scmp.ne.s32.totalorder %s24938_s1, %s21047_s27  ;;  %p21391_p13 = pneg %p21375_p11 }
  0x18   : > { %p21054_p5 = scmp.lt.u32.totalorder %s21047_s27, %s24938_s1 }
  0x19   : > { %p21050_p0 = pnand %p21391_p13, %p21048_p12 }
  0x1b   : > { %p21051_p3 = pneg %p21050_p0 }
  0x1d   : > { %p21056_p7 = pnand %p21054_p5, %p21051_p3 }
  0x1f   : > { %21059 = shalt.err (!%p21056_p7)
}
  0x20   : > { %s21060_s23 = scalar_lea.vmem %s21368_s19, 9216  ;;  %p21068_p2 = scmp.lt.s32.totalorder %s21368_s19, %s21368_s19 }
  0x21   : > { %p21061_p9 = scmp.ne.s32.totalorder %s21368_s19, %s21060_s23  ;;  %p21069_p6 = scmp.lt.s32.totalorder %s21060_s23, %s21060_s23 }
  0x23   : > { %p21063_p10 = pnand %p21061_p9, %p21391_p13  ;;  %p21070_p12 = por %p21069_p6, %p21068_p2 }
  0x25   : > { %p21064_p1 = pneg %p21063_p10 }
  0x27   : > { %p21071_p0 = pnand %p21070_p12, %p21064_p1 }
  0x29   : > { %21074 = shalt.err (!%p21071_p0)
}
  0x2a   : > { %s21268_s25 = smov 64   ;;  %s21269_s26 = smov 4  }
  0x2b   : > { %20573 = dma.hbm_to_vmem [thread:$0]  (!%p21375_p11), %s24938_s1, 9216, %s21368_s19, [#allocation7], %s21268_s25, %s21268_s25, %s21269_s26  }
  0x2c   : > { %s21075_s21 = scalar_lea.hbm %s24942_s5, 9216 }
  0x2d   : > { %p21076_p1 = scmp.ne.s32.totalorder %s24942_s5, %s21075_s21  ;;  %p21082_p10 = scmp.lt.u32.totalorder %s21075_s21, %s24942_s5 }
  0x2f   : > { %p21078_p2 = pnand %p21076_p1, %p21391_p13 }
  0x31   : > { %p21079_p6 = pneg %p21078_p2 }
  0x33   : > { %p21084_p3 = pnand %p21082_p10, %p21079_p6 }
  0x35   : > { %21087 = shalt.err (!%p21084_p3)
}
  0x36   : > { %s21088_s19 = scalar_lea.vmem %s21379_s22, 9216  ;;  %p21096_p12 = scmp.lt.s32.totalorder %s21379_s22, %s21379_s22 }
  0x37   : > { %p21089_p5 = scmp.ne.s32.totalorder %s21379_s22, %s21088_s19  ;;  %p21097_p0 = scmp.lt.s32.totalorder %s21088_s19, %s21088_s19 }
  0x39   : > { %p21091_p7 = pnand %p21089_p5, %p21391_p13  ;;  %p21098_p1 = por %p21097_p0, %p21096_p12 }
  0x3b   : > { %p21092_p9 = pneg %p21091_p7 }
  0x3d   : > { %p21099_p2 = pnand %p21098_p1, %p21092_p9 }
  0x3f   : > { %21102 = shalt.err (!%p21099_p2)
}
  0x40   : > { %20579 = dma.hbm_to_vmem [thread:$0]  (!%p21375_p11), %s24942_s5, 9216, %s21379_s22, [#allocation10], %s21268_s25, %s21268_s25, %s21269_s26  }
  0x41   : > { %s21103_s28 = scalar_lea.hbm %s24940_s3, 9216 }
  0x42   : > { %p21104_p6 = scmp.ne.s32.totalorder %s24940_s3, %s21103_s28  ;;  %p21110_p5 = scmp.lt.u32.totalorder %s21103_s28, %s24940_s3 }
  0x44   : > { %p21106_p10 = pnand %p21104_p6, %p21391_p13 }
  0x46   : > { %p21107_p3 = pneg %p21106_p10 }
  0x48   : > { %p21112_p7 = pnand %p21110_p5, %p21107_p3 }
  0x4a   : > { %21115 = shalt.err (!%p21112_p7)
}
  0x4b   : > { %s21116_s19 = scalar_lea.vmem %s281_s24, 9216  ;;  %p21124_p1 = scmp.lt.s32.totalorder %s281_s24, %s281_s24 }
  0x4c   : > { %p21117_p9 = scmp.ne.s32.totalorder %s281_s24, %s21116_s19  ;;  %p21125_p2 = scmp.lt.s32.totalorder %s21116_s19, %s21116_s19 }
  0x4e   : > { %p21119_p12 = pnand %p21117_p9, %p21391_p13  ;;  %p21126_p4 = por %p21125_p2, %p21124_p1 }
  0x50   : > { %p21120_p0 = pneg %p21119_p12 }
  0x52   : > { %p21127_p8 = pnand %p21126_p4, %p21120_p0 }
  0x54   : > { %21130 = shalt.err (!%p21127_p8)
}
  0x55   : > { %20576 = dma.hbm_to_vmem [thread:$0]  (!%p21375_p11), %s24940_s3, 9216, %s281_s24, [#allocation7], %s21268_s25, %s21268_s25, %s21269_s26  }
  0x56   : > { %s21270_s30 = smov [#allocation11]   ;;  %s21131_s29 = scalar_lea.hbm %s24944_s7, 9216 }
  0x57   : > { %s312_s16 = sshll.u32 %s21270_s30, 4  ;;  %p21132_p4 = scmp.ne.s32.totalorder %s24944_s7, %s21131_s29  ;;  %s313_s16 = int_to_ptr.vmem [resolvable:$true] %s312_s16 }
  0x58   : > { %p21138_p10 = scmp.lt.u32.totalorder %s21131_s29, %s24944_s7 }
  0x59   : > { %p21134_p8 = pnand %p21132_p4, %p21391_p13 }
  0x5b   : > { %p21135_p6 = pneg %p21134_p8 }
  0x5d   : > { %p21140_p3 = pnand %p21138_p10, %p21135_p6 }
  0x5f   : > { %21143 = shalt.err (!%p21140_p3)
}
  0x60   : > { %s21144_s24 = scalar_lea.vmem %s313_s16, 9216  ;;  %p21152_p12 = scmp.lt.s32.totalorder %s313_s16, %s313_s16 }
  0x61   : > { %p21145_p5 = scmp.ne.s32.totalorder %s313_s16, %s21144_s24  ;;  %p21153_p0 = scmp.lt.s32.totalorder %s21144_s24, %s21144_s24 }
  0x63   : > { %p21147_p7 = pnand %p21145_p5, %p21391_p13  ;;  %p21154_p1 = por %p21153_p0, %p21152_p12 }
  0x65   : > { %p21148_p9 = pneg %p21147_p7 }
  0x67   : > { %p21155_p2 = pnand %p21154_p1, %p21148_p9 }
  0x69   : > { %21158 = shalt.err (!%p21155_p2)
}
  0x6a   : > { %20582 = dma.hbm_to_vmem [thread:$0]  (!%p21375_p11), %s24944_s7, 9216, %s313_s16, [#allocation10], %s21268_s25, %s21268_s25, %s21269_s26  }
  0x6b   : > { %s21485_s14 = sadd.s32 1, %s21263_s12   ;;  %s34_s20 = sadd.s32 1, %s21259_s11 }
  0x6c   : > { %s31_s30 = ssub.s32 %s21263_s12, %s21485_s14  ;;  %p41_p13 = scmp.ne.s32.totalorder %s21259_s11, %s21255_s10 }
  0x6d   : > { %p32_p4 = scmp.eq.s32.totalorder %s31_s30, 0  ;;  %p42_p8 = scmp.eq.s32.totalorder %s21263_s12, 0 }
  0x6e   : > { %p25016_p6 = scmp.eq.s32.totalorder %s21345_s13, 1  ;;  %p20595_p3 = scmp.lt.s32.totalorder %s21263_s12, 2 }
  0x6f   : > { %s21501_s28 = scalar_select %p32_p4, %s21259_s11, %s34_s20  }
  0x70   : > { %p21495_p10 = por %p25016_p6, %p41_p13  ;;  %p43_p5 = por %p42_p8, %p41_p13 }
  0x71   : > { %s329_s29 = sand.u32 1, %s21259_s11   ;;  %s16836_s16 = sshll.u32 %s21263_s12, 11 }
  0x72   : > { %s16145_s18 = sshll.u32 %s329_s29, 7  ;;  %s21508_s19 = scalar_lea.hbm %s24937_s0, %s16836_s16 }
  0x73   : > { %s333_s24 = scalar_lea.vmem [#allocation3], %s16145_s18  ;;  %p21512_p11 = pnand %p20595_p3, %p43_p5 }
  0x74   : > { %s340_s22 = sshll.u32 %s333_s24, 4  ;;  %s21516_s20 = scalar_lea.sflag [#allocation4], %s329_s29  ;;  %s21510_s22 = int_to_ptr.vmem [resolvable:$true] %s340_s22 }
  0x75   : > { %s21159_s30 = scalar_lea.hbm %s21508_s19, 2048  ;;  %p21161_p9 = pneg %p21512_p11 }
  0x76   : > { %p21160_p7 = scmp.ne.s32.totalorder %s21508_s19, %s21159_s30  ;;  %s21164_s21 = scalar_lea.hbm %s24937_s0, 4096 }
  0x77   : > { %p21165_p1 = scmp.lt.u32.totalorder %s21508_s19, %s24937_s0  ;;  %p21166_p2 = scmp.lt.u32.totalorder %s21164_s21, %s21159_s30 }
  0x78   : > { %p21162_p12 = pnand %p21161_p9, %p21160_p7  ;;  %p21168_p4 = scmp.lt.u32.totalorder %s21159_s30, %s21508_s19 }
  0x79   : > { %p21167_p13 = por %p21166_p2, %p21165_p1 }
  0x7a   : > { %p21163_p0 = pneg %p21162_p12 }
  0x7b   : > { %p21169_p8 = por %p21168_p4, %p21167_p13 }
  0x7d   : > { %p21170_p6 = pnand %p21169_p8, %p21163_p0 }
  0x7f   : > { %21173 = shalt.err (!%p21170_p6)
}
  0x80   : > { %s21174_s29 = scalar_lea.vmem %s21510_s22, 2048  ;;  %s21271_s18 = smov [#allocation3]  }
  0x81   : > { %p21175_p3 = scmp.ne.s32.totalorder %s21510_s22, %s21174_s29  ;;  %s21179_s16 = sshll.u32 %s21271_s18, 4  ;;  %s21180_s16 = int_to_ptr.vmem [resolvable:$false] %s21179_s16 }
  0x82   : > { %s21181_s23 = scalar_lea.vmem %s21180_s16, 4096  ;;  %p21182_p12 = scmp.lt.s32.totalorder %s21510_s22, %s21180_s16 }
  0x83   : > { %p21177_p5 = pnand %p21175_p3, %p21161_p9  ;;  %p21183_p1 = scmp.lt.s32.totalorder %s21181_s23, %s21174_s29 }
  0x85   : > { %p21178_p7 = pneg %p21177_p5  ;;  %p21184_p2 = por %p21183_p1, %p21182_p12 }
  0x87   : > { %p21185_p13 = pnand %p21184_p2, %p21178_p7 }
  0x89   : > { %21188 = shalt.err (!%p21185_p13)
}
  0x8a   : > { %20586 = dma.hbm_to_vmem [thread:$0]  (!%p21512_p11), %s21508_s19, 2048, %s21510_s22, %s21516_s20, %s21268_s25, %s21268_s25, %s21269_s26  }
  0x8b   : > { %p25019_p9 = scmp.ne.s32.totalorder %s25013_s17, 0 }
  0x8d   : > { %352 = sbr.rel (%p25019_p9) target bundleno = 3444 (0xd74), region = 56 }
  0x94   : > { %s21550_s30 = sand.u32 1, %s21255_s10   ;;  %p25020_p0 = scmp.ne.s32.totalorder %s25010_s15, 0 }
  0x95   : > { %s16149_s21 = sshll.u32 %s21550_s30, 7  ;;  %s355_s24 = scalar_lea.sflag [#allocation4], %s21550_s30 }
  0x96   : > { %s21554_s29 = scalar_lea.vmem [#allocation3], %s16149_s21 }
  0x97   : > { %21234 = dma.done.wait (%p25020_p0), %s355_s24, 2048  }
  0x98   : > { %21236 = vsyncadd (%p25020_p0), %s355_s24, 4294965248  ;;  %p25021_p11 = scmp.eq.s32.totalorder %s21345_s13, 0 }
  0x9a   : > { %21238 = dma.done.wait (%p25021_p11), [#allocation7], 18432   ;;  %p25022_p4 = pmov %p25021_p11 }
  0x9c   : > { %21240 = vsyncadd (%p25022_p4), [#allocation7], 4294948864  ;;  %p25023_p8 = pmov %p25022_p4 }
  0x9d   : > { %p25024_p6 = pmov %p25022_p4 }
  0x9e   : > { %21242 = dma.done.wait (%p25023_p8), [#allocation10], 18432  }
  0x9f   : > { %21244 = vsyncadd (%p25024_p6), [#allocation10], 4294948864  ;;  %v21272_v0 = vmov 0   ;;  %v20640_v1 = vld [vmem:[#allocation6 + $0xc0] sm:$0xff]   ;;  %v20641_v2 = vld [vmem:[#allocation6 + $0xc8] sm:$0xff]   ;;  %vm417_vm0 = vcmask 1040384  }
  0xa0   : > { %410 = vst [vmem:[#allocation2] sm:$0xf] %v21272_v0  ;;  %411 = vst [vmem:[#allocation2 + $0x4] sm:$0xf] %v21272_v0  ;;  %17798 = vmatprep.subr.bf16.mxu0 %v20640_v1  ;;  %vm418_vm1 = vsmask.f32 256 }
  0xa1   : > { %412 = vst [vmem:[#allocation2 + $0x8] sm:$0x1] %v21272_v0  ;;  %414 = vst [vmem:[#allocation2 + $0xcc] sm:$0xf] %v21272_v0  ;;  %17799 = vmatpush3.bf16.msra.mxu0 %v20640_v1  ;;  %v20642_v3 = vld [vmem:[#allocation6 + $0xd0] sm:$0xff]   ;;  %v25025_v4 = vmov 0 }
  0xa2   : > { %415 = vst [vmem:[#allocation2 + $0xd0] sm:$0xf] %v21272_v0  ;;  %416 = vst [vmem:[#allocation2 + $0xd4] sm:$0x1] %v21272_v0  ;;  %17800 = vmatprep.subr.bf16.mxu0 %v20641_v2  ;;  %vm474_vm3 = vsmask.f32 7938 }
  0xa3   : > { %vm21569_vm2 = vmand %vm417_vm0, %vm418_vm1  ;;  %v25028_v5 = vmov 0  ;;  %vm562_vm5 = vsmask.f32 4368  ;;  %v20643_v6 = vld [vmem:[#allocation6 + $0xd8] sm:$0xff]   ;;  %v423_v7 = vld [vmem:[#allocation2 + $0xc] sm:$0x1] }
  0xa4   : > { %v25026_v4 = vsel %vm21569_vm2, 4294967295, %v25025_v4  ;;  %vm21574_vm4 = vmand %vm417_vm0, %vm474_vm3  ;;  %v479_v8 = vld [vmem:[#allocation2 + $0x14] sm:$0x1]  ;;  %v530_v9 = vld [vmem:[%s21554_s29] sm:$0xf]  ;;  %v424_v10 = vsel %vm21569_vm2, 0, %v423_v7 }
  0xa5   : > { %25027 = vst [vmem:[#allocation19_spill] sm:$0xff] %v25026_v4  ;;  %v25029_v5 = vsel %vm21574_vm4, 4294967295, %v25028_v5  ;;  %17801 = vmatpush3.bf16.msra.mxu0 %v20641_v2  ;;  %v480_v11 = vsel %vm21574_vm4, 0, %v479_v8  ;;  %v531_v12 = vld [vmem:[%s21554_s29 + $0x4] sm:$0xf]  ;;  %v565_v13 = vshrl.u32 %v530_v9, 16  ;;  %vm21592_vm7 = vmor %vm418_vm1, %vm562_vm5 }
  0xa6   : > { %25030 = vst [vmem:[#allocation20_spill] sm:$0xff] %v25029_v5  ;;  %17802 = vmatprep.subr.bf16.mxu0 %v20642_v3  ;;  %v568_v14 = vshll.u32 %v530_v9, 16  ;;  %425 = vst [vmem:[#allocation2 + $0xc] sm:$0x1] %v424_v10  ;;  %v573_v15 = vshrl.u32 %v531_v12, 16  ;;  %v576_v16 = vshll.u32 %v531_v12, 16 }
  0xa7   : > { %481 = vst [vmem:[#allocation2 + $0x14] sm:$0x1] %v480_v11  ;;  %v426_v17 = vld [vmem:[#allocation2 + $0x18] sm:$0x1]  ;;  %v482_v18 = vld [vmem:[#allocation2 + $0x20] sm:$0x1] }
  0xa8   : > { %v567_v19 = vrot.slane %v565_v13, 7  ;;  %vm885_vm6 = vcmask 1043456   ;;  %v427_v20 = vsel %vm21569_vm2, 0, %v426_v17  ;;  %v483_v21 = vsel %vm21574_vm4, 0, %v482_v18  ;;  %v532_v22 = vld [vmem:[%s21554_s29 + $0x8] sm:$0xf] }
  0xa9   : > { %17803 = vmatpush3.bf16.msra.mxu0 %v20642_v3  ;;  %v20644_v23 = vld [vmem:[#allocation6 + $0xe0] sm:$0xff]   ;;  %v575_v24 = vrot.slane %v573_v15, 7  ;;  %428 = vst [vmem:[#allocation2 + $0x18] sm:$0x1] %v427_v20  ;;  %484 = vst [vmem:[#allocation2 + $0x20] sm:$0x1] %v483_v21 }
  0xaa   : > { %17804 = vmatprep.subr.bf16.mxu0 %v20643_v6  ;;  %v533_v25 = vld [vmem:[%s21554_s29 + $0xc] sm:$0xf]  ;;  %v582_v26 = vshrl.u32 %v532_v22, 16  ;;  %v585_v27 = vshll.u32 %v532_v22, 16  ;;  %v25031_v28 = vmov 0  ;;  %v571_v29 = vrot.slane %v567_v19, 4  ;;  %vm21598_vm8 = vmand %vm885_vm6, %vm474_vm3 }
  0xab   : > { %v25032_v28 = vsel %vm21592_vm7, 4294967295, %v25031_v28  ;;  %v590_v30 = vshrl.u32 %v533_v25, 16  ;;  %v593_v31 = vshll.u32 %v533_v25, 16  ;;  %v20645_v32 = vld [vmem:[#allocation6 + $0xe8] sm:$0xff]   ;;  %v570_v33 = vor.u32 %v568_v14, %v567_v19  ;;  %v485_v41 = vld [vmem:[#allocation2 + $0x2c] sm:$0x1] }
  0xac   : > { %25033 = vst [vmem:[#allocation21_spill] sm:$0xff] %v25032_v28  ;;  %v578_v34 = vor.u32 %v576_v16, %v575_v24  ;;  %v580_v35 = vrot.slane %v575_v24, 4  ;;  %v584_v36 = vrot.slane %v582_v26, 7  ;;  %v429_v37 = vld [vmem:[#allocation2 + $0x24] sm:$0x1]  ;;  %v25034_v38 = vmov 0 }
  0xad   : > { %17805 = vmatpush3.bf16.msra.mxu0 %v20643_v6  ;;  %v25035_v38 = vsel %vm21598_vm8, 4294967295, %v25034_v38  ;;  %v592_v39 = vrot.slane %v590_v30, 7  ;;  %v430_v40 = vsel %vm21569_vm2, 0, %v429_v37  ;;  %v534_v42 = vld [vmem:[%s21554_s29 + $0x10] sm:$0xf]  ;;  %v486_v46 = vsel %vm21574_vm4, 0, %v485_v41 }
  0xae   : > { %25036 = vst [vmem:[#allocation22_spill] sm:$0xff] %v25035_v38  ;;  %17806 = vmatprep.subr.bf16.mxu0 %v20644_v23  ;;  %v579_v43 = vsel %vm21592_vm7, %v571_v29, %v578_v34  ;;  %v587_v44 = vor.u32 %v585_v27, %v584_v36  ;;  %v588_v45 = vrot.slane %v584_v36, 4  ;;  %431 = vst [vmem:[#allocation2 + $0x24] sm:$0x1] %v430_v40  ;;  %v535_v47 = vld [vmem:[%s21554_s29 + $0x14] sm:$0xf] }
  0xaf   : > { %v432_v48 = vld [vmem:[#allocation2 + $0x30] sm:$0x1]  ;;  %v887_v49 = vld [vmem:[#allocation2 + $0xc] sm:$0xf]  ;;  %890 = vst [vmem:[#allocation2 + $0x10] sm:$0xf] %v579_v43  ;;  %v595_v51 = vor.u32 %v593_v31, %v592_v39 }
  0xb0   : > { %v891_v50 = vld [vmem:[#allocation2 + $0x14] sm:$0x1]  ;;  %v597_v52 = vrot.slane %v592_v39, 4  ;;  %487 = vst [vmem:[#allocation2 + $0x2c] sm:$0x1] %v486_v46  ;;  %v599_v53 = vshrl.u32 %v534_v42, 16  ;;  %v888_v55 = vsel %vm21598_vm8, %v570_v33, %v887_v49 }
  0xb1   : > { %v20646_v54 = vld [vmem:[#allocation6 + $0xf0] sm:$0xff]   ;;  %v892_v56 = vsel %vm21569_vm2, %v580_v35, %v891_v50  ;;  %v602_v57 = vshll.u32 %v534_v42, 16  ;;  %v607_v58 = vshrl.u32 %v535_v47, 16  ;;  %v488_v59 = vld [vmem:[#allocation2 + $0x38] sm:$0x1]  ;;  %17807 = vmatpush3.bf16.msra.mxu0 %v20644_v23  ;;  %v596_v61 = vsel %vm21592_vm7, %v588_v45, %v595_v51  ;;  %v20647_v22 = vld [vmem:[#allocation6 + $0xf8] sm:$0xff]  }
  0xb2   : > { %v536_v60 = vld [vmem:[%s21554_s29 + $0x18] sm:$0xf]  ;;  %889 = vst [vmem:[#allocation2 + $0xc] sm:$0xf] %v888_v55  ;;  %893 = vst [vmem:[#allocation2 + $0x14] sm:$0x1] %v892_v56  ;;  %17808 = vmatprep.subr.bf16.mxu0 %v20645_v32 }
  0xb3   : > { %v894_v62 = vld [vmem:[#allocation2 + $0x18] sm:$0xf]  ;;  %v898_v63 = vld [vmem:[#allocation2 + $0x20] sm:$0x1]  ;;  %v601_v0 = vrot.slane %v599_v53, 7  ;;  %v610_v1 = vshll.u32 %v535_v47, 16 }
  0xb4   : > { %v895_v2 = vsel %vm21598_vm8, %v587_v44, %v894_v62  ;;  %897 = vst [vmem:[#allocation2 + $0x1c] sm:$0xf] %v596_v61  ;;  %v899_v3 = vsel %vm21569_vm2, %v597_v52, %v898_v63  ;;  %v609_v6 = vrot.slane %v607_v58, 7  ;;  %v433_v7 = vsel %vm21569_vm2, 0, %v432_v48  ;;  %v537_v8 = vld [vmem:[%s21554_s29 + $0x1c] sm:$0xf] }
  0xb5   : > { %896 = vst [vmem:[#allocation2 + $0x18] sm:$0xf] %v895_v2  ;;  %900 = vst [vmem:[#allocation2 + $0x20] sm:$0x1] %v899_v3  ;;  %v604_v9 = vor.u32 %v602_v57, %v601_v0  ;;  %v605_v10 = vrot.slane %v601_v0, 4  ;;  %v489_v11 = vsel %vm21574_vm4, 0, %v488_v59  ;;  %17809 = vmatpush3.bf16.msra.mxu0 %v20645_v32 }
  0xb6   : > { %434 = vst [vmem:[#allocation2 + $0x30] sm:$0x1] %v433_v7  ;;  %v616_v12 = vshrl.u32 %v536_v60, 16  ;;  %v612_v13 = vor.u32 %v610_v1, %v609_v6  ;;  %v614_v14 = vrot.slane %v609_v6, 4  ;;  %490 = vst [vmem:[#allocation2 + $0x38] sm:$0x1] %v489_v11  ;;  %17810 = vmatprep.subr.bf16.mxu0 %v20646_v54 }
  0xb7   : > { %v619_v15 = vshll.u32 %v536_v60, 16  ;;  %v624_v16 = vshrl.u32 %v537_v8, 16  ;;  %v435_v17 = vld [vmem:[#allocation2 + $0x3c] sm:$0x1]  ;;  %v901_v18 = vld [vmem:[#allocation2 + $0x24] sm:$0xf] }
  0xb8   : > { %v618_v19 = vrot.slane %v616_v12, 7  ;;  %v627_v20 = vshll.u32 %v537_v8, 16  ;;  %v436_v21 = vsel %vm21569_vm2, 0, %v435_v17  ;;  %v613_v23 = vsel %vm21592_vm7, %v605_v10, %v612_v13  ;;  %v905_v25 = vld [vmem:[#allocation2 + $0x2c] sm:$0x1]  ;;  %v20650_v39 = vld [vmem:[#allocation6] sm:$0xff]  }
  0xb9   : > { %v902_v24 = vsel %vm21598_vm8, %v604_v9, %v901_v18  ;;  %v626_v26 = vrot.slane %v624_v16, 7  ;;  %437 = vst [vmem:[#allocation2 + $0x3c] sm:$0x1] %v436_v21  ;;  %904 = vst [vmem:[#allocation2 + $0x28] sm:$0xf] %v613_v23  ;;  %v906_v27 = vsel %vm21569_vm2, %v614_v14, %v905_v25  ;;  %v21635_v33 = vld [vmem:[#allocation2 + $0xc] sm:$0xff]   ;;  %17811 = vmatpush3.bf16.msra.mxu0 %v20646_v54 }
  0xba   : > { %903 = vst [vmem:[#allocation2 + $0x24] sm:$0xf] %v902_v24  ;;  %v621_v29 = vor.u32 %v619_v15, %v618_v19  ;;  %v622_v30 = vrot.slane %v618_v19, 4  ;;  %v491_v31 = vld [vmem:[#allocation2 + $0x44] sm:$0x1]  ;;  %17812 = vmatprep.subr.bf16.mxu0 %v20647_v22  ;;  %17814 = vmatprep.mubr.bf16.mxu0 %v21635_v33  ;;  %v20656_v17 = vld [vmem:[#allocation6 + $0x10] sm:$0xff]  }
  0xbb   : > { %v538_v32 = vld [vmem:[%s21554_s29 + $0x20] sm:$0xf]  ;;  %907 = vst [vmem:[#allocation2 + $0x2c] sm:$0x1] %v906_v27  ;;  %v629_v34 = vor.u32 %v627_v20, %v626_v26  ;;  %v631_v35 = vrot.slane %v626_v26, 4  ;;  %v492_v36 = vsel %vm21574_vm4, 0, %v491_v31 }
  0xbc   : > { %v633_v37 = vshrl.u32 %v538_v32, 16  ;;  %493 = vst [vmem:[#allocation2 + $0x44] sm:$0x1] %v492_v36  ;;  %v539_v40 = vld [vmem:[%s21554_s29 + $0x24] sm:$0xf]  ;;  %v636_v41 = vshll.u32 %v538_v32, 16 }
  0xbd   : > { %v21641_v42 = vld [vmem:[#allocation2 + $0x18] sm:$0xff]   ;;  %v630_v43 = vsel %vm21592_vm7, %v622_v30, %v629_v34  ;;  %v908_v44 = vld [vmem:[#allocation2 + $0x30] sm:$0xf]  ;;  %v641_v48 = vshrl.u32 %v539_v40, 16  ;;  %v644_v49 = vshll.u32 %v539_v40, 16  ;;  %v20653_v52 = vld [vmem:[#allocation6 + $0x8] sm:$0xff]   ;;  %17813 = vmatpush3.bf16.msra.mxu0 %v20647_v22 }
  0xbe   : > { %v635_v45 = vrot.slane %v633_v37, 7  ;;  %v909_v46 = vsel %vm21598_vm8, %v621_v29, %v908_v44  ;;  %911 = vst [vmem:[#allocation2 + $0x34] sm:$0xf] %v630_v43  ;;  %v912_v47 = vld [vmem:[#allocation2 + $0x38] sm:$0x1]  ;;  %17846 = vmatprep.subr.bf16.mxu0 %v20650_v39  ;;  %v20659_v29 = vld [vmem:[#allocation6 + $0x18] sm:$0xff]  }
  0xbf   : > { %v438_v50 = vld [vmem:[#allocation2 + $0x48] sm:$0x1]  ;;  %910 = vst [vmem:[#allocation2 + $0x30] sm:$0xf] %v909_v46  ;;  %v913_v51 = vsel %vm21569_vm2, %v631_v35, %v912_v47  ;;  %v494_v56 = vld [vmem:[#allocation2 + $0x50] sm:$0x1] }
  0xc0   : > { %v638_v53 = vor.u32 %v636_v41, %v635_v45  ;;  %v639_v54 = vrot.slane %v635_v45, 4  ;;  %v439_v55 = vsel %vm21569_vm2, 0, %v438_v50  ;;  %v540_v57 = vld [vmem:[%s21554_s29 + $0x28] sm:$0xf]  ;;  %914 = vst [vmem:[#allocation2 + $0x38] sm:$0x1] %v913_v51  ;;  %17815 = vmatmul.mubr.bf16.vlgmr.msra.gmra.mrb[0].mxu0 %v21641_v42 }
  0xc1   : > { %v643_v58 = vrot.slane %v641_v48, 7  ;;  %v915_v59 = vld [vmem:[#allocation2 + $0x3c] sm:$0xf]  ;;  %440 = vst [vmem:[#allocation2 + $0x48] sm:$0x1] %v439_v55  ;;  %v495_v60 = vsel %vm21574_vm4, 0, %v494_v56  ;;  %17847 = vmatpush3.bf16.msra.mxu0 %v20650_v39 }
  0xc2   : > { %v541_v61 = vld [vmem:[%s21554_s29 + $0x2c] sm:$0xf]  ;;  %v916_v63 = vsel %vm21598_vm8, %v638_v53, %v915_v59  ;;  %496 = vst [vmem:[#allocation2 + $0x50] sm:$0x1] %v495_v60  ;;  %v650_v0 = vshrl.u32 %v540_v57, 16  ;;  %v653_v3 = vshll.u32 %v540_v57, 16  ;;  %17848 = vmatprep.subr.bf16.mxu0 %v20653_v52 }
  0xc3   : > { %v21655_v62 = vld [vmem:[#allocation2 + $0x24] sm:$0xff]   ;;  %v646_v1 = vor.u32 %v644_v49, %v643_v58  ;;  %v648_v2 = vrot.slane %v643_v58, 4  ;;  %917 = vst [vmem:[#allocation2 + $0x3c] sm:$0xf] %v916_v63  ;;  %v658_v6 = vshrl.u32 %v541_v61, 16  ;;  %v661_v9 = vshll.u32 %v541_v61, 16 }
  0xc4   : > { %v919_v7 = vld [vmem:[#allocation2 + $0x44] sm:$0x1]  ;;  %v652_v8 = vrot.slane %v650_v0, 7  ;;  %17818 = vmatprep.mubr.bf16.mxu0 %v21655_v62  ;;  %v441_v13 = vld [vmem:[#allocation2 + $0x54] sm:$0x1]  ;;  %v20662_v59 = vld [vmem:[#allocation6 + $0x20] sm:$0xff]  }
  0xc5   : > { %v647_v10 = vsel %vm21592_vm7, %v639_v54, %v646_v1  ;;  %v920_v11 = vsel %vm21569_vm2, %v648_v2, %v919_v7  ;;  %v660_v12 = vrot.slane %v658_v6, 7  ;;  %v497_v14 = vld [vmem:[#allocation2 + $0x5c] sm:$0x1]  ;;  %v442_v18 = vsel %vm21569_vm2, 0, %v441_v13  ;;  %v542_v23 = vld [vmem:[%s21554_s29 + $0x30] sm:$0xf]  ;;  %17849 = vmatpush3.bf16.msra.mxu0 %v20653_v52 }
  0xc6   : > { %918 = vst [vmem:[#allocation2 + $0x40] sm:$0xf] %v647_v10  ;;  %921 = vst [vmem:[#allocation2 + $0x44] sm:$0x1] %v920_v11  ;;  %v655_v15 = vor.u32 %v653_v3, %v652_v8  ;;  %v656_v16 = vrot.slane %v652_v8, 4  ;;  %v498_v19 = vsel %vm21574_vm4, 0, %v497_v14  ;;  %17850 = vmatprep.subr.bf16.mxu0 %v20656_v17 }
  0xc7   : > { %v21669_v20 = vld [vmem:[#allocation2 + $0x30] sm:$0xff]   ;;  %v663_v21 = vor.u32 %v661_v9, %v660_v12  ;;  %v665_v22 = vrot.slane %v660_v12, 4  ;;  %443 = vst [vmem:[#allocation2 + $0x54] sm:$0x1] %v442_v18  ;;  %499 = vst [vmem:[#allocation2 + $0x5c] sm:$0x1] %v498_v19 }
  0xc8   : > { %v922_v24 = vld [vmem:[#allocation2 + $0x48] sm:$0xf]  ;;  %v543_v25 = vld [vmem:[%s21554_s29 + $0x34] sm:$0xf]  ;;  %v667_v26 = vshrl.u32 %v542_v23, 16  ;;  %v670_v27 = vshll.u32 %v542_v23, 16  ;;  %17819 = vmatmul.mubr.bf16.gmra.mrb[4].mxu0 %v21669_v20 }
  0xc9   : > { %v664_v30 = vsel %vm21592_vm7, %v656_v16, %v663_v21  ;;  %v923_v31 = vsel %vm21598_vm8, %v655_v15, %v922_v24  ;;  %v926_v32 = vld [vmem:[#allocation2 + $0x50] sm:$0x1]  ;;  %v675_v34 = vshrl.u32 %v543_v25, 16  ;;  %v678_v35 = vshll.u32 %v543_v25, 16  ;;  %v444_v36 = vld [vmem:[#allocation2 + $0x60] sm:$0x1]  ;;  %17851 = vmatpush3.bf16.msra.mxu0 %v20656_v17 }
  0xca   : > { %924 = vst [vmem:[#allocation2 + $0x48] sm:$0xf] %v923_v31  ;;  %925 = vst [vmem:[#allocation2 + $0x4c] sm:$0xf] %v664_v30  ;;  %v927_v37 = vsel %vm21569_vm2, %v665_v22, %v926_v32  ;;  %v669_v39 = vrot.slane %v667_v26, 7  ;;  %v445_v40 = vsel %vm21569_vm2, 0, %v444_v36  ;;  %17852 = vmatprep.subr.bf16.mxu0 %v20659_v29 }
  0xcb   : > { %v500_v41 = vld [vmem:[#allocation2 + $0x68] sm:$0x1]  ;;  %928 = vst [vmem:[#allocation2 + $0x50] sm:$0x1] %v927_v37  ;;  %v677_v43 = vrot.slane %v675_v34, 7  ;;  %v20665_v9 = vld [vmem:[#allocation6 + $0x28] sm:$0xff]  }
  0xcc   : > { %446 = vst [vmem:[#allocation2 + $0x60] sm:$0x1] %v445_v40  ;;  %v501_v44 = vsel %vm21574_vm4, 0, %v500_v41  ;;  %v544_v45 = vld [vmem:[%s21554_s29 + $0x38] sm:$0xf]  ;;  %v672_v47 = vor.u32 %v670_v27, %v669_v39  ;;  %v673_v48 = vrot.slane %v669_v39, 4 }
  0xcd   : > { %v545_v46 = vld [vmem:[%s21554_s29 + $0x3c] sm:$0xf]  ;;  %502 = vst [vmem:[#allocation2 + $0x68] sm:$0x1] %v501_v44  ;;  %v684_v49 = vshrl.u32 %v544_v45, 16  ;;  %v687_v50 = vshll.u32 %v544_v45, 16  ;;  %v680_v52 = vor.u32 %v678_v35, %v677_v43  ;;  %17853 = vmatpush3.bf16.msra.mxu0 %v20659_v29 }
  0xce   : > { %v21686_v51 = vld [vmem:[#allocation2 + $0x3c] sm:$0xff]   ;;  %v682_v53 = vrot.slane %v677_v43, 4  ;;  %v692_v54 = vshrl.u32 %v545_v46, 16  ;;  %v695_v55 = vshll.u32 %v545_v46, 16  ;;  %v929_v56 = vld [vmem:[#allocation2 + $0x54] sm:$0xf]  ;;  %17854 = vmatprep.subr.bf16.mxu0 %v20662_v59 }
  0xcf   : > { %v933_v57 = vld [vmem:[#allocation2 + $0x5c] sm:$0x1]  ;;  %v686_v58 = vrot.slane %v684_v49, 7  ;;  %17822 = vmatprep.mubr.bf16.mxu0 %v21686_v51  ;;  %v681_v60 = vsel %vm21592_vm7, %v673_v48, %v680_v52  ;;  %v930_v61 = vsel %vm21598_vm8, %v672_v47, %v929_v56  ;;  %v447_v1 = vld [vmem:[#allocation2 + $0x6c] sm:$0x1]  ;;  %vm3253_vm12 = vcmask 1042432  }
  0xd0   : > { %v934_v63 = vsel %vm21569_vm2, %v682_v53, %v933_v57  ;;  %v694_v0 = vrot.slane %v692_v54, 7  ;;  %931 = vst [vmem:[#allocation2 + $0x54] sm:$0xf] %v930_v61  ;;  %932 = vst [vmem:[#allocation2 + $0x58] sm:$0xf] %v681_v60  ;;  %v448_v6 = vsel %vm21569_vm2, 0, %v447_v1 }
  0xd1   : > { %935 = vst [vmem:[#allocation2 + $0x5c] sm:$0x1] %v934_v63  ;;  %v689_v2 = vor.u32 %v687_v50, %v686_v58  ;;  %v690_v3 = vrot.slane %v686_v58, 4  ;;  %v503_v7 = vld [vmem:[#allocation2 + $0x74] sm:$0x1]  ;;  %v21698_v10 = vld [vmem:[#allocation2 + $0x48] sm:$0xff]   ;;  %17855 = vmatpush3.bf16.msra.mxu0 %v20662_v59 }
  0xd2   : > { %v546_v8 = vld [vmem:[%s21554_s29 + $0x40] sm:$0xf]  ;;  %v697_v11 = vor.u32 %v695_v55, %v694_v0  ;;  %v699_v12 = vrot.slane %v694_v0, 4  ;;  %449 = vst [vmem:[#allocation2 + $0x6c] sm:$0x1] %v448_v6  ;;  %v504_v14 = vsel %vm21574_vm4, 0, %v503_v7  ;;  %17823 = vmatmul.mubr.bf16.gmra.mrb[8].mxu0 %v21698_v10  ;;  %17856 = vmatprep.subr.bf16.mxu0 %v20665_v9 }
  0xd3   : > { %v936_v13 = vld [vmem:[#allocation2 + $0x60] sm:$0xf]  ;;  %v547_v15 = vld [vmem:[%s21554_s29 + $0x44] sm:$0xf]  ;;  %v701_v16 = vshrl.u32 %v546_v8, 16  ;;  %v704_v21 = vshll.u32 %v546_v8, 16 }
  0xd4   : > { %v698_v17 = vsel %vm21592_vm7, %v690_v3, %v697_v11  ;;  %v937_v18 = vsel %vm21598_vm8, %v689_v2, %v936_v13  ;;  %v940_v19 = vld [vmem:[#allocation2 + $0x68] sm:$0x1]  ;;  %505 = vst [vmem:[#allocation2 + $0x74] sm:$0x1] %v504_v14  ;;  %v709_v22 = vshrl.u32 %v547_v15, 16  ;;  %v712_v26 = vshll.u32 %v547_v15, 16 }
  0xd5   : > { %v450_v23 = vld [vmem:[#allocation2 + $0x78] sm:$0x1]  ;;  %938 = vst [vmem:[#allocation2 + $0x60] sm:$0xf] %v937_v18  ;;  %939 = vst [vmem:[#allocation2 + $0x64] sm:$0xf] %v698_v17  ;;  %v941_v24 = vsel %vm21569_vm2, %v699_v12, %v940_v19  ;;  %17857 = vmatpush3.bf16.msra.mxu0 %v20665_v9 }
  0xd6   : > { %v703_v25 = vrot.slane %v701_v16, 7  ;;  %v451_v27 = vsel %vm21569_vm2, 0, %v450_v23  ;;  %v506_v29 = vld [vmem:[#allocation2 + $0x80] sm:$0x1]  ;;  %942 = vst [vmem:[#allocation2 + $0x68] sm:$0x1] %v941_v24 }
  0xd7   : > { %v711_v30 = vrot.slane %v709_v22, 7  ;;  %452 = vst [vmem:[#allocation2 + $0x78] sm:$0x1] %v451_v27  ;;  %v507_v31 = vsel %vm21574_vm4, 0, %v506_v29  ;;  %v548_v32 = vld [vmem:[%s21554_s29 + $0x48] sm:$0xf] }
  0xd8   : > { %v549_v34 = vld [vmem:[%s21554_s29 + $0x4c] sm:$0xf]  ;;  %v706_v35 = vor.u32 %v704_v21, %v703_v25  ;;  %v707_v36 = vrot.slane %v703_v25, 4  ;;  %508 = vst [vmem:[#allocation2 + $0x80] sm:$0x1] %v507_v31  ;;  %v718_v37 = vshrl.u32 %v548_v32, 16 }
  0xd9   : > { %v721_v39 = vshll.u32 %v548_v32, 16  ;;  %v20668_v40 = vld [vmem:[#allocation6 + $0x30] sm:$0xff]   ;;  %v21716_v41 = vld [vmem:[#allocation2 + $0x54] sm:$0xff]   ;;  %v714_v43 = vor.u32 %v712_v26, %v711_v30  ;;  %v716_v44 = vrot.slane %v711_v30, 4  ;;  %v726_v47 = vshrl.u32 %v549_v34, 16  ;;  %s16154_s18 = sshll.u32 %s21550_s30, 4 }
  0xda   : > { %v943_v45 = vld [vmem:[#allocation2 + $0x6c] sm:$0xf]  ;;  %v720_v46 = vrot.slane %v718_v37, 7  ;;  %v729_v48 = vshll.u32 %v549_v34, 16  ;;  %17826 = vmatprep.mubr.bf16.mxu0 %v21716_v41  ;;  %v453_v52 = vld [vmem:[#allocation2 + $0x84] sm:$0x1]  ;;  %17858 = vmatprep.subr.bf16.mxu0 %v20668_v40 }
  0xdb   : > { %v715_v49 = vsel %vm21592_vm7, %v707_v36, %v714_v43  ;;  %v944_v50 = vsel %vm21598_vm8, %v706_v35, %v943_v45  ;;  %v509_v53 = vld [vmem:[#allocation2 + $0x8c] sm:$0x1]  ;;  %v947_v54 = vld [vmem:[#allocation2 + $0x74] sm:$0x1]  ;;  %v728_v57 = vrot.slane %v726_v47, 7  ;;  %v454_v58 = vsel %vm21569_vm2, 0, %v453_v52  ;;  %17859 = vmatpush3.bf16.msra.mxu0 %v20668_v40 }
  0xdc   : > { %945 = vst [vmem:[#allocation2 + $0x6c] sm:$0xf] %v944_v50  ;;  %946 = vst [vmem:[#allocation2 + $0x70] sm:$0xf] %v715_v49  ;;  %v723_v55 = vor.u32 %v721_v39, %v720_v46  ;;  %v724_v56 = vrot.slane %v720_v46, 4  ;;  %v20671_v59 = vld [vmem:[#allocation6 + $0x38] sm:$0xff]   ;;  %v948_v61 = vsel %vm21569_vm2, %v716_v44, %v947_v54 }
  0xdd   : > { %v21725_v60 = vld [vmem:[#allocation2 + $0x60] sm:$0xff]   ;;  %455 = vst [vmem:[#allocation2 + $0x84] sm:$0x1] %v454_v58  ;;  %v510_v63 = vsel %vm21574_vm4, 0, %v509_v53  ;;  %949 = vst [vmem:[#allocation2 + $0x74] sm:$0x1] %v948_v61  ;;  %v731_v0 = vor.u32 %v729_v48, %v728_v57  ;;  %17860 = vmatprep.subr.bf16.mxu0 %v20671_v59 }
  0xde   : > { %v733_v1 = vrot.slane %v728_v57, 4  ;;  %v950_v2 = vld [vmem:[#allocation2 + $0x78] sm:$0xf]  ;;  %511 = vst [vmem:[#allocation2 + $0x8c] sm:$0x1] %v510_v63  ;;  %17827 = vmatmul.mubr.bf16.gmra.mrb[12].mxu0 %v21725_v60  ;;  %vm3254_vm13 = vcmask 1046532  }
  0xdf   : > { %v550_v3 = vld [vmem:[%s21554_s29 + $0x50] sm:$0xf]  ;;  %v951_v6 = vsel %vm21598_vm8, %v723_v55, %v950_v2  ;;  %v954_v7 = vld [vmem:[#allocation2 + $0x80] sm:$0x1]  ;;  %v551_v8 = vld [vmem:[%s21554_s29 + $0x54] sm:$0xf]  ;;  %v732_v12 = vsel %vm21592_vm7, %v724_v56, %v731_v0  ;;  %17861 = vmatpush3.bf16.msra.mxu0 %v20671_v59 }
  0xe0   : > { %v735_v9 = vshrl.u32 %v550_v3, 16  ;;  %v738_v11 = vshll.u32 %v550_v3, 16  ;;  %952 = vst [vmem:[#allocation2 + $0x78] sm:$0xf] %v951_v6  ;;  %v955_v13 = vsel %vm21569_vm2, %v733_v1, %v954_v7  ;;  %v743_v14 = vshrl.u32 %v551_v8, 16  ;;  %v21745_v23 = vld [vmem:[#allocation6 + $0x180] sm:$0xff]   ;;  %vm22237_vm14 = vmor %vm3253_vm12, %vm3254_vm13 }
  0xe1   : > { %v746_v15 = vshll.u32 %v551_v8, 16  ;;  %v456_v16 = vld [vmem:[#allocation2 + $0x90] sm:$0x1]  ;;  %v512_v17 = vld [vmem:[#allocation2 + $0x98] sm:$0x1]  ;;  %17894 = vmatprep.subr.bf16.mxu0 %v21745_v23  ;;  %s408_s16 = scalar_lea.vmem [#allocation12], %s16154_s18 }
  0xe2   : > { %953 = vst [vmem:[#allocation2 + $0x7c] sm:$0xf] %v732_v12  ;;  %956 = vst [vmem:[#allocation2 + $0x80] sm:$0x1] %v955_v13  ;;  %v737_v18 = vrot.slane %v735_v9, 7  ;;  %v457_v19 = vsel %vm21569_vm2, 0, %v456_v16 }
  0xe3   : > { %v513_v21 = vsel %vm21574_vm4, 0, %v512_v17  ;;  %v552_v22 = vld [vmem:[%s21554_s29 + $0x58] sm:$0xf]  ;;  %v745_v24 = vrot.slane %v743_v14, 7  ;;  %458 = vst [vmem:[#allocation2 + $0x90] sm:$0x1] %v457_v19 }
  0xe4   : > { %514 = vst [vmem:[#allocation2 + $0x98] sm:$0x1] %v513_v21  ;;  %v553_v25 = vld [vmem:[%s21554_s29 + $0x5c] sm:$0xf]  ;;  %v752_v26 = vshrl.u32 %v552_v22, 16  ;;  %v755_v27 = vshll.u32 %v552_v22, 16  ;;  %v740_v30 = vor.u32 %v738_v11, %v737_v18 }
  0xe5   : > { %v21748_v29 = vld [vmem:[#allocation2 + $0x6c] sm:$0xff]   ;;  %v741_v31 = vrot.slane %v737_v18, 4  ;;  %v748_v32 = vor.u32 %v746_v15, %v745_v24  ;;  %v750_v34 = vrot.slane %v745_v24, 4  ;;  %v957_v35 = vld [vmem:[#allocation2 + $0x84] sm:$0xf]  ;;  %v760_v37 = vshrl.u32 %v553_v25, 16 }
  0xe6   : > { %v754_v36 = vrot.slane %v752_v26, 7  ;;  %17830 = vmatprep.mubr.bf16.mxu0 %v21748_v29  ;;  %v958_v39 = vsel %vm21598_vm8, %v740_v30, %v957_v35  ;;  %v961_v40 = vld [vmem:[#allocation2 + $0x8c] sm:$0x1]  ;;  %v763_v43 = vshll.u32 %v553_v25, 16  ;;  %v459_v48 = vld [vmem:[#allocation2 + $0x9c] sm:$0x1] }
  0xe7   : > { %v749_v44 = vsel %vm21592_vm7, %v741_v31, %v748_v32  ;;  %959 = vst [vmem:[#allocation2 + $0x84] sm:$0xf] %v958_v39  ;;  %v962_v45 = vsel %vm21569_vm2, %v750_v34, %v961_v40  ;;  %v762_v49 = vrot.slane %v760_v37, 7  ;;  %v460_v50 = vsel %vm21569_vm2, 0, %v459_v48  ;;  %v515_v52 = vld [vmem:[#allocation2 + $0xa4] sm:$0x1] }
  0xe8   : > { %v757_v46 = vor.u32 %v755_v27, %v754_v36  ;;  %v758_v47 = vrot.slane %v754_v36, 4  ;;  %960 = vst [vmem:[#allocation2 + $0x88] sm:$0xf] %v749_v44  ;;  %963 = vst [vmem:[#allocation2 + $0x8c] sm:$0x1] %v962_v45  ;;  %v516_v54 = vsel %vm21574_vm4, 0, %v515_v52 }
  0xe9   : > { %v21760_v53 = vld [vmem:[#allocation2 + $0x78] sm:$0xff]   ;;  %461 = vst [vmem:[#allocation2 + $0x9c] sm:$0x1] %v460_v50  ;;  %v765_v56 = vor.u32 %v763_v43, %v762_v49  ;;  %v767_v57 = vrot.slane %v762_v49, 4  ;;  %517 = vst [vmem:[#allocation2 + $0xa4] sm:$0x1] %v516_v54 }
  0xea   : > { %v554_v55 = vld [vmem:[%s21554_s29 + $0x60] sm:$0xf]  ;;  %v964_v58 = vld [vmem:[#allocation2 + $0x90] sm:$0xf]  ;;  %17831 = vmatmul.mubr.bf16.gmra.mrb[16].mxu0 %v21760_v53  ;;  %v555_v0 = vld [vmem:[%s21554_s29 + $0x64] sm:$0xf] }
  0xeb   : > { %v968_v59 = vld [vmem:[#allocation2 + $0x98] sm:$0x1]  ;;  %v769_v61 = vshrl.u32 %v554_v55, 16  ;;  %v965_v63 = vsel %vm21598_vm8, %v757_v46, %v964_v58  ;;  %v772_v1 = vshll.u32 %v554_v55, 16  ;;  %v462_v2 = vld [vmem:[#allocation2 + $0xa8] sm:$0x1]  ;;  %v766_v3 = vsel %vm21592_vm7, %v758_v47, %v765_v56 }
  0xec   : > { %966 = vst [vmem:[#allocation2 + $0x90] sm:$0xf] %v965_v63  ;;  %v969_v6 = vsel %vm21569_vm2, %v767_v57, %v968_v59  ;;  %v777_v8 = vshrl.u32 %v555_v0, 16  ;;  %v518_v9 = vld [vmem:[#allocation2 + $0xb0] sm:$0x1]  ;;  %v780_v12 = vshll.u32 %v555_v0, 16 }
  0xed   : > { %v771_v7 = vrot.slane %v769_v61, 7  ;;  %v556_v11 = vld [vmem:[%s21554_s29 + $0x68] sm:$0xf]  ;;  %967 = vst [vmem:[#allocation2 + $0x94] sm:$0xf] %v766_v3  ;;  %v463_v13 = vsel %vm21569_vm2, 0, %v462_v2 }
  0xee   : > { %970 = vst [vmem:[#allocation2 + $0x98] sm:$0x1] %v969_v6  ;;  %v519_v14 = vsel %vm21574_vm4, 0, %v518_v9  ;;  %v557_v15 = vld [vmem:[%s21554_s29 + $0x6c] sm:$0xf]  ;;  %v786_v16 = vshrl.u32 %v556_v11, 16 }
  0xef   : > { %v774_v17 = vor.u32 %v772_v1, %v771_v7  ;;  %v775_v18 = vrot.slane %v771_v7, 4  ;;  %v779_v19 = vrot.slane %v777_v8, 7  ;;  %464 = vst [vmem:[#allocation2 + $0xa8] sm:$0x1] %v463_v13  ;;  %520 = vst [vmem:[#allocation2 + $0xb0] sm:$0x1] %v519_v14 }
  0xf0   : > { %v789_v21 = vshll.u32 %v556_v11, 16  ;;  %v21779_v22 = vld [vmem:[#allocation2 + $0x84] sm:$0xff]   ;;  %v788_v24 = vrot.slane %v786_v16, 7  ;;  %v794_v25 = vshrl.u32 %v557_v15, 16  ;;  %v797_v26 = vshll.u32 %v557_v15, 16  ;;  %s16030_s23 = sshll.u32 %s408_s16, 4  ;;  %s24890_s23 = int_to_ptr.vmem [resolvable:$true] %s16030_s23 }
  0xf1   : > { %v782_v27 = vor.u32 %v780_v12, %v779_v19  ;;  %v784_v30 = vrot.slane %v779_v19, 4  ;;  %v971_v31 = vld [vmem:[#allocation2 + $0x9c] sm:$0xf]  ;;  %17834 = vmatprep.mubr.bf16.mxu0 %v21779_v22  ;;  %v975_v34 = vld [vmem:[#allocation2 + $0xa4] sm:$0x1]  ;;  %s16933_s21 = sshll.u32 %s21345_s13, 8 }
  0xf2   : > { %v972_v32 = vsel %vm21598_vm8, %v774_v17, %v971_v31  ;;  %v792_v35 = vrot.slane %v788_v24, 4  ;;  %v796_v36 = vrot.slane %v794_v25, 7  ;;  %v791_v40 = vor.u32 %v789_v21, %v788_v24  ;;  %v465_v43 = vld [vmem:[#allocation2 + $0xb4] sm:$0x1]  ;;  %v521_v44 = vld [vmem:[#allocation2 + $0xbc] sm:$0x1] }
  0xf3   : > { %v783_v37 = vsel %vm21592_vm7, %v775_v18, %v782_v27  ;;  %973 = vst [vmem:[#allocation2 + $0x9c] sm:$0xf] %v972_v32  ;;  %v976_v39 = vsel %vm21569_vm2, %v784_v30, %v975_v34  ;;  %v558_v45 = vld [vmem:[%s21554_s29 + $0x70] sm:$0xf]  ;;  %v466_v48 = vsel %vm21569_vm2, 0, %v465_v43  ;;  %v522_v49 = vsel %vm21574_vm4, 0, %v521_v44 }
  0xf4   : > { %974 = vst [vmem:[#allocation2 + $0xa0] sm:$0xf] %v783_v37  ;;  %977 = vst [vmem:[#allocation2 + $0xa4] sm:$0x1] %v976_v39  ;;  %v799_v46 = vor.u32 %v797_v26, %v796_v36  ;;  %v801_v47 = vrot.slane %v796_v36, 4  ;;  %v21793_v50 = vld [vmem:[#allocation2 + $0x90] sm:$0xff]  }
  0xf5   : > { %467 = vst [vmem:[#allocation2 + $0xb4] sm:$0x1] %v466_v48  ;;  %523 = vst [vmem:[#allocation2 + $0xbc] sm:$0x1] %v522_v49  ;;  %v559_v52 = vld [vmem:[%s21554_s29 + $0x74] sm:$0xf]  ;;  %17835 = vmatmul.mubr.bf16.gmra.mrb[20].mxu0 %v21793_v50 }
  0xf6   : > { %v803_v54 = vshrl.u32 %v558_v45, 16  ;;  %v800_v55 = vsel %vm21592_vm7, %v792_v35, %v799_v46  ;;  %v978_v56 = vld [vmem:[#allocation2 + $0xa8] sm:$0xf]  ;;  %v982_v57 = vld [vmem:[#allocation2 + $0xb0] sm:$0x1]  ;;  %v806_v58 = vshll.u32 %v558_v45, 16 }
  0xf7   : > { %v811_v59 = vshrl.u32 %v559_v52, 16  ;;  %v979_v61 = vsel %vm21598_vm8, %v791_v40, %v978_v56  ;;  %981 = vst [vmem:[#allocation2 + $0xac] sm:$0xf] %v800_v55  ;;  %v983_v63 = vsel %vm21569_vm2, %v801_v47, %v982_v57  ;;  %v814_v1 = vshll.u32 %v559_v52, 16  ;;  %v468_v2 = vld [vmem:[#allocation2 + $0xc0] sm:$0x1] }
  0xf8   : > { %v805_v0 = vrot.slane %v803_v54, 7  ;;  %v524_v3 = vld [vmem:[#allocation2 + $0xc8] sm:$0x1]  ;;  %980 = vst [vmem:[#allocation2 + $0xa8] sm:$0xf] %v979_v61  ;;  %v469_v7 = vsel %vm21569_vm2, 0, %v468_v2 }
  0xf9   : > { %984 = vst [vmem:[#allocation2 + $0xb0] sm:$0x1] %v983_v63  ;;  %v813_v6 = vrot.slane %v811_v59, 7  ;;  %v525_v8 = vsel %vm21574_vm4, 0, %v524_v3  ;;  %v560_v9 = vld [vmem:[%s21554_s29 + $0x78] sm:$0xf] }
  0xfa   : > { %v808_v11 = vor.u32 %v806_v58, %v805_v0  ;;  %v809_v12 = vrot.slane %v805_v0, 4  ;;  %470 = vst [vmem:[#allocation2 + $0xc0] sm:$0x1] %v469_v7  ;;  %526 = vst [vmem:[#allocation2 + $0xc8] sm:$0x1] %v525_v8  ;;  %v820_v14 = vshrl.u32 %v560_v9, 16 }
  0xfb   : > { %v561_v13 = vld [vmem:[%s21554_s29 + $0x7c] sm:$0xf]  ;;  %v823_v15 = vshll.u32 %v560_v9, 16  ;;  %v816_v16 = vor.u32 %v814_v1, %v813_v6  ;;  %v818_v17 = vrot.slane %v813_v6, 4  ;;  %v21809_v21 = vld [vmem:[#allocation2 + $0x9c] sm:$0xff]   ;;  %v20675_v61 = vld [vmem:[#allocation6 + $0x190] sm:$0xff]  }
  0xfc   : > { %v828_v18 = vshrl.u32 %v561_v13, 16  ;;  %v831_v19 = vshll.u32 %v561_v13, 16  ;;  %v822_v24 = vrot.slane %v820_v14, 7  ;;  %v985_v26 = vld [vmem:[#allocation2 + $0xb4] sm:$0xf]  ;;  %17838 = vmatprep.mubr.bf16.mxu0 %v21809_v21  ;;  %v20674_v59 = vld [vmem:[#allocation6 + $0x188] sm:$0xff]  }
  0xfd   : > { %v817_v25 = vsel %vm21592_vm7, %v809_v12, %v816_v16  ;;  %v989_v27 = vld [vmem:[#allocation2 + $0xbc] sm:$0x1]  ;;  %v986_v31 = vsel %vm21598_vm8, %v808_v11, %v985_v26  ;;  %v420_v36 = vld [vmem:[#allocation2] sm:$0x1]  ;;  %v471_v55 = vld [vmem:[#allocation2 + $0xcc] sm:$0x1] }
  0xfe   : > { %v830_v30 = vrot.slane %v828_v18, 7  ;;  %988 = vst [vmem:[#allocation2 + $0xb8] sm:$0xf] %v817_v25  ;;  %v990_v32 = vsel %vm21569_vm2, %v818_v17, %v989_v27  ;;  %v825_v34 = vor.u32 %v823_v15, %v822_v24  ;;  %v826_v35 = vrot.slane %v822_v24, 4  ;;  %987 = vst [vmem:[#allocation2 + $0xb4] sm:$0xf] %v986_v31 }
  0xff   : > { %991 = vst [vmem:[#allocation2 + $0xbc] sm:$0x1] %v990_v32  ;;  %v421_v40 = vsel %vm21569_vm2, 0, %v420_v36  ;;  %v21820_v43 = vld [vmem:[#allocation2 + $0xa8] sm:$0xff]   ;;  %v472_v56 = vsel %vm21569_vm2, 0, %v471_v55  ;;  %v20676_v63 = vld [vmem:[#allocation6 + $0x198] sm:$0xff]  }
 0x100   : > { %v833_v37 = vor.u32 %v831_v19, %v830_v30  ;;  %v835_v39 = vrot.slane %v830_v30, 4  ;;  %422 = vst [vmem:[#allocation2] sm:$0x1] %v421_v40  ;;  %17839 = vmatmul.mubr.bf16.gmra.mrb[24].mxu0 %v21820_v43  ;;  %473 = vst [vmem:[#allocation2 + $0xcc] sm:$0x1] %v472_v56  ;;  %v20677_v0 = vld [vmem:[#allocation6 + $0x1a0] sm:$0xff]  }
 0x101   : > { %v992_v45 = vld [vmem:[#allocation2 + $0xc0] sm:$0xf]  ;;  %v996_v46 = vld [vmem:[#allocation2 + $0xc8] sm:$0x1]  ;;  %v1853_v2 = vld [vmem:[#allocation2 + $0x4] sm:$0xf] }
 0x102   : > { %v834_v44 = vsel %vm21592_vm7, %v826_v35, %v833_v37  ;;  %v993_v47 = vsel %vm21598_vm8, %v825_v34, %v992_v45  ;;  %v997_v48 = vsel %vm21569_vm2, %v835_v39, %v996_v46  ;;  %v476_v57 = vld [vmem:[#allocation2 + $0x8] sm:$0x1]  ;;  %v1856_v3 = vld [vmem:[#allocation2 + $0x10] sm:$0xf]  ;;  %v1858_v7 = vld [vmem:[#allocation2 + $0x18] sm:$0xf] }
 0x103   : > { %995 = vst [vmem:[#allocation2 + $0xc4] sm:$0xf] %v834_v44  ;;  %994 = vst [vmem:[#allocation2 + $0xc0] sm:$0xf] %v993_v47  ;;  %v477_v58 = vsel %vm21574_vm4, 0, %v476_v57  ;;  %v1919_v8 = vshll.u32 %v1853_v2, 16 }
 0x104   : > { %998 = vst [vmem:[#allocation2 + $0xc8] sm:$0x1] %v997_v48  ;;  %478 = vst [vmem:[#allocation2 + $0x8] sm:$0x1] %v477_v58  ;;  %v1923_v9 = vshrl.u32 %v1853_v2, 16  ;;  %v1947_v12 = vshrl.u32 %v1856_v3, 16 }
 0x105   : > { %v21829_v49 = vld [vmem:[#allocation2 + $0xb4] sm:$0xff]   ;;  %v20679_v13 = vld [vmem:[#allocation6 + $0x1b0] sm:$0xff]   ;;  %v1859_v14 = vld [vmem:[#allocation2 + $0x1c] sm:$0xf]  ;;  %v1958_v15 = vshrl.u32 %v1858_v7, 16  ;;  %v1961_v16 = vshll.u32 %v1858_v7, 16 }
 0x106   : > { %17842 = vmatprep.mubr.bf16.mxu0 %v21829_v49  ;;  %v1857_v19 = vld [vmem:[#allocation2 + $0x14] sm:$0x1]  ;;  %v21843_v24 = vrot.slane %v1919_v8, 5  ;;  %v1967_v30 = vshll.u32 %v1859_v14, 16  ;;  %v1971_v31 = vshrl.u32 %v1859_v14, 16  ;;  %v21853_v56 = vld [vmem:[#allocation6 + $0x40] sm:$0xff]  }
 0x107   : > { %v20672_v52 = vld [vmem:[#allocation2] sm:$0xff]   ;;  %v20680_v32 = vld [vmem:[#allocation6 + $0x1b8] sm:$0xff]   ;;  %v1960_v35 = vrot.slane %v1958_v15, 4  ;;  %v1963_v36 = vrot.slane %v1961_v16, 5  ;;  %v1953_v39 = vshll.u32 %v1857_v19, 16  ;;  %s25153_s15 = sld [smem:[#allocation38_spill]] }
 0x108   : > { %v1852_v1 = vld [vmem:[#allocation2] sm:$0xf]  ;;  %v1861_v44 = vld [vmem:[#allocation2 + $0x24] sm:$0xf]  ;;  %v1862_v55 = vld [vmem:[#allocation2 + $0x28] sm:$0xf] }
 0x109   : > { %v1913_v6 = vshll.u32 %v1852_v1, 16  ;;  %v1860_v40 = vld [vmem:[#allocation2 + $0x20] sm:$0x1]  ;;  %v1964_v57 = vor.u32 %v1963_v36, %v1960_v35  ;;  %v1995_v2 = vshrl.u32 %v1862_v55, 16  ;;  %v1865_v7 = vld [vmem:[#allocation2 + $0x34] sm:$0xf] }
 0x10a   : > { %v20670_v54 = vld [vmem:[#allocation2 + $0xc0] sm:$0xff]   ;;  %v1977_v58 = vshll.u32 %v1860_v40, 16  ;;  %v2019_v19 = vshrl.u32 %v1865_v7, 16  ;;  %v1871_v35 = vld [vmem:[#allocation2 + $0x4c] sm:$0xf]  ;;  %s16016_s25 = scalar_lea.sflag [#allocation5], %s21550_s30 }
 0x10b   : > { %17843 = vmatmul.mubr.bf16.gmra.mrb[28].mxu0 %v20670_v54  ;;  %v1915_v18 = vrot.slane %v1913_v6, 5  ;;  %v1854_v34 = vld [vmem:[#allocation2 + $0x8] sm:$0x1]  ;;  %v1973_v54 = vrot.slane %v1971_v31, 4  ;;  %v1863_v6 = vld [vmem:[#allocation2 + $0x2c] sm:$0x1] }
 0x10c   : > { %17862 = vmatprep.mubr.bf16.mxu0 %v20672_v52  ;;  %v1929_v47 = vshll.u32 %v1854_v34, 16  ;;  %v21851_v52 = vrot.slane %v1967_v30, 5  ;;  %v21869_v8 = vrot.slane %v1964_v57, 4  ;;  %v1868_v15 = vld [vmem:[#allocation2 + $0x40] sm:$0xf]  ;;  %s21189_s26 = scalar_lea.vmem %s24890_s23, 256 }
 0x10d   : > { %v2043_v34 = vshrl.u32 %v1868_v15, 16  ;;  %v1884_v4 = vld [vmem:[#allocation2 + $0x80] sm:$0x1]  ;;  %vm1906_vm9 = vsmask.f32 3328  ;;  %s24895_s17 = scalar_lea.hbm %s25153_s15, %s16933_s21  ;;  %p21190_p3 = scmp.ne.s32.totalorder %s24890_s23, %s21189_s26 }
 0x10e   : > { %vm1907_vm10 = vsmask.f32 7440  ;;  %s21273_s19 = smov [#allocation12]  }
 0x10f   : > { %vm21986_vm11 = vmor %vm1906_vm9, %vm1907_vm10  ;;  %p21191_p5 = pnand %p21190_p3, %p21495_p10  ;;  %s21193_s13 = sshll.u32 %s21273_s19, 4  ;;  %s21194_s13 = int_to_ptr.vmem [resolvable:$false] %s21193_s13 }
 0x110   : > { %s21195_s22 = scalar_lea.vmem %s21194_s13, 512  ;;  %p21196_p12 = scmp.lt.s32.totalorder %s24890_s23, %s21194_s13 }
 0x111   : > { %p21192_p7 = pneg %p21191_p5  ;;  %p21197_p1 = scmp.lt.s32.totalorder %s21195_s22, %s21189_s26 }
 0x113   : > { %17863 = vmatmul.mubr.bf16.vlgmr.msra.gmra.mrb[0].mxu0 %v21635_v33  ;;  %v1855_v33 = vld [vmem:[#allocation2 + $0xc] sm:$0xf]  ;;  %p21198_p2 = por %p21197_p1, %p21196_p12 }
 0x114   : > { %17895 = vmatpush3.bf16.msra.mxu0 %v21745_v23  ;;  %17866 = vmatprep.mubr.bf16.mxu0 %v21641_v42  ;;  %v20678_v23 = vld [vmem:[#allocation6 + $0x1a8] sm:$0xff]   ;;  %v1910_v42 = vshrl.u32 %v1852_v1, 16  ;;  %v1937_v11 = vshll.u32 %v1855_v33, 16  ;;  %v1991_v1 = vshll.u32 %v1862_v55, 16 }
 0x115   : > { %17896 = vmatprep.subr.bf16.mxu0 %v20674_v59  ;;  %p21199_p13 = pnand %p21198_p2, %p21192_p7 }
 0x116   : > { %v1912_v17 = vrot.slane %v1910_v42, 4  ;;  %v1939_v26 = vrot.slane %v1937_v11, 5  ;;  %v1974_v42 = vor.u32 %v1973_v54, %v21851_v52  ;;  %v21874_v16 = vrot.slane %v1991_v1, 5 }
 0x117   : > { %v2067_v54 = vshrl.u32 %v1871_v35, 16 }
 0x118   : > { %17897 = vmatpush3.bf16.msra.mxu0 %v20674_v59  ;;  %v1916_v37 = vor.u32 %v1915_v18, %v1912_v17  ;;  %v1982_v59 = vshrl.u32 %v1861_v44, 16  ;;  %v1997_v17 = vrot.slane %v1995_v2, 4  ;;  %v2015_v18 = vshll.u32 %v1865_v7, 16 }
 0x119   : > { %17898 = vmatprep.subr.bf16.mxu0 %v20675_v61 }
 0x11a   : > { %v1998_v40 = vor.u32 %v1997_v17, %v21874_v16 }
 0x11b   : > { %17867 = vmatmul.mubr.bf16.gmra.mrb[4].mxu0 %v21655_v62  ;;  %v1934_v62 = vshrl.u32 %v1855_v33, 16  ;;  %v1864_v33 = vld [vmem:[#allocation2 + $0x30] sm:$0xf] }
 0x11c   : > { %17870 = vmatprep.mubr.bf16.mxu0 %v21669_v20  ;;  %17899 = vmatpush3.bf16.msra.mxu0 %v20675_v61  ;;  %v1943_v20 = vshll.u32 %v1856_v3, 16  ;;  %v21855_v61 = vrot.slane %v1916_v37, 4  ;;  %v2009_v14 = vshll.u32 %v1864_v33, 16 }
 0x11d   : > { %17900 = vmatprep.subr.bf16.mxu0 %v20676_v63  ;;  %v1936_v25 = vrot.slane %v1934_v62, 4  ;;  %v1984_v62 = vrot.slane %v1982_v59, 4  ;;  %v2045_v59 = vrot.slane %v2043_v34, 4  ;;  %v1877_v34 = vld [vmem:[#allocation2 + $0x64] sm:$0xf] }
 0x11e   : > { %v21845_v27 = vrot.slane %v1943_v20, 5  ;;  %v1867_v20 = vld [vmem:[#allocation2 + $0x3c] sm:$0xf]  ;;  %v2011_v37 = vrot.slane %v2009_v14, 5  ;;  %v2069_v14 = vrot.slane %v2067_v54, 4 }
 0x11f   : > { %v1940_v46 = vor.u32 %v1939_v26, %v1936_v25  ;;  %v21877_v25 = vrot.slane %v1974_v42, 4  ;;  %v2001_v26 = vshll.u32 %v1863_v6, 16  ;;  %v2033_v30 = vshll.u32 %v1867_v20, 16 }
 0x120   : > { %17901 = vmatpush3.bf16.msra.mxu0 %v20676_v63  ;;  %v21857_v63 = vrot.slane %v1953_v39, 5  ;;  %v21887_v6 = vrot.slane %v1998_v40, 4 }
 0x121   : > { %17902 = vmatprep.subr.bf16.mxu0 %v20677_v0  ;;  %v2035_v57 = vrot.slane %v2033_v30, 5  ;;  %v21889_v7 = vrot.slane %v2001_v26, 5 }
 0x123   : > { %17871 = vmatmul.mubr.bf16.gmra.mrb[8].mxu0 %v21686_v51  ;;  %v1925_v51 = vrot.slane %v1923_v9, 4  ;;  %v21871_v9 = vrot.slane %v1977_v58, 5 }
 0x124   : > { %17874 = vmatprep.mubr.bf16.mxu0 %v21698_v10  ;;  %17903 = vmatpush3.bf16.msra.mxu0 %v20677_v0  ;;  %v1949_v10 = vrot.slane %v1947_v12, 4  ;;  %v21861_v0 = vrot.slane %v1940_v46, 4  ;;  %v1866_v12 = vld [vmem:[#allocation2 + $0x38] sm:$0x1] }
 0x125   : > { %17904 = vmatprep.subr.bf16.mxu0 %v20678_v23  ;;  %v1926_v45 = vor.u32 %v1925_v51, %v21843_v24  ;;  %v1870_v51 = vld [vmem:[#allocation2 + $0x48] sm:$0xf]  ;;  %v2025_v46 = vshll.u32 %v1866_v12, 16 }
 0x126   : > { %v1950_v48 = vor.u32 %v1949_v10, %v21845_v27  ;;  %v2030_v10 = vshrl.u32 %v1867_v20, 16  ;;  %v2057_v39 = vshll.u32 %v1870_v51, 16 }
 0x127   : > { %v21893_v20 = vrot.slane %v2025_v46, 5 }
 0x128   : > { %17905 = vmatpush3.bf16.msra.mxu0 %v20678_v23  ;;  %v21863_v23 = vrot.slane %v1929_v47, 5  ;;  %v21865_v3 = vrot.slane %v1950_v48, 4  ;;  %v1872_v47 = vld [vmem:[#allocation2 + $0x50] sm:$0x1]  ;;  %v2063_v48 = vshll.u32 %v1871_v35, 16  ;;  %v2032_v55 = vrot.slane %v2030_v10, 4 }
 0x129   : > { %17906 = vmatprep.subr.bf16.mxu0 %v20679_v13  ;;  %v2059_v2 = vrot.slane %v2057_v39, 5  ;;  %v2073_v17 = vshll.u32 %v1872_v47, 16  ;;  %v1880_v39 = vld [vmem:[#allocation2 + $0x70] sm:$0xf] }
 0x12b   : > { %17875 = vmatmul.mubr.bf16.gmra.mrb[12].mxu0 %v21716_v41  ;;  %v1985_v41 = vshll.u32 %v1861_v44, 16  ;;  %v21880_v44 = vrot.slane %v2015_v18, 5  ;;  %v21909_v46 = vrot.slane %v2073_v17, 5  ;;  %v2139_v17 = vshrl.u32 %v1880_v39, 16 }
 0x12c   : > { %17878 = vmatprep.mubr.bf16.mxu0 %v21725_v60  ;;  %17907 = vmatpush3.bf16.msra.mxu0 %v20679_v13  ;;  %v21859_v60 = vrot.slane %v1926_v45, 4  ;;  %v2006_v13 = vshrl.u32 %v1864_v33, 16  ;;  %v2021_v45 = vrot.slane %v2019_v19, 4  ;;  %v1873_v33 = vld [vmem:[#allocation2 + $0x54] sm:$0xf] }
 0x12d   : > { %17908 = vmatprep.subr.bf16.mxu0 %v20680_v32  ;;  %v1987_v11 = vrot.slane %v1985_v41, 5  ;;  %v2078_v18 = vshrl.u32 %v1873_v33, 16  ;;  %v1876_v19 = vld [vmem:[#allocation2 + $0x60] sm:$0xf]  ;;  %v2081_v10 = vshll.u32 %v1873_v33, 16 }
 0x12e   : > { %v2008_v36 = vrot.slane %v2006_v13, 4  ;;  %v21895_v13 = vrot.slane %v2063_v48, 5  ;;  %v1882_v33 = vld [vmem:[#allocation2 + $0x78] sm:$0xf] }
 0x12f   : > { %v1988_v31 = vor.u32 %v1987_v11, %v1984_v62  ;;  %v2022_v62 = vor.u32 %v2021_v45, %v21880_v44  ;;  %v1874_v11 = vld [vmem:[#allocation2 + $0x58] sm:$0xf]  ;;  %v2083_v48 = vrot.slane %v2081_v10, 5  ;;  %v2153_v10 = vshll.u32 %v1882_v33, 16 }
 0x130   : > { %17909 = vmatpush3.bf16.msra.mxu0 %v20680_v32  ;;  %v2039_v32 = vshll.u32 %v1868_v15, 16  ;;  %v2012_v41 = vor.u32 %v2011_v37, %v2008_v36  ;;  %v2036_v15 = vor.u32 %v2035_v57, %v2032_v55  ;;  %v2087_v30 = vshll.u32 %v1874_v11, 16 }
 0x131   : > { %17942 = vmatprep.subr.bf16.mxu0 %v21853_v56  ;;  %v21885_v42 = vrot.slane %v1988_v31, 4  ;;  %v21900_v31 = vrot.slane %v2022_v62, 4  ;;  %v2070_v36 = vor.u32 %v2069_v14, %v21895_v13  ;;  %v2102_v37 = vshrl.u32 %v1876_v19, 16 }
 0x132   : > { %v21882_v58 = vrot.slane %v2039_v32, 5  ;;  %v2091_v32 = vshrl.u32 %v1874_v11, 16  ;;  %v21905_v40 = vrot.slane %v2036_v15, 4  ;;  %v21913_v54 = vrot.slane %v2087_v30, 5  ;;  %v1883_v15 = vld [vmem:[#allocation2 + $0x7c] sm:$0xf] }
 0x133   : > { %17879 = vmatmul.mubr.bf16.gmra.mrb[16].mxu0 %v21748_v29  ;;  %v2054_v29 = vshrl.u32 %v1870_v51, 16  ;;  %v21898_v51 = vrot.slane %v2012_v41, 4  ;;  %v2105_v41 = vshll.u32 %v1876_v19, 16  ;;  %v21917_v62 = vrot.slane %v2070_v36, 4 }
 0x134   : > { %17882 = vmatprep.mubr.bf16.mxu0 %v21760_v53  ;;  %v1869_v53 = vld [vmem:[#allocation2 + $0x44] sm:$0x1]  ;;  %v2093_v57 = vrot.slane %v2091_v32, 4  ;;  %v2104_v11 = vrot.slane %v2102_v37, 4  ;;  %v1881_v32 = vld [vmem:[#allocation2 + $0x74] sm:$0x1] }
 0x135   : > { %v2056_v1 = vrot.slane %v2054_v29, 4  ;;  %v2049_v12 = vshll.u32 %v1869_v53, 16  ;;  %v1879_v29 = vld [vmem:[#allocation2 + $0x6c] sm:$0xf]  ;;  %v2080_v53 = vrot.slane %v2078_v18, 4  ;;  %v2107_v30 = vrot.slane %v2105_v41, 5 }
 0x136   : > { %v2129_v14 = vshll.u32 %v1879_v29, 16  ;;  %v2159_v37 = vshll.u32 %v1883_v15, 16  ;;  %v2155_v38 = vrot.slane %v2153_v10, 5  ;;  %v1887_v10 = vld [vmem:[#allocation2 + $0x8c] sm:$0x1] }
 0x137   : > { %v2060_v26 = vor.u32 %v2059_v2, %v2056_v1  ;;  %v21902_v35 = vrot.slane %v2049_v12, 5  ;;  %v2111_v1 = vshll.u32 %v1877_v34, 16  ;;  %v2115_v2 = vshrl.u32 %v1877_v34, 16 }
 0x138   : > { %v2126_v12 = vshrl.u32 %v1879_v29, 16  ;;  %v2084_v18 = vor.u32 %v2083_v48, %v2080_v53  ;;  %v2131_v36 = vrot.slane %v2129_v14, 5  ;;  %v2163_v53 = vshrl.u32 %v1883_v15, 16  ;;  %v1885_v48 = vld [vmem:[#allocation2 + $0x84] sm:$0xf] }
 0x139   : > { %v21911_v47 = vrot.slane %v2060_v26, 4  ;;  %v2150_v26 = vshrl.u32 %v1882_v33, 16  ;;  %v21920_v19 = vrot.slane %v2111_v1, 5  ;;  %v21934_v15 = vrot.slane %v2159_v37, 5 }
 0x13a   : > { %v2177_v5 = vshll.u32 %v1885_v48, 16 }
 0x13b   : > { %17883 = vmatmul.mubr.bf16.gmra.mrb[20].mxu0 %v21779_v22  ;;  %v2046_v22 = vor.u32 %v2045_v59, %v21882_v58  ;;  %v1878_v59 = vld [vmem:[#allocation2 + $0x68] sm:$0x1]  ;;  %25037 = vst [vmem:[#allocation23_spill] sm:$0xff] %v21920_v19  ;;  %v2152_v33 = vrot.slane %v2150_v26, 4  ;;  %25038 = vst [vmem:[#allocation24_spill] sm:$0xff] %v21934_v15  ;;  %v2165_v26 = vrot.slane %v2163_v53, 4 }
 0x13c   : > { %17886 = vmatprep.mubr.bf16.mxu0 %v21793_v50  ;;  %v1875_v50 = vld [vmem:[#allocation2 + $0x5c] sm:$0x1]  ;;  %v2121_v34 = vshll.u32 %v1878_v59, 16  ;;  %v2108_v59 = vor.u32 %v2107_v30, %v2104_v11  ;;  %v1888_v30 = vld [vmem:[#allocation2 + $0x90] sm:$0xf] }
 0x13d   : > { %v21907_v45 = vrot.slane %v2046_v22, 4  ;;  %v2097_v55 = vshll.u32 %v1875_v50, 16  ;;  %v2135_v22 = vshll.u32 %v1880_v39, 16  ;;  %v2117_v50 = vrot.slane %v2115_v2, 4  ;;  %v1886_v2 = vld [vmem:[#allocation2 + $0x88] sm:$0xf] }
 0x13e   : > { %v2141_v39 = vrot.slane %v2139_v17, 4  ;;  %v2183_v11 = vshll.u32 %v1886_v2, 16 }
 0x13f   : > { %v21922_v28 = vrot.slane %v2097_v55, 5  ;;  %v21924_v29 = vrot.slane %v2135_v22, 5  ;;  %v2118_v1 = vor.u32 %v2117_v50, %v21920_v19  ;;  %v21932_v55 = vrot.slane %v2121_v34, 5  ;;  %v21941_v34 = vld [vmem:[#allocation2 + $0x94] sm:$0xf] }
 0x140   : > { %v2145_v22 = vshll.u32 %v1881_v32, 16  ;;  %v21937_v50 = vrot.slane %v2108_v59, 4  ;;  %v21954_v59 = vrot.slane %v2183_v11, 5 }
 0x141   : > { %v2142_v17 = vor.u32 %v2141_v39, %v21924_v29  ;;  %v21939_v19 = vrot.slane %v2118_v1, 4  ;;  %v2187_v39 = vshrl.u32 %v1886_v2, 16  ;;  %v21001_v1 = vld [vmem:[#allocation2 + $0x24] sm:$0xff]  }
 0x142   : > { %v21945_v32 = vrot.slane %v2145_v22, 5  ;;  %v2198_v22 = vshrl.u32 %v1888_v30, 16 }
 0x143   : > { %17887 = vmatmul.mubr.bf16.gmra.mrb[24].mxu0 %v21809_v21  ;;  %v2094_v21 = vor.u32 %v2093_v57, %v21913_v54  ;;  %v21927_v57 = vrot.slane %v2084_v18, 4  ;;  %v2156_v18 = vor.u32 %v2155_v38, %v2152_v33  ;;  %v21947_v37 = vrot.slane %v2142_v17, 4 }
 0x144   : > { %17890 = vmatprep.mubr.bf16.mxu0 %v21820_v43  ;;  %v2128_v43 = vrot.slane %v2126_v12, 4  ;;  %v21000_v12 = vld [vmem:[#allocation2 + $0x18] sm:$0xff]   ;;  %25039 = vst [vmem:[#allocation25_spill] sm:$0xff] %v21945_v32  ;;  %v2179_v33 = vrot.slane %v2177_v5, 5  ;;  %v2201_v32 = vshll.u32 %v1888_v30, 16  ;;  %v2207_v17 = vshll.u32 %v21941_v34, 16 }
 0x145   : > { %v21929_v41 = vrot.slane %v2094_v21, 4  ;;  %v2174_v21 = vshrl.u32 %v1885_v48, 16  ;;  %25040 = vst [vmem:[#allocation26_spill] sm:$0xff] %v21947_v37  ;;  %v21952_v53 = vrot.slane %v2156_v18, 4  ;;  %v20684_v5 = vld [vmem:[#allocation6 + $0x58] sm:$0xff]   ;;  %v21964_v11 = vrot.slane %v2198_v22, 4 }
 0x146   : > { %v2132_v14 = vor.u32 %v2131_v36, %v2128_v43  ;;  %v20682_v36 = vld [vmem:[#allocation6 + $0x48] sm:$0xff]   ;;  %v20685_v30 = vld [vmem:[#allocation6 + $0x60] sm:$0xff]  }
 0x147   : > { %25042 = vst [vmem:[#allocation28_spill] sm:$0xff] %v21952_v53  ;;  %v2176_v48 = vrot.slane %v2174_v21, 4  ;;  %v1890_v22 = vld [vmem:[#allocation2 + $0x98] sm:$0x1]  ;;  %v1896_v53 = vld [vmem:[#allocation2 + $0xb0] sm:$0x1] }
 0x148   : > { %v21943_v43 = vrot.slane %v2132_v14, 4  ;;  %v2193_v14 = vshll.u32 %v1887_v10, 16  ;;  %v21003_v10 = vld [vmem:[#allocation2 + $0x3c] sm:$0xff]  }
 0x149   : > { %v2180_v18 = vor.u32 %v2179_v33, %v2176_v48  ;;  %v20687_v48 = vld [vmem:[#allocation6 + $0x70] sm:$0xff]   ;;  %v21968_v33 = vrot.slane %v2207_v17, 5 }
 0x14a   : > { %v21962_v21 = vrot.slane %v2193_v14, 5  ;;  %v21006_v14 = vld [vmem:[#allocation2 + $0x60] sm:$0xff]  }
 0x14b   : > { %17891 = vmatmul.mubr.bf16.gmra.mrb[28].mxu0 %v21829_v49  ;;  %v2169_v49 = vshll.u32 %v1884_v4, 16  ;;  %v2166_v4 = vor.u32 %v2165_v26, %v21934_v15  ;;  %v21002_v26 = vld [vmem:[#allocation2 + $0x30] sm:$0xff]   ;;  %25046 = vst [vmem:[#allocation32_spill] sm:$0xff] %v21968_v33 }
 0x14c   : > { %17910 = vmatprep.mubr.bf16.mxu0 %v21000_v12  ;;  %v20683_v12 = vld [vmem:[#allocation6 + $0x50] sm:$0xff]   ;;  %25044 = vst [vmem:[#allocation30_spill] sm:$0xff] %v21962_v21 }
 0x14d   : > { %v21950_v38 = vrot.slane %v2169_v49, 5  ;;  %v21958_v2 = vrot.slane %v2166_v4, 4  ;;  %v21960_v49 = vrot.slane %v2187_v39, 4  ;;  %v20686_v4 = vld [vmem:[#allocation6 + $0x68] sm:$0xff]   ;;  %v21005_v39 = vld [vmem:[#allocation2 + $0x54] sm:$0xff]  }
 0x14e   : > { %v1894_v21 = vld [vmem:[#allocation2 + $0xa8] sm:$0xf] }
 0x14f   : > { %25041 = vst [vmem:[#allocation27_spill] sm:$0xff] %v21950_v38  ;;  %25043 = vst [vmem:[#allocation29_spill] sm:$0xff] %v21958_v2  ;;  %v2246_v15 = vshrl.u32 %v1894_v21, 16 }
 0x153   : > { %17911 = vmatmul.mubr.bf16.vlgmr.msra.gmra.mrb[0].mxu0 %v21001_v1  ;;  %v21966_v1 = vrot.slane %v2180_v18, 4  ;;  %v20689_v18 = vld [vmem:[#allocation6 + $0x78] sm:$0xff]  }
 0x154   : > { %17943 = vmatpush3.bf16.msra.mxu0 %v21853_v56  ;;  %17914 = vmatprep.mubr.bf16.mxu0 %v21002_v26  ;;  %v2203_v56 = vrot.slane %v2201_v32, 5  ;;  %v21004_v26 = vld [vmem:[#allocation2 + $0x48] sm:$0xff]   ;;  %v1891_v32 = vld [vmem:[#allocation2 + $0x9c] sm:$0xf] }
 0x155   : > { %17944 = vmatprep.subr.bf16.mxu0 %v20682_v36  ;;  %25045 = vst [vmem:[#allocation31_spill] sm:$0xff] %v21966_v1 }
 0x158   : > { %17945 = vmatpush3.bf16.msra.mxu0 %v20682_v36  ;;  %v2211_v36 = vshrl.u32 %v21941_v34, 16  ;;  %v21009_v34 = vld [vmem:[#allocation2 + $0x84] sm:$0xff]  }
 0x159   : > { %17946 = vmatprep.subr.bf16.mxu0 %v20683_v12 }
 0x15a   : > { %v2213_v17 = vrot.slane %v2211_v36, 4  ;;  %v1895_v36 = vld [vmem:[#allocation2 + $0xac] sm:$0xf] }
 0x15b   : > { %17915 = vmatmul.mubr.bf16.gmra.mrb[4].mxu0 %v21003_v10  ;;  %v2217_v10 = vshll.u32 %v1890_v22, 16  ;;  %v21011_v22 = vld [vmem:[#allocation2 + $0x9c] sm:$0xff]  }
 0x15c   : > { %17918 = vmatprep.mubr.bf16.mxu0 %v21004_v26  ;;  %17947 = vmatpush3.bf16.msra.mxu0 %v20683_v12  ;;  %v21007_v12 = vld [vmem:[#allocation2 + $0x6c] sm:$0xff]   ;;  %v2222_v26 = vshrl.u32 %v1891_v32, 16 }
 0x15d   : > { %17948 = vmatprep.subr.bf16.mxu0 %v20684_v5 }
 0x15e   : > { %v2224_v1 = vrot.slane %v2222_v26, 4  ;;  %v21982_v26 = vrot.slane %v2217_v10, 5 }
 0x160   : > { %17949 = vmatpush3.bf16.msra.mxu0 %v20684_v5  ;;  %v21971_v5 = vld [vmem:[#allocation6 + $0x100] sm:$0xff]   ;;  %25048 = vst [vmem:[#allocation34_spill] sm:$0xff] %v21982_v26 }
 0x161   : > { %17950 = vmatprep.subr.bf16.mxu0 %v20685_v30 }
 0x163   : > { %17919 = vmatmul.mubr.bf16.gmra.mrb[8].mxu0 %v21005_v39  ;;  %v21008_v39 = vld [vmem:[#allocation2 + $0x78] sm:$0xff]  }
 0x164   : > { %17922 = vmatprep.mubr.bf16.mxu0 %v21006_v14  ;;  %17951 = vmatpush3.bf16.msra.mxu0 %v20685_v30  ;;  %v2225_v30 = vshll.u32 %v1891_v32, 16  ;;  %v21010_v14 = vld [vmem:[#allocation2 + $0x90] sm:$0xff]   ;;  %v2214_v32 = vor.u32 %v2213_v17, %v21968_v33  ;;  %v2255_v17 = vshll.u32 %v1895_v36, 16 }
 0x165   : > { %17952 = vmatprep.subr.bf16.mxu0 %v20686_v4  ;;  %v20688_v33 = vld [vmem:[#allocation2 + $0xcc] sm:$0xff]  }
 0x168   : > { %17953 = vmatpush3.bf16.msra.mxu0 %v20686_v4  ;;  %v1892_v4 = vld [vmem:[#allocation2 + $0xa0] sm:$0xf] }
 0x169   : > { %17954 = vmatprep.subr.bf16.mxu0 %v20687_v48  ;;  %v2235_v2 = vshrl.u32 %v1892_v4, 16 }
 0x16b   : > { %17923 = vmatmul.mubr.bf16.gmra.mrb[12].mxu0 %v21007_v12  ;;  %v1893_v12 = vld [vmem:[#allocation2 + $0xa4] sm:$0x1] }
 0x16c   : > { %17926 = vmatprep.mubr.bf16.mxu0 %v21008_v39  ;;  %17955 = vmatpush3.bf16.msra.mxu0 %v20687_v48  ;;  %v2227_v39 = vrot.slane %v2225_v30, 5  ;;  %v21012_v48 = vld [vmem:[#allocation2 + $0xa8] sm:$0xff]   ;;  %v2241_v38 = vshll.u32 %v1893_v12, 16  ;;  %v21013_v12 = vld [vmem:[#allocation2 + $0xb4] sm:$0xff]  }
 0x16d   : > { %17956 = vmatprep.subr.bf16.mxu0 %v20689_v18 }
 0x16e   : > { %v2228_v30 = vor.u32 %v2227_v39, %v2224_v1  ;;  %v21994_v10 = vrot.slane %v2241_v38, 5  ;;  %v2248_v1 = vrot.slane %v2246_v15, 4  ;;  %v21014_v39 = vld [vmem:[#allocation2 + $0xc0] sm:$0xff]   ;;  %v22006_v38 = vrot.slane %v2255_v17, 5 }
 0x170   : > { %17957 = vmatpush3.bf16.msra.mxu0 %v20689_v18  ;;  %v2190_v18 = vor.u32 %v21960_v49, %v21954_v59  ;;  %v21996_v26 = vrot.slane %v2228_v30, 4 }
 0x171   : > { %17990 = vmatprep.subr.bf16.mxu0 %v21971_v5 }
 0x172   : > { %v21978_v37 = vrot.slane %v2190_v18, 4 }
 0x173   : > { %17927 = vmatmul.mubr.bf16.gmra.mrb[16].mxu0 %v21009_v34  ;;  %v2204_v34 = vor.u32 %v2203_v56, %v21964_v11  ;;  %v21990_v11 = vrot.slane %v2214_v32, 4  ;;  %v2249_v56 = vshll.u32 %v1894_v21, 16  ;;  %v1922_v21 = vsel %vm21986_vm11, %v21855_v61, %v21843_v24 }
 0x174   : > { %17930 = vmatprep.mubr.bf16.mxu0 %v21010_v14  ;;  %v2231_v14 = vshll.u32 %v1892_v4, 16  ;;  %v2259_v4 = vshrl.u32 %v1895_v36, 16  ;;  %v1932_v36 = vsel %vm21986_vm11, %v21859_v60, %v21863_v23  ;;  %v1946_v24 = vsel %vm21986_vm11, %v21861_v0, %v21845_v27  ;;  %v20692_v27 = vld [vmem:[#allocation6 + $0x110] sm:$0xff]  }
 0x175   : > { %v1956_v61 = vsel %vm21986_vm11, %v21865_v3, %v21857_v63  ;;  %v1970_v60 = vsel %vm21986_vm11, %v21869_v8, %v21851_v52  ;;  %v1980_v23 = vsel %vm21986_vm11, %v21877_v25, %v21871_v9  ;;  %v1994_v52 = vsel %vm21986_vm11, %v21885_v42, %v21874_v16  ;;  %v1898_v25 = vld [vmem:[#allocation2 + $0xb8] sm:$0xf]  ;;  %v20693_v16 = vld [vmem:[#allocation6 + $0x118] sm:$0xff]  }
 0x176   : > { %v21992_v18 = vrot.slane %v2231_v14, 5  ;;  %v22008_v15 = vrot.slane %v2259_v4, 4  ;;  %v2004_v3 = vsel %vm21986_vm11, %v21887_v6, %v21889_v7  ;;  %v2018_v8 = vsel %vm21986_vm11, %v21898_v51, %v21880_v44  ;;  %v20694_v6 = vld [vmem:[#allocation6 + $0x120] sm:$0xff]  }
 0x177   : > { %v2028_v9 = vsel %vm21986_vm11, %v21900_v31, %v21893_v20  ;;  %v2042_v44 = vsel %vm21986_vm11, %v21905_v40, %v21882_v58  ;;  %v2052_v20 = vsel %vm21986_vm11, %v21907_v45, %v21902_v35  ;;  %v2066_v51 = vsel %vm21986_vm11, %v21911_v47, %v21895_v13  ;;  %v20695_v58 = vld [vmem:[#allocation6 + $0x128] sm:$0xff]   ;;  %v20696_v35 = vld [vmem:[#allocation6 + $0x130] sm:$0xff]   ;;  %v25051_v47 = vld [vmem:[#allocation23_spill] sm:$0xff] }
 0x178   : > { %v22058_v42 = vcombine.low %v2018_v8, %v2028_v9  ;;  %v2076_v31 = vsel %vm21986_vm11, %v21917_v62, %v21909_v46  ;;  %v22080_v17 = vcombine.low %v2042_v44, %v2052_v20  ;;  %v2090_v13 = vsel %vm21986_vm11, %v21927_v57, %v21913_v54  ;;  %v20697_v57 = vld [vmem:[#allocation6 + $0x138] sm:$0xff]  }
 0x179   : > { %v22082_v4 = vcombine.low %v2066_v51, %v2076_v31  ;;  %v2100_v46 = vsel %vm21986_vm11, %v21929_v41, %v21922_v28  ;;  %v2114_v62 = vsel %vm21986_vm11, %v21937_v50, %v25051_v47  ;;  %v2262_v54 = vor.u32 %v22008_v15, %v22006_v38  ;;  %v20698_v41 = vld [vmem:[#allocation6 + $0x1c0] sm:$0xff]   ;;  %v25053_v50 = vld [vmem:[#allocation26_spill] sm:$0xff]  ;;  %v25055_v15 = vld [vmem:[#allocation28_spill] sm:$0xff] }
 0x17a   : > { %v25062_v9 = vld [vmem:[#allocation34_spill] sm:$0xff]  ;;  %v2234_v51 = vsel %vm21986_vm11, %v21996_v26, %v21992_v18  ;;  %v20703_v47 = vld [vmem:[#allocation6 + $0x1e8] sm:$0xff]  }
 0x17b   : > { %17931 = vmatmul.mubr.bf16.gmra.mrb[20].mxu0 %v21011_v22  ;;  %v21980_v22 = vrot.slane %v2204_v34, 4  ;;  %v2237_v34 = vrot.slane %v2235_v2, 4  ;;  %v2251_v2 = vrot.slane %v2249_v56, 5  ;;  %v22033_v56 = vcombine.low %v1970_v60, %v1980_v23  ;;  %v25058_v23 = vld [vmem:[#allocation31_spill] sm:$0xff] }
 0x17c   : > { %17934 = vmatprep.mubr.bf16.mxu0 %v21012_v48  ;;  %v1897_v48 = vld [vmem:[#allocation2 + $0xb4] sm:$0xf]  ;;  %v2263_v28 = vrot.slane %v2262_v54, 4  ;;  %v22193_v54 = vld [vmem:[#allocation2 + $0xc4] sm:$0xf] }
 0x17d   : > { %25047 = vst [vmem:[#allocation33_spill] sm:$0xff] %v21980_v22  ;;  %v2265_v22 = vshll.u32 %v1896_v53, 16  ;;  %v2270_v32 = vshrl.u32 %v1897_v48, 16  ;;  %v2238_v14 = vor.u32 %v2237_v34, %v21992_v18  ;;  %v16197_v53 = vcombine.low %v1922_v21, %v1932_v36 }
 0x17e   : > { %v2273_v63 = vshll.u32 %v1897_v48, 16  ;;  %v2279_v48 = vshll.u32 %v1898_v25, 16  ;;  %v2252_v40 = vor.u32 %v2251_v2, %v2248_v1  ;;  %v2283_v34 = vshrl.u32 %v1898_v25, 16  ;;  %v25054_v2 = vld [vmem:[#allocation24_spill] sm:$0xff] }
 0x17f   : > { %v22011_v30 = vrot.slane %v2238_v14, 4  ;;  %v22036_v0 = vrot.slane %v2270_v32, 4  ;;  %v2124_v1 = vsel %vm21986_vm11, %v21939_v19, %v21932_v55  ;;  %v2138_v19 = vsel %vm21986_vm11, %v21943_v43, %v21924_v29  ;;  %v25052_v55 = vld [vmem:[#allocation25_spill] sm:$0xff]  ;;  %v25056_v14 = vld [vmem:[#allocation27_spill] sm:$0xff] }
 0x180   : > { %v22061_v7 = vrot.slane %v2273_v63, 5  ;;  %v2253_v45 = vrot.slane %v2252_v40, 4  ;;  %v22106_v21 = vcombine.low %v2114_v62, %v2124_v1  ;;  %v2148_v36 = vsel %vm21986_vm11, %v25053_v50, %v25052_v55  ;;  %v1900_v62 = vld [vmem:[#allocation2 + $0xc0] sm:$0xf]  ;;  %v20705_v1 = vld [vmem:[#allocation6 + $0x1f8] sm:$0xff]  }
 0x181   : > { %v2162_v32 = vsel %vm21986_vm11, %v25055_v15, %v25054_v2  ;;  %v2281_v43 = vrot.slane %v2279_v48, 5  ;;  %v2285_v60 = vrot.slane %v2283_v34, 4  ;;  %v2220_v25 = vsel %vm21986_vm11, %v21990_v11, %v25062_v9  ;;  %v22199_v50 = vld [vmem:[#allocation2 + $0xc8] sm:$0x1]  ;;  %v20710_v9 = vld [vmem:[#allocation6 + $0xa0] sm:$0xff]  }
 0x182   : > { %v2244_v11 = vsel %vm21986_vm11, %v22011_v30, %v21994_v10  ;;  %v2276_v31 = vor.u32 %v22061_v7, %v22036_v0  ;;  %v2258_v40 = vsel %vm21986_vm11, %v2253_v45, %v22006_v38  ;;  %v20700_v7 = vld [vmem:[#allocation6 + $0x1d0] sm:$0xff]   ;;  %v20701_v45 = vld [vmem:[#allocation6 + $0x1d8] sm:$0xff]   ;;  %v2629_v55 = vshrl.u32 %v22193_v54, 16 }
 0x183   : > { %17935 = vmatmul.mubr.bf16.gmra.mrb[24].mxu0 %v21013_v12  ;;  %v22013_v12 = vrot.slane %v2265_v22, 5  ;;  %v20691_v22 = vld [vmem:[#allocation6 + $0x108] sm:$0xff]   ;;  %v22172_v34 = vcombine.low %v2234_v51, %v2244_v11 }
 0x184   : > { %17938 = vmatprep.mubr.bf16.mxu0 %v21014_v39  ;;  %v22102_v39 = vcombine.low %v2090_v13, %v2100_v46  ;;  %v2277_v18 = vrot.slane %v2276_v31, 4  ;;  %v20702_v46 = vld [vmem:[#allocation6 + $0x1e0] sm:$0xff]   ;;  %v21015_v11 = vld [vmem:[#allocation2 + $0x4] sm:$0xf] }
 0x185   : > { %v3258_v31 = vrot.slane %v21015_v11, 5  ;;  %v3192_v11 = vld [vmem:[#allocation2 + $0x3c] sm:$0xe] }
 0x186   : > { %v2282_v30 = vsel %vm21986_vm11, %v2277_v18, %v2281_v43 }
 0x18b   : > { %17939 = vmatmul.mubr.bf16.gmra.mrb[28].mxu0 %v20688_v33  ;;  %v22031_v33 = vcombine.low %v1946_v24, %v1956_v61  ;;  %v22126_v61 = vcombine.low %v2138_v19, %v2148_v36  ;;  %v2625_v19 = vshll.u32 %v22193_v54, 16 }
 0x18c   : > { %17958 = vmatprep.mubr.bf16.mxu0 %v16197_v53  ;;  %v25057_v53 = vld [vmem:[#allocation29_spill] sm:$0xff] }
 0x18d   : > { %v2172_v24 = vsel %vm21986_vm11, %v25057_v53, %v25056_v14  ;;  %v2627_v15 = vrot.slane %v2625_v19, 5  ;;  %v2635_v14 = vshll.u32 %v22199_v50, 16 }
 0x18e   : > { %v22128_v29 = vcombine.low %v2162_v32, %v2172_v24  ;;  %v2631_v32 = vrot.slane %v2629_v55, 4  ;;  %v21019_v55 = vld [vmem:[#allocation2 + $0x14] sm:$0x1] }
 0x190   : > { %v2632_v24 = vor.u32 %v2631_v32, %v2627_v15  ;;  %v21020_v32 = vld [vmem:[#allocation2 + $0x20] sm:$0x1] }
 0x193   : > { %17959 = vmatmul.mubr.bf16.vlgmr.msra.gmra.mrb[0].mxu0 %v22031_v33 }
 0x194   : > { %17991 = vmatpush3.bf16.msra.mxu0 %v21971_v5  ;;  %17962 = vmatprep.mubr.bf16.mxu0 %v22033_v56  ;;  %v22056_v5 = vcombine.low %v1994_v52, %v2004_v3  ;;  %v25060_v52 = vld [vmem:[#allocation32_spill] sm:$0xff]  ;;  %v25061_v3 = vld [vmem:[#allocation33_spill] sm:$0xff] }
 0x195   : > { %17992 = vmatprep.subr.bf16.mxu0 %v20691_v22  ;;  %v2210_v8 = vsel %vm21986_vm11, %v25061_v3, %v25060_v52  ;;  %v20707_v52 = vld [vmem:[#allocation6 + $0x88] sm:$0xff]   ;;  %v20708_v3 = vld [vmem:[#allocation6 + $0x90] sm:$0xff]  }
 0x196   : > { %v22150_v48 = vcombine.low %v2210_v8, %v2220_v25  ;;  %v20709_v8 = vld [vmem:[#allocation6 + $0x98] sm:$0xff]  }
 0x197   : > { %v22225_v25 = vld [vmem:[#allocation2 + $0xd0] sm:$0xf] }
 0x198   : > { %17993 = vmatpush3.bf16.msra.mxu0 %v20691_v22  ;;  %v2186_v22 = vsel %vm21986_vm11, %v25058_v23, %v21954_v59  ;;  %v527_v59 = vld [vmem:[#allocation2 + $0xd4] sm:$0x1]  ;;  %v2637_v23 = vrot.slane %v2635_v14, 5  ;;  %v3275_v14 = vrot.slane %v21020_v32, 5 }
 0x199   : > { %17994 = vmatprep.subr.bf16.mxu0 %v20692_v27  ;;  %v528_v20 = vsel %vm21574_vm4, 0, %v527_v59 }
 0x19a   : > { %529 = vst [vmem:[#allocation2 + $0xd4] sm:$0x1] %v528_v20 }
 0x19b   : > { %17963 = vmatmul.mubr.bf16.gmra.mrb[4].mxu0 %v22056_v5 }
 0x19c   : > { %17966 = vmatprep.mubr.bf16.mxu0 %v22058_v42  ;;  %17995 = vmatpush3.bf16.msra.mxu0 %v20692_v27  ;;  %v25059_v27 = vld [vmem:[#allocation30_spill] sm:$0xff] }
 0x19d   : > { %17996 = vmatprep.subr.bf16.mxu0 %v20693_v16  ;;  %v2196_v63 = vsel %vm21986_vm11, %v21978_v37, %v25059_v27 }
 0x1a0   : > { %17997 = vmatpush3.bf16.msra.mxu0 %v20693_v16  ;;  %v1899_v16 = vld [vmem:[#allocation2 + $0xbc] sm:$0x1] }
 0x1a1   : > { %17998 = vmatprep.subr.bf16.mxu0 %v20694_v6  ;;  %v2289_v44 = vshll.u32 %v1899_v16, 16  ;;  %v22232_v20 = vld [vmem:[#allocation2 + $0xd4] sm:$0x1] }
 0x1a3   : > { %17967 = vmatmul.mubr.bf16.gmra.mrb[8].mxu0 %v22080_v17  ;;  %v2291_v10 = vrot.slane %v2289_v44, 5 }
 0x1a4   : > { %17970 = vmatprep.mubr.bf16.mxu0 %v22082_v4  ;;  %17999 = vmatpush3.bf16.msra.mxu0 %v20694_v6  ;;  %v22148_v6 = vcombine.low %v2186_v22, %v2196_v63 }
 0x1a5   : > { %18000 = vmatprep.subr.bf16.mxu0 %v20695_v58 }
 0x1a8   : > { %18001 = vmatpush3.bf16.msra.mxu0 %v20695_v58  ;;  %v2286_v58 = vor.u32 %v2285_v60, %v2281_v43  ;;  %v2633_v60 = vrot.slane %v2632_v24, 4 }
 0x1a9   : > { %18002 = vmatprep.subr.bf16.mxu0 %v20696_v35 }
 0x1aa   : > { %v2287_v13 = vrot.slane %v2286_v58, 4  ;;  %v2638_v27 = vsel %vm21986_vm11, %v2633_v60, %v2637_v23  ;;  %v3187_v58 = vld [vmem:[#allocation2] sm:$0xe] }
 0x1ab   : > { %17971 = vmatmul.mubr.bf16.gmra.mrb[12].mxu0 %v22102_v39 }
 0x1ac   : > { %17974 = vmatprep.mubr.bf16.mxu0 %v22106_v21  ;;  %18003 = vmatpush3.bf16.msra.mxu0 %v20696_v35  ;;  %v2268_v35 = vsel %vm21986_vm11, %v2263_v28, %v22013_v12  ;;  %v2292_v38 = vsel %vm21986_vm11, %v2287_v13, %v2291_v10  ;;  %v20699_v12 = vld [vmem:[#allocation6 + $0x1c8] sm:$0xff]   ;;  %v2619_v28 = vshll.u32 %v1900_v62, 16  ;;  %v16239_v13 = vrot.slane %v3187_v58, 9 }
 0x1ad   : > { %18004 = vmatprep.subr.bf16.mxu0 %v20697_v57  ;;  %v22174_v26 = vcombine.low %v2258_v40, %v2268_v35  ;;  %v22182_v0 = vcombine.low %v2282_v30, %v2292_v38  ;;  %v3260_v10 = vrot.slane %v3258_v31, 4  ;;  %v21016_v30 = vld [vmem:[#allocation2 + $0x8] sm:$0x1] }
 0x1ae   : > { %v2621_v2 = vrot.slane %v2619_v28, 5  ;;  %v3261_v38 = vrot.slane %v21016_v30, 5  ;;  %v21027_v30 = vld [vmem:[#allocation2 + $0x44] sm:$0x1] }
 0x1b0   : > { %18005 = vmatpush3.bf16.msra.mxu0 %v20697_v57  ;;  %v2616_v57 = vshrl.u32 %v1900_v62, 16  ;;  %v21018_v62 = vld [vmem:[#allocation2 + $0x1c] sm:$0xf] }
 0x1b1   : > { %18038 = vmatprep.subr.bf16.mxu0 %v20698_v41 }
 0x1b2   : > { %v2618_v36 = vrot.slane %v2616_v57, 4 }
 0x1b3   : > { %17975 = vmatmul.mubr.bf16.gmra.mrb[16].mxu0 %v22126_v61 }
 0x1b4   : > { %17978 = vmatprep.mubr.bf16.mxu0 %v22128_v29  ;;  %v2622_v53 = vor.u32 %v2621_v2, %v2618_v36  ;;  %v3268_v36 = vrot.slane %v21019_v55, 5  ;;  %v20718_v55 = vld [vmem:[#allocation6 + $0x160] sm:$0xff]  }
 0x1b6   : > { %v2623_v43 = vrot.slane %v2622_v53, 4 }
 0x1b8   : > { %v2628_v22 = vsel %vm21986_vm11, %v2623_v43, %v2627_v15  ;;  %v21021_v43 = vld [vmem:[#allocation2 + $0x28] sm:$0xf] }
 0x1b9   : > { %v22211_v63 = vcombine.low %v2628_v22, %v2638_v27  ;;  %v3279_v60 = vrot.slane %v21021_v43, 5  ;;  %v3190_v27 = vld [vmem:[#allocation2 + $0x24] sm:$0xe] }
 0x1bb   : > { %17979 = vmatmul.mubr.bf16.gmra.mrb[20].mxu0 %v22148_v6 }
 0x1bc   : > { %17982 = vmatprep.mubr.bf16.mxu0 %v22150_v48 }
 0x1c3   : > { %17983 = vmatmul.mubr.bf16.gmra.mrb[24].mxu0 %v22172_v34 }
 0x1c4   : > { %17986 = vmatprep.mubr.bf16.mxu0 %v22174_v26 }
 0x1cb   : > { %17987 = vmatmul.mubr.bf16.gmra.mrb[28].mxu0 %v22182_v0 }
 0x1cc   : > { %18006 = vmatprep.mubr.bf16.mxu0 %v22031_v33  ;;  %v20704_v33 = vld [vmem:[#allocation6 + $0x1f0] sm:$0xff]  }
 0x1d3   : > { %18007 = vmatmul.mubr.bf16.vlgmr.msra.gmra.mrb[0].mxu0 %v22033_v56 }
 0x1d4   : > { %18039 = vmatpush3.bf16.msra.mxu0 %v20698_v41  ;;  %18010 = vmatprep.mubr.bf16.mxu0 %v22056_v5  ;;  %v20706_v41 = vld [vmem:[#allocation6 + $0x80] sm:$0xff]  }
 0x1d5   : > { %18040 = vmatprep.subr.bf16.mxu0 %v20699_v12 }
 0x1d8   : > { %18041 = vmatpush3.bf16.msra.mxu0 %v20699_v12 }
 0x1d9   : > { %18042 = vmatprep.subr.bf16.mxu0 %v20700_v7 }
 0x1db   : > { %18011 = vmatmul.mubr.bf16.gmra.mrb[4].mxu0 %v22058_v42 }
 0x1dc   : > { %18014 = vmatprep.mubr.bf16.mxu0 %v22080_v17  ;;  %18043 = vmatpush3.bf16.msra.mxu0 %v20700_v7  ;;  %v21017_v7 = vld [vmem:[#allocation2 + $0x10] sm:$0xf] }
 0x1dd   : > { %18044 = vmatprep.subr.bf16.mxu0 %v20701_v45 }
 0x1e0   : > { %18045 = vmatpush3.bf16.msra.mxu0 %v20701_v45  ;;  %v3265_v45 = vrot.slane %v21017_v7, 5  ;;  %v21028_v7 = vld [vmem:[#allocation2 + $0x50] sm:$0x1] }
 0x1e1   : > { %18046 = vmatprep.subr.bf16.mxu0 %v20702_v46 }
 0x1e2   : > { %v3267_v19 = vrot.slane %v3265_v45, 4 }
 0x1e3   : > { %18015 = vmatmul.mubr.bf16.gmra.mrb[8].mxu0 %v22082_v4 }
 0x1e4   : > { %18018 = vmatprep.mubr.bf16.mxu0 %v22102_v39  ;;  %18047 = vmatpush3.bf16.msra.mxu0 %v20702_v46  ;;  %v3259_v46 = vsel %vm22237_vm14, %v16239_v13, %v3258_v31  ;;  %v3269_v24 = vsel %vm22237_vm14, %v3267_v19, %v3268_v36  ;;  %v20716_v31 = vld [vmem:[#allocation6 + $0x150] sm:$0xff]   ;;  %v16244_v13 = vrot.slane %v3192_v11, 9  ;;  %v3195_v36 = vld [vmem:[#allocation2 + $0x60] sm:$0xe] }
 0x1e5   : > { %18048 = vmatprep.subr.bf16.mxu0 %v20703_v47  ;;  %v16247_v43 = vrot.slane %v3195_v36, 9 }
 0x1e8   : > { %18049 = vmatpush3.bf16.msra.mxu0 %v20703_v47  ;;  %v3262_v47 = vsel %vm22237_vm14, %v3260_v10, %v3261_v38  ;;  %v3296_v38 = vrot.slane %v21027_v30, 5 }
 0x1e9   : > { %18050 = vmatprep.subr.bf16.mxu0 %v20704_v33  ;;  %v16255_v28 = vcombine.low %v3259_v46, %v3262_v47  ;;  %v20717_v46 = vld [vmem:[#allocation6 + $0x158] sm:$0xff]  }
 0x1eb   : > { %18019 = vmatmul.mubr.bf16.gmra.mrb[12].mxu0 %v22106_v21 }
 0x1ec   : > { %18022 = vmatprep.mubr.bf16.mxu0 %v22126_v61  ;;  %18051 = vmatpush3.bf16.msra.mxu0 %v20704_v33  ;;  %v3188_v33 = vld [vmem:[#allocation2 + $0xc] sm:$0xe] }
 0x1ed   : > { %18052 = vmatprep.subr.bf16.mxu0 %v20705_v1 }
 0x1f0   : > { %18053 = vmatpush3.bf16.msra.mxu0 %v20705_v1  ;;  %v3272_v1 = vrot.slane %v21018_v62, 5  ;;  %v21029_v62 = vld [vmem:[#allocation2 + $0x58] sm:$0xf] }
 0x1f1   : > { %18086 = vmatprep.subr.bf16.mxu0 %v20706_v41 }
 0x1f2   : > { %v3274_v15 = vrot.slane %v3272_v1, 4 }
 0x1f3   : > { %18023 = vmatmul.mubr.bf16.gmra.mrb[16].mxu0 %v22128_v29 }
 0x1f4   : > { %18026 = vmatprep.mubr.bf16.mxu0 %v22148_v6  ;;  %v3276_v22 = vsel %vm22237_vm14, %v3274_v15, %v3275_v14 }
 0x1fb   : > { %18027 = vmatmul.mubr.bf16.gmra.mrb[20].mxu0 %v22150_v48 }
 0x1fc   : > { %18030 = vmatprep.mubr.bf16.mxu0 %v22172_v34 }
 0x203   : > { %18031 = vmatmul.mubr.bf16.gmra.mrb[24].mxu0 %v22174_v26 }
 0x204   : > { %18034 = vmatprep.mubr.bf16.mxu0 %v22182_v0 }
 0x20b   : > { %18035 = vmatmul.mubr.bf16.gmra.mrb[28].mxu0 %v22211_v63 }
 0x20c   : > { %18054 = vmatprep.mubr.bf16.mxu0 %v22033_v56  ;;  %v20711_v56 = vld [vmem:[#allocation6 + $0xa8] sm:$0xff]  }
 0x213   : > { %18055 = vmatmul.mubr.bf16.vlgmr.msra.gmra.mrb[0].mxu0 %v22056_v5  ;;  %v20712_v5 = vld [vmem:[#allocation6 + $0xb0] sm:$0xff]  }
 0x214   : > { %18087 = vmatpush3.bf16.msra.mxu0 %v20706_v41  ;;  %18058 = vmatprep.mubr.bf16.mxu0 %v22058_v42  ;;  %v20713_v42 = vld [vmem:[#allocation6 + $0xb8] sm:$0xff]   ;;  %v16240_v41 = vrot.slane %v3188_v33, 9 }
 0x215   : > { %18088 = vmatprep.subr.bf16.mxu0 %v20707_v52 }
 0x216   : > { %v3266_v53 = vsel %vm22237_vm14, %v16240_v41, %v3265_v45  ;;  %v3303_v45 = vrot.slane %v21028_v7, 5  ;;  %v21030_v41 = vld [vmem:[#allocation2 + $0x64] sm:$0xf]  ;;  %v21038_v7 = vld [vmem:[#allocation2 + $0x94] sm:$0xf] }
 0x217   : > { %v3314_v19 = vrot.slane %v21030_v41, 5 }
 0x218   : > { %18089 = vmatpush3.bf16.msra.mxu0 %v20707_v52 }
 0x219   : > { %18090 = vmatprep.subr.bf16.mxu0 %v20708_v3 }
 0x21b   : > { %18059 = vmatmul.mubr.bf16.gmra.mrb[4].mxu0 %v22080_v17  ;;  %v22223_v17 = vld [vmem:[#allocation6 + $0x140] sm:$0xff]  }
 0x21c   : > { %18062 = vmatprep.mubr.bf16.mxu0 %v22082_v4  ;;  %18091 = vmatpush3.bf16.msra.mxu0 %v20708_v3  ;;  %v1903_v4 = vld [vmem:[#allocation2 + $0xcc] sm:$0xf]  ;;  %v3191_v3 = vld [vmem:[#allocation2 + $0x30] sm:$0xe] }
 0x21d   : > { %18092 = vmatprep.subr.bf16.mxu0 %v20709_v8 }
 0x220   : > { %18093 = vmatpush3.bf16.msra.mxu0 %v20709_v8  ;;  %v22259_v8 = vcombine.low %v3266_v53, %v3269_v24  ;;  %v21031_v53 = vld [vmem:[#allocation2 + $0x5c] sm:$0x1] }
 0x221   : > { %18094 = vmatprep.subr.bf16.mxu0 %v20710_v9  ;;  %v3310_v24 = vrot.slane %v21031_v53, 5  ;;  %v21041_v53 = vld [vmem:[#allocation2 + $0xa0] sm:$0xf] }
 0x223   : > { %18063 = vmatmul.mubr.bf16.gmra.mrb[8].mxu0 %v22102_v39  ;;  %v2902_v39 = vshrl.u32 %v1903_v4, 16 }
 0x224   : > { %18066 = vmatprep.mubr.bf16.mxu0 %v22106_v21  ;;  %18095 = vmatpush3.bf16.msra.mxu0 %v20710_v9  ;;  %v2905_v21 = vshll.u32 %v1903_v4, 16 }
 0x225   : > { %18096 = vmatprep.subr.bf16.mxu0 %v20711_v56  ;;  %v2904_v16 = vrot.slane %v2902_v39, 4  ;;  %v20715_v39 = vld [vmem:[#allocation6 + $0x148] sm:$0xff]  }
 0x226   : > { %v2907_v59 = vrot.slane %v2905_v21, 5  ;;  %v16243_v21 = vrot.slane %v3191_v3, 9  ;;  %v21033_v3 = vld [vmem:[#allocation2 + $0x70] sm:$0xf] }
 0x228   : > { %18097 = vmatpush3.bf16.msra.mxu0 %v20711_v56  ;;  %v2908_v51 = vor.u32 %v2907_v59, %v2904_v16  ;;  %v16242_v56 = vrot.slane %v3190_v27, 9  ;;  %v20719_v27 = vld [vmem:[#allocation6 + $0x168] sm:$0xff]  }
 0x229   : > { %18098 = vmatprep.subr.bf16.mxu0 %v20712_v5 }
 0x22a   : > { %v2909_v40 = vrot.slane %v2908_v51, 4  ;;  %v3280_v59 = vsel %vm22237_vm14, %v16242_v56, %v3279_v60  ;;  %v3321_v56 = vrot.slane %v21033_v3, 5 }
 0x22b   : > { %18067 = vmatmul.mubr.bf16.gmra.mrb[12].mxu0 %v22126_v61  ;;  %v2911_v61 = vshll.u32 %v22225_v25, 16 }
 0x22c   : > { %18070 = vmatprep.mubr.bf16.mxu0 %v22128_v29  ;;  %18099 = vmatpush3.bf16.msra.mxu0 %v20712_v5  ;;  %v2915_v29 = vshrl.u32 %v22225_v25, 16  ;;  %v3281_v5 = vrot.slane %v3279_v60, 4  ;;  %v3316_v60 = vrot.slane %v3314_v19, 4 }
 0x22d   : > { %18100 = vmatprep.subr.bf16.mxu0 %v20713_v42  ;;  %v2913_v44 = vrot.slane %v2911_v61, 5 }
 0x22e   : > { %v2917_v37 = vrot.slane %v2915_v29, 4  ;;  %v21024_v29 = vld [vmem:[#allocation2 + $0x38] sm:$0x1] }
 0x22f   : > { %v3289_v16 = vrot.slane %v21024_v29, 5  ;;  %v3197_v29 = vld [vmem:[#allocation2 + $0x78] sm:$0xe] }
 0x230   : > { %18101 = vmatpush3.bf16.msra.mxu0 %v20713_v42  ;;  %v21023_v42 = vld [vmem:[#allocation2 + $0x2c] sm:$0x1] }
 0x231   : > { %18134 = vmatprep.subr.bf16.mxu0 %v22223_v17  ;;  %v3282_v4 = vrot.slane %v21023_v42, 5 }
 0x233   : > { %18071 = vmatmul.mubr.bf16.gmra.mrb[16].mxu0 %v22148_v6  ;;  %v2918_v6 = vor.u32 %v2917_v37, %v2913_v44  ;;  %v21025_v37 = vld [vmem:[#allocation2 + $0x40] sm:$0xf] }
 0x234   : > { %18074 = vmatprep.mubr.bf16.mxu0 %v22150_v48  ;;  %v2921_v48 = vshll.u32 %v22232_v20, 16  ;;  %v3293_v51 = vrot.slane %v21025_v37, 5  ;;  %v3323_v37 = vrot.slane %v3321_v56, 4 }
 0x235   : > { %v2919_v35 = vrot.slane %v2918_v6, 4 }
 0x236   : > { %v2923_v18 = vrot.slane %v2921_v48, 5  ;;  %v3295_v10 = vrot.slane %v3293_v51, 4  ;;  %v3294_v47 = vsel %vm22237_vm14, %v16244_v13, %v3293_v51  ;;  %v21035_v51 = vld [vmem:[#allocation2 + $0x74] sm:$0x1] }
 0x238   : > { %v2924_v12 = vsel %vm21986_vm11, %v2919_v35, %v2923_v18  ;;  %v3297_v33 = vsel %vm22237_vm14, %v3295_v10, %v3296_v38  ;;  %v21037_v10 = vld [vmem:[#allocation2 + $0x88] sm:$0xf] }
 0x239   : > { %v3335_v30 = vrot.slane %v21037_v10, 5  ;;  %v21046_v10 = vld [vmem:[#allocation2 + $0xbc] sm:$0x1] }
 0x23b   : > { %18075 = vmatmul.mubr.bf16.gmra.mrb[20].mxu0 %v22172_v34 }
 0x23c   : > { %18078 = vmatprep.mubr.bf16.mxu0 %v22174_v26  ;;  %v2914_v26 = vsel %vm21986_vm11, %v2909_v40, %v2913_v44  ;;  %v3283_v44 = vsel %vm22237_vm14, %v3281_v5, %v3282_v4  ;;  %v3193_v40 = vld [vmem:[#allocation2 + $0x48] sm:$0xe]  ;;  %v3315_v5 = vsel %vm22237_vm14, %v16247_v43, %v3314_v19  ;;  %v3196_v4 = vld [vmem:[#allocation2 + $0x6c] sm:$0xe] }
 0x23d   : > { %v16230_v57 = vcombine.low %v2914_v26, %v2924_v12  ;;  %v22274_v35 = vcombine.low %v3280_v59, %v3283_v44  ;;  %v16245_v26 = vrot.slane %v3193_v40, 9  ;;  %v16248_v44 = vrot.slane %v3196_v4, 9 }
 0x23f   : > { %v3322_v40 = vsel %vm22237_vm14, %v16248_v44, %v3321_v56 }
 0x243   : > { %18079 = vmatmul.mubr.bf16.gmra.mrb[24].mxu0 %v22182_v0  ;;  %v3189_v0 = vld [vmem:[#allocation2 + $0x18] sm:$0xe] }
 0x244   : > { %18082 = vmatprep.mubr.bf16.mxu0 %v22211_v63  ;;  %v16241_v2 = vrot.slane %v3189_v0, 9  ;;  %v21022_v63 = vld [vmem:[#allocation2 + $0x34] sm:$0xf] }
 0x245   : > { %v3286_v52 = vrot.slane %v21022_v63, 5 }
 0x246   : > { %v3273_v23 = vsel %vm22237_vm14, %v16241_v2, %v3272_v1  ;;  %v3307_v1 = vrot.slane %v21029_v62, 5  ;;  %v22288_v2 = vcombine.low %v3294_v47, %v3297_v33  ;;  %v3199_v47 = vld [vmem:[#allocation2 + $0x90] sm:$0xe] }
 0x247   : > { %v22261_v9 = vcombine.low %v3273_v23, %v3276_v22  ;;  %v3288_v61 = vrot.slane %v3286_v52, 4  ;;  %v3287_v6 = vsel %vm22237_vm14, %v16243_v21, %v3286_v52  ;;  %v21032_v23 = vld [vmem:[#allocation2 + $0x68] sm:$0x1]  ;;  %v16251_v41 = vrot.slane %v3199_v47, 9 }
 0x248   : > { %v3309_v14 = vrot.slane %v3307_v1, 4  ;;  %v3317_v22 = vrot.slane %v21032_v23, 5  ;;  %v3200_v23 = vld [vmem:[#allocation2 + $0x9c] sm:$0xe]  ;;  %v20724_v47 = vld [vmem:[#allocation6 + $0x210] sm:$0xff]  }
 0x249   : > { %v3290_v48 = vsel %vm22237_vm14, %v3288_v61, %v3289_v16  ;;  %v20720_v61 = vld [vmem:[#allocation6 + $0x170] sm:$0xff]   ;;  %v16252_v56 = vrot.slane %v3200_v23, 9  ;;  %v22404_v23 = vld [vmem:[%s24939_s2] ss:$0 sm:$0xff] }
 0x24a   : > { %v22276_v18 = vcombine.low %v3287_v6, %v3290_v48  ;;  %v3311_v52 = vsel %vm22237_vm14, %v3309_v14, %v3310_v24  ;;  %v3318_v42 = vsel %vm22237_vm14, %v3316_v60, %v3317_v22  ;;  %v3324_v6 = vrot.slane %v21035_v51, 5  ;;  %v21042_v22 = vld [vmem:[#allocation2 + $0xac] sm:$0xf]  ;;  %v21045_v51 = vld [vmem:[#allocation2 + $0xb8] sm:$0xf] }
 0x24b   : > { %18083 = vmatmul.mubr.bf16.gmra.mrb[28].mxu0 %v16230_v57  ;;  %v22304_v59 = vcombine.low %v3315_v5, %v3318_v42  ;;  %v16249_v48 = vrot.slane %v3197_v29, 9  ;;  %v3349_v24 = vrot.slane %v21041_v53, 5  ;;  %v21043_v42 = vld [vmem:[#allocation2 + $0xa4] sm:$0x1] }
 0x24c   : > { %18102 = vmatprep.mubr.bf16.mxu0 %v16255_v28  ;;  %v3194_v28 = vld [vmem:[#allocation2 + $0x54] sm:$0xe]  ;;  %v3325_v13 = vsel %vm22237_vm14, %v3323_v37, %v3324_v6  ;;  %v3352_v4 = vrot.slane %v21043_v42, 5  ;;  %v3363_v6 = vrot.slane %v21045_v51, 5 }
 0x24d   : > { %v16246_v32 = vrot.slane %v3194_v28, 9  ;;  %v22316_v33 = vcombine.low %v3322_v40, %v3325_v13  ;;  %v3351_v5 = vrot.slane %v3349_v24, 4  ;;  %v3350_v44 = vsel %vm22237_vm14, %v16252_v56, %v3349_v24  ;;  %v20736_v24 = vld [vmem:[#allocation8 + $0xf0] sm:$0xff]  }
 0x24e   : > { %v3365_v13 = vrot.slane %v3363_v6, 4 }
 0x24f   : > { %v3308_v63 = vsel %vm22237_vm14, %v16246_v32, %v3307_v1  ;;  %v3353_v37 = vsel %vm22237_vm14, %v3351_v5, %v3352_v4 }
 0x250   : > { %v22302_v16 = vcombine.low %v3308_v63, %v3311_v52  ;;  %v3201_v63 = vld [vmem:[#allocation2 + $0xa8] sm:$0xe] }
 0x253   : > { %18103 = vmatmul.mubr.bf16.vlgmr.msra.gmra.mrb[0].mxu0 %v22259_v8 }
 0x254   : > { %18135 = vmatpush3.bf16.msra.mxu0 %v22223_v17  ;;  %18106 = vmatprep.mubr.bf16.mxu0 %v22261_v9  ;;  %v21026_v17 = vld [vmem:[#allocation2 + $0x4c] sm:$0xf] }
 0x255   : > { %18136 = vmatprep.subr.bf16.mxu0 %v20715_v39  ;;  %v3300_v58 = vrot.slane %v21026_v17, 5 }
 0x257   : > { %v3302_v12 = vrot.slane %v3300_v58, 4  ;;  %v3301_v0 = vsel %vm22237_vm14, %v16245_v26, %v3300_v58  ;;  %v20721_v58 = vld [vmem:[#allocation6 + $0x178] sm:$0xff]  }
 0x258   : > { %18137 = vmatpush3.bf16.msra.mxu0 %v20715_v39  ;;  %v21034_v39 = vld [vmem:[#allocation2 + $0x7c] sm:$0xf] }
 0x259   : > { %18138 = vmatprep.subr.bf16.mxu0 %v20716_v31  ;;  %v3304_v57 = vsel %vm22237_vm14, %v3302_v12, %v3303_v45  ;;  %v3328_v21 = vrot.slane %v21034_v39, 5  ;;  %v3198_v12 = vld [vmem:[#allocation2 + $0x84] sm:$0xe]  ;;  %v3342_v45 = vrot.slane %v21038_v7, 5  ;;  %v16253_v39 = vrot.slane %v3201_v63, 9  ;;  %v20730_v7 = vld [vmem:[#allocation8 + $0xc0] sm:$0xff]  }
 0x25a   : > { %v22290_v15 = vcombine.low %v3301_v0, %v3304_v57  ;;  %v16250_v1 = vrot.slane %v3198_v12, 9  ;;  %v3337_v0 = vrot.slane %v3335_v30, 4  ;;  %v21039_v57 = vld [vmem:[#allocation2 + $0x8c] sm:$0x1]  ;;  %18230 = vmatprep.subr.bf16.mxu1 %v20730_v7 }
 0x25b   : > { %18107 = vmatmul.mubr.bf16.gmra.mrb[4].mxu0 %v22274_v35  ;;  %v3330_v11 = vrot.slane %v3328_v21, 4  ;;  %v3329_v38 = vsel %vm22237_vm14, %v16249_v48, %v3328_v21  ;;  %v3338_v28 = vrot.slane %v21039_v57, 5  ;;  %v3344_v19 = vrot.slane %v3342_v45, 4  ;;  %18231 = vmatpush3.bf16.msra.mxu1 %v20730_v7  ;;  %v20729_v57 = vld [vmem:[#allocation6 + $0x238] sm:$0xff]  }
 0x25c   : > { %18110 = vmatprep.mubr.bf16.mxu0 %v22276_v18  ;;  %18139 = vmatpush3.bf16.msra.mxu0 %v20716_v31  ;;  %v21036_v31 = vld [vmem:[#allocation2 + $0x80] sm:$0x1]  ;;  %v3336_v32 = vsel %vm22237_vm14, %v16250_v1, %v3335_v30  ;;  %v3343_v43 = vsel %vm22237_vm14, %v16251_v41, %v3342_v45  ;;  %v3366_v30 = vrot.slane %v21046_v10, 5  ;;  %v20725_v1 = vld [vmem:[#allocation6 + $0x218] sm:$0xff]   ;;  %v3203_v41 = vld [vmem:[#allocation2 + $0xc0] sm:$0xe] }
 0x25d   : > { %18140 = vmatprep.subr.bf16.mxu0 %v20717_v46  ;;  %v3331_v17 = vrot.slane %v21036_v31, 5  ;;  %v3339_v14 = vsel %vm22237_vm14, %v3337_v0, %v3338_v28  ;;  %v3202_v31 = vld [vmem:[#allocation2 + $0xb4] sm:$0xe]  ;;  %v20723_v45 = vld [vmem:[#allocation6 + $0x208] sm:$0xff]   ;;  %v3695_v28 = vrot.slane %v22193_v54, 5  ;;  %v3967_v54 = vrot.slane %v22225_v25, 5 }
 0x25e   : > { %v22330_v52 = vcombine.low %v3336_v32, %v3339_v14  ;;  %v16254_v40 = vrot.slane %v3202_v31, 9  ;;  %v20727_v0 = vld [vmem:[#allocation6 + $0x228] sm:$0xff]   ;;  %v20732_v25 = vld [vmem:[#allocation8 + $0xd0] sm:$0xff]  }
 0x25f   : > { %v3332_v26 = vsel %vm22237_vm14, %v3330_v11, %v3331_v17  ;;  %v22344_v17 = vcombine.low %v3350_v44, %v3353_v37 }
 0x260   : > { %18141 = vmatpush3.bf16.msra.mxu0 %v20717_v46  ;;  %v20722_v46 = vld [vmem:[#allocation6 + $0x200] sm:$0xff]   ;;  %v22318_v62 = vcombine.low %v3329_v38, %v3332_v26  ;;  %v3364_v38 = vsel %vm22237_vm14, %v16254_v40, %v3363_v6  ;;  %v3367_v26 = vsel %vm22237_vm14, %v3365_v13, %v3366_v30 }
 0x261   : > { %18142 = vmatprep.subr.bf16.mxu0 %v20718_v55  ;;  %v22354_v12 = vcombine.low %v3364_v38, %v3367_v26 }
 0x263   : > { %18111 = vmatmul.mubr.bf16.gmra.mrb[8].mxu0 %v22288_v2 }
 0x264   : > { %18114 = vmatprep.mubr.bf16.mxu0 %v22290_v15  ;;  %18143 = vmatpush3.bf16.msra.mxu0 %v20718_v55  ;;  %v21040_v55 = vld [vmem:[#allocation2 + $0x98] sm:$0x1] }
 0x265   : > { %18144 = vmatprep.subr.bf16.mxu0 %v20719_v27  ;;  %v3345_v36 = vrot.slane %v21040_v55, 5  ;;  %v3697_v55 = vrot.slane %v3695_v28, 4 }
 0x267   : > { %v3346_v60 = vsel %vm22237_vm14, %v3344_v19, %v3345_v36  ;;  %v16279_v19 = vrot.slane %v3203_v41, 9  ;;  %v3698_v36 = vrot.slane %v22199_v50, 5  ;;  %v3204_v50 = vld [vmem:[#allocation2 + $0xcc] sm:$0xe] }
 0x268   : > { %18145 = vmatpush3.bf16.msra.mxu0 %v20719_v27  ;;  %v3356_v27 = vrot.slane %v21042_v22, 5  ;;  %v22332_v3 = vcombine.low %v3343_v43, %v3346_v60  ;;  %v20737_v43 = vld [vmem:[#allocation8 + $0xf8] sm:$0xff]   ;;  %v22398_v60 = vld [vmem:[#allocation8] sm:$0xff]  }
 0x269   : > { %18146 = vmatprep.subr.bf16.mxu0 %v20720_v61  ;;  %v3696_v32 = vsel %vm22237_vm14, %v16279_v19, %v3695_v28  ;;  %v3699_v14 = vsel %vm22237_vm14, %v3697_v55, %v3698_v36  ;;  %v4785_v19 = vld [vmem:[#allocation2 + $0xc] sm:$0xf] }
 0x26a   : > { %v3358_v21 = vrot.slane %v3356_v27, 4  ;;  %v3357_v48 = vsel %vm22237_vm14, %v16253_v39, %v3356_v27  ;;  %v16280_v53 = vcombine.low %v3696_v32, %v3699_v14 }
 0x26b   : > { %18115 = vmatmul.mubr.bf16.gmra.mrb[12].mxu0 %v22302_v16 }
 0x26c   : > { %18118 = vmatprep.mubr.bf16.mxu0 %v22304_v59  ;;  %18147 = vmatpush3.bf16.msra.mxu0 %v20720_v61  ;;  %v21044_v61 = vld [vmem:[#allocation2 + $0xb0] sm:$0x1] }
 0x26d   : > { %18148 = vmatprep.subr.bf16.mxu0 %v20721_v58  ;;  %v3359_v29 = vrot.slane %v21044_v61, 5 }
 0x26f   : > { %v3360_v11 = vsel %vm22237_vm14, %v3358_v21, %v3359_v29 }
 0x270   : > { %18149 = vmatpush3.bf16.msra.mxu0 %v20721_v58  ;;  %v22346_v58 = vcombine.low %v3357_v48, %v3360_v11 }
 0x271   : > { %18182 = vmatprep.subr.bf16.mxu0 %v20722_v46 }
 0x273   : > { %18119 = vmatmul.mubr.bf16.gmra.mrb[16].mxu0 %v22316_v33 }
 0x274   : > { %18122 = vmatprep.mubr.bf16.mxu0 %v22318_v62 }
 0x27b   : > { %18123 = vmatmul.mubr.bf16.gmra.mrb[20].mxu0 %v22330_v52 }
 0x27c   : > { %18126 = vmatprep.mubr.bf16.mxu0 %v22332_v3 }
 0x283   : > { %18127 = vmatmul.mubr.bf16.gmra.mrb[24].mxu0 %v22344_v17 }
 0x284   : > { %18130 = vmatprep.mubr.bf16.mxu0 %v22346_v58 }
 0x28b   : > { %18131 = vmatmul.mubr.bf16.gmra.mrb[28].mxu0 %v22354_v12 }
 0x28c   : > { %18150 = vmatprep.mubr.bf16.mxu0 %v22259_v8  ;;  %v20726_v8 = vld [vmem:[#allocation6 + $0x220] sm:$0xff]  }
 0x293   : > { %18151 = vmatmul.mubr.bf16.vlgmr.msra.gmra.mrb[0].mxu0 %v22261_v9 }
 0x294   : > { %18183 = vmatpush3.bf16.msra.mxu0 %v20722_v46  ;;  %18154 = vmatprep.mubr.bf16.mxu0 %v22274_v35  ;;  %v20728_v46 = vld [vmem:[#allocation6 + $0x230] sm:$0xff]  }
 0x295   : > { %18184 = vmatprep.subr.bf16.mxu0 %v20723_v45 }
 0x298   : > { %18185 = vmatpush3.bf16.msra.mxu0 %v20723_v45 }
 0x299   : > { %18186 = vmatprep.subr.bf16.mxu0 %v20724_v47 }
 0x29b   : > { %18155 = vmatmul.mubr.bf16.gmra.mrb[4].mxu0 %v22276_v18 }
 0x29c   : > { %18158 = vmatprep.mubr.bf16.mxu0 %v22288_v2  ;;  %18187 = vmatpush3.bf16.msra.mxu0 %v20724_v47 }
 0x29d   : > { %18188 = vmatprep.subr.bf16.mxu0 %v20725_v1 }
 0x2a0   : > { %18189 = vmatpush3.bf16.msra.mxu0 %v20725_v1 }
 0x2a1   : > { %18190 = vmatprep.subr.bf16.mxu0 %v20726_v8 }
 0x2a3   : > { %18159 = vmatmul.mubr.bf16.gmra.mrb[8].mxu0 %v22290_v15 }
 0x2a4   : > { %18162 = vmatprep.mubr.bf16.mxu0 %v22302_v16  ;;  %18191 = vmatpush3.bf16.msra.mxu0 %v20726_v8 }
 0x2a5   : > { %18192 = vmatprep.subr.bf16.mxu0 %v20727_v0 }
 0x2a8   : > { %18193 = vmatpush3.bf16.msra.mxu0 %v20727_v0 }
 0x2a9   : > { %18194 = vmatprep.subr.bf16.mxu0 %v20728_v46 }
 0x2ab   : > { %18163 = vmatmul.mubr.bf16.gmra.mrb[12].mxu0 %v22304_v59 }
 0x2ac   : > { %18166 = vmatprep.mubr.bf16.mxu0 %v22316_v33  ;;  %18195 = vmatpush3.bf16.msra.mxu0 %v20728_v46 }
 0x2ad   : > { %18196 = vmatprep.subr.bf16.mxu0 %v20729_v57 }
 0x2b0   : > { %18197 = vmatpush3.bf16.msra.mxu0 %v20729_v57 }
 0x2b3   : > { %18167 = vmatmul.mubr.bf16.gmra.mrb[16].mxu0 %v22318_v62 }
 0x2b4   : > { %18170 = vmatprep.mubr.bf16.mxu0 %v22330_v52 }
 0x2bb   : > { %18171 = vmatmul.mubr.bf16.gmra.mrb[20].mxu0 %v22332_v3 }
 0x2bc   : > { %18174 = vmatprep.mubr.bf16.mxu0 %v22344_v17 }
 0x2c3   : > { %18175 = vmatmul.mubr.bf16.gmra.mrb[24].mxu0 %v22346_v58 }
 0x2c4   : > { %18178 = vmatprep.mubr.bf16.mxu0 %v22354_v12 }
 0x2cb   : > { %18179 = vmatmul.mubr.bf16.gmra.mrb[28].mxu0 %v16280_v53 }
 0x2cc   : > { %18198 = vmatprep.mubr.bf16.mxu0 %v22261_v9  ;;  %v16289_v9 = vrot.slane %v3204_v50, 9 }
 0x2d3   : > { %18199 = vmatmul.mubr.bf16.vlgmr.msra.gmra.mrb[0].mxu0 %v22274_v35  ;;  %v3969_v35 = vrot.slane %v3967_v54, 4 }
 0x2d4   : > { %18202 = vmatprep.mubr.bf16.mxu0 %v22276_v18  ;;  %v3970_v18 = vrot.slane %v22232_v20, 5  ;;  %v20734_v20 = vld [vmem:[#allocation8 + $0xe0] sm:$0xff]  }
 0x2db   : > { %18203 = vmatmul.mubr.bf16.gmra.mrb[4].mxu0 %v22288_v2  ;;  %v3968_v2 = vsel %vm22237_vm14, %v16289_v9, %v3967_v54 }
 0x2dc   : > { %18206 = vmatprep.mubr.bf16.mxu0 %v22290_v15  ;;  %v3971_v15 = vsel %vm22237_vm14, %v3969_v35, %v3970_v18 }
 0x2e3   : > { %18207 = vmatmul.mubr.bf16.gmra.mrb[8].mxu0 %v22302_v16  ;;  %v16290_v16 = vcombine.low %v3968_v2, %v3971_v15  ;;  %v4789_v2 = vld [vmem:[#allocation2 + $0x14] sm:$0x1] }
 0x2e4   : > { %18210 = vmatprep.mubr.bf16.mxu0 %v22304_v59  ;;  %v20731_v59 = vld [vmem:[#allocation8 + $0xc8] sm:$0xff]  }
 0x2e5   : > { %18232 = vmatprep.subr.bf16.mxu1 %v20731_v59 }
 0x2e6   : > { %18233 = vmatpush3.bf16.msra.mxu1 %v20731_v59 }
 0x2e7   : > { %18234 = vmatprep.subr.bf16.mxu1 %v20732_v25 }
 0x2ea   : > { %18235 = vmatpush3.bf16.msra.mxu1 %v20732_v25 }
 0x2eb   : > { %18211 = vmatmul.mubr.bf16.gmra.mrb[12].mxu0 %v22316_v33  ;;  %v20733_v33 = vld [vmem:[#allocation8 + $0xd8] sm:$0xff]  }
 0x2ec   : > { %18214 = vmatprep.mubr.bf16.mxu0 %v22318_v62  ;;  %18236 = vmatprep.subr.bf16.mxu1 %v20733_v33  ;;  %v20735_v62 = vld [vmem:[#allocation8 + $0xe8] sm:$0xff]  }
 0x2ee   : > { %18237 = vmatpush3.bf16.msra.mxu1 %v20733_v33 }
 0x2ef   : > { %18238 = vmatprep.subr.bf16.mxu1 %v20734_v20 }
 0x2f2   : > { %18239 = vmatpush3.bf16.msra.mxu1 %v20734_v20 }
 0x2f3   : > { %18215 = vmatmul.mubr.bf16.gmra.mrb[16].mxu0 %v22330_v52  ;;  %18240 = vmatprep.subr.bf16.mxu1 %v20735_v62 }
 0x2f4   : > { %18218 = vmatprep.mubr.bf16.mxu0 %v22332_v3 }
 0x2f6   : > { %18241 = vmatpush3.bf16.msra.mxu1 %v20735_v62 }
 0x2f7   : > { %18242 = vmatprep.subr.bf16.mxu1 %v20736_v24 }
 0x2fa   : > { %18243 = vmatpush3.bf16.msra.mxu1 %v20736_v24 }
 0x2fb   : > { %18219 = vmatmul.mubr.bf16.gmra.mrb[20].mxu0 %v22344_v17  ;;  %18244 = vmatprep.subr.bf16.mxu1 %v20737_v43 }
 0x2fc   : > { %18222 = vmatprep.mubr.bf16.mxu0 %v22346_v58 }
 0x2fe   : > { %18245 = vmatpush3.bf16.msra.mxu1 %v20737_v43 }
 0x2ff   : > { %18278 = vmatprep.subr.bf16.mxu1 %v22398_v60 }
 0x303   : > { %18223 = vmatmul.mubr.bf16.gmra.mrb[24].mxu0 %v22354_v12  ;;  %v4792_v12 = vld [vmem:[#allocation2 + $0x18] sm:$0xf] }
 0x304   : > { %18226 = vmatprep.mubr.bf16.mxu0 %v16280_v53  ;;  %v4796_v53 = vld [vmem:[#allocation2 + $0x20] sm:$0x1] }
 0x30b   : > { %18227 = vmatmul.mubr.bf16.gmra.mrb[28].mxu0 %v16290_v16 }
 0x3a6   : > { %v18200_v22 = vpop.f32.mrb[0].mxu0 }
 0x3a7   : > { %v4243_v27 = vadd.f32 %v18200_v22, %v22404_v23  ;;  %v4075_v63 = vpop.f32.mrb[1].mxu0 }
 0x3a8   : > { %v4241_v52 = vadd.f32 %v22404_v23, %v4075_v63  ;;  %v18201_v3 = vpop.f32.mrb[2].mxu0 }
 0x3a9   : > { %vm4275_vm15 = vcmp.ge.f32.partialorder %v4243_v27, 0.0  ;;  %v4307_v56 = vmul.f32 0.1, %v4243_v27  ;;  %v4244_v5 = vadd.f32 %v18201_v3, %v22404_v23  ;;  %v4078_v42 = vpop.f32.mrb[3].mxu0 }
 0x3aa   : > { %vm4273_vm0 = vcmp.ge.f32.partialorder %v4241_v52, 0.0  ;;  %v4305_v4 = vmul.f32 0.1, %v4241_v52  ;;  %v4242_v39 = vadd.f32 %v22404_v23, %v4078_v42 }
 0x3ab   : > { %v4339_v21 = vsel %vm4275_vm15, %v4243_v27, %v4307_v56  ;;  %vm4276_vm1 = vcmp.ge.f32.partialorder %v4244_v5, 0.0  ;;  %v4308_v61 = vmul.f32 0.1, %v4244_v5 }
 0x3ac   : > { %v16839_v29 = vpack.c.bf16 %v4339_v21, %v4339_v21  ;;  %v4337_v44 = vsel %vm4273_vm0, %v4241_v52, %v4305_v4  ;;  %vm4274_vm3 = vcmp.ge.f32.partialorder %v4242_v39, 0.0  ;;  %v4306_v37 = vmul.f32 0.1, %v4242_v39 }
 0x3ad   : > { %v16837_v51 = vpack.c.bf16 %v4337_v44, %v4337_v44  ;;  %v4340_v6 = vsel %vm4276_vm1, %v4244_v5, %v4308_v61 }
 0x3ae   : > { %v4483_v48 = vshrl.u32 %v16839_v29, 16  ;;  %v4486_v11 = vshll.u32 %v16839_v29, 16  ;;  %v16840_v31 = vpack.c.bf16 %v4340_v6, %v4340_v6  ;;  %v4338_v17 = vsel %vm4274_vm3, %v4242_v39, %v4306_v37  ;;  %v18204_v58 = vpop.f32.mrb[4].mxu0 }
 0x3af   : > { %v4466_v40 = vshrl.u32 %v16837_v51, 16  ;;  %v4469_v13 = vshll.u32 %v16837_v51, 16  ;;  %v16838_v10 = vpack.c.bf16 %v4338_v17, %v4338_v17  ;;  %v4247_v30 = vadd.f32 %v18204_v58, %v22404_v23  ;;  %v4091_v38 = vpop.f32.mrb[5].mxu0 }
 0x3b0   : > { %v4485_v26 = vrot.slane %v4483_v48, 7  ;;  %v4491_v7 = vshrl.u32 %v16840_v31, 16  ;;  %v4494_v45 = vshll.u32 %v16840_v31, 16  ;;  %v4245_v47 = vadd.f32 %v22404_v23, %v4091_v38  ;;  %v18205_v1 = vpop.f32.mrb[6].mxu0  ;;  %v4806_v48 = vld [vmem:[#allocation2 + $0x30] sm:$0xf] }
 0x3b1   : > { %v4468_v8 = vrot.slane %v4466_v40, 7  ;;  %v4474_v0 = vshrl.u32 %v16838_v10, 16  ;;  %v4477_v46 = vshll.u32 %v16838_v10, 16  ;;  %vm4279_vm4 = vcmp.ge.f32.partialorder %v4247_v30, 0.0  ;;  %v4094_v57 = vpop.f32.mrb[7].mxu0 }
 0x3b2   : > { %v4488_v28 = vor.u32 %v4486_v11, %v4485_v26  ;;  %v4489_v41 = vrot.slane %v4485_v26, 4  ;;  %v4493_v55 = vrot.slane %v4491_v7, 7  ;;  %v4311_v36 = vmul.f32 0.1, %v4247_v30 }
 0x3b3   : > { %v4471_v32 = vor.u32 %v4469_v13, %v4468_v8  ;;  %v4472_v14 = vrot.slane %v4468_v8, 4  ;;  %v4476_v54 = vrot.slane %v4474_v0, 7  ;;  %vm4277_vm5 = vcmp.ge.f32.partialorder %v4245_v47, 0.0 }
 0x3b4   : > { %v4793_v9 = vsel %vm21598_vm8, %v4488_v28, %v4792_v12  ;;  %v4496_v35 = vor.u32 %v4494_v45, %v4493_v55  ;;  %v4498_v18 = vrot.slane %v4493_v55, 4  ;;  %v4343_v15 = vsel %vm4279_vm4, %v4247_v30, %v4311_v36  ;;  %v4799_v45 = vld [vmem:[#allocation2 + $0x24] sm:$0xf] }
 0x3b5   : > { %4794 = vst [vmem:[#allocation2 + $0x18] sm:$0xf] %v4793_v9  ;;  %v4786_v16 = vsel %vm21598_vm8, %v4471_v32, %v4785_v19  ;;  %v4479_v59 = vor.u32 %v4477_v46, %v4476_v54  ;;  %v4481_v25 = vrot.slane %v4476_v54, 4  ;;  %v16843_v33 = vpack.c.bf16 %v4343_v15, %v4343_v15  ;;  %v4810_v19 = vld [vmem:[#allocation2 + $0x38] sm:$0x1] }
 0x3b6   : > { %4787 = vst [vmem:[#allocation2 + $0xc] sm:$0xf] %v4786_v16  ;;  %v4497_v62 = vsel %vm21592_vm7, %v4489_v41, %v4496_v35  ;;  %v4797_v43 = vsel %vm21569_vm2, %v4498_v18, %v4796_v53  ;;  %v4309_v22 = vmul.f32 0.1, %v4245_v47  ;;  %v4248_v27 = vadd.f32 %v18205_v1, %v22404_v23  ;;  %v18208_v63 = vpop.f32.mrb[8].mxu0 }
 0x3b7   : > { %4795 = vst [vmem:[#allocation2 + $0x1c] sm:$0xf] %v4497_v62  ;;  %4798 = vst [vmem:[#allocation2 + $0x20] sm:$0x1] %v4797_v43  ;;  %v4480_v52 = vsel %vm21592_vm7, %v4472_v14, %v4479_v59  ;;  %v4790_v3 = vsel %vm21569_vm2, %v4481_v25, %v4789_v2  ;;  %v4517_v56 = vshrl.u32 %v16843_v33, 16  ;;  %v4520_v5 = vshll.u32 %v16843_v33, 16 }
 0x3b8   : > { %v4107_v42 = vpop.f32.mrb[9].mxu0  ;;  %4788 = vst [vmem:[#allocation2 + $0x10] sm:$0xf] %v4480_v52  ;;  %4791 = vst [vmem:[#allocation2 + $0x14] sm:$0x1] %v4790_v3  ;;  %v4341_v4 = vsel %vm4277_vm5, %v4245_v47, %v4309_v22  ;;  %vm4280_vm6 = vcmp.ge.f32.partialorder %v4248_v27, 0.0  ;;  %v4246_v21 = vadd.f32 %v22404_v23, %v4094_v57  ;;  %v4251_v37 = vadd.f32 %v18208_v63, %v22404_v23 }
 0x3b9   : > { %v4312_v39 = vmul.f32 0.1, %v4248_v27  ;;  %v18209_v61 = vpop.f32.mrb[10].mxu0  ;;  %v4519_v29 = vrot.slane %v4517_v56, 7  ;;  %v16841_v44 = vpack.c.bf16 %v4341_v4, %v4341_v4  ;;  %v4249_v51 = vadd.f32 %v22404_v23, %v4107_v42  ;;  %v20743_v33 = vld [vmem:[#allocation8 + $0x8] sm:$0xff]  }
 0x3ba   : > { %v22430_v6 = vpop.f32.mrb[11].mxu0  ;;  %vm4278_vm9 = vcmp.ge.f32.partialorder %v4246_v21, 0.0  ;;  %v4310_v31 = vmul.f32 0.1, %v4246_v21  ;;  %v4252_v17 = vadd.f32 %v18209_v61, %v22404_v23  ;;  %vm4283_vm10 = vcmp.ge.f32.partialorder %v4251_v37, 0.0 }
 0x3bb   : > { %v4344_v11 = vsel %vm4280_vm6, %v4248_v27, %v4312_v39  ;;  %v4522_v58 = vor.u32 %v4520_v5, %v4519_v29  ;;  %v4523_v40 = vrot.slane %v4519_v29, 4  ;;  %v4500_v13 = vshrl.u32 %v16841_v44, 16  ;;  %v4803_v22 = vld [vmem:[#allocation2 + $0x2c] sm:$0x1] }
 0x3bc   : > { %v4503_v10 = vshll.u32 %v16841_v44, 16  ;;  %v16844_v30 = vpack.c.bf16 %v4344_v11, %v4344_v11  ;;  %v4342_v38 = vsel %vm4278_vm9, %v4246_v21, %v4310_v31  ;;  %v4315_v26 = vmul.f32 0.1, %v4251_v37  ;;  %v4820_v44 = vld [vmem:[#allocation2 + $0x48] sm:$0xf] }
 0x3bd   : > { %v4807_v12 = vsel %vm21598_vm8, %v4522_v58, %v4806_v48  ;;  %v4502_v7 = vrot.slane %v4500_v13, 7  ;;  %v16842_v47 = vpack.c.bf16 %v4342_v38, %v4342_v38  ;;  %vm4281_vm12 = vcmp.ge.f32.partialorder %v4249_v51, 0.0  ;;  %v20746_v48 = vld [vmem:[#allocation8 + $0x10] sm:$0xff]  }
 0x3be   : > { %4808 = vst [vmem:[#allocation2 + $0x30] sm:$0xf] %v4807_v12  ;;  %v4525_v1 = vshrl.u32 %v16844_v30, 16  ;;  %v4528_v8 = vshll.u32 %v16844_v30, 16  ;;  %v4347_v0 = vsel %vm4283_vm10, %v4251_v37, %v4315_v26  ;;  %v4313_v46 = vmul.f32 0.1, %v4249_v51 }
 0x3bf   : > { %v18212_v57 = vpop.f32.mrb[12].mxu0  ;;  %v4505_v28 = vor.u32 %v4503_v10, %v4502_v7  ;;  %v4506_v41 = vrot.slane %v4502_v7, 4  ;;  %v4508_v55 = vshrl.u32 %v16842_v47, 16  ;;  %v4511_v36 = vshll.u32 %v16842_v47, 16  ;;  %v22439_v35 = vld [vmem:[#allocation2 + $0xc] sm:$0xff]   ;;  %v22443_v25 = vld [vmem:[#allocation2 + $0x18] sm:$0xff]  }
 0x3c0   : > { %v22435_v32 = vpop.f32.mrb[13].mxu0  ;;  %v4527_v14 = vrot.slane %v4525_v1, 7  ;;  %v16847_v53 = vpack.c.bf16 %v4347_v0, %v4347_v0  ;;  %v4345_v54 = vsel %vm4281_vm12, %v4249_v51, %v4313_v46  ;;  %vm4284_vm13 = vcmp.ge.f32.partialorder %v4252_v17, 0.0  ;;  %18246 = vmatprep.mubr.bf16.mxu1 %v22439_v35 }
 0x3c1   : > { %v22437_v9 = vpop.f32.mrb[14].mxu0  ;;  %v4800_v18 = vsel %vm21598_vm8, %v4505_v28, %v4799_v45  ;;  %v4510_v2 = vrot.slane %v4508_v55, 7  ;;  %v16845_v15 = vpack.c.bf16 %v4345_v54, %v4345_v54  ;;  %v4316_v16 = vmul.f32 0.1, %v4252_v17  ;;  %18247 = vmatmul.mubr.bf16.vlgmr.msra.gmra.mrb[0].mxu1 %v22443_v25 }
 0x3c2   : > { %v4126_v59 = vpop.f32.mrb[15].mxu0  ;;  %4801 = vst [vmem:[#allocation2 + $0x24] sm:$0xf] %v4800_v18  ;;  %v4530_v62 = vor.u32 %v4528_v8, %v4527_v14  ;;  %v4532_v43 = vrot.slane %v4527_v14, 4  ;;  %v4551_v27 = vshrl.u32 %v16847_v53, 16  ;;  %v4554_v63 = vshll.u32 %v16847_v53, 16  ;;  %18279 = vmatpush3.bf16.msra.mxu1 %v22398_v60 }
 0x3c3   : > { %v4513_v52 = vor.u32 %v4511_v36, %v4510_v2  ;;  %v4515_v3 = vrot.slane %v4510_v2, 4  ;;  %v4534_v56 = vshrl.u32 %v16845_v15, 16  ;;  %v4537_v5 = vshll.u32 %v16845_v15, 16  ;;  %18280 = vmatprep.subr.bf16.mxu1 %v20743_v33 }
 0x3c4   : > { %v4531_v42 = vsel %vm21592_vm7, %v4523_v40, %v4530_v62  ;;  %v4811_v4 = vsel %vm21569_vm2, %v4532_v43, %v4810_v19  ;;  %v4553_v39 = vrot.slane %v4551_v27, 7  ;;  %v4348_v21 = vsel %vm4284_vm13, %v4252_v17, %v4316_v16  ;;  %v4813_v17 = vld [vmem:[#allocation2 + $0x3c] sm:$0xf]  ;;  %v4817_v62 = vld [vmem:[#allocation2 + $0x44] sm:$0x1] }
 0x3c5   : > { %4809 = vst [vmem:[#allocation2 + $0x34] sm:$0xf] %v4531_v42  ;;  %4812 = vst [vmem:[#allocation2 + $0x38] sm:$0x1] %v4811_v4  ;;  %v4514_v61 = vsel %vm21592_vm7, %v4506_v41, %v4513_v52  ;;  %v4804_v29 = vsel %vm21569_vm2, %v4515_v3, %v4803_v22  ;;  %v22457_v37 = vrot.slane %v4534_v56, 7  ;;  %v16848_v51 = vpack.c.bf16 %v4348_v21, %v4348_v21 }
 0x3c6   : > { %4802 = vst [vmem:[#allocation2 + $0x28] sm:$0xf] %v4514_v61  ;;  %4805 = vst [vmem:[#allocation2 + $0x2c] sm:$0x1] %v4804_v29  ;;  %v4556_v11 = vor.u32 %v4554_v63, %v4553_v39  ;;  %v4557_v31 = vrot.slane %v4553_v39, 4  ;;  %v4250_v60 = vadd.f32 %v22404_v23, %v22430_v6  ;;  %v4255_v58 = vadd.f32 %v18212_v57, %v22404_v23  ;;  %v18216_v40 = vpop.f32.mrb[16].mxu0 }
 0x3c7   : > { %v4539_v13 = vor.u32 %v4537_v5, %v22457_v37  ;;  %v4540_v10 = vrot.slane %v22457_v37, 4  ;;  %v4559_v30 = vshrl.u32 %v16848_v51, 16  ;;  %v4562_v38 = vshll.u32 %v16848_v51, 16  ;;  %v22464_v26 = vpop.f32.mrb[17].mxu0  ;;  %18281 = vmatpush3.bf16.msra.mxu1 %v20743_v33  ;;  %v20749_v6 = vld [vmem:[#allocation8 + $0x18] sm:$0xff]   ;;  %v20752_v33 = vld [vmem:[#allocation8 + $0x20] sm:$0xff]  }
 0x3c8   : > { %v4821_v12 = vsel %vm21598_vm8, %v4556_v11, %v4820_v44  ;;  %vm4282_vm15 = vcmp.ge.f32.partialorder %v4250_v60, 0.0  ;;  %v4314_v7 = vmul.f32 0.1, %v4250_v60  ;;  %vm4287_vm0 = vcmp.ge.f32.partialorder %v4255_v58, 0.0  ;;  %v22468_v45 = vpop.f32.mrb[18].mxu0  ;;  %18282 = vmatprep.subr.bf16.mxu1 %v20746_v48 }
 0x3c9   : > { %4822 = vst [vmem:[#allocation2 + $0x48] sm:$0xf] %v4821_v12  ;;  %v4814_v47 = vsel %vm21598_vm8, %v4539_v13, %v4813_v17  ;;  %v4561_v1 = vrot.slane %v4559_v30, 7  ;;  %v4319_v8 = vmul.f32 0.1, %v4255_v58  ;;  %v4253_v0 = vadd.f32 %v22404_v23, %v22435_v32  ;;  %v22474_v46 = vpop.f32.mrb[19].mxu0 }
 0x3ca   : > { %4815 = vst [vmem:[#allocation2 + $0x3c] sm:$0xf] %v4814_v47  ;;  %v4824_v57 = vld [vmem:[#allocation2 + $0x50] sm:$0x1]  ;;  %v4346_v28 = vsel %vm4282_vm15, %v4250_v60, %v4314_v7  ;;  %v4256_v41 = vadd.f32 %v22437_v9, %v22404_v23  ;;  %v4254_v19 = vadd.f32 %v22404_v23, %v4126_v59  ;;  %v4259_v55 = vadd.f32 %v18216_v40, %v22404_v23  ;;  %v4834_v5 = vld [vmem:[#allocation2 + $0x60] sm:$0xf] }
 0x3cb   : > { %v4564_v36 = vor.u32 %v4562_v38, %v4561_v1  ;;  %v4566_v14 = vrot.slane %v4561_v1, 4  ;;  %v16846_v53 = vpack.c.bf16 %v4346_v28, %v4346_v28  ;;  %v4351_v54 = vsel %vm4287_vm0, %v4255_v58, %v4319_v8  ;;  %18283 = vmatpush3.bf16.msra.mxu1 %v20746_v48  ;;  %v20755_v30 = vld [vmem:[#allocation8 + $0x28] sm:$0xff]   ;;  %v4827_v1 = vld [vmem:[#allocation2 + $0x54] sm:$0xf] }
 0x3cc   : > { %v16851_v18 = vpack.c.bf16 %v4351_v54, %v4351_v54  ;;  %vm4285_vm1 = vcmp.ge.f32.partialorder %v4253_v0, 0.0  ;;  %v4317_v32 = vmul.f32 0.1, %v4253_v0  ;;  %vm4288_vm3 = vcmp.ge.f32.partialorder %v4256_v41, 0.0  ;;  %18284 = vmatprep.subr.bf16.mxu1 %v20749_v6  ;;  %v22488_v52 = vld [vmem:[#allocation2 + $0x30] sm:$0xff]  }
 0x3cd   : > { %v4565_v2 = vsel %vm21592_vm7, %v4557_v31, %v4564_v36  ;;  %v4825_v9 = vsel %vm21569_vm2, %v4566_v14, %v4824_v57  ;;  %v4542_v15 = vshrl.u32 %v16846_v53, 16  ;;  %v4545_v16 = vshll.u32 %v16846_v53, 16  ;;  %v22485_v59 = vld [vmem:[#allocation2 + $0x24] sm:$0xff]  }
 0x3ce   : > { %4823 = vst [vmem:[#allocation2 + $0x4c] sm:$0xf] %v4565_v2  ;;  %4826 = vst [vmem:[#allocation2 + $0x50] sm:$0x1] %v4825_v9  ;;  %v4585_v43 = vshrl.u32 %v16851_v18, 16  ;;  %v4588_v22 = vshll.u32 %v16851_v18, 16  ;;  %v4349_v27 = vsel %vm4285_vm1, %v4253_v0, %v4317_v32  ;;  %18250 = vmatprep.mubr.bf16.mxu1 %v22485_v59  ;;  %v4257_v14 = vadd.f32 %v22404_v23, %v22464_v26 }
 0x3cf   : > { %v4320_v63 = vmul.f32 0.1, %v4256_v41  ;;  %v18220_v3 = vpop.f32.mrb[20].mxu0  ;;  %v4544_v56 = vrot.slane %v4542_v15, 7  ;;  %v16849_v42 = vpack.c.bf16 %v4349_v27, %v4349_v27  ;;  %vm4286_vm4 = vcmp.ge.f32.partialorder %v4254_v19, 0.0  ;;  %18251 = vmatmul.mubr.bf16.gmra.mrb[4].mxu1 %v22488_v52  ;;  %v20758_v18 = vld [vmem:[#allocation8 + $0x30] sm:$0xff]  }
 0x3d0   : > { %v4318_v4 = vmul.f32 0.1, %v4254_v19  ;;  %v22491_v39 = vpop.f32.mrb[21].mxu0  ;;  %v22493_v21 = vrot.slane %v4585_v43, 7  ;;  %vm4291_vm5 = vcmp.ge.f32.partialorder %v4259_v55, 0.0  ;;  %18285 = vmatpush3.bf16.msra.mxu1 %v20749_v6  ;;  %v4260_v53 = vadd.f32 %v22468_v45, %v22404_v23 }
 0x3d1   : > { %v4352_v61 = vsel %vm4288_vm3, %v4256_v41, %v4320_v63  ;;  %v4323_v29 = vmul.f32 0.1, %v4259_v55  ;;  %v22497_v44 = vpop.f32.mrb[22].mxu0  ;;  %v4547_v51 = vor.u32 %v4545_v16, %v4544_v56  ;;  %v4549_v48 = vrot.slane %v4544_v56, 4  ;;  %18286 = vmatprep.subr.bf16.mxu1 %v20752_v33  ;;  %v4838_v32 = vld [vmem:[#allocation2 + $0x68] sm:$0x1] }
 0x3d2   : > { %v4568_v11 = vshrl.u32 %v16849_v42, 16  ;;  %v4571_v31 = vshll.u32 %v16849_v42, 16  ;;  %v22499_v17 = vpop.f32.mrb[23].mxu0  ;;  %v4590_v60 = vor.u32 %v4588_v22, %v22493_v21  ;;  %v4591_v58 = vrot.slane %v22493_v21, 4  ;;  %v4831_v45 = vld [vmem:[#allocation2 + $0x5c] sm:$0x1] }
 0x3d3   : > { %v16852_v40 = vpack.c.bf16 %v4352_v61, %v4352_v61  ;;  %v4350_v13 = vsel %vm4286_vm4, %v4254_v19, %v4318_v4  ;;  %v4548_v38 = vsel %vm21592_vm7, %v4540_v10, %v4547_v51  ;;  %v4818_v12 = vsel %vm21569_vm2, %v4549_v48, %v4817_v62  ;;  %v4848_v4 = vld [vmem:[#allocation2 + $0x78] sm:$0xf]  ;;  %v20761_v21 = vld [vmem:[#allocation8 + $0x38] sm:$0xff]  }
 0x3d4   : > { %v4570_v7 = vrot.slane %v4568_v11, 7  ;;  %v16850_v47 = vpack.c.bf16 %v4350_v13, %v4350_v13  ;;  %4816 = vst [vmem:[#allocation2 + $0x40] sm:$0xf] %v4548_v38  ;;  %4819 = vst [vmem:[#allocation2 + $0x44] sm:$0x1] %v4818_v12  ;;  %v4835_v6 = vsel %vm21598_vm8, %v4590_v60, %v4834_v5  ;;  %v4355_v57 = vsel %vm4291_vm5, %v4259_v55, %v4323_v29 }
 0x3d5   : > { %v4593_v8 = vshrl.u32 %v16852_v40, 16  ;;  %v4596_v0 = vshll.u32 %v16852_v40, 16  ;;  %4836 = vst [vmem:[#allocation2 + $0x60] sm:$0xf] %v4835_v6  ;;  %18287 = vmatpush3.bf16.msra.mxu1 %v20752_v33  ;;  %v16855_v36 = vpack.c.bf16 %v4355_v57, %v4355_v57  ;;  %v4258_v9 = vadd.f32 %v22404_v23, %v22474_v46  ;;  %v22544_v40 = vld [vmem:[#allocation2 + $0x48] sm:$0xff]  }
 0x3d6   : > { %v4573_v37 = vor.u32 %v4571_v31, %v4570_v7  ;;  %v4574_v28 = vrot.slane %v4570_v7, 4  ;;  %v4576_v41 = vshrl.u32 %v16850_v47, 16  ;;  %v4579_v10 = vshll.u32 %v16850_v47, 16  ;;  %v22517_v54 = vpop.f32.mrb[24].mxu0  ;;  %18288 = vmatprep.subr.bf16.mxu1 %v20755_v30 }
 0x3d7   : > { %v4595_v19 = vrot.slane %v4593_v8, 7  ;;  %v4263_v15 = vadd.f32 %v18220_v3, %v22404_v23  ;;  %v22524_v16 = vpop.f32.mrb[25].mxu0  ;;  %v4619_v62 = vshrl.u32 %v16855_v36, 16  ;;  %v4622_v43 = vshll.u32 %v16855_v36, 16  ;;  %v22553_v8 = vld [vmem:[#allocation8 + $0x180] sm:$0xff]  }
 0x3d8   : > { %v4828_v55 = vsel %vm21598_vm8, %v4573_v37, %v4827_v1  ;;  %v4578_v2 = vrot.slane %v4576_v41, 7  ;;  %v22526_v22 = vpop.f32.mrb[26].mxu0  ;;  %vm4289_vm6 = vcmp.ge.f32.partialorder %v4257_v14, 0.0  ;;  %v4321_v56 = vmul.f32 0.1, %v4257_v14 }
 0x3d9   : > { %4829 = vst [vmem:[#allocation2 + $0x54] sm:$0xf] %v4828_v55  ;;  %v4598_v26 = vor.u32 %v4596_v0, %v4595_v19  ;;  %v4600_v33 = vrot.slane %v4595_v19, 4  ;;  %v22528_v5 = vpop.f32.mrb[27].mxu0  ;;  %18289 = vmatpush3.bf16.msra.mxu1 %v20755_v30  ;;  %v22534_v42 = vrot.slane %v4619_v62, 7  ;;  %vm4292_vm9 = vcmp.ge.f32.partialorder %v4260_v53, 0.0 }
 0x3da   : > { %v4581_v27 = vor.u32 %v4579_v10, %v4578_v2  ;;  %v4583_v63 = vrot.slane %v4578_v2, 4  ;;  %18290 = vmatprep.subr.bf16.mxu1 %v20758_v18  ;;  %v4353_v51 = vsel %vm4289_vm6, %v4257_v14, %v4321_v56  ;;  %v4324_v48 = vmul.f32 0.1, %v4260_v53  ;;  %v4841_v19 = vld [vmem:[#allocation2 + $0x6c] sm:$0xf] }
 0x3db   : > { %v4599_v46 = vsel %vm21592_vm7, %v4591_v58, %v4598_v26  ;;  %v4839_v3 = vsel %vm21569_vm2, %v4600_v33, %v4838_v32  ;;  %v22540_v11 = vld [vmem:[#allocation2 + $0x3c] sm:$0xff]   ;;  %v4624_v31 = vor.u32 %v4622_v43, %v22534_v42  ;;  %v4625_v60 = vrot.slane %v22534_v42, 4 }
 0x3dc   : > { %4837 = vst [vmem:[#allocation2 + $0x64] sm:$0xf] %v4599_v46  ;;  %4840 = vst [vmem:[#allocation2 + $0x68] sm:$0x1] %v4839_v3  ;;  %v4582_v61 = vsel %vm21592_vm7, %v4574_v28, %v4581_v27  ;;  %v4832_v29 = vsel %vm21569_vm2, %v4583_v63, %v4831_v45  ;;  %v16853_v58 = vpack.c.bf16 %v4353_v51, %v4353_v51  ;;  %vm4290_vm10 = vcmp.ge.f32.partialorder %v4258_v9, 0.0 }
 0x3dd   : > { %4830 = vst [vmem:[#allocation2 + $0x58] sm:$0xf] %v4582_v61  ;;  %4833 = vst [vmem:[#allocation2 + $0x5c] sm:$0x1] %v4832_v29  ;;  %v4356_v13 = vsel %vm4292_vm9, %v4260_v53, %v4324_v48  ;;  %v4322_v30 = vmul.f32 0.1, %v4258_v9  ;;  %18254 = vmatprep.mubr.bf16.mxu1 %v22540_v11  ;;  %18291 = vmatpush3.bf16.msra.mxu1 %v20758_v18  ;;  %v4849_v12 = vsel %vm21598_vm8, %v4624_v31, %v4848_v4 }
 0x3de   : > { %vm4295_vm12 = vcmp.ge.f32.partialorder %v4263_v15, 0.0  ;;  %v4327_v38 = vmul.f32 0.1, %v4263_v15  ;;  %v4602_v7 = vshrl.u32 %v16853_v58, 16  ;;  %v4605_v47 = vshll.u32 %v16853_v58, 16  ;;  %18255 = vmatmul.mubr.bf16.gmra.mrb[8].mxu1 %v22544_v40  ;;  %v22551_v1 = vpop.f32.mrb[28].mxu0  ;;  %18292 = vmatprep.subr.bf16.mxu1 %v20761_v21 }
 0x3df   : > { %v16856_v6 = vpack.c.bf16 %v4356_v13, %v4356_v13  ;;  %4850 = vst [vmem:[#allocation2 + $0x78] sm:$0xf] %v4849_v12  ;;  %v4354_v0 = vsel %vm4290_vm10, %v4258_v9, %v4322_v30  ;;  %v4261_v37 = vadd.f32 %v22404_v23, %v22491_v39  ;;  %v4264_v28 = vadd.f32 %v22497_v44, %v22404_v23  ;;  %v22560_v41 = vpop.f32.mrb[29].mxu0  ;;  %v4852_v55 = vld [vmem:[#allocation2 + $0x80] sm:$0x1] }
 0x3e0   : > { %v4359_v57 = vsel %vm4295_vm12, %v4263_v15, %v4327_v38  ;;  %v4604_v10 = vrot.slane %v4602_v7, 7  ;;  %v16854_v53 = vpack.c.bf16 %v4354_v0, %v4354_v0  ;;  %v22562_v18 = vpop.f32.mrb[30].mxu0  ;;  %v4845_v4 = vld [vmem:[#allocation2 + $0x74] sm:$0x1]  ;;  %v4262_v51 = vadd.f32 %v22404_v23, %v22499_v17  ;;  %v4862_v30 = vld [vmem:[#allocation2 + $0x90] sm:$0xf] }
 0x3e1   : > { %v4627_v36 = vshrl.u32 %v16856_v6, 16  ;;  %v4630_v14 = vshll.u32 %v16856_v6, 16  ;;  %v16859_v32 = vpack.c.bf16 %v4359_v57, %v4359_v57  ;;  %vm4293_vm13 = vcmp.ge.f32.partialorder %v4261_v37, 0.0  ;;  %v22564_v9 = vpop.f32.mrb[31].mxu0  ;;  %18293 = vmatpush3.bf16.msra.mxu1 %v20761_v21 }
 0x3e2   : > { %v4325_v2 = vmul.f32 0.1, %v4261_v37  ;;  %vm4296_vm15 = vcmp.ge.f32.partialorder %v4264_v28, 0.0  ;;  %v4607_v39 = vor.u32 %v4605_v47, %v4604_v10  ;;  %v4608_v15 = vrot.slane %v4604_v10, 4  ;;  %18326 = vmatprep.subr.bf16.mxu1 %v22553_v8 }
 0x3e3   : > { %v4629_v44 = vrot.slane %v4627_v36, 7  ;;  %v4610_v26 = vshrl.u32 %v16854_v53, 16  ;;  %v4613_v33 = vshll.u32 %v16854_v53, 16  ;;  %v4653_v45 = vshrl.u32 %v16859_v32, 16  ;;  %v22571_v42 = vld [vmem:[#allocation2 + $0x60] sm:$0xff]  }
 0x3e4   : > { %v4656_v62 = vshll.u32 %v16859_v32, 16  ;;  %v4357_v43 = vsel %vm4293_vm13, %v4261_v37, %v4325_v2  ;;  %v22567_v27 = vld [vmem:[#allocation2 + $0x54] sm:$0xff]   ;;  %v4842_v63 = vsel %vm21598_vm8, %v4607_v39, %v4841_v19  ;;  %v4328_v29 = vmul.f32 0.1, %v4264_v28  ;;  %v4855_v19 = vld [vmem:[#allocation2 + $0x84] sm:$0xf] }
 0x3e5   : > { %v4632_v56 = vor.u32 %v4630_v14, %v4629_v44  ;;  %v4634_v46 = vrot.slane %v4629_v44, 4  ;;  %v4612_v3 = vrot.slane %v4610_v26, 7  ;;  %4843 = vst [vmem:[#allocation2 + $0x6c] sm:$0xf] %v4842_v63  ;;  %v4655_v21 = vrot.slane %v4653_v45, 7  ;;  %18258 = vmatprep.mubr.bf16.mxu1 %v22567_v27 }
 0x3e6   : > { %v16857_v61 = vpack.c.bf16 %v4357_v43, %v4357_v43  ;;  %18259 = vmatmul.mubr.bf16.gmra.mrb[12].mxu1 %v22571_v42  ;;  %v4360_v6 = vsel %vm4296_vm15, %v4264_v28, %v4328_v29  ;;  %vm4294_vm0 = vcmp.ge.f32.partialorder %v4262_v51, 0.0  ;;  %v4326_v10 = vmul.f32 0.1, %v4262_v51 }
 0x3e7   : > { %v4633_v48 = vsel %vm21592_vm7, %v4625_v60, %v4632_v56  ;;  %v4853_v31 = vsel %vm21569_vm2, %v4634_v46, %v4852_v55  ;;  %v4615_v58 = vor.u32 %v4613_v33, %v4612_v3  ;;  %v4617_v13 = vrot.slane %v4612_v3, 4 }
 0x3e8   : > { %4851 = vst [vmem:[#allocation2 + $0x7c] sm:$0xf] %v4633_v48  ;;  %4854 = vst [vmem:[#allocation2 + $0x80] sm:$0x1] %v4853_v31  ;;  %v4658_v38 = vor.u32 %v4656_v62, %v4655_v21  ;;  %v4659_v12 = vrot.slane %v4655_v21, 4  ;;  %v4636_v7 = vshrl.u32 %v16857_v61, 16  ;;  %v16860_v37 = vpack.c.bf16 %v4360_v6, %v4360_v6 }
 0x3e9   : > { %v4639_v47 = vshll.u32 %v16857_v61, 16  ;;  %v4616_v17 = vsel %vm21592_vm7, %v4608_v15, %v4615_v58  ;;  %v4846_v60 = vsel %vm21569_vm2, %v4617_v13, %v4845_v4  ;;  %v4267_v36 = vadd.f32 %v22517_v54, %v22404_v23  ;;  %v4859_v13 = vld [vmem:[#allocation2 + $0x8c] sm:$0x1] }
 0x3ea   : > { %4844 = vst [vmem:[#allocation2 + $0x70] sm:$0xf] %v4616_v17  ;;  %4847 = vst [vmem:[#allocation2 + $0x74] sm:$0x1] %v4846_v60  ;;  %v4863_v0 = vsel %vm21598_vm8, %v4658_v38, %v4862_v30  ;;  %v4638_v57 = vrot.slane %v4636_v7, 7  ;;  %v4265_v14 = vadd.f32 %v22404_v23, %v22524_v16  ;;  %v4268_v28 = vadd.f32 %v22526_v22, %v22404_v23 }
 0x3eb   : > { %4864 = vst [vmem:[#allocation2 + $0x90] sm:$0xf] %v4863_v0  ;;  %v4266_v53 = vadd.f32 %v22404_v23, %v22528_v5  ;;  %v4661_v2 = vshrl.u32 %v16860_v37, 16  ;;  %v4664_v39 = vshll.u32 %v16860_v37, 16  ;;  %v4358_v15 = vsel %vm4294_vm0, %v4262_v51, %v4326_v10  ;;  %v4866_v16 = vld [vmem:[#allocation2 + $0x98] sm:$0x1] }
 0x3ec   : > { %v4641_v55 = vor.u32 %v4639_v47, %v4638_v57  ;;  %v4642_v32 = vrot.slane %v4638_v57, 4  ;;  %vm4299_vm1 = vcmp.ge.f32.partialorder %v4267_v36, 0.0  ;;  %v4331_v44 = vmul.f32 0.1, %v4267_v36 }
 0x3ed   : > { %vm4297_vm3 = vcmp.ge.f32.partialorder %v4265_v14, 0.0  ;;  %v4663_v26 = vrot.slane %v4661_v2, 7  ;;  %v16858_v33 = vpack.c.bf16 %v4358_v15, %v4358_v15  ;;  %v4329_v45 = vmul.f32 0.1, %v4265_v14 }
 0x3ee   : > { %v4856_v54 = vsel %vm21598_vm8, %v4641_v55, %v4855_v19  ;;  %v4363_v22 = vsel %vm4299_vm1, %v4267_v36, %v4331_v44  ;;  %vm4300_vm4 = vcmp.ge.f32.partialorder %v4268_v28, 0.0  ;;  %v4332_v5 = vmul.f32 0.1, %v4268_v28 }
 0x3ef   : > { %4857 = vst [vmem:[#allocation2 + $0x84] sm:$0xf] %v4856_v54  ;;  %vm4298_vm5 = vcmp.ge.f32.partialorder %v4266_v53, 0.0  ;;  %v4666_v62 = vor.u32 %v4664_v39, %v4663_v26  ;;  %v4668_v43 = vrot.slane %v4663_v26, 4  ;;  %v4644_v63 = vshrl.u32 %v16858_v33, 16  ;;  %v22606_v58 = vld [vmem:[#allocation2 + $0x78] sm:$0xff]  }
 0x3f0   : > { %v4647_v56 = vshll.u32 %v16858_v33, 16  ;;  %v16863_v46 = vpack.c.bf16 %v4363_v22, %v4363_v22  ;;  %v4361_v3 = vsel %vm4297_vm3, %v4265_v14, %v4329_v45  ;;  %v4364_v4 = vsel %vm4300_vm4, %v4268_v28, %v4332_v5  ;;  %v4876_v14 = vld [vmem:[#allocation2 + $0xa8] sm:$0xf]  ;;  %v4869_v39 = vld [vmem:[#allocation2 + $0x9c] sm:$0xf] }
 0x3f1   : > { %v4330_v21 = vmul.f32 0.1, %v4266_v53  ;;  %v22600_v61 = vld [vmem:[#allocation2 + $0x6c] sm:$0xff]   ;;  %v4667_v29 = vsel %vm21592_vm7, %v4659_v12, %v4666_v62  ;;  %v4867_v51 = vsel %vm21569_vm2, %v4668_v43, %v4866_v16  ;;  %v4646_v48 = vrot.slane %v4644_v63, 7  ;;  %v4873_v62 = vld [vmem:[#allocation2 + $0xa4] sm:$0x1] }
 0x3f2   : > { %v16861_v31 = vpack.c.bf16 %v4361_v3, %v4361_v3  ;;  %4865 = vst [vmem:[#allocation2 + $0x94] sm:$0xf] %v4667_v29  ;;  %4868 = vst [vmem:[#allocation2 + $0x98] sm:$0x1] %v4867_v51  ;;  %v4687_v30 = vshrl.u32 %v16863_v46, 16  ;;  %v4690_v38 = vshll.u32 %v16863_v46, 16  ;;  %v16864_v7 = vpack.c.bf16 %v4364_v4, %v4364_v4  ;;  %18262 = vmatprep.mubr.bf16.mxu1 %v22600_v61 }
 0x3f3   : > { %v4362_v47 = vsel %vm4298_vm5, %v4266_v53, %v4330_v21  ;;  %v4649_v17 = vor.u32 %v4647_v56, %v4646_v48  ;;  %v4651_v60 = vrot.slane %v4646_v48, 4  ;;  %18263 = vmatmul.mubr.bf16.gmra.mrb[16].mxu1 %v22606_v58  ;;  %v4271_v53 = vadd.f32 %v22551_v1, %v22404_v23  ;;  %v4880_v16 = vld [vmem:[#allocation2 + $0xb0] sm:$0x1] }
 0x3f4   : > { %v4670_v12 = vshrl.u32 %v16861_v31, 16  ;;  %v4673_v6 = vshll.u32 %v16861_v31, 16  ;;  %v4689_v0 = vrot.slane %v4687_v30, 7  ;;  %v4695_v57 = vshrl.u32 %v16864_v7, 16 }
 0x3f5   : > { %v4698_v37 = vshll.u32 %v16864_v7, 16  ;;  %v16862_v10 = vpack.c.bf16 %v4362_v47, %v4362_v47  ;;  %v4650_v19 = vsel %vm21592_vm7, %v4642_v32, %v4649_v17  ;;  %v4860_v36 = vsel %vm21569_vm2, %v4651_v60, %v4859_v13 }
 0x3f6   : > { %v4672_v28 = vrot.slane %v4670_v12, 7  ;;  %4858 = vst [vmem:[#allocation2 + $0x88] sm:$0xf] %v4650_v19  ;;  %4861 = vst [vmem:[#allocation2 + $0x8c] sm:$0x1] %v4860_v36  ;;  %v4692_v55 = vor.u32 %v4690_v38, %v4689_v0  ;;  %v4693_v2 = vrot.slane %v4689_v0, 4  ;;  %v4269_v63 = vadd.f32 %v22404_v23, %v22560_v41 }
 0x3f7   : > { %v4697_v15 = vrot.slane %v4695_v57, 7  ;;  %v4678_v44 = vshrl.u32 %v16862_v10, 16  ;;  %v4681_v33 = vshll.u32 %v16862_v10, 16  ;;  %vm4303_vm6 = vcmp.ge.f32.partialorder %v4271_v53, 0.0  ;;  %v4890_v10 = vld [vmem:[#allocation2 + $0xc0] sm:$0xf] }
 0x3f8   : > { %v4675_v54 = vor.u32 %v4673_v6, %v4672_v28  ;;  %v4676_v26 = vrot.slane %v4672_v28, 4  ;;  %v4877_v32 = vsel %vm21598_vm8, %v4692_v55, %v4876_v14  ;;  %v4335_v43 = vmul.f32 0.1, %v4271_v53 }
 0x3f9   : > { %v4700_v45 = vor.u32 %v4698_v37, %v4697_v15  ;;  %v4702_v22 = vrot.slane %v4697_v15, 4  ;;  %v4680_v5 = vrot.slane %v4678_v44, 7  ;;  %4878 = vst [vmem:[#allocation2 + $0xa8] sm:$0xf] %v4877_v32  ;;  %v4272_v56 = vadd.f32 %v22562_v18, %v22404_v23  ;;  %v22638_v60 = vld [vmem:[#allocation2 + $0x90] sm:$0xff]  }
 0x3fa   : > { %v4870_v1 = vsel %vm21598_vm8, %v4675_v54, %v4869_v39  ;;  %v4367_v29 = vsel %vm4303_vm6, %v4271_v53, %v4335_v43  ;;  %vm4301_vm9 = vcmp.ge.f32.partialorder %v4269_v63, 0.0  ;;  %v4333_v51 = vmul.f32 0.1, %v4269_v63  ;;  %v4883_v53 = vld [vmem:[#allocation2 + $0xb4] sm:$0xf] }
 0x3fb   : > { %4871 = vst [vmem:[#allocation2 + $0x9c] sm:$0xf] %v4870_v1  ;;  %v4701_v46 = vsel %vm21592_vm7, %v4693_v2, %v4700_v45  ;;  %v4881_v3 = vsel %vm21569_vm2, %v4702_v22, %v4880_v16  ;;  %v4683_v4 = vor.u32 %v4681_v33, %v4680_v5  ;;  %v4685_v21 = vrot.slane %v4680_v5, 4  ;;  %v4894_v44 = vld [vmem:[#allocation2 + $0xc8] sm:$0x1] }
 0x3fc   : > { %4879 = vst [vmem:[#allocation2 + $0xac] sm:$0xf] %v4701_v46  ;;  %4882 = vst [vmem:[#allocation2 + $0xb0] sm:$0x1] %v4881_v3  ;;  %vm4304_vm10 = vcmp.ge.f32.partialorder %v4272_v56, 0.0  ;;  %v16867_v48 = vpack.c.bf16 %v4367_v29, %v4367_v29  ;;  %v4365_v13 = vsel %vm4301_vm9, %v4269_v63, %v4333_v51  ;;  %v4270_v30 = vadd.f32 %v22404_v23, %v22564_v9  ;;  %v20762_v51 = vld [vmem:[#allocation2] sm:$0xff]  }
 0x3fd   : > { %v4684_v41 = vsel %vm21592_vm7, %v4676_v26, %v4683_v4  ;;  %v4874_v18 = vsel %vm21569_vm2, %v4685_v21, %v4873_v62  ;;  %v4336_v31 = vmul.f32 0.1, %v4272_v56  ;;  %v22636_v38 = vld [vmem:[#allocation2 + $0x84] sm:$0xff]   ;;  %v16865_v47 = vpack.c.bf16 %v4365_v13, %v4365_v13  ;;  %v4887_v63 = vld [vmem:[#allocation2 + $0xbc] sm:$0x1] }
 0x3fe   : > { %4872 = vst [vmem:[#allocation2 + $0xa0] sm:$0xf] %v4684_v41  ;;  %4875 = vst [vmem:[#allocation2 + $0xa4] sm:$0x1] %v4874_v18  ;;  %v4721_v7 = vshrl.u32 %v16867_v48, 16  ;;  %vm4302_vm12 = vcmp.ge.f32.partialorder %v4270_v30, 0.0  ;;  %18266 = vmatprep.mubr.bf16.mxu1 %v22636_v38 }
 0x3ff   : > { %v4368_v17 = vsel %vm4304_vm10, %v4272_v56, %v4336_v31  ;;  %v4334_v6 = vmul.f32 0.1, %v4270_v30  ;;  %v4724_v57 = vshll.u32 %v16867_v48, 16  ;;  %v4704_v37 = vshrl.u32 %v16865_v47, 16  ;;  %18267 = vmatmul.mubr.bf16.gmra.mrb[20].mxu1 %v22638_v60  ;;  %v20764_v18 = vld [vmem:[#allocation8 + $0x188] sm:$0xff]   ;;  %v20765_v48 = vld [vmem:[#allocation8 + $0x190] sm:$0xff]  }
 0x400   : > { %v16868_v12 = vpack.c.bf16 %v4368_v17, %v4368_v17  ;;  %v4723_v0 = vrot.slane %v4721_v7, 7  ;;  %v4707_v14 = vshll.u32 %v16865_v47, 16  ;;  %v20766_v31 = vld [vmem:[#allocation8 + $0x198] sm:$0xff]   ;;  %v20767_v13 = vld [vmem:[#allocation8 + $0x1a0] sm:$0xff]   ;;  %v20772_v47 = vld [vmem:[#allocation8 + $0x48] sm:$0xff]  }
 0x401   : > { %v4366_v23 = vsel %vm4302_vm12, %v4270_v30, %v4334_v6  ;;  %v4706_v36 = vrot.slane %v4704_v37, 7  ;;  %v20768_v30 = vld [vmem:[#allocation8 + $0x1a8] sm:$0xff]   ;;  %v20771_v7 = vld [vmem:[#allocation8 + $0x40] sm:$0xff]   ;;  %v20773_v17 = vld [vmem:[#allocation8 + $0x50] sm:$0xff]  }
 0x402   : > { %v4729_v19 = vshrl.u32 %v16868_v12, 16  ;;  %v4726_v9 = vor.u32 %v4724_v57, %v4723_v0  ;;  %v16866_v28 = vpack.c.bf16 %v4366_v23, %v4366_v23  ;;  %v4732_v2 = vshll.u32 %v16868_v12, 16  ;;  %v20774_v12 = vld [vmem:[#allocation8 + $0x58] sm:$0xff]   ;;  %v20775_v6 = vld [vmem:[#allocation8 + $0x60] sm:$0xff]   ;;  %v22882_v20 = vld [vmem:[#allocation2 + $0x8c] sm:$0x1] }
 0x403   : > { %v4709_v15 = vor.u32 %v4707_v14, %v4706_v36  ;;  %v4727_v16 = vrot.slane %v4723_v0, 4  ;;  %v22649_v1 = vld [vmem:[#allocation2 + $0xa8] sm:$0xff]   ;;  %v4710_v56 = vrot.slane %v4706_v36, 4  ;;  %v22700_v37 = vld [vmem:[#allocation2 + $0x10] sm:$0xf]  ;;  %25074 = vst [vmem:[#allocation27_spill] sm:$0xff] %v22882_v20 }
 0x404   : > { %v4731_v55 = vrot.slane %v4729_v19, 7  ;;  %v4891_v39 = vsel %vm21598_vm8, %v4726_v9, %v4890_v10  ;;  %v4712_v54 = vshrl.u32 %v16866_v28, 16  ;;  %v4715_v5 = vshll.u32 %v16866_v28, 16  ;;  %v22702_v19 = vld [vmem:[#allocation2 + $0x1c] sm:$0xf] }
 0x405   : > { %v22644_v26 = vld [vmem:[#allocation2 + $0x9c] sm:$0xff]   ;;  %4892 = vst [vmem:[#allocation2 + $0xc0] sm:$0xf] %v4891_v39  ;;  %v4884_v45 = vsel %vm21598_vm8, %v4709_v15, %v4883_v53  ;;  %v5838_v9 = vshll.u32 %v22700_v37, 16  ;;  %v5842_v36 = vshrl.u32 %v22700_v37, 16  ;;  %v5866_v39 = vshrl.u32 %v22702_v19, 16 }
 0x406   : > { %v4734_v33 = vor.u32 %v4732_v2, %v4731_v55  ;;  %v4736_v32 = vrot.slane %v4731_v55, 4  ;;  %v4714_v22 = vrot.slane %v4712_v54, 7  ;;  %18270 = vmatprep.mubr.bf16.mxu1 %v22644_v26  ;;  %4885 = vst [vmem:[#allocation2 + $0xb4] sm:$0xf] %v4884_v45  ;;  %v5756_v53 = vld [vmem:[#allocation2 + $0x18] sm:$0xf] }
 0x407   : > { %18271 = vmatmul.mubr.bf16.gmra.mrb[24].mxu1 %v22649_v1  ;;  %v22706_v55 = vld [vmem:[#allocation2 + $0x8] sm:$0x1]  ;;  %v5862_v2 = vshll.u32 %v22702_v19, 16  ;;  %v22712_v54 = vrot.slane %v5838_v9, 5  ;;  %v20778_v9 = vld [vmem:[#allocation2 + $0xcc] sm:$0xff]  }
 0x408   : > { %v4735_v62 = vsel %vm21592_vm7, %v4727_v16, %v4734_v33  ;;  %v4895_v43 = vsel %vm21569_vm2, %v4736_v32, %v4894_v44  ;;  %v4717_v46 = vor.u32 %v4715_v5, %v4714_v22  ;;  %v4719_v3 = vrot.slane %v4714_v22, 4  ;;  %v22715_v5 = vld [vmem:[#allocation2 + $0x14] sm:$0x1] }
 0x409   : > { %4893 = vst [vmem:[#allocation2 + $0xc4] sm:$0xf] %v4735_v62  ;;  %4896 = vst [vmem:[#allocation2 + $0xc8] sm:$0x1] %v4895_v43  ;;  %v5853_v16 = vshrl.u32 %v5756_v53, 16  ;;  %v5856_v33 = vshll.u32 %v5756_v53, 16 }
 0x40a   : > { %v4718_v4 = vsel %vm21592_vm7, %v4710_v56, %v4717_v46  ;;  %v4888_v21 = vsel %vm21569_vm2, %v4719_v3, %v4887_v63  ;;  %v5824_v22 = vshll.u32 %v22706_v55, 16  ;;  %v5844_v62 = vrot.slane %v5842_v36, 4  ;;  %v22719_v56 = vld [vmem:[#allocation2 + $0x20] sm:$0x1] }
 0x40b   : > { %4886 = vst [vmem:[#allocation2 + $0xb8] sm:$0xf] %v4718_v4  ;;  %4889 = vst [vmem:[#allocation2 + $0xbc] sm:$0x1] %v4888_v21  ;;  %v22717_v43 = vrot.slane %v5862_v2, 5  ;;  %v5868_v63 = vrot.slane %v5866_v39, 4 }
 0x40c   : > { %v5855_v3 = vrot.slane %v5853_v16, 4  ;;  %v5858_v4 = vrot.slane %v5856_v33, 5  ;;  %v22722_v21 = vld [vmem:[#allocation2 + $0x28] sm:$0xf]  ;;  %v22750_v16 = vld [vmem:[#allocation2 + $0x38] sm:$0x1] }
 0x410   : > { %v22662_v41 = vld [vmem:[#allocation2 + $0xc0] sm:$0xff]  }
 0x412   : > { %v22660_v29 = vld [vmem:[#allocation2 + $0xb4] sm:$0xff]  }
 0x413   : > { %18274 = vmatprep.mubr.bf16.mxu1 %v22660_v29 }
 0x414   : > { %18275 = vmatmul.mubr.bf16.gmra.mrb[28].mxu1 %v22662_v41 }
 0x415   : > { %18294 = vmatprep.mubr.bf16.mxu1 %v20762_v51 }
 0x41c   : > { %18295 = vmatmul.mubr.bf16.vlgmr.msra.gmra.mrb[0].mxu1 %v22439_v35  ;;  %v20769_v35 = vld [vmem:[#allocation8 + $0x1b0] sm:$0xff]  }
 0x41d   : > { %18298 = vmatprep.mubr.bf16.mxu1 %v22443_v25  ;;  %18327 = vmatpush3.bf16.msra.mxu1 %v22553_v8  ;;  %v20770_v8 = vld [vmem:[#allocation8 + $0x1b8] sm:$0xff]  }
 0x41e   : > { %18328 = vmatprep.subr.bf16.mxu1 %v20764_v18 }
 0x421   : > { %18329 = vmatpush3.bf16.msra.mxu1 %v20764_v18 }
 0x422   : > { %18330 = vmatprep.subr.bf16.mxu1 %v20765_v48 }
 0x424   : > { %18299 = vmatmul.mubr.bf16.gmra.mrb[4].mxu1 %v22485_v59 }
 0x425   : > { %18302 = vmatprep.mubr.bf16.mxu1 %v22488_v52  ;;  %18331 = vmatpush3.bf16.msra.mxu1 %v20765_v48  ;;  %v5826_v48 = vrot.slane %v5824_v22, 5 }
 0x426   : > { %18332 = vmatprep.subr.bf16.mxu1 %v20766_v31 }
 0x429   : > { %18333 = vmatpush3.bf16.msra.mxu1 %v20766_v31  ;;  %v5845_v31 = vor.u32 %v5844_v62, %v22712_v54 }
 0x42a   : > { %18334 = vmatprep.subr.bf16.mxu1 %v20767_v13 }
 0x42c   : > { %18303 = vmatmul.mubr.bf16.gmra.mrb[8].mxu1 %v22540_v11 }
 0x42d   : > { %18306 = vmatprep.mubr.bf16.mxu1 %v22544_v40  ;;  %18335 = vmatpush3.bf16.msra.mxu1 %v20767_v13  ;;  %v22725_v13 = vld [vmem:[#allocation2 + $0x34] sm:$0xf] }
 0x42e   : > { %18336 = vmatprep.subr.bf16.mxu1 %v20768_v30 }
 0x431   : > { %18337 = vmatpush3.bf16.msra.mxu1 %v20768_v30  ;;  %v5869_v30 = vor.u32 %v5868_v63, %v22717_v43 }
 0x432   : > { %18338 = vmatprep.subr.bf16.mxu1 %v20769_v35 }
 0x434   : > { %18307 = vmatmul.mubr.bf16.gmra.mrb[12].mxu1 %v22567_v27 }
 0x435   : > { %18310 = vmatprep.mubr.bf16.mxu1 %v22571_v42  ;;  %18339 = vmatpush3.bf16.msra.mxu1 %v20769_v35  ;;  %v5872_v35 = vshll.u32 %v22719_v56, 16 }
 0x436   : > { %18340 = vmatprep.subr.bf16.mxu1 %v20770_v8 }
 0x439   : > { %18341 = vmatpush3.bf16.msra.mxu1 %v20770_v8 }
 0x43a   : > { %18374 = vmatprep.subr.bf16.mxu1 %v20771_v7 }
 0x43c   : > { %18311 = vmatmul.mubr.bf16.gmra.mrb[16].mxu1 %v22600_v61 }
 0x43d   : > { %18314 = vmatprep.mubr.bf16.mxu1 %v22606_v58 }
 0x444   : > { %18315 = vmatmul.mubr.bf16.gmra.mrb[20].mxu1 %v22636_v38 }
 0x445   : > { %18318 = vmatprep.mubr.bf16.mxu1 %v22638_v60 }
 0x44c   : > { %18319 = vmatmul.mubr.bf16.gmra.mrb[24].mxu1 %v22644_v26 }
 0x44d   : > { %18322 = vmatprep.mubr.bf16.mxu1 %v22649_v1 }
 0x454   : > { %18323 = vmatmul.mubr.bf16.gmra.mrb[28].mxu1 %v22660_v29 }
 0x455   : > { %18342 = vmatprep.mubr.bf16.mxu1 %v22443_v25  ;;  %v20776_v25 = vld [vmem:[#allocation8 + $0x68] sm:$0xff]  }
 0x45c   : > { %18343 = vmatmul.mubr.bf16.vlgmr.msra.gmra.mrb[0].mxu1 %v22485_v59  ;;  %v20777_v59 = vld [vmem:[#allocation8 + $0x70] sm:$0xff]  }
 0x45d   : > { %18346 = vmatprep.mubr.bf16.mxu1 %v22488_v52  ;;  %18375 = vmatpush3.bf16.msra.mxu1 %v20771_v7  ;;  %v20779_v52 = vld [vmem:[#allocation8 + $0x78] sm:$0xff]  }
 0x45e   : > { %18376 = vmatprep.subr.bf16.mxu1 %v20772_v47 }
 0x461   : > { %18377 = vmatpush3.bf16.msra.mxu1 %v20772_v47  ;;  %v5886_v47 = vshll.u32 %v22722_v21, 16 }
 0x462   : > { %18378 = vmatprep.subr.bf16.mxu1 %v20773_v17 }
 0x463   : > { %v22743_v36 = vrot.slane %v5886_v47, 5 }
 0x464   : > { %18347 = vmatmul.mubr.bf16.gmra.mrb[4].mxu1 %v22540_v11  ;;  %v22691_v11 = vld [vmem:[#allocation8 + $0x100] sm:$0xff]  }
 0x465   : > { %18350 = vmatprep.mubr.bf16.mxu1 %v22544_v40  ;;  %18379 = vmatpush3.bf16.msra.mxu1 %v20773_v17  ;;  %v5750_v40 = vld [vmem:[#allocation2] sm:$0xf]  ;;  %v5890_v17 = vshrl.u32 %v22722_v21, 16 }
 0x466   : > { %18380 = vmatprep.subr.bf16.mxu1 %v20774_v12  ;;  %v5805_v0 = vshrl.u32 %v5750_v40, 16  ;;  %v5808_v57 = vshll.u32 %v5750_v40, 16 }
 0x468   : > { %v5810_v14 = vrot.slane %v5808_v57, 5  ;;  %v22739_v57 = vld [vmem:[#allocation2 + $0x2c] sm:$0x1] }
 0x469   : > { %18381 = vmatpush3.bf16.msra.mxu1 %v20774_v12  ;;  %v5896_v63 = vshll.u32 %v22739_v57, 16 }
 0x46a   : > { %18382 = vmatprep.subr.bf16.mxu1 %v20775_v6 }
 0x46c   : > { %18351 = vmatmul.mubr.bf16.gmra.mrb[8].mxu1 %v22567_v27  ;;  %v22694_v27 = vld [vmem:[#allocation2 + $0x4] sm:$0xf] }
 0x46d   : > { %18354 = vmatprep.mubr.bf16.mxu1 %v22571_v42  ;;  %18383 = vmatpush3.bf16.msra.mxu1 %v20775_v6  ;;  %v5753_v42 = vld [vmem:[#allocation2 + $0xc] sm:$0xf]  ;;  %v5859_v6 = vor.u32 %v5858_v4, %v5855_v3 }
 0x46e   : > { %18384 = vmatprep.subr.bf16.mxu1 %v20776_v25  ;;  %v5829_v10 = vshrl.u32 %v5753_v42, 16  ;;  %v5832_v23 = vshll.u32 %v5753_v42, 16 }
 0x46f   : > { %v5860_v53 = vrot.slane %v5859_v6, 4  ;;  %v5771_v6 = vld [vmem:[#allocation2 + $0x54] sm:$0xf] }
 0x470   : > { %v5831_v15 = vrot.slane %v5829_v10, 4  ;;  %v5834_v44 = vrot.slane %v5832_v23, 5  ;;  %v22741_v23 = vld [vmem:[#allocation2 + $0x40] sm:$0xf] }
 0x471   : > { %18385 = vmatpush3.bf16.msra.mxu1 %v20776_v25  ;;  %v5762_v25 = vld [vmem:[#allocation2 + $0x30] sm:$0xf]  ;;  %v5934_v33 = vshll.u32 %v22741_v23, 16  ;;  %v5865_v4 = vsel %vm21986_vm11, %v5860_v53, %v22717_v43 }
 0x472   : > { %18386 = vmatprep.subr.bf16.mxu1 %v20777_v59  ;;  %v5835_v46 = vor.u32 %v5834_v44, %v5831_v15  ;;  %v5765_v15 = vld [vmem:[#allocation2 + $0x3c] sm:$0xf] }
 0x473   : > { %v5925_v3 = vshrl.u32 %v5765_v15, 16 }
 0x474   : > { %18355 = vmatmul.mubr.bf16.gmra.mrb[12].mxu1 %v22600_v61  ;;  %v5814_v61 = vshll.u32 %v22694_v27, 16  ;;  %v5836_v12 = vrot.slane %v5835_v46, 4 }
 0x475   : > { %18358 = vmatprep.mubr.bf16.mxu1 %v22606_v58  ;;  %18387 = vmatpush3.bf16.msra.mxu1 %v20777_v59  ;;  %v5818_v58 = vshrl.u32 %v22694_v27, 16  ;;  %v5910_v59 = vshll.u32 %v22725_v13, 16 }
 0x476   : > { %18388 = vmatprep.subr.bf16.mxu1 %v20779_v52  ;;  %v5841_v44 = vsel %vm21986_vm11, %v5836_v12, %v22712_v54  ;;  %v5898_v12 = vrot.slane %v5896_v63, 5  ;;  %v22797_v63 = vld [vmem:[#allocation2 + $0x50] sm:$0x1] }
 0x477   : > { %v5820_v28 = vrot.slane %v5818_v58, 4  ;;  %v5874_v58 = vrot.slane %v5872_v35, 5  ;;  %v22745_v2 = vrot.slane %v5910_v59, 5  ;;  %v5768_v35 = vld [vmem:[#allocation2 + $0x48] sm:$0xf] }
 0x479   : > { %18389 = vmatpush3.bf16.msra.mxu1 %v20779_v52  ;;  %v5914_v52 = vshrl.u32 %v22725_v13, 16 }
 0x47a   : > { %18422 = vmatprep.subr.bf16.mxu1 %v22691_v11 }
 0x47b   : > { %v5916_v39 = vrot.slane %v5914_v52, 4  ;;  %v5927_v52 = vrot.slane %v5925_v3, 4  ;;  %v20782_v3 = vld [vmem:[#allocation8 + $0x110] sm:$0xff]  }
 0x47c   : > { %18359 = vmatmul.mubr.bf16.gmra.mrb[16].mxu1 %v22636_v38  ;;  %v5807_v38 = vrot.slane %v5805_v0, 4 }
 0x47d   : > { %18362 = vmatprep.mubr.bf16.mxu1 %v22638_v60  ;;  %v5816_v60 = vrot.slane %v5814_v61, 5  ;;  %v5870_v61 = vrot.slane %v5869_v30, 4 }
 0x47e   : > { %v5811_v32 = vor.u32 %v5810_v14, %v5807_v38  ;;  %v5892_v38 = vrot.slane %v5890_v17, 4  ;;  %v5901_v14 = vshrl.u32 %v5762_v25, 16 }
 0x47f   : > { %v5821_v45 = vor.u32 %v5820_v28, %v5816_v60  ;;  %v5904_v28 = vshll.u32 %v5762_v25, 16  ;;  %v5875_v22 = vsel %vm21986_vm11, %v5870_v61, %v5874_v58  ;;  %v5949_v61 = vshrl.u32 %v5768_v35, 16 }
 0x480   : > { %v5812_v51 = vrot.slane %v5811_v32, 4  ;;  %v5938_v32 = vshrl.u32 %v22741_v23, 16  ;;  %v5893_v54 = vor.u32 %v5892_v38, %v22743_v36  ;;  %v5903_v46 = vrot.slane %v5901_v14, 4 }
 0x481   : > { %v5822_v18 = vrot.slane %v5821_v45, 4  ;;  %v22773_v17 = vcombine.low %v5865_v4, %v5875_v22  ;;  %v5952_v58 = vshll.u32 %v5768_v35, 16 }
 0x482   : > { %v5817_v40 = vsel %vm21986_vm11, %v5812_v51, %v5816_v60  ;;  %v5917_v51 = vor.u32 %v5916_v39, %v22745_v2  ;;  %v5940_v30 = vrot.slane %v5938_v32, 4  ;;  %v5894_v25 = vrot.slane %v5893_v54, 4 }
 0x483   : > { %v5827_v42 = vsel %vm21986_vm11, %v5822_v18, %v5826_v48  ;;  %v5920_v18 = vshll.u32 %v22750_v16, 16  ;;  %v5928_v48 = vshll.u32 %v5765_v15, 16  ;;  %v22784_v15 = vld [vmem:[#allocation2 + $0x64] sm:$0xf]  ;;  %v5951_v54 = vrot.slane %v5949_v61, 4 }
 0x484   : > { %18363 = vmatmul.mubr.bf16.gmra.mrb[20].mxu1 %v22644_v26  ;;  %v5759_v26 = vld [vmem:[#allocation2 + $0x24] sm:$0xf]  ;;  %v16374_v60 = vcombine.low %v5817_v40, %v5827_v42  ;;  %v22775_v40 = vld [vmem:[#allocation2 + $0x58] sm:$0xf]  ;;  %v5918_v42 = vrot.slane %v5917_v51, 4  ;;  %v6006_v51 = vshll.u32 %v22784_v15, 16 }
 0x485   : > { %18366 = vmatprep.mubr.bf16.mxu1 %v22649_v1  ;;  %v5848_v1 = vshll.u32 %v22715_v5, 16  ;;  %v5877_v8 = vshrl.u32 %v5759_v26, 16  ;;  %v5880_v7 = vshll.u32 %v5759_v26, 16  ;;  %v22759_v26 = vld [vmem:[#allocation2 + $0x4c] sm:$0xf]  ;;  %v5982_v53 = vshll.u32 %v22775_v40, 16 }
 0x486   : > { %v5986_v39 = vshrl.u32 %v22775_v40, 16 }
 0x487   : > { %v5850_v0 = vrot.slane %v5848_v1, 5  ;;  %v5882_v10 = vrot.slane %v5880_v7, 5  ;;  %v5906_v1 = vrot.slane %v5904_v28, 5  ;;  %v5962_v7 = vshrl.u32 %v22759_v26, 16 }
 0x488   : > { %v5973_v28 = vshrl.u32 %v5771_v6, 16  ;;  %v5988_v35 = vrot.slane %v5986_v39, 4 }
 0x489   : > { %v5907_v59 = vor.u32 %v5906_v1, %v5903_v46  ;;  %v5964_v14 = vrot.slane %v5962_v7, 4  ;;  %v5954_v46 = vrot.slane %v5952_v58, 5  ;;  %v5774_v1 = vld [vmem:[#allocation2 + $0x60] sm:$0xf]  ;;  %v5968_v7 = vshll.u32 %v22797_v63, 16  ;;  %v20783_v58 = vld [vmem:[#allocation8 + $0x118] sm:$0xff]  }
 0x48b   : > { %v5908_v32 = vrot.slane %v5907_v59, 4  ;;  %v5970_v39 = vrot.slane %v5968_v7, 5 }
 0x48c   : > { %18367 = vmatmul.mubr.bf16.gmra.mrb[24].mxu1 %v22660_v29  ;;  %v5846_v29 = vrot.slane %v5845_v31, 4  ;;  %v22767_v31 = vrot.slane %v5934_v33, 5  ;;  %v5899_v33 = vsel %vm21986_vm11, %v5894_v25, %v5898_v12  ;;  %v22805_v12 = vld [vmem:[#allocation2 + $0x5c] sm:$0x1] }
 0x48d   : > { %18370 = vmatprep.mubr.bf16.mxu1 %v22662_v41  ;;  %v5879_v41 = vrot.slane %v5877_v8, 4  ;;  %v5958_v8 = vshll.u32 %v22759_v26, 16  ;;  %v5913_v59 = vsel %vm21986_vm11, %v5908_v32, %v22745_v2  ;;  %v5992_v2 = vshll.u32 %v22805_v12, 16 }
 0x48e   : > { %v5851_v45 = vsel %vm21986_vm11, %v5846_v29, %v5850_v0  ;;  %v22777_v29 = vld [vmem:[#allocation2 + $0x44] sm:$0x1]  ;;  %v5930_v0 = vrot.slane %v5928_v48, 5  ;;  %v5975_v48 = vrot.slane %v5973_v28, 4 }
 0x48f   : > { %v5883_v62 = vor.u32 %v5882_v10, %v5879_v41  ;;  %v22771_v47 = vcombine.low %v5841_v44, %v5851_v45  ;;  %v20781_v41 = vld [vmem:[#allocation8 + $0x108] sm:$0xff]   ;;  %v5922_v10 = vrot.slane %v5920_v18, 5  ;;  %v22780_v38 = vrot.slane %v5958_v8, 5 }
 0x490   : > { %v5944_v45 = vshll.u32 %v22777_v29, 16  ;;  %v6010_v18 = vshrl.u32 %v22784_v15, 16 }
 0x491   : > { %v5884_v43 = vrot.slane %v5883_v62, 4  ;;  %v5923_v22 = vsel %vm21986_vm11, %v5918_v42, %v5922_v10  ;;  %v5931_v62 = vor.u32 %v5930_v0, %v5927_v52  ;;  %v5965_v4 = vor.u32 %v5964_v14, %v22780_v38  ;;  %v5777_v14 = vld [vmem:[#allocation2 + $0x6c] sm:$0xf] }
 0x492   : > { %v5946_v8 = vrot.slane %v5944_v45, 5  ;;  %v5955_v42 = vor.u32 %v5954_v46, %v5951_v54  ;;  %v22812_v0 = vcombine.low %v5913_v59, %v5923_v22  ;;  %v22816_v10 = vrot.slane %v6006_v51, 5  ;;  %v22829_v46 = vld [vmem:[#allocation2 + $0x7c] sm:$0xf] }
 0x493   : > { %v5889_v44 = vsel %vm21986_vm11, %v5884_v43, %v22743_v36  ;;  %v6000_v43 = vshll.u32 %v5774_v1, 16  ;;  %v5932_v52 = vrot.slane %v5931_v62, 4  ;;  %v5966_v28 = vrot.slane %v5965_v4, 4  ;;  %25069 = vst [vmem:[#allocation23_spill] sm:$0xff] %v22829_v46 }
 0x494   : > { %18371 = vmatmul.mubr.bf16.gmra.mrb[28].mxu1 %v20778_v9  ;;  %v5941_v9 = vor.u32 %v5940_v30, %v22767_v31  ;;  %v22802_v30 = vrot.slane %v5982_v53, 5  ;;  %v22807_v25 = vcombine.low %v5889_v44, %v5899_v33  ;;  %v22823_v44 = vld [vmem:[#allocation2 + $0x68] sm:$0x1]  ;;  %v5956_v22 = vrot.slane %v5955_v42, 4 }
 0x495   : > { %18390 = vmatprep.mubr.bf16.mxu1 %v16374_v60  ;;  %v5976_v60 = vshll.u32 %v5771_v6, 16  ;;  %v5997_v6 = vshrl.u32 %v5774_v1, 16  ;;  %v6002_v32 = vrot.slane %v6000_v43, 5  ;;  %v5937_v45 = vsel %vm21986_vm11, %v5932_v52, %v22767_v31 }
 0x496   : > { %v5942_v36 = vrot.slane %v5941_v9, 4  ;;  %v6012_v9 = vrot.slane %v6010_v18, 4  ;;  %v5989_v53 = vor.u32 %v5988_v35, %v22802_v30  ;;  %v6021_v62 = vshrl.u32 %v5777_v14, 16  ;;  %v20784_v18 = vld [vmem:[#allocation8 + $0x120] sm:$0xff]  }
 0x497   : > { %v5999_v33 = vrot.slane %v5997_v6, 4  ;;  %v6024_v54 = vshll.u32 %v5777_v14, 16  ;;  %v5971_v31 = vsel %vm21986_vm11, %v5966_v28, %v5970_v39  ;;  %v5994_v35 = vrot.slane %v5992_v2, 5 }
 0x498   : > { %v5947_v61 = vsel %vm21986_vm11, %v5942_v36, %v5946_v8  ;;  %v6013_v36 = vor.u32 %v6012_v9, %v22816_v10  ;;  %v6016_v7 = vshll.u32 %v22823_v44, 16  ;;  %v6054_v6 = vshll.u32 %v22829_v46, 16 }
 0x499   : > { %v22831_v1 = vcombine.low %v5937_v45, %v5947_v61  ;;  %v6003_v8 = vor.u32 %v6002_v32, %v5999_v33  ;;  %v6058_v43 = vshrl.u32 %v22829_v46, 16  ;;  %v6023_v59 = vrot.slane %v6021_v62, 4  ;;  %v5783_v33 = vld [vmem:[#allocation2 + $0x84] sm:$0xf]  ;;  %v22858_v62 = vld [vmem:[#allocation2 + $0x88] sm:$0xf] }
 0x49a   : > { %v6026_v52 = vrot.slane %v6024_v54, 5  ;;  %v5961_v9 = vsel %vm21986_vm11, %v5956_v22, %v22780_v38  ;;  %v6014_v14 = vrot.slane %v6013_v36, 4  ;;  %v6018_v32 = vrot.slane %v6016_v7, 5  ;;  %25071 = vst [vmem:[#allocation26_spill] sm:$0xff] %v22858_v62 }
 0x49b   : > { %v22846_v2 = vcombine.low %v5961_v9, %v5971_v31  ;;  %v22856_v45 = vrot.slane %v6054_v6, 5  ;;  %v6060_v22 = vrot.slane %v6058_v43, 4  ;;  %v6004_v54 = vrot.slane %v6003_v8, 4 }
 0x49c   : > { %18391 = vmatmul.mubr.bf16.vlgmr.msra.gmra.mrb[0].mxu1 %v22771_v47  ;;  %v6027_v36 = vor.u32 %v6026_v52, %v6023_v59  ;;  %v6069_v7 = vshrl.u32 %v5783_v33, 16  ;;  %v6072_v6 = vshll.u32 %v5783_v33, 16  ;;  %v6078_v8 = vshll.u32 %v22858_v62, 16 }
 0x49d   : > { %18394 = vmatprep.mubr.bf16.mxu1 %v22773_v17  ;;  %18423 = vmatpush3.bf16.msra.mxu1 %v22691_v11  ;;  %v5978_v11 = vrot.slane %v5976_v60, 5  ;;  %v6082_v43 = vshrl.u32 %v22858_v62, 16  ;;  %v6061_v52 = vor.u32 %v6060_v22, %v22856_v45  ;;  %v6009_v9 = vsel %vm21986_vm11, %v6004_v54, %v22816_v10  ;;  %v20787_v22 = vld [vmem:[#allocation8 + $0x138] sm:$0xff]  }
 0x49e   : > { %18424 = vmatprep.subr.bf16.mxu1 %v20781_v41  ;;  %v6071_v50 = vrot.slane %v6069_v7, 4  ;;  %v22884_v62 = vrot.slane %v6078_v8, 5  ;;  %v22895_v7 = vld [vmem:[#allocation2 + $0xac] sm:$0xf]  ;;  %v6088_v8 = vshll.u32 %v22882_v20, 16 }
 0x49f   : > { %v5979_v60 = vor.u32 %v5978_v11, %v5975_v48  ;;  %v5780_v48 = vld [vmem:[#allocation2 + $0x78] sm:$0xf]  ;;  %v6062_v54 = vrot.slane %v6061_v52, 4  ;;  %25076 = vst [vmem:[#allocation31_spill] sm:$0xff] %v22895_v7 }
 0x4a0   : > { %v6045_v42 = vshrl.u32 %v5780_v48, 16  ;;  %v6048_v61 = vshll.u32 %v5780_v48, 16  ;;  %v22861_v48 = vld [vmem:[#allocation2 + $0x94] sm:$0xf]  ;;  %v22900_v52 = vld [vmem:[#allocation8 + $0x1c0] sm:$0xff]  }
 0x4a1   : > { %18425 = vmatpush3.bf16.msra.mxu1 %v20781_v41  ;;  %v22820_v41 = vld [vmem:[#allocation2 + $0x70] sm:$0xf]  ;;  %v5980_v11 = vrot.slane %v5979_v60, 4  ;;  %25072 = vst [vmem:[#allocation24_spill] sm:$0xff] %v22861_v48 }
 0x4a2   : > { %18426 = vmatprep.subr.bf16.mxu1 %v20782_v3  ;;  %v6030_v4 = vshll.u32 %v22820_v41, 16  ;;  %v6034_v51 = vshrl.u32 %v22820_v41, 16 }
 0x4a3   : > { %v5985_v38 = vsel %vm21986_vm11, %v5980_v11, %v22802_v30  ;;  %v6019_v30 = vsel %vm21986_vm11, %v6014_v14, %v6018_v32  ;;  %v6028_v14 = vrot.slane %v6027_v36, 4 }
 0x4a4   : > { %18395 = vmatmul.mubr.bf16.gmra.mrb[4].mxu1 %v22807_v25  ;;  %v22844_v28 = vrot.slane %v6030_v4, 5  ;;  %v6036_v60 = vrot.slane %v6034_v51, 4  ;;  %v6047_v4 = vrot.slane %v6045_v42, 4  ;;  %v6050_v51 = vrot.slane %v6048_v61, 5 }
 0x4a5   : > { %18398 = vmatprep.mubr.bf16.mxu1 %v22812_v0  ;;  %18427 = vmatpush3.bf16.msra.mxu1 %v20782_v3  ;;  %v5990_v3 = vrot.slane %v5989_v53, 4  ;;  %v20785_v53 = vld [vmem:[#allocation8 + $0x128] sm:$0xff]   ;;  %v6102_v42 = vshll.u32 %v22861_v48, 16  ;;  %v6106_v61 = vshrl.u32 %v22861_v48, 16  ;;  %v22880_v33 = vcombine.low %v6009_v9, %v6019_v30 }
 0x4a6   : > { %18428 = vmatprep.subr.bf16.mxu1 %v20783_v58  ;;  %v6037_v11 = vor.u32 %v6036_v60, %v22844_v28  ;;  %v6051_v60 = vor.u32 %v6050_v51, %v6047_v4  ;;  %v6074_v48 = vrot.slane %v6072_v6, 5  ;;  %v22889_v4 = vld [vmem:[#allocation2 + $0xa0] sm:$0xf]  ;;  %v6033_v51 = vsel %vm21986_vm11, %v6028_v14, %v22844_v28  ;;  %v22903_v28 = vld [vmem:[#allocation2 + $0x98] sm:$0x1] }
 0x4a7   : > { %v5995_v39 = vsel %vm21986_vm11, %v5990_v3, %v5994_v35  ;;  %v22868_v3 = vld [vmem:[#allocation2 + $0x80] sm:$0x1]  ;;  %v20786_v35 = vld [vmem:[#allocation8 + $0x130] sm:$0xff]   ;;  %v22887_v36 = vrot.slane %v6102_v42, 5  ;;  %25075 = vst [vmem:[#allocation29_spill] sm:$0xff] %v22889_v4  ;;  %25077 = vst [vmem:[#allocation30_spill] sm:$0xff] %v22903_v28 }
 0x4a8   : > { %v22863_v31 = vcombine.low %v5985_v38, %v5995_v39  ;;  %25073 = vst [vmem:[#allocation28_spill] sm:$0xff] %v22868_v3  ;;  %v6064_v39 = vshll.u32 %v22868_v3, 16  ;;  %v6038_v38 = vrot.slane %v6037_v11, 4  ;;  %v6052_v30 = vrot.slane %v6051_v60, 4  ;;  %v5792_v14 = vld [vmem:[#allocation2 + $0xa8] sm:$0xf] }
 0x4a9   : > { %18429 = vmatpush3.bf16.msra.mxu1 %v20783_v58  ;;  %v22850_v58 = vld [vmem:[#allocation2 + $0x74] sm:$0x1]  ;;  %v6075_v42 = vor.u32 %v6074_v48, %v6071_v50  ;;  %v6126_v9 = vshll.u32 %v22889_v4, 16  ;;  %v6141_v20 = vshrl.u32 %v5792_v14, 16 }
 0x4aa   : > { %18430 = vmatprep.subr.bf16.mxu1 %v20784_v18  ;;  %25070 = vst [vmem:[#allocation25_spill] sm:$0xff] %v22850_v58  ;;  %v6040_v59 = vshll.u32 %v22850_v58, 16  ;;  %v6084_v58 = vrot.slane %v6082_v43, 4  ;;  %v6066_v11 = vrot.slane %v6064_v39, 5  ;;  %v6057_v50 = vsel %vm21986_vm11, %v6052_v30, %v22856_v45 }
 0x4ac   : > { %18399 = vmatmul.mubr.bf16.gmra.mrb[8].mxu1 %v22831_v1  ;;  %v6042_v10 = vrot.slane %v6040_v59, 5  ;;  %v5789_v59 = vld [vmem:[#allocation2 + $0x9c] sm:$0xf]  ;;  %v6067_v60 = vsel %vm21986_vm11, %v6062_v54, %v6066_v11  ;;  %v6144_v54 = vshll.u32 %v5792_v14, 16 }
 0x4ad   : > { %18402 = vmatprep.mubr.bf16.mxu1 %v22846_v2  ;;  %18431 = vmatpush3.bf16.msra.mxu1 %v20784_v18  ;;  %v5786_v18 = vld [vmem:[#allocation2 + $0x90] sm:$0xf]  ;;  %v6120_v48 = vshll.u32 %v5789_v59, 16 }
 0x4ae   : > { %18432 = vmatprep.subr.bf16.mxu1 %v20785_v53  ;;  %v6093_v32 = vshrl.u32 %v5786_v18, 16  ;;  %v6096_v24 = vshll.u32 %v5786_v18, 16  ;;  %v6043_v6 = vsel %vm21986_vm11, %v6038_v38, %v6042_v10  ;;  %v6154_v38 = vshrl.u32 %v22895_v7, 16 }
 0x4af   : > { %v6122_v14 = vrot.slane %v6120_v48, 5 }
 0x4b0   : > { %v6095_v43 = vrot.slane %v6093_v32, 4  ;;  %v6098_v18 = vrot.slane %v6096_v24, 5  ;;  %v6150_v24 = vshll.u32 %v22895_v7, 16  ;;  %v22912_v32 = vcombine.low %v6033_v51, %v6043_v6 }
 0x4b1   : > { %18433 = vmatpush3.bf16.msra.mxu1 %v20785_v53  ;;  %v6108_v53 = vrot.slane %v6106_v61, 4  ;;  %v6085_v61 = vor.u32 %v6084_v58, %v22884_v62  ;;  %v6117_v58 = vshrl.u32 %v5789_v59, 16  ;;  %v6128_v7 = vrot.slane %v6126_v9, 5  ;;  %v22922_v59 = vld [vmem:[#allocation2 + $0xb8] sm:$0xf] }
 0x4b2   : > { %18434 = vmatprep.subr.bf16.mxu1 %v20786_v35  ;;  %v6099_v10 = vor.u32 %v6098_v18, %v6095_v43  ;;  %v6076_v6 = vrot.slane %v6075_v42, 4  ;;  %v6152_v45 = vrot.slane %v6150_v24, 5  ;;  %v6156_v30 = vrot.slane %v6154_v38, 4  ;;  %25078 = vst [vmem:[#allocation32_spill] sm:$0xff] %v22922_v59  ;;  %v22925_v43 = vld [vmem:[#allocation2 + $0xa4] sm:$0x1] }
 0x4b3   : > { %v6109_v39 = vor.u32 %v6108_v53, %v22887_v36  ;;  %v22919_v53 = vcombine.low %v6057_v50, %v6067_v60  ;;  %v6086_v11 = vrot.slane %v6085_v61, 4  ;;  %v6119_v18 = vrot.slane %v6117_v58, 4  ;;  %v22929_v24 = vld [vmem:[#allocation2 + $0xb0] sm:$0x1] }
 0x4b4   : > { %18403 = vmatmul.mubr.bf16.gmra.mrb[12].mxu1 %v22863_v31  ;;  %v6100_v60 = vrot.slane %v6099_v10, 4  ;;  %v6143_v61 = vrot.slane %v6141_v20, 4  ;;  %v6146_v9 = vrot.slane %v6144_v54, 5  ;;  %v6174_v38 = vshll.u32 %v22922_v59, 16 }
 0x4b5   : > { %18406 = vmatprep.mubr.bf16.mxu1 %v22880_v33  ;;  %18435 = vmatpush3.bf16.msra.mxu1 %v20786_v35  ;;  %v6130_v35 = vshrl.u32 %v22889_v4, 16  ;;  %v6112_v4 = vshll.u32 %v22903_v28, 16  ;;  %v6110_v3 = vrot.slane %v6109_v39, 4  ;;  %v6178_v28 = vshrl.u32 %v22922_v59, 16 }
 0x4b6   : > { %18436 = vmatprep.subr.bf16.mxu1 %v20787_v22  ;;  %v6157_v20 = vor.u32 %v6156_v30, %v6152_v45  ;;  %v6123_v58 = vor.u32 %v6122_v14, %v6119_v18  ;;  %v6136_v48 = vshll.u32 %v22925_v43, 16  ;;  %v6160_v59 = vshll.u32 %v22929_v24, 16 }
 0x4b7   : > { %v6132_v51 = vrot.slane %v6130_v35, 4  ;;  %v6114_v50 = vrot.slane %v6112_v4, 5  ;;  %v5795_v35 = vld [vmem:[#allocation2 + $0xb4] sm:$0xf] }
 0x4b8   : > { %v6165_v10 = vshrl.u32 %v5795_v35, 16  ;;  %v6168_v54 = vshll.u32 %v5795_v35, 16  ;;  %v6158_v30 = vrot.slane %v6157_v20, 4  ;;  %v6124_v18 = vrot.slane %v6123_v58, 4 }
 0x4b9   : > { %18437 = vmatpush3.bf16.msra.mxu1 %v20787_v22  ;;  %v6090_v22 = vrot.slane %v6088_v8, 5  ;;  %v6133_v39 = vor.u32 %v6132_v51, %v6128_v7  ;;  %v6081_v8 = vsel %vm21986_vm11, %v6076_v6, %v22884_v62  ;;  %v6115_v4 = vsel %vm21986_vm11, %v6110_v3, %v6114_v50 }
 0x4ba   : > { %18470 = vmatprep.subr.bf16.mxu1 %v22900_v52  ;;  %v6105_v51 = vsel %vm21986_vm11, %v6100_v60, %v22887_v36  ;;  %v6176_v6 = vrot.slane %v6174_v38, 5  ;;  %v6180_v3 = vrot.slane %v6178_v28, 4  ;;  %v6138_v14 = vrot.slane %v6136_v48, 5  ;;  %v22949_v36 = vld [vmem:[#allocation2 + $0xbc] sm:$0x1] }
 0x4bb   : > { %v6091_v42 = vsel %vm21986_vm11, %v6086_v11, %v6090_v22  ;;  %v6147_v22 = vor.u32 %v6146_v9, %v6143_v61  ;;  %v22945_v46 = vcombine.low %v6105_v51, %v6115_v4  ;;  %v6134_v62 = vrot.slane %v6133_v39, 4 }
 0x4bc   : > { %18407 = vmatmul.mubr.bf16.gmra.mrb[16].mxu1 %v22912_v32  ;;  %v22939_v11 = vcombine.low %v6081_v8, %v6091_v42  ;;  %v6167_v50 = vrot.slane %v6165_v10, 4  ;;  %v6170_v35 = vrot.slane %v6168_v54, 5  ;;  %v6162_v8 = vrot.slane %v6160_v59, 5 }
 0x4bd   : > { %18410 = vmatprep.mubr.bf16.mxu1 %v22919_v53  ;;  %v6148_v42 = vrot.slane %v6147_v22, 4  ;;  %v6139_v60 = vsel %vm21986_vm11, %v6134_v62, %v6138_v14  ;;  %v6181_v61 = vor.u32 %v6180_v3, %v6176_v6  ;;  %v6129_v9 = vsel %vm21986_vm11, %v6124_v18, %v6128_v7  ;;  %v20790_v22 = vld [vmem:[#allocation8 + $0x1d0] sm:$0xff]   ;;  %v20791_v62 = vld [vmem:[#allocation8 + $0x1d8] sm:$0xff]   ;;  %v22984_v18 = vld [vmem:[#allocation2 + $0xc4] sm:$0xf] }
 0x4be   : > { %v6163_v28 = vsel %vm21986_vm11, %v6158_v30, %v6162_v8  ;;  %v6171_v39 = vor.u32 %v6170_v35, %v6167_v50  ;;  %v6184_v38 = vshll.u32 %v22949_v36, 16  ;;  %v22958_v4 = vcombine.low %v6129_v9, %v6139_v60  ;;  %v20795_v3 = vld [vmem:[#allocation8 + $0x1f8] sm:$0xff]   ;;  %v20796_v30 = vld [vmem:[#allocation8 + $0x80] sm:$0xff]   ;;  %v5798_v14 = vld [vmem:[#allocation2 + $0xc0] sm:$0xf] }
 0x4bf   : > { %v6153_v59 = vsel %vm21986_vm11, %v6148_v42, %v6152_v45  ;;  %v6182_v58 = vrot.slane %v6181_v61, 4  ;;  %v20789_v45 = vld [vmem:[#allocation8 + $0x1c8] sm:$0xff]   ;;  %v6520_v50 = vshll.u32 %v22984_v18, 16  ;;  %v6524_v35 = vshrl.u32 %v22984_v18, 16 }
 0x4c0   : > { %v22962_v20 = vcombine.low %v6153_v59, %v6163_v28  ;;  %v6172_v48 = vrot.slane %v6171_v39, 4  ;;  %v6186_v10 = vrot.slane %v6184_v38, 5  ;;  %v6511_v42 = vshrl.u32 %v5798_v14, 16  ;;  %v22991_v39 = vld [vmem:[#allocation2 + $0xc8] sm:$0x1] }
 0x4c1   : > { %v6514_v8 = vshll.u32 %v5798_v14, 16  ;;  %v6522_v60 = vrot.slane %v6520_v50, 5  ;;  %v6526_v61 = vrot.slane %v6524_v35, 4 }
 0x4c2   : > { %v6187_v7 = vsel %vm21986_vm11, %v6182_v58, %v6186_v10  ;;  %v6177_v54 = vsel %vm21986_vm11, %v6172_v48, %v6176_v6  ;;  %v20792_v6 = vld [vmem:[#allocation8 + $0x1e0] sm:$0xff]   ;;  %v6513_v28 = vrot.slane %v6511_v42, 4  ;;  %v6530_v58 = vshll.u32 %v22991_v39, 16  ;;  %v23015_v42 = vld [vmem:[#allocation2 + $0xd4] sm:$0x1] }
 0x4c3   : > { %v22970_v51 = vcombine.low %v6177_v54, %v6187_v7  ;;  %v6516_v9 = vrot.slane %v6514_v8, 5  ;;  %v6527_v38 = vor.u32 %v6526_v61, %v6522_v60  ;;  %v7082_v61 = vld [vmem:[#allocation2] sm:$0xe] }
 0x4c4   : > { %18411 = vmatmul.mubr.bf16.gmra.mrb[20].mxu1 %v22939_v11  ;;  %v6532_v7 = vrot.slane %v6530_v58, 5 }
 0x4c5   : > { %18414 = vmatprep.mubr.bf16.mxu1 %v22945_v46  ;;  %v6517_v59 = vor.u32 %v6516_v9, %v6513_v28  ;;  %v6528_v48 = vrot.slane %v6527_v38, 4 }
 0x4c7   : > { %v6518_v10 = vrot.slane %v6517_v59, 4  ;;  %v6533_v54 = vsel %vm21986_vm11, %v6528_v48, %v6532_v7  ;;  %v16416_v59 = vrot.slane %v7082_v61, 9  ;;  %v7153_v48 = vrot.slane %v22706_v55, 5 }
 0x4c8   : > { %v7157_v7 = vrot.slane %v22700_v37, 5  ;;  %v7164_v55 = vrot.slane %v22702_v19, 5  ;;  %v7171_v37 = vrot.slane %v22722_v21, 5  ;;  %v7085_v21 = vld [vmem:[#allocation2 + $0x24] sm:$0xe] }
 0x4cc   : > { %18415 = vmatmul.mubr.bf16.gmra.mrb[24].mxu1 %v22958_v4 }
 0x4cd   : > { %18418 = vmatprep.mubr.bf16.mxu1 %v22962_v20 }
 0x4d4   : > { %18419 = vmatmul.mubr.bf16.gmra.mrb[28].mxu1 %v22970_v51 }
 0x4d5   : > { %18438 = vmatprep.mubr.bf16.mxu1 %v22771_v47  ;;  %v20793_v47 = vld [vmem:[#allocation8 + $0x1e8] sm:$0xff]  }
 0x4dc   : > { %18439 = vmatmul.mubr.bf16.vlgmr.msra.gmra.mrb[0].mxu1 %v22773_v17 }
 0x4dd   : > { %18442 = vmatprep.mubr.bf16.mxu1 %v22807_v25  ;;  %18471 = vmatpush3.bf16.msra.mxu1 %v22900_v52  ;;  %v20794_v52 = vld [vmem:[#allocation8 + $0x1f0] sm:$0xff]  }
 0x4de   : > { %18472 = vmatprep.subr.bf16.mxu1 %v20789_v45 }
 0x4e1   : > { %18473 = vmatpush3.bf16.msra.mxu1 %v20789_v45  ;;  %v6523_v45 = vsel %vm21986_vm11, %v6518_v10, %v6522_v60  ;;  %v7150_v60 = vrot.slane %v22694_v27, 5 }
 0x4e2   : > { %18474 = vmatprep.subr.bf16.mxu1 %v20790_v22 }
 0x4e3   : > { %v7152_v58 = vrot.slane %v7150_v60, 4  ;;  %v7151_v27 = vsel %vm22237_vm14, %v16416_v59, %v7150_v60  ;;  %v7087_v59 = vld [vmem:[#allocation2 + $0x3c] sm:$0xe] }
 0x4e4   : > { %18443 = vmatmul.mubr.bf16.gmra.mrb[4].mxu1 %v22812_v0 }
 0x4e5   : > { %18446 = vmatprep.mubr.bf16.mxu1 %v22831_v1  ;;  %18475 = vmatpush3.bf16.msra.mxu1 %v20790_v22  ;;  %v16398_v22 = vcombine.low %v6523_v45, %v6533_v54  ;;  %v7154_v10 = vsel %vm22237_vm14, %v7152_v58, %v7153_v48  ;;  %v7088_v48 = vld [vmem:[#allocation2 + $0x48] sm:$0xe] }
 0x4e6   : > { %18476 = vmatprep.subr.bf16.mxu1 %v20791_v62  ;;  %v16432_v45 = vcombine.low %v7151_v27, %v7154_v10  ;;  %v16421_v27 = vrot.slane %v7087_v59, 9  ;;  %v25083_v59 = vld [vmem:[#allocation24_spill] sm:$0xff] }
 0x4e9   : > { %18477 = vmatpush3.bf16.msra.mxu1 %v20791_v62  ;;  %v20797_v62 = vld [vmem:[#allocation8 + $0x88] sm:$0xff]  }
 0x4ea   : > { %18478 = vmatprep.subr.bf16.mxu1 %v20792_v6 }
 0x4ec   : > { %18447 = vmatmul.mubr.bf16.gmra.mrb[8].mxu1 %v22846_v2 }
 0x4ed   : > { %18450 = vmatprep.mubr.bf16.mxu1 %v22863_v31  ;;  %18479 = vmatpush3.bf16.msra.mxu1 %v20792_v6  ;;  %v20798_v6 = vld [vmem:[#allocation8 + $0x90] sm:$0xff]  }
 0x4ee   : > { %18480 = vmatprep.subr.bf16.mxu1 %v20793_v47 }
 0x4f1   : > { %18481 = vmatpush3.bf16.msra.mxu1 %v20793_v47  ;;  %v20799_v47 = vld [vmem:[#allocation8 + $0x98] sm:$0xff]  }
 0x4f2   : > { %18482 = vmatprep.subr.bf16.mxu1 %v20794_v52 }
 0x4f4   : > { %18451 = vmatmul.mubr.bf16.gmra.mrb[12].mxu1 %v22880_v33 }
 0x4f5   : > { %18454 = vmatprep.mubr.bf16.mxu1 %v22912_v32  ;;  %18483 = vmatpush3.bf16.msra.mxu1 %v20794_v52  ;;  %v20800_v52 = vld [vmem:[#allocation8 + $0xa0] sm:$0xff]  }
 0x4f6   : > { %18484 = vmatprep.subr.bf16.mxu1 %v20795_v3 }
 0x4f9   : > { %18485 = vmatpush3.bf16.msra.mxu1 %v20795_v3  ;;  %v23009_v3 = vld [vmem:[#allocation2 + $0xd0] sm:$0xf] }
 0x4fa   : > { %18518 = vmatprep.subr.bf16.mxu1 %v20796_v30 }
 0x4fc   : > { %18455 = vmatmul.mubr.bf16.gmra.mrb[16].mxu1 %v22919_v53 }
 0x4fd   : > { %18458 = vmatprep.mubr.bf16.mxu1 %v22939_v11 }
 0x504   : > { %18459 = vmatmul.mubr.bf16.gmra.mrb[20].mxu1 %v22945_v46 }
 0x505   : > { %18462 = vmatprep.mubr.bf16.mxu1 %v22958_v4 }
 0x50c   : > { %18463 = vmatmul.mubr.bf16.gmra.mrb[24].mxu1 %v22962_v20 }
 0x50d   : > { %18466 = vmatprep.mubr.bf16.mxu1 %v22970_v51 }
 0x514   : > { %18467 = vmatmul.mubr.bf16.gmra.mrb[28].mxu1 %v16398_v22 }
 0x515   : > { %18486 = vmatprep.mubr.bf16.mxu1 %v22773_v17  ;;  %v20801_v17 = vld [vmem:[#allocation8 + $0xa8] sm:$0xff]  }
 0x51c   : > { %18487 = vmatmul.mubr.bf16.vlgmr.msra.gmra.mrb[0].mxu1 %v22807_v25  ;;  %v20802_v25 = vld [vmem:[#allocation8 + $0xb0] sm:$0xff]  }
 0x51d   : > { %18490 = vmatprep.mubr.bf16.mxu1 %v22812_v0  ;;  %18519 = vmatpush3.bf16.msra.mxu1 %v20796_v30  ;;  %v20803_v0 = vld [vmem:[#allocation8 + $0xb8] sm:$0xff]   ;;  %v6806_v30 = vshll.u32 %v23009_v3, 16 }
 0x51e   : > { %18520 = vmatprep.subr.bf16.mxu1 %v20797_v62 }
 0x51f   : > { %v6808_v50 = vrot.slane %v6806_v30, 5 }
 0x521   : > { %18521 = vmatpush3.bf16.msra.mxu1 %v20797_v62  ;;  %v7166_v62 = vrot.slane %v7164_v55, 4 }
 0x522   : > { %18522 = vmatprep.subr.bf16.mxu1 %v20798_v6 }
 0x524   : > { %18491 = vmatmul.mubr.bf16.gmra.mrb[4].mxu1 %v22831_v1  ;;  %v20804_v1 = vld [vmem:[#allocation8 + $0x140] sm:$0xff]  }
 0x525   : > { %18494 = vmatprep.mubr.bf16.mxu1 %v22846_v2  ;;  %18523 = vmatpush3.bf16.msra.mxu1 %v20798_v6  ;;  %v5801_v2 = vld [vmem:[#allocation2 + $0xcc] sm:$0xf]  ;;  %v7160_v6 = vrot.slane %v22715_v5, 5 }
 0x526   : > { %18524 = vmatprep.subr.bf16.mxu1 %v20799_v47 }
 0x529   : > { %18525 = vmatpush3.bf16.msra.mxu1 %v20799_v47  ;;  %v7084_v47 = vld [vmem:[#allocation2 + $0x18] sm:$0xe] }
 0x52a   : > { %18526 = vmatprep.subr.bf16.mxu1 %v20800_v52 }
 0x52c   : > { %18495 = vmatmul.mubr.bf16.gmra.mrb[8].mxu1 %v22863_v31  ;;  %v6797_v31 = vshrl.u32 %v5801_v2, 16 }
 0x52d   : > { %18498 = vmatprep.mubr.bf16.mxu1 %v22880_v33  ;;  %18527 = vmatpush3.bf16.msra.mxu1 %v20800_v52  ;;  %v6800_v33 = vshll.u32 %v5801_v2, 16  ;;  %v7167_v52 = vrot.slane %v22719_v56, 5  ;;  %v7178_v2 = vrot.slane %v22725_v13, 5  ;;  %v20805_v56 = vld [vmem:[#allocation8 + $0x148] sm:$0xff]   ;;  %v7174_v13 = vrot.slane %v22739_v57, 5 }
 0x52e   : > { %18528 = vmatprep.subr.bf16.mxu1 %v20801_v17  ;;  %v6799_v14 = vrot.slane %v6797_v31, 4 }
 0x52f   : > { %v7168_v19 = vsel %vm22237_vm14, %v7166_v62, %v7167_v52  ;;  %v7090_v52 = vld [vmem:[#allocation2 + $0x60] sm:$0xe] }
 0x531   : > { %18529 = vmatpush3.bf16.msra.mxu1 %v20801_v17 }
 0x532   : > { %18530 = vmatprep.subr.bf16.mxu1 %v20802_v25 }
 0x534   : > { %18499 = vmatmul.mubr.bf16.gmra.mrb[12].mxu1 %v22912_v32  ;;  %v6810_v32 = vshrl.u32 %v23009_v3, 16 }
 0x535   : > { %18502 = vmatprep.mubr.bf16.mxu1 %v22919_v53  ;;  %18531 = vmatpush3.bf16.msra.mxu1 %v20802_v25  ;;  %v6802_v53 = vrot.slane %v6800_v33, 5 }
 0x536   : > { %18532 = vmatprep.subr.bf16.mxu1 %v20803_v0  ;;  %v6812_v35 = vrot.slane %v6810_v32, 4  ;;  %v7173_v32 = vrot.slane %v7171_v37, 4 }
 0x537   : > { %v6803_v8 = vor.u32 %v6802_v53, %v6799_v14  ;;  %v7180_v14 = vrot.slane %v7178_v2, 4  ;;  %v7086_v53 = vld [vmem:[#allocation2 + $0x30] sm:$0xe] }
 0x538   : > { %v16420_v60 = vrot.slane %v7086_v53, 9 }
 0x539   : > { %18533 = vmatpush3.bf16.msra.mxu1 %v20803_v0  ;;  %v6804_v28 = vrot.slane %v6803_v8, 4  ;;  %v16418_v0 = vrot.slane %v7084_v47, 9  ;;  %v16419_v8 = vrot.slane %v7085_v21, 9  ;;  %v20811_v21 = vld [vmem:[#allocation8 + $0x178] sm:$0xff]  }
 0x53a   : > { %18566 = vmatprep.subr.bf16.mxu1 %v20804_v1 }
 0x53b   : > { %v7165_v5 = vsel %vm22237_vm14, %v16418_v0, %v7164_v55  ;;  %v7172_v57 = vsel %vm22237_vm14, %v16419_v8, %v7171_v37  ;;  %v7092_v8 = vld [vmem:[#allocation2 + $0x78] sm:$0xe] }
 0x53c   : > { %18503 = vmatmul.mubr.bf16.gmra.mrb[16].mxu1 %v22939_v11  ;;  %v6813_v11 = vor.u32 %v6812_v35, %v6808_v50  ;;  %v23047_v30 = vcombine.low %v7165_v5, %v7168_v19  ;;  %v20806_v35 = vld [vmem:[#allocation8 + $0x150] sm:$0xff]   ;;  %v7213_v19 = vrot.slane %v22820_v41, 5  ;;  %v25079_v5 = vld [vmem:[#allocation23_spill] sm:$0xff] }
 0x53d   : > { %18506 = vmatprep.mubr.bf16.mxu1 %v22945_v46  ;;  %v6816_v46 = vshll.u32 %v23015_v42, 16 }
 0x53e   : > { %v6814_v9 = vrot.slane %v6813_v11, 4  ;;  %v7175_v11 = vsel %vm22237_vm14, %v7173_v32, %v7174_v13  ;;  %v7215_v41 = vrot.slane %v7213_v19, 4  ;;  %v7091_v13 = vld [vmem:[#allocation2 + $0x6c] sm:$0xe] }
 0x53f   : > { %v6818_v38 = vrot.slane %v6816_v46, 5  ;;  %v7185_v46 = vrot.slane %v22741_v23, 5 }
 0x541   : > { %v7187_v23 = vrot.slane %v7185_v46, 4 }
 0x544   : > { %18507 = vmatmul.mubr.bf16.gmra.mrb[20].mxu1 %v22958_v4  ;;  %v6809_v4 = vsel %vm21986_vm11, %v6804_v28, %v6808_v50  ;;  %v7181_v50 = vrot.slane %v22750_v16, 5  ;;  %v7192_v28 = vrot.slane %v22759_v26, 5  ;;  %v7179_v16 = vsel %vm22237_vm14, %v16420_v60, %v7178_v2  ;;  %v23107_v60 = vld [vmem:[#allocation8 + $0x200] sm:$0xff]  }
 0x545   : > { %18510 = vmatprep.mubr.bf16.mxu1 %v22962_v20  ;;  %v6819_v20 = vsel %vm21986_vm11, %v6814_v9, %v6818_v38  ;;  %v20807_v9 = vld [vmem:[#allocation8 + $0x158] sm:$0xff]   ;;  %v7188_v26 = vrot.slane %v22777_v29, 5  ;;  %v7186_v29 = vsel %vm22237_vm14, %v16421_v27, %v7185_v46  ;;  %v16424_v2 = vrot.slane %v7090_v52, 9 }
 0x546   : > { %v16407_v54 = vcombine.low %v6809_v4, %v6819_v20  ;;  %v7182_v61 = vsel %vm22237_vm14, %v7180_v14, %v7181_v50  ;;  %v7194_v58 = vrot.slane %v7192_v28, 4  ;;  %v7195_v4 = vrot.slane %v22797_v63, 5  ;;  %v20808_v20 = vld [vmem:[#allocation8 + $0x160] sm:$0xff]   ;;  %v25080_v50 = vld [vmem:[#allocation25_spill] sm:$0xff] }
 0x547   : > { %v23065_v38 = vcombine.low %v7179_v16, %v7182_v61  ;;  %v7189_v10 = vsel %vm22237_vm14, %v7187_v23, %v7188_v26  ;;  %v16425_v61 = vrot.slane %v7091_v13, 9 }
 0x548   : > { %v7196_v55 = vsel %vm22237_vm14, %v7194_v58, %v7195_v4  ;;  %v7234_v58 = vrot.slane %v25083_v59, 5 }
 0x549   : > { %v7214_v26 = vsel %vm22237_vm14, %v16425_v61, %v7213_v19 }
 0x54c   : > { %18511 = vmatmul.mubr.bf16.gmra.mrb[24].mxu1 %v22970_v51  ;;  %v7159_v51 = vrot.slane %v7157_v7, 4 }
 0x54d   : > { %18514 = vmatprep.mubr.bf16.mxu1 %v16398_v22  ;;  %v7083_v22 = vld [vmem:[#allocation2 + $0xc] sm:$0xe] }
 0x54e   : > { %v16417_v17 = vrot.slane %v7083_v22, 9  ;;  %v7161_v25 = vsel %vm22237_vm14, %v7159_v51, %v7160_v6  ;;  %v23079_v51 = vcombine.low %v7186_v29, %v7189_v10  ;;  %v20809_v22 = vld [vmem:[#allocation8 + $0x168] sm:$0xff]   ;;  %v7089_v6 = vld [vmem:[#allocation2 + $0x54] sm:$0xe] }
 0x54f   : > { %v16423_v37 = vrot.slane %v7089_v6, 9  ;;  %v7093_v10 = vld [vmem:[#allocation2 + $0x84] sm:$0xe]  ;;  %v25085_v29 = vld [vmem:[#allocation30_spill] sm:$0xff]  ;;  %v25086_v6 = vld [vmem:[#allocation29_spill] sm:$0xff] }
 0x550   : > { %v7158_v31 = vsel %vm22237_vm14, %v16417_v17, %v7157_v7  ;;  %v7199_v7 = vrot.slane %v22775_v40, 5  ;;  %v7209_v17 = vrot.slane %v22823_v44, 5 }
 0x551   : > { %v23043_v33 = vcombine.low %v7158_v31, %v7161_v25  ;;  %v20810_v25 = vld [vmem:[#allocation8 + $0x170] sm:$0xff]  }
 0x552   : > { %v7201_v40 = vrot.slane %v7199_v7, 4 }
 0x554   : > { %18515 = vmatmul.mubr.bf16.gmra.mrb[28].mxu1 %v16407_v54  ;;  %v16422_v54 = vrot.slane %v7088_v48, 9 }
 0x555   : > { %18534 = vmatprep.mubr.bf16.mxu1 %v16432_v45  ;;  %v7206_v45 = vrot.slane %v22784_v15, 5  ;;  %v7202_v15 = vrot.slane %v22805_v12, 5  ;;  %v7200_v12 = vsel %vm22237_vm14, %v16423_v37, %v7199_v7  ;;  %v7236_v7 = vrot.slane %v7234_v58, 4 }
 0x556   : > { %v7193_v63 = vsel %vm22237_vm14, %v16422_v54, %v7192_v28  ;;  %v25084_v54 = vld [vmem:[#allocation27_spill] sm:$0xff] }
 0x557   : > { %v23083_v62 = vcombine.low %v7193_v63, %v7196_v55  ;;  %v7208_v47 = vrot.slane %v7206_v45, 4  ;;  %v7203_v0 = vsel %vm22237_vm14, %v7201_v40, %v7202_v15  ;;  %v7207_v44 = vsel %vm22237_vm14, %v16424_v2, %v7206_v45  ;;  %v7094_v45 = vld [vmem:[#allocation2 + $0x90] sm:$0xe] }
 0x558   : > { %v23097_v32 = vcombine.low %v7200_v12, %v7203_v0  ;;  %v7230_v55 = vrot.slane %v25084_v54, 5  ;;  %v7237_v63 = vrot.slane %v25085_v29, 5  ;;  %v16428_v15 = vrot.slane %v7094_v45, 9  ;;  %v20816_v54 = vld [vmem:[#allocation8 + $0x220] sm:$0xff]   ;;  %v20819_v45 = vld [vmem:[#allocation8 + $0x238] sm:$0xff]  }
 0x559   : > { %v7210_v31 = vsel %vm22237_vm14, %v7208_v47, %v7209_v17  ;;  %v7241_v47 = vrot.slane %v25086_v6, 5  ;;  %v25087_v17 = vld [vmem:[#allocation31_spill] sm:$0xff]  ;;  %v7244_v12 = vrot.slane %v22925_v43, 5  ;;  %v7587_v29 = vrot.slane %v22984_v18, 5 }
 0x55a   : > { %v23101_v14 = vcombine.low %v7207_v44, %v7210_v31  ;;  %v7238_v52 = vsel %vm22237_vm14, %v7236_v7, %v7237_v63  ;;  %v7235_v19 = vsel %vm22237_vm14, %v16428_v15, %v7234_v58  ;;  %v7096_v44 = vld [vmem:[#allocation2 + $0xa8] sm:$0xe]  ;;  %v20820_v58 = vld [vmem:[#allocation9 + $0xc0] sm:$0xff]   ;;  %v7859_v18 = vrot.slane %v23009_v3, 5 }
 0x55b   : > { %v23140_v2 = vcombine.low %v7235_v19, %v7238_v52  ;;  %v7243_v31 = vrot.slane %v7241_v47, 4  ;;  %18662 = vmatprep.subr.bf16.mxu0 %v20820_v58  ;;  %v20824_v7 = vld [vmem:[#allocation9 + $0xe0] sm:$0xff]   ;;  %v7589_v63 = vrot.slane %v7587_v29, 4  ;;  %v20826_v3 = vld [vmem:[#allocation9 + $0xf0] sm:$0xff]  }
 0x55c   : > { %18535 = vmatmul.mubr.bf16.vlgmr.msra.gmra.mrb[0].mxu1 %v23043_v33  ;;  %18663 = vmatpush3.bf16.msra.mxu0 %v20820_v58 }
 0x55d   : > { %18538 = vmatprep.mubr.bf16.mxu1 %v23047_v30  ;;  %18567 = vmatpush3.bf16.msra.mxu1 %v20804_v1  ;;  %v23061_v1 = vcombine.low %v7172_v57, %v7175_v11  ;;  %v25081_v11 = vld [vmem:[#allocation28_spill] sm:$0xff]  ;;  %v25082_v57 = vld [vmem:[#allocation26_spill] sm:$0xff]  ;;  %v7245_v13 = vsel %vm22237_vm14, %v7243_v31, %v7244_v12 }
 0x55e   : > { %18568 = vmatprep.subr.bf16.mxu1 %v20805_v56  ;;  %v7223_v46 = vrot.slane %v25081_v11, 5  ;;  %v7227_v16 = vrot.slane %v25082_v57, 5  ;;  %v7258_v57 = vrot.slane %v22949_v36, 5  ;;  %v20813_v36 = vld [vmem:[#allocation8 + $0x208] sm:$0xff]  }
 0x560   : > { %v7229_v27 = vrot.slane %v7227_v16, 4 }
 0x561   : > { %18569 = vmatpush3.bf16.msra.mxu1 %v20805_v56  ;;  %v7220_v56 = vrot.slane %v25079_v5, 5  ;;  %v7095_v5 = vld [vmem:[#allocation2 + $0x9c] sm:$0xe] }
 0x562   : > { %18570 = vmatprep.subr.bf16.mxu1 %v20806_v35  ;;  %v7231_v40 = vsel %vm22237_vm14, %v7229_v27, %v7230_v55  ;;  %v20823_v27 = vld [vmem:[#allocation9 + $0xd8] sm:$0xff]   ;;  %v20818_v55 = vld [vmem:[#allocation8 + $0x230] sm:$0xff]  }
 0x563   : > { %v7222_v53 = vrot.slane %v7220_v56, 4 }
 0x564   : > { %18539 = vmatmul.mubr.bf16.gmra.mrb[4].mxu1 %v23061_v1 }
 0x565   : > { %18542 = vmatprep.mubr.bf16.mxu1 %v23065_v38  ;;  %18571 = vmatpush3.bf16.msra.mxu1 %v20806_v35  ;;  %v7216_v35 = vrot.slane %v25080_v50, 5  ;;  %v7224_v23 = vsel %vm22237_vm14, %v7222_v53, %v7223_v46  ;;  %v25088_v53 = vld [vmem:[#allocation32_spill] sm:$0xff] }
 0x566   : > { %18572 = vmatprep.subr.bf16.mxu1 %v20807_v9  ;;  %v7255_v50 = vrot.slane %v25088_v53, 5 }
 0x567   : > { %v7217_v28 = vsel %vm22237_vm14, %v7215_v41, %v7216_v35  ;;  %v16429_v41 = vrot.slane %v7095_v5, 9  ;;  %v16430_v35 = vrot.slane %v7096_v44, 9 }
 0x568   : > { %v23117_v48 = vcombine.low %v7214_v26, %v7217_v28  ;;  %v7097_v28 = vld [vmem:[#allocation2 + $0xb4] sm:$0xe]  ;;  %v20821_v26 = vld [vmem:[#allocation9 + $0xc8] sm:$0xff]  }
 0x569   : > { %18573 = vmatpush3.bf16.msra.mxu1 %v20807_v9  ;;  %v16426_v9 = vrot.slane %v7092_v8, 9  ;;  %v7242_v11 = vsel %vm22237_vm14, %v16429_v41, %v7241_v47  ;;  %18664 = vmatprep.subr.bf16.mxu0 %v20821_v26 }
 0x56a   : > { %18574 = vmatprep.subr.bf16.mxu1 %v20808_v20  ;;  %v23153_v46 = vcombine.low %v7242_v11, %v7245_v13  ;;  %18665 = vmatpush3.bf16.msra.mxu0 %v20821_v26 }
 0x56b   : > { %v7221_v4 = vsel %vm22237_vm14, %v16426_v9, %v7220_v56 }
 0x56c   : > { %18543 = vmatmul.mubr.bf16.gmra.mrb[8].mxu1 %v23079_v51 }
 0x56d   : > { %18546 = vmatprep.mubr.bf16.mxu1 %v23083_v62  ;;  %18575 = vmatpush3.bf16.msra.mxu1 %v20808_v20  ;;  %v23122_v20 = vcombine.low %v7221_v4, %v7224_v23  ;;  %v20822_v4 = vld [vmem:[#allocation9 + $0xd0] sm:$0xff]  }
 0x56e   : > { %18576 = vmatprep.subr.bf16.mxu1 %v20809_v22  ;;  %18666 = vmatprep.subr.bf16.mxu0 %v20822_v4 }
 0x56f   : > { %18667 = vmatpush3.bf16.msra.mxu0 %v20822_v4 }
 0x570   : > { %18668 = vmatprep.subr.bf16.mxu0 %v20823_v27 }
 0x571   : > { %18577 = vmatpush3.bf16.msra.mxu1 %v20809_v22  ;;  %v16427_v22 = vrot.slane %v7093_v10, 9  ;;  %v20814_v10 = vld [vmem:[#allocation8 + $0x210] sm:$0xff]  }
 0x572   : > { %18578 = vmatprep.subr.bf16.mxu1 %v20810_v25 }
 0x573   : > { %v7228_v37 = vsel %vm22237_vm14, %v16427_v22, %v7227_v16  ;;  %v16431_v16 = vrot.slane %v7097_v28, 9  ;;  %18669 = vmatpush3.bf16.msra.mxu0 %v20823_v27  ;;  %v7098_v22 = vld [vmem:[#allocation2 + $0xc0] sm:$0xe] }
 0x574   : > { %18547 = vmatmul.mubr.bf16.gmra.mrb[12].mxu1 %v23097_v32  ;;  %v23136_v0 = vcombine.low %v7228_v37, %v7231_v40  ;;  %18670 = vmatprep.subr.bf16.mxu0 %v20824_v7  ;;  %v7590_v40 = vrot.slane %v22991_v39, 5  ;;  %v16456_v6 = vrot.slane %v7098_v22, 9  ;;  %v7099_v39 = vld [vmem:[#allocation2 + $0xcc] sm:$0xe] }
 0x575   : > { %18550 = vmatprep.mubr.bf16.mxu1 %v23101_v14  ;;  %18579 = vmatpush3.bf16.msra.mxu1 %v20810_v25  ;;  %v7248_v25 = vrot.slane %v25087_v17, 5  ;;  %v7256_v23 = vsel %vm22237_vm14, %v16431_v16, %v7255_v50 }
 0x576   : > { %18580 = vmatprep.subr.bf16.mxu1 %v20811_v21  ;;  %v7591_v47 = vsel %vm22237_vm14, %v7589_v63, %v7590_v40  ;;  %v7588_v15 = vsel %vm22237_vm14, %v16456_v6, %v7587_v29 }
 0x577   : > { %v7250_v56 = vrot.slane %v7248_v25, 4  ;;  %v7249_v43 = vsel %vm22237_vm14, %v16430_v35, %v7248_v25  ;;  %18671 = vmatpush3.bf16.msra.mxu0 %v20824_v7  ;;  %v16457_v52 = vcombine.low %v7588_v15, %v7591_v47  ;;  %v8677_v47 = vld [vmem:[#allocation2 + $0xc] sm:$0xf] }
 0x579   : > { %18581 = vmatpush3.bf16.msra.mxu1 %v20811_v21  ;;  %v7251_v21 = vrot.slane %v22929_v24, 5  ;;  %v7257_v24 = vrot.slane %v7255_v50, 4 }
 0x57a   : > { %18614 = vmatprep.subr.bf16.mxu1 %v23107_v60 }
 0x57b   : > { %v7252_v8 = vsel %vm22237_vm14, %v7250_v56, %v7251_v21  ;;  %v7259_v9 = vsel %vm22237_vm14, %v7257_v24, %v7258_v57 }
 0x57c   : > { %18551 = vmatmul.mubr.bf16.gmra.mrb[16].mxu1 %v23117_v48  ;;  %v23157_v61 = vcombine.low %v7249_v43, %v7252_v8  ;;  %v23166_v59 = vcombine.low %v7256_v23, %v7259_v9 }
 0x57d   : > { %18554 = vmatprep.mubr.bf16.mxu1 %v23122_v20 }
 0x584   : > { %18555 = vmatmul.mubr.bf16.gmra.mrb[20].mxu1 %v23136_v0 }
 0x585   : > { %18558 = vmatprep.mubr.bf16.mxu1 %v23140_v2 }
 0x58c   : > { %18559 = vmatmul.mubr.bf16.gmra.mrb[24].mxu1 %v23153_v46 }
 0x58d   : > { %18562 = vmatprep.mubr.bf16.mxu1 %v23157_v61 }
 0x594   : > { %18563 = vmatmul.mubr.bf16.gmra.mrb[28].mxu1 %v23166_v59 }
 0x595   : > { %18582 = vmatprep.mubr.bf16.mxu1 %v23043_v33  ;;  %v20815_v33 = vld [vmem:[#allocation8 + $0x218] sm:$0xff]  }
 0x59c   : > { %18583 = vmatmul.mubr.bf16.vlgmr.msra.gmra.mrb[0].mxu1 %v23047_v30 }
 0x59d   : > { %18586 = vmatprep.mubr.bf16.mxu1 %v23061_v1  ;;  %18615 = vmatpush3.bf16.msra.mxu1 %v23107_v60  ;;  %v20817_v60 = vld [vmem:[#allocation8 + $0x228] sm:$0xff]  }
 0x59e   : > { %18616 = vmatprep.subr.bf16.mxu1 %v20813_v36 }
 0x5a1   : > { %18617 = vmatpush3.bf16.msra.mxu1 %v20813_v36 }
 0x5a2   : > { %18618 = vmatprep.subr.bf16.mxu1 %v20814_v10 }
 0x5a4   : > { %18587 = vmatmul.mubr.bf16.gmra.mrb[4].mxu1 %v23065_v38 }
 0x5a5   : > { %18590 = vmatprep.mubr.bf16.mxu1 %v23079_v51  ;;  %18619 = vmatpush3.bf16.msra.mxu1 %v20814_v10 }
 0x5a6   : > { %18620 = vmatprep.subr.bf16.mxu1 %v20815_v33 }
 0x5a9   : > { %18621 = vmatpush3.bf16.msra.mxu1 %v20815_v33 }
 0x5aa   : > { %18622 = vmatprep.subr.bf16.mxu1 %v20816_v54 }
 0x5ac   : > { %18591 = vmatmul.mubr.bf16.gmra.mrb[8].mxu1 %v23083_v62 }
 0x5ad   : > { %18594 = vmatprep.mubr.bf16.mxu1 %v23097_v32  ;;  %18623 = vmatpush3.bf16.msra.mxu1 %v20816_v54 }
 0x5ae   : > { %18624 = vmatprep.subr.bf16.mxu1 %v20817_v60 }
 0x5b1   : > { %18625 = vmatpush3.bf16.msra.mxu1 %v20817_v60 }
 0x5b2   : > { %18626 = vmatprep.subr.bf16.mxu1 %v20818_v55 }
 0x5b4   : > { %18595 = vmatmul.mubr.bf16.gmra.mrb[12].mxu1 %v23101_v14 }
 0x5b5   : > { %18598 = vmatprep.mubr.bf16.mxu1 %v23117_v48  ;;  %18627 = vmatpush3.bf16.msra.mxu1 %v20818_v55 }
 0x5b6   : > { %18628 = vmatprep.subr.bf16.mxu1 %v20819_v45 }
 0x5b9   : > { %18629 = vmatpush3.bf16.msra.mxu1 %v20819_v45  ;;  %v8684_v45 = vld [vmem:[#allocation2 + $0x18] sm:$0xf] }
 0x5bc   : > { %18599 = vmatmul.mubr.bf16.gmra.mrb[16].mxu1 %v23122_v20 }
 0x5bd   : > { %18602 = vmatprep.mubr.bf16.mxu1 %v23136_v0 }
 0x5c4   : > { %18603 = vmatmul.mubr.bf16.gmra.mrb[20].mxu1 %v23140_v2 }
 0x5c5   : > { %18606 = vmatprep.mubr.bf16.mxu1 %v23153_v46 }
 0x5cc   : > { %18607 = vmatmul.mubr.bf16.gmra.mrb[24].mxu1 %v23157_v61 }
 0x5cd   : > { %18610 = vmatprep.mubr.bf16.mxu1 %v23166_v59 }
 0x5d4   : > { %18611 = vmatmul.mubr.bf16.gmra.mrb[28].mxu1 %v16457_v52 }
 0x5d5   : > { %18630 = vmatprep.mubr.bf16.mxu1 %v23047_v30  ;;  %v16466_v30 = vrot.slane %v7099_v39, 9 }
 0x5dc   : > { %18631 = vmatmul.mubr.bf16.vlgmr.msra.gmra.mrb[0].mxu1 %v23061_v1  ;;  %v7861_v1 = vrot.slane %v7859_v18, 4 }
 0x5dd   : > { %18634 = vmatprep.mubr.bf16.mxu1 %v23065_v38  ;;  %v7862_v38 = vrot.slane %v23015_v42, 5  ;;  %v23211_v42 = vld [vmem:[#allocation9] sm:$0xff]  }
 0x5e4   : > { %18635 = vmatmul.mubr.bf16.gmra.mrb[4].mxu1 %v23079_v51  ;;  %v7860_v51 = vsel %vm22237_vm14, %v16466_v30, %v7859_v18  ;;  %v8688_v30 = vld [vmem:[#allocation2 + $0x20] sm:$0x1] }
 0x5e5   : > { %18638 = vmatprep.mubr.bf16.mxu1 %v23083_v62  ;;  %v7863_v62 = vsel %vm22237_vm14, %v7861_v1, %v7862_v38 }
 0x5ec   : > { %18639 = vmatmul.mubr.bf16.gmra.mrb[8].mxu1 %v23097_v32  ;;  %v16467_v32 = vcombine.low %v7860_v51, %v7863_v62 }
 0x5ed   : > { %18642 = vmatprep.mubr.bf16.mxu1 %v23101_v14  ;;  %v20825_v14 = vld [vmem:[#allocation9 + $0xe8] sm:$0xff]  }
 0x5ee   : > { %18672 = vmatprep.subr.bf16.mxu0 %v20825_v14 }
 0x5ef   : > { %18673 = vmatpush3.bf16.msra.mxu0 %v20825_v14 }
 0x5f0   : > { %18674 = vmatprep.subr.bf16.mxu0 %v20826_v3 }
 0x5f3   : > { %18675 = vmatpush3.bf16.msra.mxu0 %v20826_v3 }
 0x5f4   : > { %18643 = vmatmul.mubr.bf16.gmra.mrb[12].mxu1 %v23117_v48  ;;  %v20827_v48 = vld [vmem:[#allocation9 + $0xf8] sm:$0xff]  }
 0x5f5   : > { %18646 = vmatprep.mubr.bf16.mxu1 %v23122_v20  ;;  %18676 = vmatprep.subr.bf16.mxu0 %v20827_v48  ;;  %v23217_v20 = vld [vmem:[%s24941_s4] ss:$0 sm:$0xff] }
 0x5f7   : > { %18677 = vmatpush3.bf16.msra.mxu0 %v20827_v48  ;;  %v8681_v48 = vld [vmem:[#allocation2 + $0x14] sm:$0x1] }
 0x5f8   : > { %18710 = vmatprep.subr.bf16.mxu0 %v23211_v42 }
 0x5fc   : > { %18647 = vmatmul.mubr.bf16.gmra.mrb[16].mxu1 %v23136_v0 }
 0x5fd   : > { %18650 = vmatprep.mubr.bf16.mxu1 %v23140_v2 }
 0x604   : > { %18651 = vmatmul.mubr.bf16.gmra.mrb[20].mxu1 %v23153_v46 }
 0x605   : > { %18654 = vmatprep.mubr.bf16.mxu1 %v23157_v61 }
 0x60c   : > { %18655 = vmatmul.mubr.bf16.gmra.mrb[24].mxu1 %v23166_v59 }
 0x60d   : > { %18658 = vmatprep.mubr.bf16.mxu1 %v16457_v52 }
 0x614   : > { %18659 = vmatmul.mubr.bf16.gmra.mrb[28].mxu1 %v16467_v32 }
 0x6af   : > { %v18632_v17 = vpop.f32.mrb[0].mxu1 }
 0x6b0   : > { %v8135_v25 = vadd.f32 %v18632_v17, %v23217_v20  ;;  %v7967_v37 = vpop.f32.mrb[1].mxu1 }
 0x6b1   : > { %v8133_v0 = vadd.f32 %v23217_v20, %v7967_v37  ;;  %v18633_v19 = vpop.f32.mrb[2].mxu1 }
 0x6b2   : > { %vm8167_vm13 = vcmp.ge.f32.partialorder %v8135_v25, 0.0  ;;  %v8199_v2 = vmul.f32 0.1, %v8135_v25  ;;  %v8136_v31 = vadd.f32 %v18633_v19, %v23217_v20  ;;  %v7970_v5 = vpop.f32.mrb[3].mxu1 }
 0x6b3   : > { %vm8165_vm15 = vcmp.ge.f32.partialorder %v8133_v0, 0.0  ;;  %v8197_v56 = vmul.f32 0.1, %v8133_v0  ;;  %v8134_v12 = vadd.f32 %v23217_v20, %v7970_v5 }
 0x6b4   : > { %v8231_v44 = vsel %vm8167_vm13, %v8135_v25, %v8199_v2  ;;  %vm8168_vm0 = vcmp.ge.f32.partialorder %v8136_v31, 0.0  ;;  %v8200_v21 = vmul.f32 0.1, %v8136_v31 }
 0x6b5   : > { %v16871_v41 = vpack.c.bf16 %v8231_v44, %v8231_v44  ;;  %v8229_v13 = vsel %vm8165_vm15, %v8133_v0, %v8197_v56  ;;  %vm8166_vm1 = vcmp.ge.f32.partialorder %v8134_v12, 0.0  ;;  %v8198_v53 = vmul.f32 0.1, %v8134_v12 }
 0x6b6   : > { %v16869_v50 = vpack.c.bf16 %v8229_v13, %v8229_v13  ;;  %v8232_v35 = vsel %vm8168_vm0, %v8136_v31, %v8200_v21 }
 0x6b7   : > { %v8375_v8 = vshrl.u32 %v16871_v41, 16  ;;  %v8378_v11 = vshll.u32 %v16871_v41, 16  ;;  %v16872_v46 = vpack.c.bf16 %v8232_v35, %v8232_v35  ;;  %v8230_v43 = vsel %vm8166_vm1, %v8134_v12, %v8198_v53  ;;  %v18636_v61 = vpop.f32.mrb[4].mxu1 }
 0x6b8   : > { %v8358_v24 = vshrl.u32 %v16869_v50, 16  ;;  %v8361_v28 = vshll.u32 %v16869_v50, 16  ;;  %v16870_v57 = vpack.c.bf16 %v8230_v43, %v8230_v43  ;;  %v8139_v16 = vadd.f32 %v18636_v61, %v23217_v20  ;;  %v7983_v9 = vpop.f32.mrb[5].mxu1 }
 0x6b9   : > { %v8377_v23 = vrot.slane %v8375_v8, 7  ;;  %v8383_v59 = vshrl.u32 %v16872_v46, 16  ;;  %v8386_v58 = vshll.u32 %v16872_v46, 16  ;;  %v8137_v26 = vadd.f32 %v23217_v20, %v7983_v9  ;;  %v18637_v4 = vpop.f32.mrb[6].mxu1 }
 0x6ba   : > { %v8360_v36 = vrot.slane %v8358_v24, 7  ;;  %v8366_v27 = vshrl.u32 %v16870_v57, 16  ;;  %v8369_v10 = vshll.u32 %v16870_v57, 16  ;;  %vm8171_vm3 = vcmp.ge.f32.partialorder %v8139_v16, 0.0  ;;  %v7986_v7 = vpop.f32.mrb[7].mxu1 }
 0x6bb   : > { %v8380_v33 = vor.u32 %v8378_v11, %v8377_v23  ;;  %v8381_v54 = vrot.slane %v8377_v23, 4  ;;  %v8385_v60 = vrot.slane %v8383_v59, 7  ;;  %v8203_v55 = vmul.f32 0.1, %v8139_v16  ;;  %v8698_v24 = vld [vmem:[#allocation2 + $0x30] sm:$0xf] }
 0x6bc   : > { %v8363_v29 = vor.u32 %v8361_v28, %v8360_v36  ;;  %v8364_v63 = vrot.slane %v8360_v36, 4  ;;  %v8368_v22 = vrot.slane %v8366_v27, 7  ;;  %vm8169_vm4 = vcmp.ge.f32.partialorder %v8137_v26, 0.0 }
 0x6bd   : > { %v8685_v6 = vsel %vm21598_vm8, %v8380_v33, %v8684_v45  ;;  %v8388_v15 = vor.u32 %v8386_v58, %v8385_v60  ;;  %v8390_v52 = vrot.slane %v8385_v60, 4  ;;  %v8235_v18 = vsel %vm8171_vm3, %v8139_v16, %v8203_v55 }
 0x6be   : > { %8686 = vst [vmem:[#allocation2 + $0x18] sm:$0xf] %v8685_v6  ;;  %v8678_v39 = vsel %vm21598_vm8, %v8363_v29, %v8677_v47  ;;  %v8371_v1 = vor.u32 %v8369_v10, %v8368_v22  ;;  %v8373_v38 = vrot.slane %v8368_v22, 4  ;;  %v16875_v51 = vpack.c.bf16 %v8235_v18, %v8235_v18 }
 0x6bf   : > { %8679 = vst [vmem:[#allocation2 + $0xc] sm:$0xf] %v8678_v39  ;;  %v8389_v32 = vsel %vm21592_vm7, %v8381_v54, %v8388_v15  ;;  %v8689_v3 = vsel %vm21569_vm2, %v8390_v52, %v8688_v30  ;;  %v8201_v17 = vmul.f32 0.1, %v8137_v26  ;;  %v8140_v25 = vadd.f32 %v18637_v4, %v23217_v20  ;;  %v18640_v37 = vpop.f32.mrb[8].mxu1 }
 0x6c0   : > { %8687 = vst [vmem:[#allocation2 + $0x1c] sm:$0xf] %v8389_v32  ;;  %8690 = vst [vmem:[#allocation2 + $0x20] sm:$0x1] %v8689_v3  ;;  %v8372_v0 = vsel %vm21592_vm7, %v8364_v63, %v8371_v1  ;;  %v8682_v19 = vsel %vm21569_vm2, %v8373_v38, %v8681_v48  ;;  %v8409_v2 = vshrl.u32 %v16875_v51, 16  ;;  %v8412_v31 = vshll.u32 %v16875_v51, 16 }
 0x6c1   : > { %v7999_v5 = vpop.f32.mrb[9].mxu1  ;;  %8680 = vst [vmem:[#allocation2 + $0x10] sm:$0xf] %v8372_v0  ;;  %8683 = vst [vmem:[#allocation2 + $0x14] sm:$0x1] %v8682_v19  ;;  %v8233_v56 = vsel %vm8169_vm4, %v8137_v26, %v8201_v17  ;;  %vm8172_vm5 = vcmp.ge.f32.partialorder %v8140_v25, 0.0  ;;  %v8138_v44 = vadd.f32 %v23217_v20, %v7986_v7  ;;  %v8143_v53 = vadd.f32 %v18640_v37, %v23217_v20 }
 0x6c2   : > { %v8204_v12 = vmul.f32 0.1, %v8140_v25  ;;  %v18641_v21 = vpop.f32.mrb[10].mxu1  ;;  %v8411_v41 = vrot.slane %v8409_v2, 7  ;;  %v16873_v13 = vpack.c.bf16 %v8233_v56, %v8233_v56  ;;  %v8141_v50 = vadd.f32 %v23217_v20, %v7999_v5  ;;  %v8691_v4 = vld [vmem:[#allocation2 + $0x24] sm:$0xf] }
 0x6c3   : > { %v23242_v35 = vpop.f32.mrb[11].mxu1  ;;  %vm8170_vm6 = vcmp.ge.f32.partialorder %v8138_v44, 0.0  ;;  %v8202_v11 = vmul.f32 0.1, %v8138_v44  ;;  %v8144_v46 = vadd.f32 %v18641_v21, %v23217_v20  ;;  %vm8175_vm9 = vcmp.ge.f32.partialorder %v8143_v53, 0.0  ;;  %v20833_v51 = vld [vmem:[#allocation9 + $0x8] sm:$0xff]  }
 0x6c4   : > { %v8236_v8 = vsel %vm8172_vm5, %v8140_v25, %v8204_v12  ;;  %v8414_v43 = vor.u32 %v8412_v31, %v8411_v41  ;;  %v8415_v61 = vrot.slane %v8411_v41, 4  ;;  %v8392_v28 = vshrl.u32 %v16873_v13, 16  ;;  %v8702_v25 = vld [vmem:[#allocation2 + $0x38] sm:$0x1]  ;;  %v8695_v56 = vld [vmem:[#allocation2 + $0x2c] sm:$0x1] }
 0x6c5   : > { %v8395_v57 = vshll.u32 %v16873_v13, 16  ;;  %v16876_v16 = vpack.c.bf16 %v8236_v8, %v8236_v8  ;;  %v8234_v9 = vsel %vm8170_vm6, %v8138_v44, %v8202_v11  ;;  %v8207_v23 = vmul.f32 0.1, %v8143_v53 }
 0x6c6   : > { %v8699_v59 = vsel %vm21598_vm8, %v8414_v43, %v8698_v24  ;;  %v8394_v58 = vrot.slane %v8392_v28, 7  ;;  %v16874_v26 = vpack.c.bf16 %v8234_v9, %v8234_v9  ;;  %vm8173_vm10 = vcmp.ge.f32.partialorder %v8141_v50, 0.0 }
 0x6c7   : > { %8700 = vst [vmem:[#allocation2 + $0x30] sm:$0xf] %v8699_v59  ;;  %v8417_v36 = vshrl.u32 %v16876_v16, 16  ;;  %v8420_v27 = vshll.u32 %v16876_v16, 16  ;;  %v8239_v10 = vsel %vm8175_vm9, %v8143_v53, %v8207_v23  ;;  %v8205_v7 = vmul.f32 0.1, %v8141_v50 }
 0x6c8   : > { %v18644_v33 = vpop.f32.mrb[12].mxu1  ;;  %v8397_v54 = vor.u32 %v8395_v57, %v8394_v58  ;;  %v8398_v60 = vrot.slane %v8394_v58, 4  ;;  %v8400_v55 = vshrl.u32 %v16874_v26, 16  ;;  %v8403_v45 = vshll.u32 %v16874_v26, 16  ;;  %v23251_v15 = vld [vmem:[#allocation2 + $0xc] sm:$0xff]   ;;  %v23255_v38 = vld [vmem:[#allocation2 + $0x18] sm:$0xff]  }
 0x6c9   : > { %v23247_v29 = vpop.f32.mrb[13].mxu1  ;;  %v8419_v63 = vrot.slane %v8417_v36, 7  ;;  %v16879_v22 = vpack.c.bf16 %v8239_v10, %v8239_v10  ;;  %v8237_v6 = vsel %vm8173_vm10, %v8141_v50, %v8205_v7  ;;  %vm8176_vm12 = vcmp.ge.f32.partialorder %v8144_v46, 0.0  ;;  %18678 = vmatprep.mubr.bf16.mxu0 %v23251_v15  ;;  %v20836_v50 = vld [vmem:[#allocation9 + $0x10] sm:$0xff]   ;;  %v8705_v57 = vld [vmem:[#allocation2 + $0x3c] sm:$0xf] }
 0x6ca   : > { %v23249_v47 = vpop.f32.mrb[14].mxu1  ;;  %v8692_v52 = vsel %vm21598_vm8, %v8397_v54, %v8691_v4  ;;  %v8402_v18 = vrot.slane %v8400_v55, 7  ;;  %v16877_v39 = vpack.c.bf16 %v8237_v6, %v8237_v6  ;;  %v8208_v30 = vmul.f32 0.1, %v8144_v46  ;;  %18679 = vmatmul.mubr.bf16.vlgmr.msra.gmra.mrb[32].mxu0 %v23255_v38 }
 0x6cb   : > { %v8018_v1 = vpop.f32.mrb[15].mxu1  ;;  %8693 = vst [vmem:[#allocation2 + $0x24] sm:$0xf] %v8692_v52  ;;  %v8422_v32 = vor.u32 %v8420_v27, %v8419_v63  ;;  %v8424_v3 = vrot.slane %v8419_v63, 4  ;;  %v8443_v48 = vshrl.u32 %v16879_v22, 16  ;;  %v8446_v17 = vshll.u32 %v16879_v22, 16  ;;  %18711 = vmatpush3.bf16.msra.mxu0 %v23211_v42 }
 0x6cc   : > { %v8405_v37 = vor.u32 %v8403_v45, %v8402_v18  ;;  %v8407_v0 = vrot.slane %v8402_v18, 4  ;;  %v8426_v19 = vshrl.u32 %v16877_v39, 16  ;;  %v8429_v2 = vshll.u32 %v16877_v39, 16  ;;  %18712 = vmatprep.subr.bf16.mxu0 %v20833_v51  ;;  %v8716_v22 = vld [vmem:[#allocation2 + $0x50] sm:$0x1] }
 0x6cd   : > { %v8423_v31 = vsel %vm21592_vm7, %v8415_v61, %v8422_v32  ;;  %v8703_v5 = vsel %vm21569_vm2, %v8424_v3, %v8702_v25  ;;  %v8445_v12 = vrot.slane %v8443_v48, 7  ;;  %v8240_v44 = vsel %vm8176_vm12, %v8144_v46, %v8208_v30  ;;  %v8712_v46 = vld [vmem:[#allocation2 + $0x48] sm:$0xf]  ;;  %v20842_v32 = vld [vmem:[#allocation9 + $0x20] sm:$0xff]  }
 0x6ce   : > { %8701 = vst [vmem:[#allocation2 + $0x34] sm:$0xf] %v8423_v31  ;;  %8704 = vst [vmem:[#allocation2 + $0x38] sm:$0x1] %v8703_v5  ;;  %v8406_v21 = vsel %vm21592_vm7, %v8398_v60, %v8405_v37  ;;  %v8696_v41 = vsel %vm21569_vm2, %v8407_v0, %v8695_v56  ;;  %v23269_v13 = vrot.slane %v8426_v19, 7  ;;  %v16880_v53 = vpack.c.bf16 %v8240_v44, %v8240_v44 }
 0x6cf   : > { %8694 = vst [vmem:[#allocation2 + $0x28] sm:$0xf] %v8406_v21  ;;  %8697 = vst [vmem:[#allocation2 + $0x2c] sm:$0x1] %v8696_v41  ;;  %v8448_v8 = vor.u32 %v8446_v17, %v8445_v12  ;;  %v8449_v11 = vrot.slane %v8445_v12, 4  ;;  %v8142_v42 = vadd.f32 %v23217_v20, %v23242_v35  ;;  %v8147_v43 = vadd.f32 %v18644_v33, %v23217_v20  ;;  %v18648_v61 = vpop.f32.mrb[16].mxu1 }
 0x6d0   : > { %v8431_v24 = vor.u32 %v8429_v2, %v23269_v13  ;;  %v8432_v28 = vrot.slane %v23269_v13, 4  ;;  %v8451_v16 = vshrl.u32 %v16880_v53, 16  ;;  %v8454_v9 = vshll.u32 %v16880_v53, 16  ;;  %v23276_v23 = vpop.f32.mrb[17].mxu1  ;;  %18713 = vmatpush3.bf16.msra.mxu0 %v20833_v51  ;;  %v20839_v35 = vld [vmem:[#allocation9 + $0x18] sm:$0xff]  }
 0x6d1   : > { %v8713_v59 = vsel %vm21598_vm8, %v8448_v8, %v8712_v46  ;;  %vm8174_vm13 = vcmp.ge.f32.partialorder %v8142_v42, 0.0  ;;  %v8206_v58 = vmul.f32 0.1, %v8142_v42  ;;  %vm8179_vm15 = vcmp.ge.f32.partialorder %v8147_v43, 0.0  ;;  %v23280_v26 = vpop.f32.mrb[18].mxu1  ;;  %18714 = vmatprep.subr.bf16.mxu0 %v20836_v50 }
 0x6d2   : > { %8714 = vst [vmem:[#allocation2 + $0x48] sm:$0xf] %v8713_v59  ;;  %v8706_v4 = vsel %vm21598_vm8, %v8431_v24, %v8705_v57  ;;  %v8453_v36 = vrot.slane %v8451_v16, 7  ;;  %v8211_v27 = vmul.f32 0.1, %v8147_v43  ;;  %v8145_v10 = vadd.f32 %v23217_v20, %v23247_v29  ;;  %v23286_v7 = vpop.f32.mrb[19].mxu1 }
 0x6d3   : > { %8707 = vst [vmem:[#allocation2 + $0x3c] sm:$0xf] %v8706_v4  ;;  %v8238_v33 = vsel %vm8174_vm13, %v8142_v42, %v8206_v58  ;;  %v8148_v54 = vadd.f32 %v23249_v47, %v23217_v20  ;;  %v8146_v60 = vadd.f32 %v23217_v20, %v8018_v1  ;;  %v8151_v55 = vadd.f32 %v18648_v61, %v23217_v20  ;;  %v8709_v46 = vld [vmem:[#allocation2 + $0x44] sm:$0x1]  ;;  %v8726_v59 = vld [vmem:[#allocation2 + $0x60] sm:$0xf] }
 0x6d4   : > { %v8456_v45 = vor.u32 %v8454_v9, %v8453_v36  ;;  %v8458_v63 = vrot.slane %v8453_v36, 4  ;;  %v16878_v6 = vpack.c.bf16 %v8238_v33, %v8238_v33  ;;  %v8243_v52 = vsel %vm8179_vm15, %v8147_v43, %v8211_v27  ;;  %18715 = vmatpush3.bf16.msra.mxu0 %v20836_v50  ;;  %v20845_v57 = vld [vmem:[#allocation9 + $0x28] sm:$0xff]  }
 0x6d5   : > { %v16883_v18 = vpack.c.bf16 %v8243_v52, %v8243_v52  ;;  %vm8177_vm0 = vcmp.ge.f32.partialorder %v8145_v10, 0.0  ;;  %v8209_v29 = vmul.f32 0.1, %v8145_v10  ;;  %vm8180_vm1 = vcmp.ge.f32.partialorder %v8148_v54, 0.0  ;;  %18716 = vmatprep.subr.bf16.mxu0 %v20839_v35  ;;  %v23299_v37 = vld [vmem:[#allocation2 + $0x30] sm:$0xff]  }
 0x6d6   : > { %v8457_v39 = vsel %vm21592_vm7, %v8449_v11, %v8456_v45  ;;  %v8717_v47 = vsel %vm21569_vm2, %v8458_v63, %v8716_v22  ;;  %v8434_v30 = vshrl.u32 %v16878_v6, 16  ;;  %v8437_v1 = vshll.u32 %v16878_v6, 16  ;;  %v23297_v51 = vld [vmem:[#allocation2 + $0x24] sm:$0xff]  }
 0x6d7   : > { %8715 = vst [vmem:[#allocation2 + $0x4c] sm:$0xf] %v8457_v39  ;;  %8718 = vst [vmem:[#allocation2 + $0x50] sm:$0x1] %v8717_v47  ;;  %v8477_v3 = vshrl.u32 %v16883_v18, 16  ;;  %v8480_v48 = vshll.u32 %v16883_v18, 16  ;;  %v8241_v17 = vsel %vm8177_vm0, %v8145_v10, %v8209_v29  ;;  %18682 = vmatprep.mubr.bf16.mxu0 %v23297_v51  ;;  %v8149_v22 = vadd.f32 %v23217_v20, %v23276_v23 }
 0x6d8   : > { %v8212_v25 = vmul.f32 0.1, %v8148_v54  ;;  %v18652_v0 = vpop.f32.mrb[20].mxu1  ;;  %v8436_v19 = vrot.slane %v8434_v30, 7  ;;  %v16881_v2 = vpack.c.bf16 %v8241_v17, %v8241_v17  ;;  %vm8178_vm3 = vcmp.ge.f32.partialorder %v8146_v60, 0.0  ;;  %18683 = vmatmul.mubr.bf16.gmra.mrb[36].mxu0 %v23299_v37  ;;  %v20848_v18 = vld [vmem:[#allocation9 + $0x30] sm:$0xff]  }
 0x6d9   : > { %v8210_v31 = vmul.f32 0.1, %v8146_v60  ;;  %v23302_v5 = vpop.f32.mrb[21].mxu1  ;;  %v23304_v56 = vrot.slane %v8477_v3, 7  ;;  %vm8183_vm4 = vcmp.ge.f32.partialorder %v8151_v55, 0.0  ;;  %18717 = vmatpush3.bf16.msra.mxu0 %v20839_v35  ;;  %v8152_v6 = vadd.f32 %v23280_v26, %v23217_v20 }
 0x6da   : > { %v8244_v12 = vsel %vm8180_vm1, %v8148_v54, %v8212_v25  ;;  %v8215_v44 = vmul.f32 0.1, %v8151_v55  ;;  %v23308_v21 = vpop.f32.mrb[22].mxu1  ;;  %v8439_v41 = vor.u32 %v8437_v1, %v8436_v19  ;;  %v8441_v53 = vrot.slane %v8436_v19, 4  ;;  %18718 = vmatprep.subr.bf16.mxu0 %v20842_v32 }
 0x6db   : > { %v8460_v50 = vshrl.u32 %v16881_v2, 16  ;;  %v8463_v8 = vshll.u32 %v16881_v2, 16  ;;  %v23310_v11 = vpop.f32.mrb[23].mxu1  ;;  %v8482_v42 = vor.u32 %v8480_v48, %v23304_v56  ;;  %v8483_v43 = vrot.slane %v23304_v56, 4 }
 0x6dc   : > { %v16884_v61 = vpack.c.bf16 %v8244_v12, %v8244_v12  ;;  %v8242_v24 = vsel %vm8178_vm3, %v8146_v60, %v8210_v31  ;;  %v8440_v16 = vsel %vm21592_vm7, %v8432_v28, %v8439_v41  ;;  %v8710_v9 = vsel %vm21569_vm2, %v8441_v53, %v8709_v46  ;;  %v8719_v60 = vld [vmem:[#allocation2 + $0x54] sm:$0xf]  ;;  %v8723_v31 = vld [vmem:[#allocation2 + $0x5c] sm:$0x1]  ;;  %v8740_v53 = vld [vmem:[#allocation2 + $0x78] sm:$0xf] }
 0x6dd   : > { %v8462_v58 = vrot.slane %v8460_v50, 7  ;;  %v16882_v35 = vpack.c.bf16 %v8242_v24, %v8242_v24  ;;  %8708 = vst [vmem:[#allocation2 + $0x40] sm:$0xf] %v8440_v16  ;;  %8711 = vst [vmem:[#allocation2 + $0x44] sm:$0x1] %v8710_v9  ;;  %v8727_v4 = vsel %vm21598_vm8, %v8482_v42, %v8726_v59  ;;  %v8247_v10 = vsel %vm8183_vm4, %v8151_v55, %v8215_v44  ;;  %v20851_v12 = vld [vmem:[#allocation9 + $0x38] sm:$0xff]  }
 0x6de   : > { %v8485_v36 = vshrl.u32 %v16884_v61, 16  ;;  %v8488_v27 = vshll.u32 %v16884_v61, 16  ;;  %8728 = vst [vmem:[#allocation2 + $0x60] sm:$0xf] %v8727_v4  ;;  %18719 = vmatpush3.bf16.msra.mxu0 %v20842_v32  ;;  %v16887_v63 = vpack.c.bf16 %v8247_v10, %v8247_v10  ;;  %v8150_v39 = vadd.f32 %v23217_v20, %v23286_v7  ;;  %v8730_v32 = vld [vmem:[#allocation2 + $0x68] sm:$0x1] }
 0x6df   : > { %v8465_v13 = vor.u32 %v8463_v8, %v8462_v58  ;;  %v8466_v33 = vrot.slane %v8462_v58, 4  ;;  %v8468_v54 = vshrl.u32 %v16882_v35, 16  ;;  %v8471_v28 = vshll.u32 %v16882_v35, 16  ;;  %v23328_v52 = vpop.f32.mrb[24].mxu1  ;;  %18720 = vmatprep.subr.bf16.mxu0 %v20845_v57  ;;  %v23356_v24 = vld [vmem:[#allocation2 + $0x48] sm:$0xff]  }
 0x6e0   : > { %v8487_v45 = vrot.slane %v8485_v36, 7  ;;  %v8155_v47 = vadd.f32 %v18652_v0, %v23217_v20  ;;  %v23335_v30 = vpop.f32.mrb[25].mxu1  ;;  %v8511_v26 = vshrl.u32 %v16887_v63, 16  ;;  %v8514_v3 = vshll.u32 %v16887_v63, 16 }
 0x6e1   : > { %v8720_v55 = vsel %vm21598_vm8, %v8465_v13, %v8719_v60  ;;  %v8470_v29 = vrot.slane %v8468_v54, 7  ;;  %v23337_v48 = vpop.f32.mrb[26].mxu1  ;;  %vm8181_vm5 = vcmp.ge.f32.partialorder %v8149_v22, 0.0  ;;  %v8213_v19 = vmul.f32 0.1, %v8149_v22 }
 0x6e2   : > { %8721 = vst [vmem:[#allocation2 + $0x54] sm:$0xf] %v8720_v55  ;;  %v8490_v23 = vor.u32 %v8488_v27, %v8487_v45  ;;  %v8492_v1 = vrot.slane %v8487_v45, 4  ;;  %v23339_v2 = vpop.f32.mrb[27].mxu1  ;;  %18721 = vmatpush3.bf16.msra.mxu0 %v20845_v57  ;;  %v23345_v56 = vrot.slane %v8511_v26, 7  ;;  %vm8184_vm6 = vcmp.ge.f32.partialorder %v8152_v6, 0.0 }
 0x6e3   : > { %v8473_v17 = vor.u32 %v8471_v28, %v8470_v29  ;;  %v8475_v25 = vrot.slane %v8470_v29, 4  ;;  %18722 = vmatprep.subr.bf16.mxu0 %v20848_v18  ;;  %v8245_v50 = vsel %vm8181_vm5, %v8149_v22, %v8213_v19  ;;  %v8216_v8 = vmul.f32 0.1, %v8152_v6  ;;  %v23365_v27 = vld [vmem:[#allocation9 + $0x180] sm:$0xff]  }
 0x6e4   : > { %v8491_v7 = vsel %vm21592_vm7, %v8483_v43, %v8490_v23  ;;  %v8731_v0 = vsel %vm21569_vm2, %v8492_v1, %v8730_v32  ;;  %v23352_v46 = vld [vmem:[#allocation2 + $0x3c] sm:$0xff]   ;;  %v8516_v42 = vor.u32 %v8514_v3, %v23345_v56  ;;  %v8517_v43 = vrot.slane %v23345_v56, 4 }
 0x6e5   : > { %8729 = vst [vmem:[#allocation2 + $0x64] sm:$0xf] %v8491_v7  ;;  %8732 = vst [vmem:[#allocation2 + $0x68] sm:$0x1] %v8731_v0  ;;  %v8474_v44 = vsel %vm21592_vm7, %v8466_v33, %v8473_v17  ;;  %v8724_v41 = vsel %vm21569_vm2, %v8475_v25, %v8723_v31  ;;  %v16885_v61 = vpack.c.bf16 %v8245_v50, %v8245_v50  ;;  %vm8182_vm9 = vcmp.ge.f32.partialorder %v8150_v39, 0.0 }
 0x6e6   : > { %8722 = vst [vmem:[#allocation2 + $0x58] sm:$0xf] %v8474_v44  ;;  %8725 = vst [vmem:[#allocation2 + $0x5c] sm:$0x1] %v8724_v41  ;;  %v8248_v57 = vsel %vm8184_vm6, %v8152_v6, %v8216_v8  ;;  %v8214_v16 = vmul.f32 0.1, %v8150_v39  ;;  %18686 = vmatprep.mubr.bf16.mxu0 %v23352_v46  ;;  %18723 = vmatpush3.bf16.msra.mxu0 %v20848_v18  ;;  %v8741_v59 = vsel %vm21598_vm8, %v8516_v42, %v8740_v53 }
 0x6e7   : > { %vm8187_vm10 = vcmp.ge.f32.partialorder %v8155_v47, 0.0  ;;  %v8219_v9 = vmul.f32 0.1, %v8155_v47  ;;  %v8494_v58 = vshrl.u32 %v16885_v61, 16  ;;  %v8497_v35 = vshll.u32 %v16885_v61, 16  ;;  %18687 = vmatmul.mubr.bf16.gmra.mrb[40].mxu0 %v23356_v24  ;;  %v23363_v36 = vpop.f32.mrb[28].mxu1  ;;  %18724 = vmatprep.subr.bf16.mxu0 %v20851_v12 }
 0x6e8   : > { %v16888_v4 = vpack.c.bf16 %v8248_v57, %v8248_v57  ;;  %8742 = vst [vmem:[#allocation2 + $0x78] sm:$0xf] %v8741_v59  ;;  %v8246_v10 = vsel %vm8182_vm9, %v8150_v39, %v8214_v16  ;;  %v8153_v33 = vadd.f32 %v23217_v20, %v23302_v5  ;;  %v8156_v54 = vadd.f32 %v23308_v21, %v23217_v20  ;;  %v23372_v28 = vpop.f32.mrb[29].mxu1  ;;  %v8733_v18 = vld [vmem:[#allocation2 + $0x6c] sm:$0xf] }
 0x6e9   : > { %v8251_v13 = vsel %vm8187_vm10, %v8155_v47, %v8219_v9  ;;  %v8496_v60 = vrot.slane %v8494_v58, 7  ;;  %v16886_v22 = vpack.c.bf16 %v8246_v10, %v8246_v10  ;;  %v23374_v6 = vpop.f32.mrb[30].mxu1  ;;  %v8744_v56 = vld [vmem:[#allocation2 + $0x80] sm:$0x1]  ;;  %v8154_v53 = vadd.f32 %v23217_v20, %v23310_v11  ;;  %v8737_v57 = vld [vmem:[#allocation2 + $0x74] sm:$0x1] }
 0x6ea   : > { %v8519_v45 = vshrl.u32 %v16888_v4, 16  ;;  %v8522_v63 = vshll.u32 %v16888_v4, 16  ;;  %v16891_v55 = vpack.c.bf16 %v8251_v13, %v8251_v13  ;;  %vm8185_vm12 = vcmp.ge.f32.partialorder %v8153_v33, 0.0  ;;  %v23376_v39 = vpop.f32.mrb[31].mxu1  ;;  %18725 = vmatpush3.bf16.msra.mxu0 %v20851_v12 }
 0x6eb   : > { %v8217_v29 = vmul.f32 0.1, %v8153_v33  ;;  %vm8188_vm13 = vcmp.ge.f32.partialorder %v8156_v54, 0.0  ;;  %v8499_v5 = vor.u32 %v8497_v35, %v8496_v60  ;;  %v8500_v47 = vrot.slane %v8496_v60, 4  ;;  %18758 = vmatprep.subr.bf16.mxu0 %v23365_v27  ;;  %v8754_v35 = vld [vmem:[#allocation2 + $0x90] sm:$0xf] }
 0x6ec   : > { %v8521_v23 = vrot.slane %v8519_v45, 7  ;;  %v8502_v21 = vshrl.u32 %v16886_v22, 16  ;;  %v8505_v1 = vshll.u32 %v16886_v22, 16  ;;  %v8545_v32 = vshrl.u32 %v16891_v55, 16  ;;  %v23383_v31 = vld [vmem:[#allocation2 + $0x60] sm:$0xff]  }
 0x6ed   : > { %v8548_v26 = vshll.u32 %v16891_v55, 16  ;;  %v8249_v3 = vsel %vm8185_vm12, %v8153_v33, %v8217_v29  ;;  %v23379_v17 = vld [vmem:[#allocation2 + $0x54] sm:$0xff]   ;;  %v8734_v25 = vsel %vm21598_vm8, %v8499_v5, %v8733_v18  ;;  %v8220_v41 = vmul.f32 0.1, %v8156_v54  ;;  %v8747_v29 = vld [vmem:[#allocation2 + $0x84] sm:$0xf] }
 0x6ee   : > { %v8524_v19 = vor.u32 %v8522_v63, %v8521_v23  ;;  %v8526_v7 = vrot.slane %v8521_v23, 4  ;;  %v8504_v0 = vrot.slane %v8502_v21, 7  ;;  %8735 = vst [vmem:[#allocation2 + $0x6c] sm:$0xf] %v8734_v25  ;;  %v23385_v12 = vrot.slane %v8545_v32, 7  ;;  %18690 = vmatprep.mubr.bf16.mxu0 %v23379_v17 }
 0x6ef   : > { %v16889_v44 = vpack.c.bf16 %v8249_v3, %v8249_v3  ;;  %18691 = vmatmul.mubr.bf16.gmra.mrb[44].mxu0 %v23383_v31  ;;  %v8252_v4 = vsel %vm8188_vm13, %v8156_v54, %v8220_v41  ;;  %vm8186_vm15 = vcmp.ge.f32.partialorder %v8154_v53, 0.0  ;;  %v8218_v60 = vmul.f32 0.1, %v8154_v53  ;;  %v8758_v25 = vld [vmem:[#allocation2 + $0x98] sm:$0x1] }
 0x6f0   : > { %v8525_v50 = vsel %vm21592_vm7, %v8517_v43, %v8524_v19  ;;  %v8745_v8 = vsel %vm21569_vm2, %v8526_v7, %v8744_v56  ;;  %v8507_v42 = vor.u32 %v8505_v1, %v8504_v0  ;;  %v8509_v61 = vrot.slane %v8504_v0, 4 }
 0x6f1   : > { %8743 = vst [vmem:[#allocation2 + $0x7c] sm:$0xf] %v8525_v50  ;;  %8746 = vst [vmem:[#allocation2 + $0x80] sm:$0x1] %v8745_v8  ;;  %v8550_v16 = vor.u32 %v8548_v26, %v23385_v12  ;;  %v8551_v9 = vrot.slane %v23385_v12, 4  ;;  %v8528_v11 = vshrl.u32 %v16889_v44, 16  ;;  %v16892_v33 = vpack.c.bf16 %v8252_v4, %v8252_v4 }
 0x6f2   : > { %v8531_v59 = vshll.u32 %v16889_v44, 16  ;;  %v8508_v58 = vsel %vm21592_vm7, %v8500_v47, %v8507_v42  ;;  %v8738_v43 = vsel %vm21569_vm2, %v8509_v61, %v8737_v57  ;;  %v8159_v45 = vadd.f32 %v23328_v52, %v23217_v20  ;;  %v8751_v4 = vld [vmem:[#allocation2 + $0x8c] sm:$0x1] }
 0x6f3   : > { %8736 = vst [vmem:[#allocation2 + $0x70] sm:$0xf] %v8508_v58  ;;  %8739 = vst [vmem:[#allocation2 + $0x74] sm:$0x1] %v8738_v43  ;;  %v8755_v10 = vsel %vm21598_vm8, %v8550_v16, %v8754_v35  ;;  %v8530_v13 = vrot.slane %v8528_v11, 7  ;;  %v8157_v63 = vadd.f32 %v23217_v20, %v23335_v30  ;;  %v8160_v22 = vadd.f32 %v23337_v48, %v23217_v20 }
 0x6f4   : > { %8756 = vst [vmem:[#allocation2 + $0x90] sm:$0xf] %v8755_v10  ;;  %v8158_v54 = vadd.f32 %v23217_v20, %v23339_v2  ;;  %v8553_v5 = vshrl.u32 %v16892_v33, 16  ;;  %v8556_v47 = vshll.u32 %v16892_v33, 16  ;;  %v8250_v23 = vsel %vm8186_vm15, %v8154_v53, %v8218_v60 }
 0x6f5   : > { %v8533_v18 = vor.u32 %v8531_v59, %v8530_v13  ;;  %v8534_v55 = vrot.slane %v8530_v13, 4  ;;  %vm8191_vm0 = vcmp.ge.f32.partialorder %v8159_v45, 0.0  ;;  %v8223_v21 = vmul.f32 0.1, %v8159_v45 }
 0x6f6   : > { %vm8189_vm1 = vcmp.ge.f32.partialorder %v8157_v63, 0.0  ;;  %v8555_v30 = vrot.slane %v8553_v5, 7  ;;  %v16890_v1 = vpack.c.bf16 %v8250_v23, %v8250_v23  ;;  %v8221_v32 = vmul.f32 0.1, %v8157_v63  ;;  %v8768_v23 = vld [vmem:[#allocation2 + $0xa8] sm:$0xf] }
 0x6f7   : > { %v8748_v52 = vsel %vm21598_vm8, %v8533_v18, %v8747_v29  ;;  %v8255_v48 = vsel %vm8191_vm0, %v8159_v45, %v8223_v21  ;;  %vm8192_vm3 = vcmp.ge.f32.partialorder %v8160_v22, 0.0  ;;  %v8224_v2 = vmul.f32 0.1, %v8160_v22 }
 0x6f8   : > { %8749 = vst [vmem:[#allocation2 + $0x84] sm:$0xf] %v8748_v52  ;;  %vm8190_vm4 = vcmp.ge.f32.partialorder %v8158_v54, 0.0  ;;  %v8558_v26 = vor.u32 %v8556_v47, %v8555_v30  ;;  %v8560_v3 = vrot.slane %v8555_v30, 4  ;;  %v8536_v19 = vshrl.u32 %v16890_v1, 16  ;;  %v23422_v61 = vld [vmem:[#allocation2 + $0x78] sm:$0xff]  }
 0x6f9   : > { %v8539_v7 = vshll.u32 %v16890_v1, 16  ;;  %v16895_v0 = vpack.c.bf16 %v8255_v48, %v8255_v48  ;;  %v8253_v56 = vsel %vm8189_vm1, %v8157_v63, %v8221_v32  ;;  %v8256_v12 = vsel %vm8192_vm3, %v8160_v22, %v8224_v2  ;;  %v8761_v1 = vld [vmem:[#allocation2 + $0x9c] sm:$0xf] }
 0x6fa   : > { %v8222_v44 = vmul.f32 0.1, %v8158_v54  ;;  %v23416_v41 = vld [vmem:[#allocation2 + $0x6c] sm:$0xff]   ;;  %v8559_v53 = vsel %vm21592_vm7, %v8551_v9, %v8558_v26  ;;  %v8759_v50 = vsel %vm21569_vm2, %v8560_v3, %v8758_v25  ;;  %v8538_v8 = vrot.slane %v8536_v19, 7 }
 0x6fb   : > { %v16893_v42 = vpack.c.bf16 %v8253_v56, %v8253_v56  ;;  %8757 = vst [vmem:[#allocation2 + $0x94] sm:$0xf] %v8559_v53  ;;  %8760 = vst [vmem:[#allocation2 + $0x98] sm:$0x1] %v8759_v50  ;;  %v8579_v57 = vshrl.u32 %v16895_v0, 16  ;;  %v8582_v16 = vshll.u32 %v16895_v0, 16  ;;  %v16896_v11 = vpack.c.bf16 %v8256_v12, %v8256_v12  ;;  %18694 = vmatprep.mubr.bf16.mxu0 %v23416_v41 }
 0x6fc   : > { %v8254_v59 = vsel %vm8190_vm4, %v8158_v54, %v8222_v44  ;;  %v8541_v58 = vor.u32 %v8539_v7, %v8538_v8  ;;  %v8543_v43 = vrot.slane %v8538_v8, 4  ;;  %18695 = vmatmul.mubr.bf16.gmra.mrb[48].mxu0 %v23422_v61  ;;  %v8163_v54 = vadd.f32 %v23363_v36, %v23217_v20  ;;  %v8772_v26 = vld [vmem:[#allocation2 + $0xb0] sm:$0x1]  ;;  %v8765_v44 = vld [vmem:[#allocation2 + $0xa4] sm:$0x1] }
 0x6fd   : > { %v8562_v35 = vshrl.u32 %v16893_v42, 16  ;;  %v8565_v9 = vshll.u32 %v16893_v42, 16  ;;  %v8581_v10 = vrot.slane %v8579_v57, 7  ;;  %v8587_v13 = vshrl.u32 %v16896_v11, 16 }
 0x6fe   : > { %v8590_v33 = vshll.u32 %v16896_v11, 16  ;;  %v16894_v60 = vpack.c.bf16 %v8254_v59, %v8254_v59  ;;  %v8542_v45 = vsel %vm21592_vm7, %v8534_v55, %v8541_v58  ;;  %v8752_v63 = vsel %vm21569_vm2, %v8543_v43, %v8751_v4 }
 0x6ff   : > { %v8564_v22 = vrot.slane %v8562_v35, 7  ;;  %8750 = vst [vmem:[#allocation2 + $0x88] sm:$0xf] %v8542_v45  ;;  %8753 = vst [vmem:[#allocation2 + $0x8c] sm:$0x1] %v8752_v63  ;;  %v8584_v18 = vor.u32 %v8582_v16, %v8581_v10  ;;  %v8585_v29 = vrot.slane %v8581_v10, 4  ;;  %v8161_v25 = vadd.f32 %v23217_v20, %v23372_v28 }
 0x700   : > { %v8589_v5 = vrot.slane %v8587_v13, 7  ;;  %v8570_v47 = vshrl.u32 %v16894_v60, 16  ;;  %v8573_v30 = vshll.u32 %v16894_v60, 16  ;;  %vm8195_vm5 = vcmp.ge.f32.partialorder %v8163_v54, 0.0 }
 0x701   : > { %v8567_v21 = vor.u32 %v8565_v9, %v8564_v22  ;;  %v8568_v52 = vrot.slane %v8564_v22, 4  ;;  %v8769_v55 = vsel %vm21598_vm8, %v8584_v18, %v8768_v23  ;;  %v8227_v3 = vmul.f32 0.1, %v8163_v54 }
 0x702   : > { %v8592_v32 = vor.u32 %v8590_v33, %v8589_v5  ;;  %v8594_v48 = vrot.slane %v8589_v5, 4  ;;  %v8572_v2 = vrot.slane %v8570_v47, 7  ;;  %8770 = vst [vmem:[#allocation2 + $0xa8] sm:$0xf] %v8769_v55  ;;  %v8164_v19 = vadd.f32 %v23374_v6, %v23217_v20  ;;  %v23454_v35 = vld [vmem:[#allocation2 + $0x90] sm:$0xff]  }
 0x703   : > { %v8762_v36 = vsel %vm21598_vm8, %v8567_v21, %v8761_v1  ;;  %v8259_v53 = vsel %vm8195_vm5, %v8163_v54, %v8227_v3  ;;  %vm8193_vm6 = vcmp.ge.f32.partialorder %v8161_v25, 0.0  ;;  %v8225_v50 = vmul.f32 0.1, %v8161_v25  ;;  %v8782_v54 = vld [vmem:[#allocation2 + $0xc0] sm:$0xf] }
 0x704   : > { %8763 = vst [vmem:[#allocation2 + $0x9c] sm:$0xf] %v8762_v36  ;;  %v8593_v7 = vsel %vm21592_vm7, %v8585_v29, %v8592_v32  ;;  %v8773_v0 = vsel %vm21569_vm2, %v8594_v48, %v8772_v26  ;;  %v8575_v56 = vor.u32 %v8573_v30, %v8572_v2  ;;  %v8577_v12 = vrot.slane %v8572_v2, 4  ;;  %v8775_v30 = vld [vmem:[#allocation2 + $0xb4] sm:$0xf] }
 0x705   : > { %8771 = vst [vmem:[#allocation2 + $0xac] sm:$0xf] %v8593_v7  ;;  %8774 = vst [vmem:[#allocation2 + $0xb0] sm:$0x1] %v8773_v0  ;;  %vm8196_vm9 = vcmp.ge.f32.partialorder %v8164_v19, 0.0  ;;  %v16899_v8 = vpack.c.bf16 %v8259_v53, %v8259_v53  ;;  %v8257_v57 = vsel %vm8193_vm6, %v8161_v25, %v8225_v50  ;;  %v8162_v16 = vadd.f32 %v23217_v20, %v23376_v39  ;;  %v20852_v50 = vld [vmem:[#allocation2] sm:$0xff]  }
 0x706   : > { %v8576_v28 = vsel %vm21592_vm7, %v8568_v52, %v8575_v56  ;;  %v8766_v6 = vsel %vm21569_vm2, %v8577_v12, %v8765_v44  ;;  %v8228_v42 = vmul.f32 0.1, %v8164_v19  ;;  %v23452_v11 = vld [vmem:[#allocation2 + $0x84] sm:$0xff]   ;;  %v16897_v58 = vpack.c.bf16 %v8257_v57, %v8257_v57  ;;  %v8779_v56 = vld [vmem:[#allocation2 + $0xbc] sm:$0x1] }
 0x707   : > { %8764 = vst [vmem:[#allocation2 + $0xa0] sm:$0xf] %v8576_v28  ;;  %8767 = vst [vmem:[#allocation2 + $0xa4] sm:$0x1] %v8766_v6  ;;  %v8613_v59 = vshrl.u32 %v16899_v8, 16  ;;  %vm8194_vm10 = vcmp.ge.f32.partialorder %v8162_v16, 0.0  ;;  %18698 = vmatprep.mubr.bf16.mxu0 %v23452_v11 }
 0x708   : > { %v8260_v43 = vsel %vm8196_vm9, %v8164_v19, %v8228_v42  ;;  %v8226_v4 = vmul.f32 0.1, %v8162_v16  ;;  %v8616_v13 = vshll.u32 %v16899_v8, 16  ;;  %v8596_v33 = vshrl.u32 %v16897_v58, 16  ;;  %18699 = vmatmul.mubr.bf16.gmra.mrb[52].mxu0 %v23454_v35  ;;  %v8786_v48 = vld [vmem:[#allocation2 + $0xc8] sm:$0x1] }
 0x709   : > { %v16900_v9 = vpack.c.bf16 %v8260_v43, %v8260_v43  ;;  %v8615_v10 = vrot.slane %v8613_v59, 7  ;;  %v8599_v63 = vshll.u32 %v16897_v58, 16  ;;  %v20854_v6 = vld [vmem:[#allocation9 + $0x188] sm:$0xff]   ;;  %v20855_v8 = vld [vmem:[#allocation9 + $0x190] sm:$0xff]   ;;  %v20856_v42 = vld [vmem:[#allocation9 + $0x198] sm:$0xff]  }
 0x70a   : > { %v8258_v45 = vsel %vm8194_vm10, %v8162_v16, %v8226_v4  ;;  %v8598_v39 = vrot.slane %v8596_v33, 7  ;;  %v20857_v57 = vld [vmem:[#allocation9 + $0x1a0] sm:$0xff]   ;;  %v20858_v16 = vld [vmem:[#allocation9 + $0x1a8] sm:$0xff]   ;;  %v20863_v43 = vld [vmem:[#allocation9 + $0x50] sm:$0xff]  }
 0x70b   : > { %v8621_v60 = vshrl.u32 %v16900_v9, 16  ;;  %v8618_v20 = vor.u32 %v8616_v13, %v8615_v10  ;;  %v16898_v22 = vpack.c.bf16 %v8258_v45, %v8258_v45  ;;  %v8624_v29 = vshll.u32 %v16900_v9, 16  ;;  %v20861_v59 = vld [vmem:[#allocation9 + $0x40] sm:$0xff]   ;;  %v20862_v58 = vld [vmem:[#allocation9 + $0x48] sm:$0xff]   ;;  %v20864_v9 = vld [vmem:[#allocation9 + $0x58] sm:$0xff]  }
 0x70c   : > { %v8601_v47 = vor.u32 %v8599_v63, %v8598_v39  ;;  %v8619_v52 = vrot.slane %v8615_v10, 4  ;;  %v23465_v26 = vld [vmem:[#allocation2 + $0xa8] sm:$0xff]   ;;  %v8602_v19 = vrot.slane %v8598_v39, 4  ;;  %v20865_v4 = vld [vmem:[#allocation9 + $0x60] sm:$0xff]   ;;  %v23516_v33 = vld [vmem:[#allocation2 + $0x10] sm:$0xf] }
 0x70d   : > { %v8623_v18 = vrot.slane %v8621_v60, 7  ;;  %v8783_v5 = vsel %vm21598_vm8, %v8618_v20, %v8782_v54  ;;  %v8604_v23 = vshrl.u32 %v16898_v22, 16  ;;  %v8607_v36 = vshll.u32 %v16898_v22, 16  ;;  %v9645_v13 = vld [vmem:[#allocation2 + $0xc] sm:$0xf] }
 0x70e   : > { %v23460_v21 = vld [vmem:[#allocation2 + $0x9c] sm:$0xff]   ;;  %8784 = vst [vmem:[#allocation2 + $0xc0] sm:$0xf] %v8783_v5  ;;  %v8776_v32 = vsel %vm21598_vm8, %v8601_v47, %v8775_v30  ;;  %v9648_v60 = vld [vmem:[#allocation2 + $0x18] sm:$0xf]  ;;  %v9721_v45 = vshrl.u32 %v9645_v13, 16 }
 0x70f   : > { %v8626_v55 = vor.u32 %v8624_v29, %v8623_v18  ;;  %v8628_v1 = vrot.slane %v8623_v18, 4  ;;  %v8606_v2 = vrot.slane %v8604_v23, 7  ;;  %18702 = vmatprep.mubr.bf16.mxu0 %v23460_v21  ;;  %8777 = vst [vmem:[#allocation2 + $0xb4] sm:$0xf] %v8776_v32  ;;  %v23518_v20 = vld [vmem:[#allocation2 + $0x1c] sm:$0xf] }
 0x710   : > { %18703 = vmatmul.mubr.bf16.gmra.mrb[56].mxu0 %v23465_v26  ;;  %v23522_v54 = vld [vmem:[#allocation2 + $0x28] sm:$0xf]  ;;  %v9724_v18 = vshll.u32 %v9645_v13, 16  ;;  %v9730_v29 = vshll.u32 %v23516_v33, 16  ;;  %v9734_v5 = vshrl.u32 %v23516_v33, 16  ;;  %v9745_v47 = vshrl.u32 %v9648_v60, 16 }
 0x711   : > { %v8627_v3 = vsel %vm21592_vm7, %v8619_v52, %v8626_v55  ;;  %v8787_v25 = vsel %vm21569_vm2, %v8628_v1, %v8786_v48  ;;  %v8609_v7 = vor.u32 %v8607_v36, %v8606_v2  ;;  %v8611_v0 = vrot.slane %v8606_v2, 4  ;;  %v9651_v1 = vld [vmem:[#allocation2 + $0x24] sm:$0xf] }
 0x712   : > { %8785 = vst [vmem:[#allocation2 + $0xc4] sm:$0xf] %v8627_v3  ;;  %8788 = vst [vmem:[#allocation2 + $0xc8] sm:$0x1] %v8787_v25  ;;  %v9748_v23 = vshll.u32 %v9648_v60, 16  ;;  %v9754_v52 = vshll.u32 %v23518_v20, 16 }
 0x713   : > { %v8610_v12 = vsel %vm21592_vm7, %v8602_v19, %v8609_v7  ;;  %v8780_v44 = vsel %vm21569_vm2, %v8611_v0, %v8779_v56  ;;  %v9758_v30 = vshrl.u32 %v23518_v20, 16  ;;  %v9723_v55 = vrot.slane %v9721_v45, 4  ;;  %v9657_v45 = vld [vmem:[#allocation2 + $0x3c] sm:$0xf] }
 0x714   : > { %8778 = vst [vmem:[#allocation2 + $0xb8] sm:$0xf] %v8610_v12  ;;  %8781 = vst [vmem:[#allocation2 + $0xbc] sm:$0x1] %v8780_v44  ;;  %v9778_v32 = vshll.u32 %v23522_v54, 16  ;;  %v9782_v3 = vshrl.u32 %v23522_v54, 16 }
 0x715   : > { %v9726_v25 = vrot.slane %v9724_v18, 5  ;;  %v9736_v19 = vrot.slane %v9734_v5, 4  ;;  %v9747_v7 = vrot.slane %v9745_v47, 4  ;;  %v9750_v0 = vrot.slane %v9748_v23, 5 }
 0x716   : > { %v23538_v56 = vrot.slane %v9754_v52, 5  ;;  %v9769_v12 = vshrl.u32 %v9651_v1, 16  ;;  %v9772_v44 = vshll.u32 %v9651_v1, 16  ;;  %v23565_v52 = vld [vmem:[#allocation2 + $0x40] sm:$0xf] }
 0x719   : > { %v23478_v28 = vld [vmem:[#allocation2 + $0xc0] sm:$0xff]  }
 0x71b   : > { %v23476_v53 = vld [vmem:[#allocation2 + $0xb4] sm:$0xff]  }
 0x71c   : > { %18706 = vmatprep.mubr.bf16.mxu0 %v23476_v53 }
 0x71d   : > { %18707 = vmatmul.mubr.bf16.gmra.mrb[60].mxu0 %v23478_v28 }
 0x71e   : > { %18726 = vmatprep.mubr.bf16.mxu0 %v20852_v50  ;;  %v23540_v50 = vrot.slane %v9778_v32, 5 }
 0x725   : > { %18727 = vmatmul.mubr.bf16.vlgmr.msra.gmra.mrb[32].mxu0 %v23251_v15  ;;  %v20859_v15 = vld [vmem:[#allocation9 + $0x1b0] sm:$0xff]  }
 0x726   : > { %18730 = vmatprep.mubr.bf16.mxu0 %v23255_v38  ;;  %18759 = vmatpush3.bf16.msra.mxu0 %v23365_v27  ;;  %v20860_v27 = vld [vmem:[#allocation9 + $0x1b8] sm:$0xff]  }
 0x727   : > { %18760 = vmatprep.subr.bf16.mxu0 %v20854_v6 }
 0x72a   : > { %18761 = vmatpush3.bf16.msra.mxu0 %v20854_v6  ;;  %v9654_v6 = vld [vmem:[#allocation2 + $0x30] sm:$0xf] }
 0x72b   : > { %18762 = vmatprep.subr.bf16.mxu0 %v20855_v8 }
 0x72d   : > { %18731 = vmatmul.mubr.bf16.gmra.mrb[36].mxu0 %v23297_v51 }
 0x72e   : > { %18734 = vmatprep.mubr.bf16.mxu0 %v23299_v37  ;;  %18763 = vmatpush3.bf16.msra.mxu0 %v20855_v8 }
 0x72f   : > { %18764 = vmatprep.subr.bf16.mxu0 %v20856_v42 }
 0x732   : > { %18765 = vmatpush3.bf16.msra.mxu0 %v20856_v42 }
 0x733   : > { %18766 = vmatprep.subr.bf16.mxu0 %v20857_v57 }
 0x735   : > { %18735 = vmatmul.mubr.bf16.gmra.mrb[40].mxu0 %v23352_v46 }
 0x736   : > { %18738 = vmatprep.mubr.bf16.mxu0 %v23356_v24  ;;  %18767 = vmatpush3.bf16.msra.mxu0 %v20857_v57 }
 0x737   : > { %18768 = vmatprep.subr.bf16.mxu0 %v20858_v16 }
 0x73a   : > { %18769 = vmatpush3.bf16.msra.mxu0 %v20858_v16  ;;  %v9784_v16 = vrot.slane %v9782_v3, 4  ;;  %v9817_v3 = vshrl.u32 %v9657_v45, 16 }
 0x73b   : > { %18770 = vmatprep.subr.bf16.mxu0 %v20859_v15 }
 0x73d   : > { %18739 = vmatmul.mubr.bf16.gmra.mrb[44].mxu0 %v23379_v17 }
 0x73e   : > { %18742 = vmatprep.mubr.bf16.mxu0 %v23383_v31  ;;  %18771 = vmatpush3.bf16.msra.mxu0 %v20859_v15  ;;  %v23542_v15 = vld [vmem:[#allocation2 + $0x34] sm:$0xf] }
 0x73f   : > { %18772 = vmatprep.subr.bf16.mxu0 %v20860_v27  ;;  %v9806_v13 = vshrl.u32 %v23542_v15, 16 }
 0x741   : > { %v9808_v32 = vrot.slane %v9806_v13, 4 }
 0x742   : > { %18773 = vmatpush3.bf16.msra.mxu0 %v20860_v27  ;;  %v9727_v27 = vor.u32 %v9726_v25, %v9723_v55  ;;  %v9820_v25 = vshll.u32 %v9657_v45, 16  ;;  %v9666_v45 = vld [vmem:[#allocation2 + $0x60] sm:$0xf] }
 0x743   : > { %18806 = vmatprep.subr.bf16.mxu0 %v20861_v59 }
 0x744   : > { %v9728_v60 = vrot.slane %v9727_v27, 4 }
 0x745   : > { %18743 = vmatmul.mubr.bf16.gmra.mrb[48].mxu0 %v23416_v41 }
 0x746   : > { %18746 = vmatprep.mubr.bf16.mxu0 %v23422_v61 }
 0x74d   : > { %18747 = vmatmul.mubr.bf16.gmra.mrb[52].mxu0 %v23452_v11 }
 0x74e   : > { %18750 = vmatprep.mubr.bf16.mxu0 %v23454_v35 }
 0x755   : > { %18751 = vmatmul.mubr.bf16.gmra.mrb[56].mxu0 %v23460_v21 }
 0x756   : > { %18754 = vmatprep.mubr.bf16.mxu0 %v23465_v26 }
 0x75d   : > { %18755 = vmatmul.mubr.bf16.gmra.mrb[60].mxu0 %v23476_v53 }
 0x75e   : > { %18774 = vmatprep.mubr.bf16.mxu0 %v23255_v38  ;;  %v20866_v38 = vld [vmem:[#allocation9 + $0x68] sm:$0xff]  }
 0x765   : > { %18775 = vmatmul.mubr.bf16.vlgmr.msra.gmra.mrb[32].mxu0 %v23297_v51  ;;  %v20867_v51 = vld [vmem:[#allocation9 + $0x70] sm:$0xff]  }
 0x766   : > { %18778 = vmatprep.mubr.bf16.mxu0 %v23299_v37  ;;  %18807 = vmatpush3.bf16.msra.mxu0 %v20861_v59  ;;  %v20869_v37 = vld [vmem:[#allocation9 + $0x78] sm:$0xff]  }
 0x767   : > { %18808 = vmatprep.subr.bf16.mxu0 %v20862_v58  ;;  %v23545_v59 = vld [vmem:[#allocation2 + $0x14] sm:$0x1] }
 0x76a   : > { %18809 = vmatpush3.bf16.msra.mxu0 %v20862_v58 }
 0x76b   : > { %18810 = vmatprep.subr.bf16.mxu0 %v20863_v43 }
 0x76d   : > { %18779 = vmatmul.mubr.bf16.gmra.mrb[36].mxu0 %v23352_v46  ;;  %v23507_v46 = vld [vmem:[#allocation9 + $0x100] sm:$0xff]  }
 0x76e   : > { %18782 = vmatprep.mubr.bf16.mxu0 %v23356_v24  ;;  %18811 = vmatpush3.bf16.msra.mxu0 %v20863_v43  ;;  %v9642_v24 = vld [vmem:[#allocation2] sm:$0xf] }
 0x76f   : > { %18812 = vmatprep.subr.bf16.mxu0 %v20864_v9  ;;  %v9700_v10 = vshll.u32 %v9642_v24, 16  ;;  %v23548_v43 = vld [vmem:[#allocation2 + $0x20] sm:$0x1] }
 0x770   : > { %v9764_v18 = vshll.u32 %v23548_v43, 16 }
 0x771   : > { %v9702_v63 = vrot.slane %v9700_v10, 5  ;;  %v9802_v10 = vshll.u32 %v23542_v15, 16 }
 0x772   : > { %18813 = vmatpush3.bf16.msra.mxu0 %v20864_v9  ;;  %v9751_v9 = vor.u32 %v9750_v0, %v9747_v7  ;;  %v9826_v0 = vshll.u32 %v23565_v52, 16 }
 0x773   : > { %18814 = vmatprep.subr.bf16.mxu0 %v20865_v4  ;;  %v23567_v1 = vrot.slane %v9802_v10, 5 }
 0x775   : > { %18783 = vmatmul.mubr.bf16.gmra.mrb[40].mxu0 %v23379_v17  ;;  %v23510_v17 = vld [vmem:[#allocation2 + $0x4] sm:$0xf]  ;;  %v9809_v27 = vor.u32 %v9808_v32, %v23567_v1 }
 0x776   : > { %18786 = vmatprep.mubr.bf16.mxu0 %v23383_v31  ;;  %18815 = vmatpush3.bf16.msra.mxu0 %v20865_v4  ;;  %v9697_v31 = vshrl.u32 %v9642_v24, 16  ;;  %v9793_v24 = vshrl.u32 %v9654_v6, 16 }
 0x777   : > { %18816 = vmatprep.subr.bf16.mxu0 %v20866_v38 }
 0x778   : > { %v9699_v39 = vrot.slane %v9697_v31, 4  ;;  %v9796_v31 = vshll.u32 %v9654_v6, 16  ;;  %v9795_v47 = vrot.slane %v9793_v24, 4  ;;  %v23591_v24 = vrot.slane %v9826_v0, 5 }
 0x779   : > { %v9892_v0 = vshll.u32 %v9666_v45, 16 }
 0x77a   : > { %18817 = vmatpush3.bf16.msra.mxu0 %v20866_v38  ;;  %v9703_v48 = vor.u32 %v9702_v63, %v9699_v39  ;;  %v9771_v38 = vrot.slane %v9769_v12, 4  ;;  %v20868_v39 = vld [vmem:[#allocation2 + $0xcc] sm:$0xff]   ;;  %v9798_v23 = vrot.slane %v9796_v31, 5  ;;  %v9660_v12 = vld [vmem:[#allocation2 + $0x48] sm:$0xf] }
 0x77b   : > { %18818 = vmatprep.subr.bf16.mxu0 %v20867_v51 }
 0x77c   : > { %v9704_v8 = vrot.slane %v9703_v48, 4 }
 0x77d   : > { %18787 = vmatmul.mubr.bf16.gmra.mrb[44].mxu0 %v23416_v41  ;;  %v9706_v41 = vshll.u32 %v23510_v17, 16 }
 0x77e   : > { %18790 = vmatprep.mubr.bf16.mxu0 %v23422_v61  ;;  %18819 = vmatpush3.bf16.msra.mxu0 %v20867_v51  ;;  %v9710_v61 = vshrl.u32 %v23510_v17, 16  ;;  %v23552_v51 = vld [vmem:[#allocation2 + $0x2c] sm:$0x1] }
 0x77f   : > { %18820 = vmatprep.subr.bf16.mxu0 %v20869_v37  ;;  %v23520_v22 = vrot.slane %v9706_v41, 5 }
 0x782   : > { %18821 = vmatpush3.bf16.msra.mxu0 %v20869_v37  ;;  %v9774_v37 = vrot.slane %v9772_v44, 5 }
 0x783   : > { %18854 = vmatprep.subr.bf16.mxu0 %v23507_v46 }
 0x785   : > { %18791 = vmatmul.mubr.bf16.gmra.mrb[48].mxu0 %v23452_v11  ;;  %v9712_v11 = vrot.slane %v9710_v61, 4  ;;  %v9785_v61 = vor.u32 %v9784_v16, %v23540_v50 }
 0x786   : > { %18794 = vmatprep.mubr.bf16.mxu0 %v23454_v35  ;;  %v23524_v35 = vld [vmem:[#allocation2 + $0x8] sm:$0x1] }
 0x787   : > { %v9713_v2 = vor.u32 %v9712_v11, %v23520_v22  ;;  %v9716_v36 = vshll.u32 %v23524_v35, 16  ;;  %v9752_v11 = vrot.slane %v9751_v9, 4  ;;  %v9786_v55 = vrot.slane %v9785_v61, 4  ;;  %v23589_v9 = vld [vmem:[#allocation2 + $0x44] sm:$0x1] }
 0x789   : > { %v9714_v42 = vrot.slane %v9713_v2, 4  ;;  %v9718_v57 = vrot.slane %v9716_v36, 5  ;;  %v23572_v36 = vld [vmem:[#allocation2 + $0x38] sm:$0x1] }
 0x78b   : > { %v9719_v41 = vsel %vm21986_vm11, %v9714_v42, %v9718_v57  ;;  %v23581_v42 = vld [vmem:[#allocation2 + $0x4c] sm:$0xf] }
 0x78c   : > { %v9850_v10 = vshll.u32 %v23581_v42, 16 }
 0x78d   : > { %18795 = vmatmul.mubr.bf16.gmra.mrb[52].mxu0 %v23460_v21  ;;  %v23536_v21 = vrot.slane %v9730_v29, 5  ;;  %v9788_v29 = vshll.u32 %v23552_v51, 16 }
 0x78e   : > { %18798 = vmatprep.mubr.bf16.mxu0 %v23465_v26  ;;  %v9760_v26 = vrot.slane %v9758_v30, 4 }
 0x78f   : > { %v9737_v58 = vor.u32 %v9736_v19, %v23536_v21  ;;  %v9733_v48 = vsel %vm21986_vm11, %v9728_v60, %v23536_v21  ;;  %v9766_v19 = vrot.slane %v9764_v18, 5  ;;  %v9790_v7 = vrot.slane %v9788_v29, 5 }
 0x790   : > { %v9761_v4 = vor.u32 %v9760_v26, %v23538_v56  ;;  %v9830_v26 = vshrl.u32 %v23565_v52, 16  ;;  %v9757_v21 = vsel %vm21986_vm11, %v9752_v11, %v23538_v56  ;;  %v9844_v56 = vshll.u32 %v9660_v12, 16 }
 0x791   : > { %v9738_v63 = vrot.slane %v9737_v58, 4  ;;  %v9791_v16 = vsel %vm21986_vm11, %v9786_v55, %v9790_v7  ;;  %v9812_v58 = vshll.u32 %v23572_v36, 16  ;;  %v9810_v11 = vrot.slane %v9809_v27, 4  ;;  %v23607_v55 = vld [vmem:[#allocation2 + $0x64] sm:$0xf] }
 0x792   : > { %v9762_v30 = vrot.slane %v9761_v4, 4  ;;  %v9819_v4 = vrot.slane %v9817_v3, 4  ;;  %v9832_v31 = vrot.slane %v9830_v26, 4  ;;  %v9836_v29 = vshll.u32 %v23589_v9, 16  ;;  %v23615_v3 = vld [vmem:[#allocation2 + $0x50] sm:$0x1] }
 0x793   : > { %v9814_v18 = vrot.slane %v9812_v58, 5  ;;  %v9889_v7 = vshrl.u32 %v9666_v45, 16  ;;  %v23626_v27 = vld [vmem:[#allocation2 + $0x70] sm:$0xf] }
 0x794   : > { %v9767_v57 = vsel %vm21986_vm11, %v9762_v30, %v9766_v19  ;;  %v9833_v32 = vor.u32 %v9832_v31, %v23591_v24  ;;  %v9922_v45 = vshll.u32 %v23626_v27, 16 }
 0x795   : > { %18799 = vmatmul.mubr.bf16.gmra.mrb[56].mxu0 %v23476_v53  ;;  %v9709_v53 = vsel %vm21986_vm11, %v9704_v8, %v23520_v22  ;;  %v9775_v22 = vor.u32 %v9774_v37, %v9771_v38  ;;  %v9799_v8 = vor.u32 %v9798_v23, %v9795_v47  ;;  %v9822_v38 = vrot.slane %v9820_v25, 5 }
 0x796   : > { %18802 = vmatprep.mubr.bf16.mxu0 %v23478_v28  ;;  %v9740_v28 = vshll.u32 %v23545_v59, 16  ;;  %v16551_v5 = vcombine.low %v9709_v53, %v9719_v41  ;;  %v9841_v37 = vshrl.u32 %v9660_v12, 16  ;;  %v9854_v53 = vshrl.u32 %v23581_v42, 16  ;;  %v9663_v41 = vld [vmem:[#allocation2 + $0x54] sm:$0xf] }
 0x797   : > { %v9776_v6 = vrot.slane %v9775_v22, 4  ;;  %v23597_v13 = vcombine.low %v9757_v21, %v9767_v57  ;;  %v9846_v47 = vrot.slane %v9844_v56, 5  ;;  %v9865_v23 = vshrl.u32 %v9663_v41, 16 }
 0x798   : > { %v9742_v2 = vrot.slane %v9740_v28, 5  ;;  %v9800_v28 = vrot.slane %v9799_v8, 4  ;;  %v9843_v22 = vrot.slane %v9841_v37, 4  ;;  %v9868_v30 = vshll.u32 %v9663_v41, 16  ;;  %v20873_v41 = vld [vmem:[#allocation9 + $0x118] sm:$0xff]  }
 0x799   : > { %v9781_v60 = vsel %vm21986_vm11, %v9776_v6, %v23540_v50  ;;  %v9823_v50 = vor.u32 %v9822_v38, %v9819_v4  ;;  %v9815_v12 = vsel %vm21986_vm11, %v9810_v11, %v9814_v18  ;;  %v9898_v21 = vshll.u32 %v23607_v55, 16 }
 0x79a   : > { %v9743_v44 = vsel %vm21986_vm11, %v9738_v63, %v9742_v2  ;;  %v20871_v63 = vld [vmem:[#allocation9 + $0x108] sm:$0xff]   ;;  %v9856_v2 = vrot.slane %v9854_v53, 4  ;;  %v9805_v26 = vsel %vm21986_vm11, %v9800_v28, %v23567_v1  ;;  %v9838_v6 = vrot.slane %v9836_v29, 5  ;;  %v9669_v53 = vld [vmem:[#allocation2 + $0x6c] sm:$0xf] }
 0x79b   : > { %v23595_v61 = vcombine.low %v9733_v48, %v9743_v44  ;;  %v23611_v48 = vrot.slane %v9850_v10, 5  ;;  %v20872_v44 = vld [vmem:[#allocation9 + $0x110] sm:$0xff]   ;;  %v9847_v8 = vor.u32 %v9846_v47, %v9843_v22  ;;  %v9867_v57 = vrot.slane %v9865_v23, 4 }
 0x79c   : > { %v9824_v58 = vrot.slane %v9823_v50, 4  ;;  %v9834_v4 = vrot.slane %v9833_v32, 4  ;;  %v9860_v1 = vshll.u32 %v23615_v3, 16  ;;  %v9891_v31 = vrot.slane %v9889_v7, 4  ;;  %v23646_v50 = vld [vmem:[#allocation2 + $0x68] sm:$0x1] }
 0x79d   : > { %18803 = vmatmul.mubr.bf16.gmra.mrb[60].mxu0 %v20868_v39  ;;  %v23602_v39 = vcombine.low %v9781_v60, %v9791_v16  ;;  %v9870_v16 = vrot.slane %v9868_v30, 5  ;;  %v9857_v38 = vor.u32 %v9856_v2, %v23611_v48  ;;  %v9894_v10 = vrot.slane %v9892_v0, 5  ;;  %v23644_v30 = vld [vmem:[#allocation2 + $0x5c] sm:$0x1] }
 0x79e   : > { %18822 = vmatprep.mubr.bf16.mxu0 %v16551_v5  ;;  %v23605_v5 = vld [vmem:[#allocation2 + $0x58] sm:$0xf]  ;;  %v23632_v60 = vrot.slane %v9898_v21, 5  ;;  %v9926_v11 = vshrl.u32 %v23626_v27, 16  ;;  %v23636_v18 = vcombine.low %v9805_v26, %v9815_v12  ;;  %v9848_v29 = vrot.slane %v9847_v8, 4 }
 0x79f   : > { %v9874_v25 = vshll.u32 %v23605_v5, 16  ;;  %v9878_v19 = vshrl.u32 %v23605_v5, 16  ;;  %v9871_v22 = vor.u32 %v9870_v16, %v9867_v57  ;;  %v9839_v47 = vsel %vm21986_vm11, %v9834_v4, %v9838_v6  ;;  %v23650_v7 = vld [vmem:[#allocation2 + $0x7c] sm:$0xf] }
 0x7a0   : > { %v9858_v23 = vrot.slane %v9857_v38, 4  ;;  %v9862_v32 = vrot.slane %v9860_v1, 5  ;;  %25092 = vst [vmem:[#allocation33_spill] sm:$0xff] %v23650_v7  ;;  %v23653_v26 = vrot.slane %v9922_v45, 5  ;;  %v9928_v12 = vrot.slane %v9926_v11, 4  ;;  %v20874_v21 = vld [vmem:[#allocation9 + $0x120] sm:$0xff]  }
 0x7a1   : > { %v23630_v37 = vrot.slane %v9874_v25, 5  ;;  %v9880_v56 = vrot.slane %v9878_v19, 4  ;;  %v9913_v25 = vshrl.u32 %v9669_v53, 16  ;;  %v9916_v19 = vshll.u32 %v9669_v53, 16  ;;  %v23666_v1 = vld [vmem:[#allocation2 + $0x74] sm:$0x1] }
 0x7a2   : > { %v9872_v8 = vrot.slane %v9871_v22, 4  ;;  %v9884_v57 = vshll.u32 %v23644_v30, 16  ;;  %v9863_v16 = vsel %vm21986_vm11, %v9858_v23, %v9862_v32  ;;  %v9946_v4 = vshll.u32 %v23650_v7, 16  ;;  %25093 = vst [vmem:[#allocation34_spill] sm:$0xff] %v23666_v1 }
 0x7a3   : > { %v9881_v2 = vor.u32 %v9880_v56, %v23630_v37  ;;  %v9950_v38 = vshrl.u32 %v23650_v7, 16  ;;  %v9915_v56 = vrot.slane %v9913_v25, 4  ;;  %v9929_v11 = vor.u32 %v9928_v12, %v23653_v26 }
 0x7a4   : > { %v9932_v23 = vshll.u32 %v23666_v1, 16  ;;  %v23673_v32 = vrot.slane %v9946_v4, 5  ;;  %v23690_v4 = vld [vmem:[#allocation2 + $0x80] sm:$0x1] }
 0x7a5   : > { %18823 = vmatmul.mubr.bf16.vlgmr.msra.gmra.mrb[32].mxu0 %v23595_v61  ;;  %v9952_v25 = vrot.slane %v9950_v38, 4  ;;  %25096 = vst [vmem:[#allocation25_spill] sm:$0xff] %v23690_v4 }
 0x7a6   : > { %18826 = vmatprep.mubr.bf16.mxu0 %v23597_v13  ;;  %18855 = vmatpush3.bf16.msra.mxu0 %v23507_v46  ;;  %v9902_v46 = vshrl.u32 %v23607_v55, 16 }
 0x7a7   : > { %18856 = vmatprep.subr.bf16.mxu0 %v20871_v63 }
 0x7a8   : > { %v9904_v28 = vrot.slane %v9902_v46, 4  ;;  %v9672_v46 = vld [vmem:[#allocation2 + $0x78] sm:$0xf] }
 0x7a9   : > { %v9940_v53 = vshll.u32 %v9672_v46, 16 }
 0x7aa   : > { %18857 = vmatpush3.bf16.msra.mxu0 %v20871_v63  ;;  %v9829_v63 = vsel %vm21986_vm11, %v9824_v58, %v23591_v24  ;;  %v9895_v24 = vor.u32 %v9894_v10, %v9891_v31  ;;  %v9905_v0 = vor.u32 %v9904_v28, %v23632_v60  ;;  %v9908_v58 = vshll.u32 %v23646_v50, 16 }
 0x7ab   : > { %18858 = vmatprep.subr.bf16.mxu0 %v20872_v44  ;;  %v23655_v6 = vcombine.low %v9829_v63, %v9839_v47  ;;  %v9918_v31 = vrot.slane %v9916_v19, 5  ;;  %v9937_v10 = vshrl.u32 %v9672_v46, 16  ;;  %v9886_v63 = vrot.slane %v9884_v57, 5  ;;  %v9675_v47 = vld [vmem:[#allocation2 + $0x84] sm:$0xf] }
 0x7ac   : > { %v9896_v28 = vrot.slane %v9895_v24, 4  ;;  %v9906_v45 = vrot.slane %v9905_v0, 4  ;;  %v23675_v19 = vld [vmem:[#allocation2 + $0x88] sm:$0xf]  ;;  %v9942_v12 = vrot.slane %v9940_v53, 5  ;;  %v9964_v38 = vshll.u32 %v9675_v47, 16 }
 0x7ad   : > { %18827 = vmatmul.mubr.bf16.gmra.mrb[36].mxu0 %v23602_v39  ;;  %25094 = vst [vmem:[#allocation20_spill] sm:$0xff] %v23675_v19  ;;  %v9919_v24 = vor.u32 %v9918_v31, %v9915_v56  ;;  %v9939_v0 = vrot.slane %v9937_v10, 4  ;;  %v23681_v46 = vld [vmem:[#allocation2 + $0x94] sm:$0xf]  ;;  %v9974_v56 = vshrl.u32 %v23675_v19, 16  ;;  %v9934_v10 = vrot.slane %v9932_v23, 5 }
 0x7ae   : > { %18830 = vmatprep.mubr.bf16.mxu0 %v23636_v18  ;;  %18859 = vmatpush3.bf16.msra.mxu0 %v20872_v44  ;;  %v9853_v44 = vsel %vm21986_vm11, %v9848_v29, %v23611_v48  ;;  %v9882_v48 = vrot.slane %v9881_v2, 4  ;;  %v20875_v29 = vld [vmem:[#allocation9 + $0x128] sm:$0xff]   ;;  %v9877_v2 = vsel %vm21986_vm11, %v9872_v8, %v23630_v37  ;;  %25095 = vst [vmem:[#allocation23_spill] sm:$0xff] %v23681_v46  ;;  %v20876_v37 = vld [vmem:[#allocation9 + $0x130] sm:$0xff]   ;;  %v9961_v8 = vshrl.u32 %v9675_v47, 16 }
 0x7af   : > { %18860 = vmatprep.subr.bf16.mxu0 %v20873_v41  ;;  %v23669_v22 = vcombine.low %v9853_v44, %v9863_v16  ;;  %v9901_v57 = vsel %vm21986_vm11, %v9896_v28, %v23632_v60  ;;  %v9678_v31 = vld [vmem:[#allocation2 + $0x90] sm:$0xf]  ;;  %v9953_v53 = vor.u32 %v9952_v25, %v23673_v32  ;;  %v9994_v60 = vshll.u32 %v23681_v46, 16 }
 0x7b0   : > { %v9887_v44 = vsel %vm21986_vm11, %v9882_v48, %v9886_v63  ;;  %v9998_v48 = vshrl.u32 %v23681_v46, 16  ;;  %v9943_v63 = vor.u32 %v9942_v12, %v9939_v0  ;;  %v9985_v14 = vshrl.u32 %v9678_v31, 16  ;;  %v20877_v25 = vld [vmem:[#allocation9 + $0x138] sm:$0xff]   ;;  %v23709_v0 = vld [vmem:[#allocation2 + $0xa0] sm:$0xf] }
 0x7b1   : > { %v23697_v28 = vcombine.low %v9877_v2, %v9887_v44  ;;  %v9988_v23 = vshll.u32 %v9678_v31, 16  ;;  %v9963_v62 = vrot.slane %v9961_v8, 4  ;;  %v9966_v40 = vrot.slane %v9964_v38, 5  ;;  %25097 = vst [vmem:[#allocation28_spill] sm:$0xff] %v23709_v0  ;;  %v9681_v31 = vld [vmem:[#allocation2 + $0x9c] sm:$0xf] }
 0x7b2   : > { %18861 = vmatpush3.bf16.msra.mxu0 %v20873_v41  ;;  %v9910_v41 = vrot.slane %v9908_v58, 5  ;;  %v9930_v58 = vrot.slane %v9929_v11, 4  ;;  %v9920_v11 = vrot.slane %v9919_v24, 4  ;;  %v9976_v2 = vrot.slane %v9974_v56, 4 }
 0x7b3   : > { %18862 = vmatprep.subr.bf16.mxu0 %v20874_v21  ;;  %v9954_v44 = vrot.slane %v9953_v53, 4  ;;  %v23707_v24 = vrot.slane %v9994_v60, 5  ;;  %v9990_v56 = vrot.slane %v9988_v23, 5  ;;  %v9967_v53 = vor.u32 %v9966_v40, %v9963_v62 }
 0x7b4   : > { %v9911_v16 = vsel %vm21986_vm11, %v9906_v45, %v9910_v41  ;;  %v9935_v47 = vsel %vm21986_vm11, %v9930_v58, %v9934_v10  ;;  %v9956_v41 = vshll.u32 %v23690_v4, 16  ;;  %v9925_v12 = vsel %vm21986_vm11, %v9920_v11, %v23653_v26  ;;  %v23717_v58 = vld [vmem:[#allocation2 + $0xac] sm:$0xf]  ;;  %v23721_v10 = vld [vmem:[#allocation9 + $0x1c0] sm:$0xff]  }
 0x7b5   : > { %18831 = vmatmul.mubr.bf16.gmra.mrb[40].mxu0 %v23655_v6  ;;  %v23699_v45 = vcombine.low %v9901_v57, %v9911_v16  ;;  %v9944_v57 = vrot.slane %v9943_v63, 4  ;;  %v23715_v16 = vld [vmem:[#allocation2 + $0x8c] sm:$0x1]  ;;  %25099 = vst [vmem:[#allocation24_spill] sm:$0xff] %v23717_v58  ;;  %v23719_v8 = vcombine.low %v9925_v12, %v9935_v47  ;;  %v10018_v26 = vshll.u32 %v23709_v0, 16 }
 0x7b6   : > { %18834 = vmatprep.mubr.bf16.mxu0 %v23669_v22  ;;  %18863 = vmatpush3.bf16.msra.mxu0 %v20874_v21  ;;  %v9970_v21 = vshll.u32 %v23675_v19, 16  ;;  %25098 = vst [vmem:[#allocation26_spill] sm:$0xff] %v23715_v16  ;;  %v9958_v38 = vrot.slane %v9956_v41, 5  ;;  %v10022_v11 = vshrl.u32 %v23709_v0, 16  ;;  %v9684_v63 = vld [vmem:[#allocation2 + $0xa8] sm:$0xf] }
 0x7b7   : > { %18864 = vmatprep.subr.bf16.mxu0 %v20875_v29  ;;  %v10042_v47 = vshll.u32 %v23717_v58, 16  ;;  %v10046_v41 = vshrl.u32 %v23717_v58, 16  ;;  %v9949_v40 = vsel %vm21986_vm11, %v9944_v57, %v23673_v32  ;;  %v9980_v62 = vshll.u32 %v23715_v16, 16 }
 0x7b8   : > { %v23704_v19 = vrot.slane %v9970_v21, 5  ;;  %v9987_v21 = vrot.slane %v9985_v14, 4  ;;  %v10009_v23 = vshrl.u32 %v9681_v31, 16  ;;  %v10033_v46 = vshrl.u32 %v9684_v63, 16 }
 0x7b9   : > { %v10020_v58 = vrot.slane %v10018_v26, 5  ;;  %v10024_v4 = vrot.slane %v10022_v11, 4  ;;  %v9968_v32 = vrot.slane %v9967_v53, 4  ;;  %v10044_v16 = vrot.slane %v10042_v47, 5  ;;  %v9687_v11 = vld [vmem:[#allocation2 + $0xb4] sm:$0xf] }
 0x7ba   : > { %18865 = vmatpush3.bf16.msra.mxu0 %v20875_v29  ;;  %v10000_v29 = vrot.slane %v9998_v48, 4  ;;  %v9977_v60 = vor.u32 %v9976_v2, %v23704_v19  ;;  %v23724_v48 = vld [vmem:[#allocation2 + $0x98] sm:$0x1]  ;;  %v10012_v2 = vshll.u32 %v9681_v31, 16  ;;  %v9991_v12 = vor.u32 %v9990_v56, %v9987_v21  ;;  %v23745_v21 = vld [vmem:[#allocation2 + $0xa4] sm:$0x1] }
 0x7bb   : > { %18866 = vmatprep.subr.bf16.mxu0 %v20876_v37  ;;  %25100 = vst [vmem:[#allocation27_spill] sm:$0xff] %v23724_v48  ;;  %v10004_v0 = vshll.u32 %v23724_v48, 16  ;;  %v10048_v1 = vrot.slane %v10046_v41, 4  ;;  %v23742_v31 = vld [vmem:[#allocation2 + $0xb8] sm:$0xf]  ;;  %v10011_v56 = vrot.slane %v10009_v23, 4 }
 0x7bc   : > { %v10001_v14 = vor.u32 %v10000_v29, %v23707_v24  ;;  %25101 = vst [vmem:[#allocation30_spill] sm:$0xff] %v23742_v31  ;;  %v23749_v47 = vld [vmem:[#allocation2 + $0xb0] sm:$0x1]  ;;  %v10066_v41 = vshll.u32 %v23742_v31, 16  ;;  %v10070_v48 = vshrl.u32 %v23742_v31, 16 }
 0x7bd   : > { %18835 = vmatmul.mubr.bf16.gmra.mrb[44].mxu0 %v23697_v28  ;;  %v10052_v31 = vshll.u32 %v23749_v47, 16 }
 0x7be   : > { %18838 = vmatprep.mubr.bf16.mxu0 %v23699_v45  ;;  %18867 = vmatpush3.bf16.msra.mxu0 %v20876_v37  ;;  %v9959_v37 = vsel %vm21986_vm11, %v9954_v44, %v9958_v38  ;;  %v10036_v44 = vshll.u32 %v9684_v63, 16  ;;  %v9978_v38 = vrot.slane %v9977_v60, 4  ;;  %v10002_v57 = vrot.slane %v10001_v14, 4 }
 0x7bf   : > { %18868 = vmatprep.subr.bf16.mxu0 %v20877_v25  ;;  %v23739_v29 = vcombine.low %v9949_v40, %v9959_v37  ;;  %v10014_v63 = vrot.slane %v10012_v2, 5  ;;  %v9992_v37 = vrot.slane %v9991_v12, 4  ;;  %v10006_v40 = vrot.slane %v10004_v0, 5 }
 0x7c0   : > { %v10035_v60 = vrot.slane %v10033_v46, 4  ;;  %v10038_v26 = vrot.slane %v10036_v44, 5  ;;  %v10025_v14 = vor.u32 %v10024_v4, %v10020_v58  ;;  %v10049_v46 = vor.u32 %v10048_v1, %v10044_v16 }
 0x7c1   : > { %v10007_v0 = vsel %vm21986_vm11, %v10002_v57, %v10006_v40  ;;  %v10015_v23 = vor.u32 %v10014_v63, %v10011_v56  ;;  %v10028_v2 = vshll.u32 %v23745_v21, 16  ;;  %v10057_v12 = vshrl.u32 %v9687_v11, 16 }
 0x7c2   : > { %18869 = vmatpush3.bf16.msra.mxu0 %v20877_v25  ;;  %v9982_v25 = vrot.slane %v9980_v62, 5  ;;  %v9973_v62 = vsel %vm21986_vm11, %v9968_v32, %v23704_v19  ;;  %v10060_v44 = vshll.u32 %v9687_v11, 16  ;;  %v10026_v19 = vrot.slane %v10025_v14, 4 }
 0x7c3   : > { %18902 = vmatprep.subr.bf16.mxu0 %v23721_v10  ;;  %v10068_v32 = vrot.slane %v10066_v41, 5  ;;  %v10072_v57 = vrot.slane %v10070_v48, 4  ;;  %v10050_v1 = vrot.slane %v10049_v46, 4  ;;  %v10016_v56 = vrot.slane %v10015_v23, 4 }
 0x7c4   : > { %v9983_v53 = vsel %vm21986_vm11, %v9978_v38, %v9982_v25  ;;  %v9997_v38 = vsel %vm21986_vm11, %v9992_v37, %v23707_v24  ;;  %v10039_v25 = vor.u32 %v10038_v26, %v10035_v60  ;;  %v10030_v63 = vrot.slane %v10028_v2, 5  ;;  %v23769_v24 = vld [vmem:[#allocation2 + $0xbc] sm:$0x1] }
 0x7c5   : > { %18839 = vmatmul.mubr.bf16.gmra.mrb[48].mxu0 %v23719_v8  ;;  %v23759_v4 = vcombine.low %v9973_v62, %v9983_v53  ;;  %v23765_v7 = vcombine.low %v9997_v38, %v10007_v0  ;;  %v10059_v40 = vrot.slane %v10057_v12, 4  ;;  %v10062_v11 = vrot.slane %v10060_v44, 5 }
 0x7c6   : > { %18842 = vmatprep.mubr.bf16.mxu0 %v23739_v29  ;;  %v10040_v53 = vrot.slane %v10039_v25, 4  ;;  %v10054_v62 = vrot.slane %v10052_v31, 5  ;;  %v10031_v37 = vsel %vm21986_vm11, %v10026_v19, %v10030_v63  ;;  %v10073_v60 = vor.u32 %v10072_v57, %v10068_v32  ;;  %v20880_v25 = vld [vmem:[#allocation9 + $0x1d0] sm:$0xff]   ;;  %v20881_v19 = vld [vmem:[#allocation9 + $0x1d8] sm:$0xff]   ;;  %v9690_v63 = vld [vmem:[#allocation2 + $0xc0] sm:$0xf] }
 0x7c7   : > { %v10021_v26 = vsel %vm21986_vm11, %v10016_v56, %v10020_v58  ;;  %v10063_v14 = vor.u32 %v10062_v11, %v10059_v40  ;;  %v10076_v41 = vshll.u32 %v23769_v24, 16  ;;  %v20885_v57 = vld [vmem:[#allocation9 + $0x1f8] sm:$0xff]   ;;  %v23804_v56 = vld [vmem:[#allocation2 + $0xc4] sm:$0xf] }
 0x7c8   : > { %v10055_v48 = vsel %vm21986_vm11, %v10050_v1, %v10054_v62  ;;  %v23778_v0 = vcombine.low %v10021_v26, %v10031_v37  ;;  %v10045_v31 = vsel %vm21986_vm11, %v10040_v53, %v10044_v16  ;;  %v10074_v23 = vrot.slane %v10073_v60, 4  ;;  %v20879_v16 = vld [vmem:[#allocation9 + $0x1c8] sm:$0xff]   ;;  %v20886_v1 = vld [vmem:[#allocation9 + $0x80] sm:$0xff]  }
 0x7c9   : > { %v23782_v46 = vcombine.low %v10045_v31, %v10055_v48  ;;  %v10064_v2 = vrot.slane %v10063_v14, 4  ;;  %v10078_v12 = vrot.slane %v10076_v41, 5  ;;  %v10412_v40 = vshll.u32 %v23804_v56, 16  ;;  %v23811_v14 = vld [vmem:[#allocation2 + $0xc8] sm:$0x1] }
 0x7ca   : > { %v10416_v11 = vshrl.u32 %v23804_v56, 16  ;;  %v10403_v53 = vshrl.u32 %v9690_v63, 16  ;;  %v10406_v62 = vshll.u32 %v9690_v63, 16 }
 0x7cb   : > { %v10079_v58 = vsel %vm21986_vm11, %v10074_v23, %v10078_v12  ;;  %v10069_v44 = vsel %vm21986_vm11, %v10064_v2, %v10068_v32  ;;  %v20882_v32 = vld [vmem:[#allocation9 + $0x1e0] sm:$0xff]   ;;  %v10414_v37 = vrot.slane %v10412_v40, 5  ;;  %v10422_v23 = vshll.u32 %v23811_v14, 16 }
 0x7cc   : > { %v23790_v38 = vcombine.low %v10069_v44, %v10079_v58  ;;  %v10418_v60 = vrot.slane %v10416_v11, 4  ;;  %v10405_v48 = vrot.slane %v10403_v53, 4  ;;  %v10408_v26 = vrot.slane %v10406_v62, 5  ;;  %v23835_v53 = vld [vmem:[#allocation2 + $0xd4] sm:$0x1] }
 0x7cd   : > { %18843 = vmatmul.mubr.bf16.gmra.mrb[52].mxu0 %v23759_v4  ;;  %v10424_v58 = vrot.slane %v10422_v23, 5 }
 0x7ce   : > { %18846 = vmatprep.mubr.bf16.mxu0 %v23765_v7  ;;  %v10419_v41 = vor.u32 %v10418_v60, %v10414_v37  ;;  %v10409_v31 = vor.u32 %v10408_v26, %v10405_v48  ;;  %v10974_v60 = vld [vmem:[#allocation2] sm:$0xe] }
 0x7d0   : > { %v10420_v2 = vrot.slane %v10419_v41, 4  ;;  %v10410_v12 = vrot.slane %v10409_v31, 4  ;;  %v16593_v31 = vrot.slane %v10974_v60, 9 }
 0x7d2   : > { %v10425_v44 = vsel %vm21986_vm11, %v10420_v2, %v10424_v58  ;;  %v11045_v2 = vrot.slane %v23524_v35, 5  ;;  %v11049_v58 = vrot.slane %v23516_v33, 5  ;;  %v11056_v35 = vrot.slane %v23518_v20, 5 }
 0x7d3   : > { %v11063_v33 = vrot.slane %v23522_v54, 5  ;;  %v10977_v54 = vld [vmem:[#allocation2 + $0x24] sm:$0xe] }
 0x7d5   : > { %18847 = vmatmul.mubr.bf16.gmra.mrb[56].mxu0 %v23778_v0 }
 0x7d6   : > { %18850 = vmatprep.mubr.bf16.mxu0 %v23782_v46 }
 0x7dd   : > { %18851 = vmatmul.mubr.bf16.gmra.mrb[60].mxu0 %v23790_v38 }
 0x7de   : > { %18870 = vmatprep.mubr.bf16.mxu0 %v23595_v61  ;;  %v20883_v61 = vld [vmem:[#allocation9 + $0x1e8] sm:$0xff]  }
 0x7e5   : > { %18871 = vmatmul.mubr.bf16.vlgmr.msra.gmra.mrb[32].mxu0 %v23597_v13 }
 0x7e6   : > { %18874 = vmatprep.mubr.bf16.mxu0 %v23602_v39  ;;  %18903 = vmatpush3.bf16.msra.mxu0 %v23721_v10  ;;  %v20884_v10 = vld [vmem:[#allocation9 + $0x1f0] sm:$0xff]  }
 0x7e7   : > { %18904 = vmatprep.subr.bf16.mxu0 %v20879_v16 }
 0x7ea   : > { %18905 = vmatpush3.bf16.msra.mxu0 %v20879_v16  ;;  %v10415_v16 = vsel %vm21986_vm11, %v10410_v12, %v10414_v37  ;;  %v11042_v37 = vrot.slane %v23510_v17, 5 }
 0x7eb   : > { %18906 = vmatprep.subr.bf16.mxu0 %v20880_v25 }
 0x7ec   : > { %v11044_v23 = vrot.slane %v11042_v37, 4  ;;  %v11043_v17 = vsel %vm22237_vm14, %v16593_v31, %v11042_v37  ;;  %v10979_v31 = vld [vmem:[#allocation2 + $0x3c] sm:$0xe] }
 0x7ed   : > { %18875 = vmatmul.mubr.bf16.gmra.mrb[36].mxu0 %v23636_v18 }
 0x7ee   : > { %18878 = vmatprep.mubr.bf16.mxu0 %v23655_v6  ;;  %18907 = vmatpush3.bf16.msra.mxu0 %v20880_v25  ;;  %v16575_v25 = vcombine.low %v10415_v16, %v10425_v44  ;;  %v11046_v12 = vsel %vm22237_vm14, %v11044_v23, %v11045_v2  ;;  %v10980_v2 = vld [vmem:[#allocation2 + $0x48] sm:$0xe] }
 0x7ef   : > { %18908 = vmatprep.subr.bf16.mxu0 %v20881_v19  ;;  %v16609_v16 = vcombine.low %v11043_v17, %v11046_v12  ;;  %v16598_v17 = vrot.slane %v10979_v31, 9  ;;  %v25106_v31 = vld [vmem:[#allocation23_spill] sm:$0xff] }
 0x7f2   : > { %18909 = vmatpush3.bf16.msra.mxu0 %v20881_v19  ;;  %v20887_v19 = vld [vmem:[#allocation9 + $0x88] sm:$0xff]  }
 0x7f3   : > { %18910 = vmatprep.subr.bf16.mxu0 %v20882_v32 }
 0x7f5   : > { %18879 = vmatmul.mubr.bf16.gmra.mrb[40].mxu0 %v23669_v22 }
 0x7f6   : > { %18882 = vmatprep.mubr.bf16.mxu0 %v23697_v28  ;;  %18911 = vmatpush3.bf16.msra.mxu0 %v20882_v32  ;;  %v20888_v32 = vld [vmem:[#allocation9 + $0x90] sm:$0xff]  }
 0x7f7   : > { %18912 = vmatprep.subr.bf16.mxu0 %v20883_v61 }
 0x7fa   : > { %18913 = vmatpush3.bf16.msra.mxu0 %v20883_v61  ;;  %v20889_v61 = vld [vmem:[#allocation9 + $0x98] sm:$0xff]  }
 0x7fb   : > { %18914 = vmatprep.subr.bf16.mxu0 %v20884_v10 }
 0x7fd   : > { %18883 = vmatmul.mubr.bf16.gmra.mrb[44].mxu0 %v23699_v45 }
 0x7fe   : > { %18886 = vmatprep.mubr.bf16.mxu0 %v23719_v8  ;;  %18915 = vmatpush3.bf16.msra.mxu0 %v20884_v10  ;;  %v20890_v10 = vld [vmem:[#allocation9 + $0xa0] sm:$0xff]  }
 0x7ff   : > { %18916 = vmatprep.subr.bf16.mxu0 %v20885_v57 }
 0x802   : > { %18917 = vmatpush3.bf16.msra.mxu0 %v20885_v57  ;;  %v23829_v57 = vld [vmem:[#allocation2 + $0xd0] sm:$0xf] }
 0x803   : > { %18950 = vmatprep.subr.bf16.mxu0 %v20886_v1 }
 0x805   : > { %18887 = vmatmul.mubr.bf16.gmra.mrb[48].mxu0 %v23739_v29 }
 0x806   : > { %18890 = vmatprep.mubr.bf16.mxu0 %v23759_v4 }
 0x80d   : > { %18891 = vmatmul.mubr.bf16.gmra.mrb[52].mxu0 %v23765_v7 }
 0x80e   : > { %18894 = vmatprep.mubr.bf16.mxu0 %v23778_v0 }
 0x815   : > { %18895 = vmatmul.mubr.bf16.gmra.mrb[56].mxu0 %v23782_v46 }
 0x816   : > { %18898 = vmatprep.mubr.bf16.mxu0 %v23790_v38 }
 0x81d   : > { %18899 = vmatmul.mubr.bf16.gmra.mrb[60].mxu0 %v16575_v25 }
 0x81e   : > { %18918 = vmatprep.mubr.bf16.mxu0 %v23597_v13  ;;  %v20891_v13 = vld [vmem:[#allocation9 + $0xa8] sm:$0xff]  }
 0x825   : > { %18919 = vmatmul.mubr.bf16.vlgmr.msra.gmra.mrb[32].mxu0 %v23602_v39  ;;  %v20892_v39 = vld [vmem:[#allocation9 + $0xb0] sm:$0xff]  }
 0x826   : > { %18922 = vmatprep.mubr.bf16.mxu0 %v23636_v18  ;;  %18951 = vmatpush3.bf16.msra.mxu0 %v20886_v1  ;;  %v20893_v18 = vld [vmem:[#allocation9 + $0xb8] sm:$0xff]   ;;  %v10698_v1 = vshll.u32 %v23829_v57, 16 }
 0x827   : > { %18952 = vmatprep.subr.bf16.mxu0 %v20887_v19 }
 0x828   : > { %v10700_v40 = vrot.slane %v10698_v1, 5 }
 0x82a   : > { %18953 = vmatpush3.bf16.msra.mxu0 %v20887_v19  ;;  %v11058_v19 = vrot.slane %v11056_v35, 4 }
 0x82b   : > { %18954 = vmatprep.subr.bf16.mxu0 %v20888_v32 }
 0x82d   : > { %18923 = vmatmul.mubr.bf16.gmra.mrb[36].mxu0 %v23655_v6  ;;  %v20894_v6 = vld [vmem:[#allocation9 + $0x140] sm:$0xff]  }
 0x82e   : > { %18926 = vmatprep.mubr.bf16.mxu0 %v23669_v22  ;;  %18955 = vmatpush3.bf16.msra.mxu0 %v20888_v32  ;;  %v9693_v22 = vld [vmem:[#allocation2 + $0xcc] sm:$0xf]  ;;  %v11052_v32 = vrot.slane %v23545_v59, 5 }
 0x82f   : > { %18956 = vmatprep.subr.bf16.mxu0 %v20889_v61 }
 0x832   : > { %18957 = vmatpush3.bf16.msra.mxu0 %v20889_v61  ;;  %v10976_v61 = vld [vmem:[#allocation2 + $0x18] sm:$0xe] }
 0x833   : > { %18958 = vmatprep.subr.bf16.mxu0 %v20890_v10 }
 0x835   : > { %18927 = vmatmul.mubr.bf16.gmra.mrb[40].mxu0 %v23697_v28  ;;  %v10689_v28 = vshrl.u32 %v9693_v22, 16 }
 0x836   : > { %18930 = vmatprep.mubr.bf16.mxu0 %v23699_v45  ;;  %18959 = vmatpush3.bf16.msra.mxu0 %v20890_v10  ;;  %v10692_v45 = vshll.u32 %v9693_v22, 16  ;;  %v11059_v10 = vrot.slane %v23548_v43, 5  ;;  %v11070_v22 = vrot.slane %v23542_v15, 5  ;;  %v20895_v43 = vld [vmem:[#allocation9 + $0x148] sm:$0xff]   ;;  %v11066_v15 = vrot.slane %v23552_v51, 5 }
 0x837   : > { %18960 = vmatprep.subr.bf16.mxu0 %v20891_v13  ;;  %v10691_v63 = vrot.slane %v10689_v28, 4 }
 0x838   : > { %v11060_v20 = vsel %vm22237_vm14, %v11058_v19, %v11059_v10  ;;  %v10982_v10 = vld [vmem:[#allocation2 + $0x60] sm:$0xe] }
 0x83a   : > { %18961 = vmatpush3.bf16.msra.mxu0 %v20891_v13 }
 0x83b   : > { %18962 = vmatprep.subr.bf16.mxu0 %v20892_v39 }
 0x83d   : > { %18931 = vmatmul.mubr.bf16.gmra.mrb[44].mxu0 %v23719_v8  ;;  %v10702_v8 = vshrl.u32 %v23829_v57, 16 }
 0x83e   : > { %18934 = vmatprep.mubr.bf16.mxu0 %v23739_v29  ;;  %18963 = vmatpush3.bf16.msra.mxu0 %v20892_v39  ;;  %v10694_v29 = vrot.slane %v10692_v45, 5 }
 0x83f   : > { %18964 = vmatprep.subr.bf16.mxu0 %v20893_v18  ;;  %v10704_v11 = vrot.slane %v10702_v8, 4  ;;  %v11065_v8 = vrot.slane %v11063_v33, 4 }
 0x840   : > { %v10695_v62 = vor.u32 %v10694_v29, %v10691_v63  ;;  %v11072_v63 = vrot.slane %v11070_v22, 4  ;;  %v10978_v29 = vld [vmem:[#allocation2 + $0x30] sm:$0xe] }
 0x841   : > { %v16597_v37 = vrot.slane %v10978_v29, 9 }
 0x842   : > { %18965 = vmatpush3.bf16.msra.mxu0 %v20893_v18  ;;  %v10696_v48 = vrot.slane %v10695_v62, 4  ;;  %v16595_v18 = vrot.slane %v10976_v61, 9  ;;  %v16596_v62 = vrot.slane %v10977_v54, 9  ;;  %v20901_v54 = vld [vmem:[#allocation9 + $0x178] sm:$0xff]  }
 0x843   : > { %18998 = vmatprep.subr.bf16.mxu0 %v20894_v6 }
 0x844   : > { %v11057_v59 = vsel %vm22237_vm14, %v16595_v18, %v11056_v35  ;;  %v11064_v51 = vsel %vm22237_vm14, %v16596_v62, %v11063_v33  ;;  %v10984_v62 = vld [vmem:[#allocation2 + $0x78] sm:$0xe] }
 0x845   : > { %18935 = vmatmul.mubr.bf16.gmra.mrb[48].mxu0 %v23759_v4  ;;  %v10705_v4 = vor.u32 %v10704_v11, %v10700_v40  ;;  %v23867_v1 = vcombine.low %v11057_v59, %v11060_v20  ;;  %v20896_v11 = vld [vmem:[#allocation9 + $0x150] sm:$0xff]   ;;  %v11105_v20 = vrot.slane %v23626_v27, 5 }
 0x846   : > { %18938 = vmatprep.mubr.bf16.mxu0 %v23765_v7  ;;  %v10708_v7 = vshll.u32 %v23835_v53, 16  ;;  %v25102_v59 = vld [vmem:[#allocation33_spill] sm:$0xff] }
 0x847   : > { %v10706_v26 = vrot.slane %v10705_v4, 4  ;;  %v11067_v4 = vsel %vm22237_vm14, %v11065_v8, %v11066_v15  ;;  %v11107_v27 = vrot.slane %v11105_v20, 4  ;;  %v10983_v15 = vld [vmem:[#allocation2 + $0x6c] sm:$0xe] }
 0x848   : > { %v10710_v41 = vrot.slane %v10708_v7, 5  ;;  %v11077_v7 = vrot.slane %v23565_v52, 5 }
 0x84a   : > { %v11079_v52 = vrot.slane %v11077_v7, 4 }
 0x84d   : > { %18939 = vmatmul.mubr.bf16.gmra.mrb[52].mxu0 %v23778_v0  ;;  %v10701_v0 = vsel %vm21986_vm11, %v10696_v48, %v10700_v40  ;;  %v11073_v40 = vrot.slane %v23572_v36, 5  ;;  %v11084_v48 = vrot.slane %v23581_v42, 5  ;;  %v11071_v36 = vsel %vm22237_vm14, %v16597_v37, %v11070_v22  ;;  %v23927_v37 = vld [vmem:[#allocation9 + $0x200] sm:$0xff]  }
 0x84e   : > { %18942 = vmatprep.mubr.bf16.mxu0 %v23782_v46  ;;  %v10711_v46 = vsel %vm21986_vm11, %v10706_v26, %v10710_v41  ;;  %v20897_v26 = vld [vmem:[#allocation9 + $0x158] sm:$0xff]   ;;  %v11080_v42 = vrot.slane %v23589_v9, 5  ;;  %v11078_v9 = vsel %vm22237_vm14, %v16598_v17, %v11077_v7  ;;  %v16601_v22 = vrot.slane %v10982_v10, 9 }
 0x84f   : > { %v16584_v44 = vcombine.low %v10701_v0, %v10711_v46  ;;  %v11074_v60 = vsel %vm22237_vm14, %v11072_v63, %v11073_v40  ;;  %v11086_v23 = vrot.slane %v11084_v48, 4  ;;  %v11087_v0 = vrot.slane %v23615_v3, 5  ;;  %v20898_v46 = vld [vmem:[#allocation9 + $0x160] sm:$0xff]   ;;  %v25103_v40 = vld [vmem:[#allocation34_spill] sm:$0xff] }
 0x850   : > { %v23885_v41 = vcombine.low %v11071_v36, %v11074_v60  ;;  %v11081_v12 = vsel %vm22237_vm14, %v11079_v52, %v11080_v42  ;;  %v16602_v60 = vrot.slane %v10983_v15, 9 }
 0x851   : > { %v11088_v35 = vsel %vm22237_vm14, %v11086_v23, %v11087_v0  ;;  %v11126_v23 = vrot.slane %v25106_v31, 5 }
 0x852   : > { %v11106_v42 = vsel %vm22237_vm14, %v16602_v60, %v11105_v20 }
 0x855   : > { %18943 = vmatmul.mubr.bf16.gmra.mrb[56].mxu0 %v23790_v38  ;;  %v11051_v38 = vrot.slane %v11049_v58, 4 }
 0x856   : > { %18946 = vmatprep.mubr.bf16.mxu0 %v16575_v25  ;;  %v10975_v25 = vld [vmem:[#allocation2 + $0xc] sm:$0xe] }
 0x857   : > { %v16594_v13 = vrot.slane %v10975_v25, 9  ;;  %v11053_v39 = vsel %vm22237_vm14, %v11051_v38, %v11052_v32  ;;  %v23899_v38 = vcombine.low %v11078_v9, %v11081_v12  ;;  %v20899_v25 = vld [vmem:[#allocation9 + $0x168] sm:$0xff]   ;;  %v10981_v32 = vld [vmem:[#allocation2 + $0x54] sm:$0xe]  ;;  %v25108_v9 = vld [vmem:[#allocation27_spill] sm:$0xff] }
 0x858   : > { %v16600_v33 = vrot.slane %v10981_v32, 9  ;;  %v10985_v12 = vld [vmem:[#allocation2 + $0x84] sm:$0xe] }
 0x859   : > { %v11050_v28 = vsel %vm22237_vm14, %v16594_v13, %v11049_v58  ;;  %v11091_v58 = vrot.slane %v23605_v5, 5  ;;  %v11101_v13 = vrot.slane %v23646_v50, 5  ;;  %v25109_v32 = vld [vmem:[#allocation28_spill] sm:$0xff] }
 0x85a   : > { %v23863_v45 = vcombine.low %v11050_v28, %v11053_v39  ;;  %v20900_v39 = vld [vmem:[#allocation9 + $0x170] sm:$0xff]  }
 0x85b   : > { %v11093_v5 = vrot.slane %v11091_v58, 4 }
 0x85d   : > { %18947 = vmatmul.mubr.bf16.gmra.mrb[60].mxu0 %v16584_v44  ;;  %v16599_v44 = vrot.slane %v10980_v2, 9 }
 0x85e   : > { %18966 = vmatprep.mubr.bf16.mxu0 %v16609_v16  ;;  %v11098_v16 = vrot.slane %v23607_v55, 5  ;;  %v11094_v55 = vrot.slane %v23644_v30, 5  ;;  %v11092_v30 = vsel %vm22237_vm14, %v16600_v33, %v11091_v58  ;;  %v11128_v58 = vrot.slane %v11126_v23, 4 }
 0x85f   : > { %v11085_v3 = vsel %vm22237_vm14, %v16599_v44, %v11084_v48  ;;  %v25107_v44 = vld [vmem:[#allocation26_spill] sm:$0xff] }
 0x860   : > { %v23903_v19 = vcombine.low %v11085_v3, %v11088_v35  ;;  %v11100_v61 = vrot.slane %v11098_v16, 4  ;;  %v11095_v18 = vsel %vm22237_vm14, %v11093_v5, %v11094_v55  ;;  %v11099_v50 = vsel %vm22237_vm14, %v16601_v22, %v11098_v16  ;;  %v10986_v16 = vld [vmem:[#allocation2 + $0x90] sm:$0xe] }
 0x861   : > { %v23917_v8 = vcombine.low %v11092_v30, %v11095_v18  ;;  %v11122_v35 = vrot.slane %v25107_v44, 5  ;;  %v11129_v3 = vrot.slane %v25108_v9, 5  ;;  %v16605_v55 = vrot.slane %v10986_v16, 9  ;;  %v20906_v44 = vld [vmem:[#allocation9 + $0x220] sm:$0xff]   ;;  %v20909_v16 = vld [vmem:[#allocation9 + $0x238] sm:$0xff]  }
 0x862   : > { %v11102_v28 = vsel %vm22237_vm14, %v11100_v61, %v11101_v13  ;;  %v11133_v61 = vrot.slane %v25109_v32, 5  ;;  %v25110_v13 = vld [vmem:[#allocation24_spill] sm:$0xff]  ;;  %v11136_v30 = vrot.slane %v23745_v21, 5  ;;  %v11479_v9 = vrot.slane %v23804_v56, 5 }
 0x863   : > { %v23921_v63 = vcombine.low %v11099_v50, %v11102_v28  ;;  %v11130_v10 = vsel %vm22237_vm14, %v11128_v58, %v11129_v3  ;;  %v11127_v20 = vsel %vm22237_vm14, %v16605_v55, %v11126_v23  ;;  %v10988_v50 = vld [vmem:[#allocation2 + $0xa8] sm:$0xe]  ;;  %v20910_v23 = vld [vmem:[#allocation11 + $0xc0] sm:$0xff]   ;;  %v11751_v56 = vrot.slane %v23829_v57, 5 }
 0x864   : > { %v23960_v22 = vcombine.low %v11127_v20, %v11130_v10  ;;  %v11135_v28 = vrot.slane %v11133_v61, 4  ;;  %19094 = vmatprep.subr.bf16.mxu1 %v20910_v23  ;;  %v20914_v58 = vld [vmem:[#allocation11 + $0xe0] sm:$0xff]   ;;  %v11481_v3 = vrot.slane %v11479_v9, 4  ;;  %v20916_v57 = vld [vmem:[#allocation11 + $0xf0] sm:$0xff]  }
 0x865   : > { %18967 = vmatmul.mubr.bf16.vlgmr.msra.gmra.mrb[32].mxu0 %v23863_v45  ;;  %19095 = vmatpush3.bf16.msra.mxu1 %v20910_v23 }
 0x866   : > { %18970 = vmatprep.mubr.bf16.mxu0 %v23867_v1  ;;  %18999 = vmatpush3.bf16.msra.mxu0 %v20894_v6  ;;  %v23881_v6 = vcombine.low %v11064_v51, %v11067_v4  ;;  %v25104_v4 = vld [vmem:[#allocation25_spill] sm:$0xff]  ;;  %v25105_v51 = vld [vmem:[#allocation20_spill] sm:$0xff]  ;;  %v11137_v15 = vsel %vm22237_vm14, %v11135_v28, %v11136_v30 }
 0x867   : > { %19000 = vmatprep.subr.bf16.mxu0 %v20895_v43  ;;  %v11115_v7 = vrot.slane %v25104_v4, 5  ;;  %v11119_v36 = vrot.slane %v25105_v51, 5  ;;  %v11150_v51 = vrot.slane %v23769_v24, 5  ;;  %v20903_v24 = vld [vmem:[#allocation9 + $0x208] sm:$0xff]  }
 0x869   : > { %v11121_v17 = vrot.slane %v11119_v36, 4 }
 0x86a   : > { %19001 = vmatpush3.bf16.msra.mxu0 %v20895_v43  ;;  %v11112_v43 = vrot.slane %v25102_v59, 5  ;;  %v10987_v59 = vld [vmem:[#allocation2 + $0x9c] sm:$0xe] }
 0x86b   : > { %19002 = vmatprep.subr.bf16.mxu0 %v20896_v11  ;;  %v11123_v5 = vsel %vm22237_vm14, %v11121_v17, %v11122_v35  ;;  %v20913_v17 = vld [vmem:[#allocation11 + $0xd8] sm:$0xff]   ;;  %v20908_v35 = vld [vmem:[#allocation9 + $0x230] sm:$0xff]  }
 0x86c   : > { %v11114_v29 = vrot.slane %v11112_v43, 4 }
 0x86d   : > { %18971 = vmatmul.mubr.bf16.gmra.mrb[36].mxu0 %v23881_v6 }
 0x86e   : > { %18974 = vmatprep.mubr.bf16.mxu0 %v23885_v41  ;;  %19003 = vmatpush3.bf16.msra.mxu0 %v20896_v11  ;;  %v11108_v11 = vrot.slane %v25103_v40, 5  ;;  %v11116_v52 = vsel %vm22237_vm14, %v11114_v29, %v11115_v7  ;;  %v25111_v29 = vld [vmem:[#allocation30_spill] sm:$0xff] }
 0x86f   : > { %19004 = vmatprep.subr.bf16.mxu0 %v20897_v26  ;;  %v11147_v40 = vrot.slane %v25111_v29, 5 }
 0x870   : > { %v11109_v48 = vsel %vm22237_vm14, %v11107_v27, %v11108_v11  ;;  %v16606_v27 = vrot.slane %v10987_v59, 9  ;;  %v16607_v11 = vrot.slane %v10988_v50, 9 }
 0x871   : > { %v23937_v2 = vcombine.low %v11106_v42, %v11109_v48  ;;  %v10989_v48 = vld [vmem:[#allocation2 + $0xb4] sm:$0xe]  ;;  %v20911_v42 = vld [vmem:[#allocation11 + $0xc8] sm:$0xff]  }
 0x872   : > { %19005 = vmatpush3.bf16.msra.mxu0 %v20897_v26  ;;  %v16603_v26 = vrot.slane %v10984_v62, 9  ;;  %v11134_v4 = vsel %vm22237_vm14, %v16606_v27, %v11133_v61  ;;  %19096 = vmatprep.subr.bf16.mxu1 %v20911_v42 }
 0x873   : > { %19006 = vmatprep.subr.bf16.mxu0 %v20898_v46  ;;  %v23973_v7 = vcombine.low %v11134_v4, %v11137_v15  ;;  %19097 = vmatpush3.bf16.msra.mxu1 %v20911_v42 }
 0x874   : > { %v11113_v0 = vsel %vm22237_vm14, %v16603_v26, %v11112_v43 }
 0x875   : > { %18975 = vmatmul.mubr.bf16.gmra.mrb[40].mxu0 %v23899_v38 }
 0x876   : > { %18978 = vmatprep.mubr.bf16.mxu0 %v23903_v19  ;;  %19007 = vmatpush3.bf16.msra.mxu0 %v20898_v46  ;;  %v23942_v46 = vcombine.low %v11113_v0, %v11116_v52  ;;  %v20912_v0 = vld [vmem:[#allocation11 + $0xd0] sm:$0xff]  }
 0x877   : > { %19008 = vmatprep.subr.bf16.mxu0 %v20899_v25  ;;  %19098 = vmatprep.subr.bf16.mxu1 %v20912_v0 }
 0x878   : > { %19099 = vmatpush3.bf16.msra.mxu1 %v20912_v0 }
 0x879   : > { %19100 = vmatprep.subr.bf16.mxu1 %v20913_v17 }
 0x87a   : > { %19009 = vmatpush3.bf16.msra.mxu0 %v20899_v25  ;;  %v16604_v25 = vrot.slane %v10985_v12, 9  ;;  %v20904_v12 = vld [vmem:[#allocation9 + $0x210] sm:$0xff]  }
 0x87b   : > { %19010 = vmatprep.subr.bf16.mxu0 %v20900_v39 }
 0x87c   : > { %v11120_v33 = vsel %vm22237_vm14, %v16604_v25, %v11119_v36  ;;  %v16608_v36 = vrot.slane %v10989_v48, 9  ;;  %19101 = vmatpush3.bf16.msra.mxu1 %v20913_v17  ;;  %v10990_v25 = vld [vmem:[#allocation2 + $0xc0] sm:$0xe] }
 0x87d   : > { %18979 = vmatmul.mubr.bf16.gmra.mrb[44].mxu0 %v23917_v8  ;;  %v23956_v18 = vcombine.low %v11120_v33, %v11123_v5  ;;  %19102 = vmatprep.subr.bf16.mxu1 %v20914_v58  ;;  %v11482_v5 = vrot.slane %v23811_v14, 5  ;;  %v16633_v32 = vrot.slane %v10990_v25, 9  ;;  %v10991_v14 = vld [vmem:[#allocation2 + $0xcc] sm:$0xe] }
 0x87e   : > { %18982 = vmatprep.mubr.bf16.mxu0 %v23921_v63  ;;  %19011 = vmatpush3.bf16.msra.mxu0 %v20900_v39  ;;  %v11140_v39 = vrot.slane %v25110_v13, 5  ;;  %v11148_v52 = vsel %vm22237_vm14, %v16608_v36, %v11147_v40 }
 0x87f   : > { %19012 = vmatprep.subr.bf16.mxu0 %v20901_v54  ;;  %v11483_v61 = vsel %vm22237_vm14, %v11481_v3, %v11482_v5  ;;  %v11480_v55 = vsel %vm22237_vm14, %v16633_v32, %v11479_v9 }
 0x880   : > { %v11142_v43 = vrot.slane %v11140_v39, 4  ;;  %v11141_v21 = vsel %vm22237_vm14, %v16607_v11, %v11140_v39  ;;  %19103 = vmatpush3.bf16.msra.mxu1 %v20914_v58  ;;  %v16634_v10 = vcombine.low %v11480_v55, %v11483_v61  ;;  %v12569_v61 = vld [vmem:[#allocation2 + $0xc] sm:$0xf] }
 0x882   : > { %19013 = vmatpush3.bf16.msra.mxu0 %v20901_v54  ;;  %v11143_v54 = vrot.slane %v23749_v47, 5  ;;  %v11149_v47 = vrot.slane %v11147_v40, 4 }
 0x883   : > { %19046 = vmatprep.subr.bf16.mxu0 %v23927_v37 }
 0x884   : > { %v11144_v62 = vsel %vm22237_vm14, %v11142_v43, %v11143_v54  ;;  %v11151_v26 = vsel %vm22237_vm14, %v11149_v47, %v11150_v51 }
 0x885   : > { %18983 = vmatmul.mubr.bf16.gmra.mrb[48].mxu0 %v23937_v2  ;;  %v23977_v60 = vcombine.low %v11141_v21, %v11144_v62  ;;  %v23986_v31 = vcombine.low %v11148_v52, %v11151_v26 }
 0x886   : > { %18986 = vmatprep.mubr.bf16.mxu0 %v23942_v46 }
 0x88d   : > { %18987 = vmatmul.mubr.bf16.gmra.mrb[52].mxu0 %v23956_v18 }
 0x88e   : > { %18990 = vmatprep.mubr.bf16.mxu0 %v23960_v22 }
 0x895   : > { %18991 = vmatmul.mubr.bf16.gmra.mrb[56].mxu0 %v23973_v7 }
 0x896   : > { %18994 = vmatprep.mubr.bf16.mxu0 %v23977_v60 }
 0x89d   : > { %18995 = vmatmul.mubr.bf16.gmra.mrb[60].mxu0 %v23986_v31 }
 0x89e   : > { %19014 = vmatprep.mubr.bf16.mxu0 %v23863_v45  ;;  %v20905_v45 = vld [vmem:[#allocation9 + $0x218] sm:$0xff]  }
 0x8a5   : > { %19015 = vmatmul.mubr.bf16.vlgmr.msra.gmra.mrb[32].mxu0 %v23867_v1 }
 0x8a6   : > { %19018 = vmatprep.mubr.bf16.mxu0 %v23881_v6  ;;  %19047 = vmatpush3.bf16.msra.mxu0 %v23927_v37  ;;  %v20907_v37 = vld [vmem:[#allocation9 + $0x228] sm:$0xff]  }
 0x8a7   : > { %19048 = vmatprep.subr.bf16.mxu0 %v20903_v24 }
 0x8aa   : > { %19049 = vmatpush3.bf16.msra.mxu0 %v20903_v24 }
 0x8ab   : > { %19050 = vmatprep.subr.bf16.mxu0 %v20904_v12 }
 0x8ad   : > { %19019 = vmatmul.mubr.bf16.gmra.mrb[36].mxu0 %v23885_v41 }
 0x8ae   : > { %19022 = vmatprep.mubr.bf16.mxu0 %v23899_v38  ;;  %19051 = vmatpush3.bf16.msra.mxu0 %v20904_v12 }
 0x8af   : > { %19052 = vmatprep.subr.bf16.mxu0 %v20905_v45 }
 0x8b2   : > { %19053 = vmatpush3.bf16.msra.mxu0 %v20905_v45 }
 0x8b3   : > { %19054 = vmatprep.subr.bf16.mxu0 %v20906_v44 }
 0x8b5   : > { %19023 = vmatmul.mubr.bf16.gmra.mrb[40].mxu0 %v23903_v19 }
 0x8b6   : > { %19026 = vmatprep.mubr.bf16.mxu0 %v23917_v8  ;;  %19055 = vmatpush3.bf16.msra.mxu0 %v20906_v44 }
 0x8b7   : > { %19056 = vmatprep.subr.bf16.mxu0 %v20907_v37 }
 0x8ba   : > { %19057 = vmatpush3.bf16.msra.mxu0 %v20907_v37 }
 0x8bb   : > { %19058 = vmatprep.subr.bf16.mxu0 %v20908_v35 }
 0x8bd   : > { %19027 = vmatmul.mubr.bf16.gmra.mrb[44].mxu0 %v23921_v63 }
 0x8be   : > { %19030 = vmatprep.mubr.bf16.mxu0 %v23937_v2  ;;  %19059 = vmatpush3.bf16.msra.mxu0 %v20908_v35 }
 0x8bf   : > { %19060 = vmatprep.subr.bf16.mxu0 %v20909_v16 }
 0x8c2   : > { %19061 = vmatpush3.bf16.msra.mxu0 %v20909_v16  ;;  %v12576_v16 = vld [vmem:[#allocation2 + $0x18] sm:$0xf] }
 0x8c5   : > { %19031 = vmatmul.mubr.bf16.gmra.mrb[48].mxu0 %v23942_v46 }
 0x8c6   : > { %19034 = vmatprep.mubr.bf16.mxu0 %v23956_v18 }
 0x8cd   : > { %19035 = vmatmul.mubr.bf16.gmra.mrb[52].mxu0 %v23960_v22 }
 0x8ce   : > { %19038 = vmatprep.mubr.bf16.mxu0 %v23973_v7 }
 0x8d5   : > { %19039 = vmatmul.mubr.bf16.gmra.mrb[56].mxu0 %v23977_v60 }
 0x8d6   : > { %19042 = vmatprep.mubr.bf16.mxu0 %v23986_v31 }
 0x8dd   : > { %19043 = vmatmul.mubr.bf16.gmra.mrb[60].mxu0 %v16634_v10 }
 0x8de   : > { %19062 = vmatprep.mubr.bf16.mxu0 %v23867_v1  ;;  %v16643_v1 = vrot.slane %v10991_v14, 9 }
 0x8e5   : > { %19063 = vmatmul.mubr.bf16.vlgmr.msra.gmra.mrb[32].mxu0 %v23881_v6  ;;  %v11753_v6 = vrot.slane %v11751_v56, 4 }
 0x8e6   : > { %19066 = vmatprep.mubr.bf16.mxu0 %v23885_v41  ;;  %v11754_v41 = vrot.slane %v23835_v53, 5  ;;  %v24031_v53 = vld [vmem:[#allocation11] sm:$0xff]  }
 0x8ed   : > { %19067 = vmatmul.mubr.bf16.gmra.mrb[36].mxu0 %v23899_v38  ;;  %v11752_v38 = vsel %vm22237_vm14, %v16643_v1, %v11751_v56  ;;  %v12580_v1 = vld [vmem:[#allocation2 + $0x20] sm:$0x1] }
 0x8ee   : > { %19070 = vmatprep.mubr.bf16.mxu0 %v23903_v19  ;;  %v11755_v19 = vsel %vm22237_vm14, %v11753_v6, %v11754_v41 }
 0x8f5   : > { %19071 = vmatmul.mubr.bf16.gmra.mrb[40].mxu0 %v23917_v8  ;;  %v16644_v8 = vcombine.low %v11752_v38, %v11755_v19  ;;  %v20945_v19 = vld [vmem:[#allocation11 + $0x190] sm:$0xff]  }
 0x8f6   : > { %19074 = vmatprep.mubr.bf16.mxu0 %v23921_v63  ;;  %v20915_v63 = vld [vmem:[#allocation11 + $0xe8] sm:$0xff]  }
 0x8f7   : > { %19104 = vmatprep.subr.bf16.mxu1 %v20915_v63 }
 0x8f8   : > { %19105 = vmatpush3.bf16.msra.mxu1 %v20915_v63  ;;  %v20946_v63 = vld [vmem:[#allocation11 + $0x198] sm:$0xff]  }
 0x8f9   : > { %19106 = vmatprep.subr.bf16.mxu1 %v20916_v57 }
 0x8fc   : > { %19107 = vmatpush3.bf16.msra.mxu1 %v20916_v57 }
 0x8fd   : > { %19075 = vmatmul.mubr.bf16.gmra.mrb[44].mxu0 %v23937_v2  ;;  %v20917_v2 = vld [vmem:[#allocation11 + $0xf8] sm:$0xff]  }
 0x8fe   : > { %19078 = vmatprep.mubr.bf16.mxu0 %v23942_v46  ;;  %19108 = vmatprep.subr.bf16.mxu1 %v20917_v2  ;;  %v24037_v46 = vld [vmem:[%s24943_s6] ss:$0 sm:$0xff] }
 0x900   : > { %19109 = vmatpush3.bf16.msra.mxu1 %v20917_v2  ;;  %v12573_v2 = vld [vmem:[#allocation2 + $0x14] sm:$0x1] }
 0x901   : > { %19142 = vmatprep.subr.bf16.mxu1 %v24031_v53 }
 0x905   : > { %19079 = vmatmul.mubr.bf16.gmra.mrb[48].mxu0 %v23956_v18 }
 0x906   : > { %19082 = vmatprep.mubr.bf16.mxu0 %v23960_v22 }
 0x90d   : > { %19083 = vmatmul.mubr.bf16.gmra.mrb[52].mxu0 %v23973_v7 }
 0x90e   : > { %19086 = vmatprep.mubr.bf16.mxu0 %v23977_v60 }
 0x915   : > { %19087 = vmatmul.mubr.bf16.gmra.mrb[56].mxu0 %v23986_v31 }
 0x916   : > { %19090 = vmatprep.mubr.bf16.mxu0 %v16634_v10 }
 0x91d   : > { %19091 = vmatmul.mubr.bf16.gmra.mrb[60].mxu0 %v16644_v8 }
 0x9b8   : > { %v19064_v13 = vpop.f32.mrb[32].mxu0 }
 0x9b9   : > { %v12027_v39 = vadd.f32 %v19064_v13, %v24037_v46  ;;  %v11859_v33 = vpop.f32.mrb[33].mxu0 }
 0x9ba   : > { %v12025_v18 = vadd.f32 %v24037_v46, %v11859_v33  ;;  %v19065_v20 = vpop.f32.mrb[34].mxu0 }
 0x9bb   : > { %vm12059_vm12 = vcmp.ge.f32.partialorder %v12027_v39, 0.0  ;;  %v12091_v22 = vmul.f32 0.1, %v12027_v39  ;;  %v12028_v28 = vadd.f32 %v19065_v20, %v24037_v46  ;;  %v11862_v59 = vpop.f32.mrb[35].mxu0 }
 0x9bc   : > { %vm12057_vm13 = vcmp.ge.f32.partialorder %v12025_v18, 0.0  ;;  %v12089_v43 = vmul.f32 0.1, %v12025_v18  ;;  %v12026_v30 = vadd.f32 %v24037_v46, %v11862_v59 }
 0x9bd   : > { %v12123_v50 = vsel %vm12059_vm12, %v12027_v39, %v12091_v22  ;;  %vm12060_vm15 = vcmp.ge.f32.partialorder %v12028_v28, 0.0  ;;  %v12092_v54 = vmul.f32 0.1, %v12028_v28 }
 0x9be   : > { %v16903_v27 = vpack.c.bf16 %v12123_v50, %v12123_v50  ;;  %v12121_v15 = vsel %vm12057_vm13, %v12025_v18, %v12089_v43  ;;  %vm12058_vm0 = vcmp.ge.f32.partialorder %v12026_v30, 0.0  ;;  %v12090_v29 = vmul.f32 0.1, %v12026_v30 }
 0x9bf   : > { %v16901_v40 = vpack.c.bf16 %v12121_v15, %v12121_v15  ;;  %v12124_v11 = vsel %vm12060_vm15, %v12028_v28, %v12092_v54 }
 0x9c0   : > { %v12267_v62 = vshrl.u32 %v16903_v27, 16  ;;  %v12270_v4 = vshll.u32 %v16903_v27, 16  ;;  %v16904_v7 = vpack.c.bf16 %v12124_v11, %v12124_v11  ;;  %v12122_v21 = vsel %vm12058_vm0, %v12026_v30, %v12090_v29  ;;  %v19068_v60 = vpop.f32.mrb[36].mxu0 }
 0x9c1   : > { %v12250_v47 = vshrl.u32 %v16901_v40, 16  ;;  %v12253_v48 = vshll.u32 %v16901_v40, 16  ;;  %v16902_v51 = vpack.c.bf16 %v12122_v21, %v12122_v21  ;;  %v12031_v36 = vadd.f32 %v19068_v60, %v24037_v46  ;;  %v11875_v26 = vpop.f32.mrb[37].mxu0 }
 0x9c2   : > { %v12269_v52 = vrot.slane %v12267_v62, 7  ;;  %v12275_v31 = vshrl.u32 %v16904_v7, 16  ;;  %v12278_v23 = vshll.u32 %v16904_v7, 16  ;;  %v12029_v42 = vadd.f32 %v24037_v46, %v11875_v26  ;;  %v19069_v0 = vpop.f32.mrb[38].mxu0 }
 0x9c3   : > { %v12252_v24 = vrot.slane %v12250_v47, 7  ;;  %v12258_v17 = vshrl.u32 %v16902_v51, 16  ;;  %v12261_v12 = vshll.u32 %v16902_v51, 16  ;;  %vm12063_vm1 = vcmp.ge.f32.partialorder %v12031_v36, 0.0  ;;  %v11878_v58 = vpop.f32.mrb[39].mxu0 }
 0x9c4   : > { %v12272_v45 = vor.u32 %v12270_v4, %v12269_v52  ;;  %v12273_v44 = vrot.slane %v12269_v52, 4  ;;  %v12277_v37 = vrot.slane %v12275_v31, 7  ;;  %v12095_v35 = vmul.f32 0.1, %v12031_v36  ;;  %v12590_v47 = vld [vmem:[#allocation2 + $0x30] sm:$0xf] }
 0x9c5   : > { %v12255_v9 = vor.u32 %v12253_v48, %v12252_v24  ;;  %v12256_v3 = vrot.slane %v12252_v24, 4  ;;  %v12260_v25 = vrot.slane %v12258_v17, 7  ;;  %vm12061_vm3 = vcmp.ge.f32.partialorder %v12029_v42, 0.0 }
 0x9c6   : > { %v12577_v32 = vsel %vm21598_vm8, %v12272_v45, %v12576_v16  ;;  %v12280_v55 = vor.u32 %v12278_v23, %v12277_v37  ;;  %v12282_v10 = vrot.slane %v12277_v37, 4  ;;  %v12127_v56 = vsel %vm12063_vm1, %v12031_v36, %v12095_v35 }
 0x9c7   : > { %12578 = vst [vmem:[#allocation2 + $0x18] sm:$0xf] %v12577_v32  ;;  %v12570_v14 = vsel %vm21598_vm8, %v12255_v9, %v12569_v61  ;;  %v12263_v6 = vor.u32 %v12261_v12, %v12260_v25  ;;  %v12265_v41 = vrot.slane %v12260_v25, 4  ;;  %v16907_v38 = vpack.c.bf16 %v12127_v56, %v12127_v56 }
 0x9c8   : > { %12571 = vst [vmem:[#allocation2 + $0xc] sm:$0xf] %v12570_v14  ;;  %v12281_v8 = vsel %vm21592_vm7, %v12273_v44, %v12280_v55  ;;  %v12581_v57 = vsel %vm21569_vm2, %v12282_v10, %v12580_v1  ;;  %v12093_v13 = vmul.f32 0.1, %v12029_v42  ;;  %v12032_v39 = vadd.f32 %v19069_v0, %v24037_v46  ;;  %v19072_v33 = vpop.f32.mrb[40].mxu0 }
 0x9c9   : > { %12579 = vst [vmem:[#allocation2 + $0x1c] sm:$0xf] %v12281_v8  ;;  %12582 = vst [vmem:[#allocation2 + $0x20] sm:$0x1] %v12581_v57  ;;  %v12264_v18 = vsel %vm21592_vm7, %v12256_v3, %v12263_v6  ;;  %v12574_v20 = vsel %vm21569_vm2, %v12265_v41, %v12573_v2  ;;  %v12301_v22 = vshrl.u32 %v16907_v38, 16  ;;  %v12304_v28 = vshll.u32 %v16907_v38, 16 }
 0x9ca   : > { %v11891_v59 = vpop.f32.mrb[41].mxu0  ;;  %12572 = vst [vmem:[#allocation2 + $0x10] sm:$0xf] %v12264_v18  ;;  %12575 = vst [vmem:[#allocation2 + $0x14] sm:$0x1] %v12574_v20  ;;  %v12125_v43 = vsel %vm12061_vm3, %v12029_v42, %v12093_v13  ;;  %vm12064_vm4 = vcmp.ge.f32.partialorder %v12032_v39, 0.0  ;;  %v12030_v50 = vadd.f32 %v24037_v46, %v11878_v58  ;;  %v12035_v29 = vadd.f32 %v19072_v33, %v24037_v46 }
 0x9cb   : > { %v12096_v30 = vmul.f32 0.1, %v12032_v39  ;;  %v19073_v54 = vpop.f32.mrb[42].mxu0  ;;  %v12303_v27 = vrot.slane %v12301_v22, 7  ;;  %v16905_v15 = vpack.c.bf16 %v12125_v43, %v12125_v43  ;;  %v12033_v40 = vadd.f32 %v24037_v46, %v11891_v59  ;;  %v12583_v0 = vld [vmem:[#allocation2 + $0x24] sm:$0xf] }
 0x9cc   : > { %v24062_v11 = vpop.f32.mrb[43].mxu0  ;;  %vm12062_vm5 = vcmp.ge.f32.partialorder %v12030_v50, 0.0  ;;  %v12094_v4 = vmul.f32 0.1, %v12030_v50  ;;  %v12036_v7 = vadd.f32 %v19073_v54, %v24037_v46  ;;  %vm12067_vm6 = vcmp.ge.f32.partialorder %v12035_v29, 0.0  ;;  %v20923_v38 = vld [vmem:[#allocation11 + $0x8] sm:$0xff]  }
 0x9cd   : > { %v12128_v62 = vsel %vm12064_vm4, %v12032_v39, %v12096_v30  ;;  %v12306_v21 = vor.u32 %v12304_v28, %v12303_v27  ;;  %v12307_v60 = vrot.slane %v12303_v27, 4  ;;  %v12284_v48 = vshrl.u32 %v16905_v15, 16  ;;  %v12594_v39 = vld [vmem:[#allocation2 + $0x38] sm:$0x1]  ;;  %v12587_v43 = vld [vmem:[#allocation2 + $0x2c] sm:$0x1] }
 0x9ce   : > { %v12287_v51 = vshll.u32 %v16905_v15, 16  ;;  %v16908_v36 = vpack.c.bf16 %v12128_v62, %v12128_v62  ;;  %v12126_v26 = vsel %vm12062_vm5, %v12030_v50, %v12094_v4  ;;  %v12099_v52 = vmul.f32 0.1, %v12035_v29 }
 0x9cf   : > { %v12591_v31 = vsel %vm21598_vm8, %v12306_v21, %v12590_v47  ;;  %v12286_v23 = vrot.slane %v12284_v48, 7  ;;  %v16906_v42 = vpack.c.bf16 %v12126_v26, %v12126_v26  ;;  %vm12065_vm9 = vcmp.ge.f32.partialorder %v12033_v40, 0.0 }
 0x9d0   : > { %12592 = vst [vmem:[#allocation2 + $0x30] sm:$0xf] %v12591_v31  ;;  %v12309_v24 = vshrl.u32 %v16908_v36, 16  ;;  %v12312_v17 = vshll.u32 %v16908_v36, 16  ;;  %v12131_v12 = vsel %vm12067_vm6, %v12035_v29, %v12099_v52  ;;  %v12097_v58 = vmul.f32 0.1, %v12033_v40 }
 0x9d1   : > { %v19076_v45 = vpop.f32.mrb[44].mxu0  ;;  %v12289_v44 = vor.u32 %v12287_v51, %v12286_v23  ;;  %v12290_v37 = vrot.slane %v12286_v23, 4  ;;  %v12292_v35 = vshrl.u32 %v16906_v42, 16  ;;  %v12295_v16 = vshll.u32 %v16906_v42, 16  ;;  %v24071_v55 = vld [vmem:[#allocation2 + $0xc] sm:$0xff]   ;;  %v24075_v41 = vld [vmem:[#allocation2 + $0x18] sm:$0xff]  }
 0x9d2   : > { %v24067_v9 = vpop.f32.mrb[45].mxu0  ;;  %v12311_v3 = vrot.slane %v12309_v24, 7  ;;  %v16911_v25 = vpack.c.bf16 %v12131_v12, %v12131_v12  ;;  %v12129_v32 = vsel %vm12065_vm9, %v12033_v40, %v12097_v58  ;;  %vm12068_vm10 = vcmp.ge.f32.partialorder %v12036_v7, 0.0  ;;  %19110 = vmatprep.mubr.bf16.mxu1 %v24071_v55  ;;  %v20926_v40 = vld [vmem:[#allocation11 + $0x10] sm:$0xff]   ;;  %v12597_v51 = vld [vmem:[#allocation2 + $0x3c] sm:$0xf] }
 0x9d3   : > { %v24069_v61 = vpop.f32.mrb[46].mxu0  ;;  %v12584_v10 = vsel %vm21598_vm8, %v12289_v44, %v12583_v0  ;;  %v12294_v56 = vrot.slane %v12292_v35, 7  ;;  %v16909_v14 = vpack.c.bf16 %v12129_v32, %v12129_v32  ;;  %v12100_v1 = vmul.f32 0.1, %v12036_v7  ;;  %19111 = vmatmul.mubr.bf16.vlgmr.msra.gmra.mrb[32].mxu1 %v24075_v41 }
 0x9d4   : > { %v11910_v6 = vpop.f32.mrb[47].mxu0  ;;  %12585 = vst [vmem:[#allocation2 + $0x24] sm:$0xf] %v12584_v10  ;;  %v12314_v8 = vor.u32 %v12312_v17, %v12311_v3  ;;  %v12316_v57 = vrot.slane %v12311_v3, 4  ;;  %v12335_v2 = vshrl.u32 %v16911_v25, 16  ;;  %v12338_v13 = vshll.u32 %v16911_v25, 16  ;;  %19143 = vmatpush3.bf16.msra.mxu1 %v24031_v53 }
 0x9d5   : > { %v12297_v33 = vor.u32 %v12295_v16, %v12294_v56  ;;  %v12299_v18 = vrot.slane %v12294_v56, 4  ;;  %v12318_v20 = vshrl.u32 %v16909_v14, 16  ;;  %v12321_v22 = vshll.u32 %v16909_v14, 16  ;;  %19144 = vmatprep.subr.bf16.mxu1 %v20923_v38  ;;  %v12608_v25 = vld [vmem:[#allocation2 + $0x50] sm:$0x1] }
 0x9d6   : > { %v12315_v28 = vsel %vm21592_vm7, %v12307_v60, %v12314_v8  ;;  %v12595_v59 = vsel %vm21569_vm2, %v12316_v57, %v12594_v39  ;;  %v12337_v30 = vrot.slane %v12335_v2, 7  ;;  %v12132_v50 = vsel %vm12068_vm10, %v12036_v7, %v12100_v1  ;;  %v12604_v7 = vld [vmem:[#allocation2 + $0x48] sm:$0xf]  ;;  %v20932_v8 = vld [vmem:[#allocation11 + $0x20] sm:$0xff]  }
 0x9d7   : > { %12593 = vst [vmem:[#allocation2 + $0x34] sm:$0xf] %v12315_v28  ;;  %12596 = vst [vmem:[#allocation2 + $0x38] sm:$0x1] %v12595_v59  ;;  %v12298_v54 = vsel %vm21592_vm7, %v12290_v37, %v12297_v33  ;;  %v12588_v27 = vsel %vm21569_vm2, %v12299_v18, %v12587_v43  ;;  %v24089_v15 = vrot.slane %v12318_v20, 7  ;;  %v16912_v29 = vpack.c.bf16 %v12132_v50, %v12132_v50 }
 0x9d8   : > { %12586 = vst [vmem:[#allocation2 + $0x28] sm:$0xf] %v12298_v54  ;;  %12589 = vst [vmem:[#allocation2 + $0x2c] sm:$0x1] %v12588_v27  ;;  %v12340_v62 = vor.u32 %v12338_v13, %v12337_v30  ;;  %v12341_v4 = vrot.slane %v12337_v30, 4  ;;  %v12034_v53 = vadd.f32 %v24037_v46, %v24062_v11  ;;  %v12039_v21 = vadd.f32 %v19076_v45, %v24037_v46  ;;  %v19080_v60 = vpop.f32.mrb[48].mxu0 }
 0x9d9   : > { %v12323_v47 = vor.u32 %v12321_v22, %v24089_v15  ;;  %v12324_v48 = vrot.slane %v24089_v15, 4  ;;  %v12343_v36 = vshrl.u32 %v16912_v29, 16  ;;  %v12346_v26 = vshll.u32 %v16912_v29, 16  ;;  %v24096_v52 = vpop.f32.mrb[49].mxu0  ;;  %19145 = vmatpush3.bf16.msra.mxu1 %v20923_v38  ;;  %v20929_v11 = vld [vmem:[#allocation11 + $0x18] sm:$0xff]  }
 0x9da   : > { %v12605_v31 = vsel %vm21598_vm8, %v12340_v62, %v12604_v7  ;;  %vm12066_vm12 = vcmp.ge.f32.partialorder %v12034_v53, 0.0  ;;  %v12098_v23 = vmul.f32 0.1, %v12034_v53  ;;  %vm12071_vm13 = vcmp.ge.f32.partialorder %v12039_v21, 0.0  ;;  %v24100_v42 = vpop.f32.mrb[50].mxu0  ;;  %19146 = vmatprep.subr.bf16.mxu1 %v20926_v40 }
 0x9db   : > { %12606 = vst [vmem:[#allocation2 + $0x48] sm:$0xf] %v12605_v31  ;;  %v12598_v0 = vsel %vm21598_vm8, %v12323_v47, %v12597_v51  ;;  %v12345_v24 = vrot.slane %v12343_v36, 7  ;;  %v12103_v17 = vmul.f32 0.1, %v12039_v21  ;;  %v12037_v12 = vadd.f32 %v24037_v46, %v24067_v9  ;;  %v24106_v58 = vpop.f32.mrb[51].mxu0 }
 0x9dc   : > { %12599 = vst [vmem:[#allocation2 + $0x3c] sm:$0xf] %v12598_v0  ;;  %v12130_v45 = vsel %vm12066_vm12, %v12034_v53, %v12098_v23  ;;  %v12040_v44 = vadd.f32 %v24069_v61, %v24037_v46  ;;  %v12038_v37 = vadd.f32 %v24037_v46, %v11910_v6  ;;  %v12043_v35 = vadd.f32 %v19080_v60, %v24037_v46  ;;  %v12601_v7 = vld [vmem:[#allocation2 + $0x44] sm:$0x1]  ;;  %v12618_v31 = vld [vmem:[#allocation2 + $0x60] sm:$0xf] }
 0x9dd   : > { %v12348_v16 = vor.u32 %v12346_v26, %v12345_v24  ;;  %v12350_v3 = vrot.slane %v12345_v24, 4  ;;  %v16910_v32 = vpack.c.bf16 %v12130_v45, %v12130_v45  ;;  %v12135_v10 = vsel %vm12071_vm13, %v12039_v21, %v12103_v17  ;;  %19147 = vmatpush3.bf16.msra.mxu1 %v20926_v40  ;;  %v20935_v51 = vld [vmem:[#allocation11 + $0x28] sm:$0xff]  }
 0x9de   : > { %v16915_v56 = vpack.c.bf16 %v12135_v10, %v12135_v10  ;;  %vm12069_vm15 = vcmp.ge.f32.partialorder %v12037_v12, 0.0  ;;  %v12101_v9 = vmul.f32 0.1, %v12037_v12  ;;  %vm12072_vm0 = vcmp.ge.f32.partialorder %v12040_v44, 0.0  ;;  %19148 = vmatprep.subr.bf16.mxu1 %v20929_v11  ;;  %v24119_v33 = vld [vmem:[#allocation2 + $0x30] sm:$0xff]  }
 0x9df   : > { %v12349_v14 = vsel %vm21592_vm7, %v12341_v4, %v12348_v16  ;;  %v12609_v61 = vsel %vm21569_vm2, %v12350_v3, %v12608_v25  ;;  %v12326_v1 = vshrl.u32 %v16910_v32, 16  ;;  %v12329_v6 = vshll.u32 %v16910_v32, 16  ;;  %v24117_v38 = vld [vmem:[#allocation2 + $0x24] sm:$0xff]  }
 0x9e0   : > { %12607 = vst [vmem:[#allocation2 + $0x4c] sm:$0xf] %v12349_v14  ;;  %12610 = vst [vmem:[#allocation2 + $0x50] sm:$0x1] %v12609_v61  ;;  %v12369_v57 = vshrl.u32 %v16915_v56, 16  ;;  %v12372_v2 = vshll.u32 %v16915_v56, 16  ;;  %v12133_v13 = vsel %vm12069_vm15, %v12037_v12, %v12101_v9  ;;  %19114 = vmatprep.mubr.bf16.mxu1 %v24117_v38  ;;  %v12041_v25 = vadd.f32 %v24037_v46, %v24096_v52 }
 0x9e1   : > { %v12104_v39 = vmul.f32 0.1, %v12040_v44  ;;  %v19084_v18 = vpop.f32.mrb[52].mxu0  ;;  %v12328_v20 = vrot.slane %v12326_v1, 7  ;;  %v16913_v22 = vpack.c.bf16 %v12133_v13, %v12133_v13  ;;  %vm12070_vm1 = vcmp.ge.f32.partialorder %v12038_v37, 0.0  ;;  %19115 = vmatmul.mubr.bf16.gmra.mrb[36].mxu1 %v24119_v33  ;;  %v20938_v56 = vld [vmem:[#allocation11 + $0x30] sm:$0xff]  }
 0x9e2   : > { %v12102_v28 = vmul.f32 0.1, %v12038_v37  ;;  %v24122_v59 = vpop.f32.mrb[53].mxu0  ;;  %v24124_v43 = vrot.slane %v12369_v57, 7  ;;  %vm12075_vm3 = vcmp.ge.f32.partialorder %v12043_v35, 0.0  ;;  %19149 = vmatpush3.bf16.msra.mxu1 %v20929_v11  ;;  %v12044_v32 = vadd.f32 %v24100_v42, %v24037_v46 }
 0x9e3   : > { %v12136_v30 = vsel %vm12072_vm0, %v12040_v44, %v12104_v39  ;;  %v12107_v50 = vmul.f32 0.1, %v12043_v35  ;;  %v24128_v54 = vpop.f32.mrb[54].mxu0  ;;  %v12331_v27 = vor.u32 %v12329_v6, %v12328_v20  ;;  %v12333_v29 = vrot.slane %v12328_v20, 4  ;;  %19150 = vmatprep.subr.bf16.mxu1 %v20932_v8 }
 0x9e4   : > { %v12352_v40 = vshrl.u32 %v16913_v22, 16  ;;  %v12355_v62 = vshll.u32 %v16913_v22, 16  ;;  %v24130_v4 = vpop.f32.mrb[55].mxu0  ;;  %v12374_v53 = vor.u32 %v12372_v2, %v24124_v43  ;;  %v12375_v21 = vrot.slane %v24124_v43, 4 }
 0x9e5   : > { %v16916_v60 = vpack.c.bf16 %v12136_v30, %v12136_v30  ;;  %v12134_v47 = vsel %vm12070_vm1, %v12038_v37, %v12102_v28  ;;  %v12332_v36 = vsel %vm21592_vm7, %v12324_v48, %v12331_v27  ;;  %v12602_v26 = vsel %vm21569_vm2, %v12333_v29, %v12601_v7  ;;  %v12611_v37 = vld [vmem:[#allocation2 + $0x54] sm:$0xf]  ;;  %v12615_v28 = vld [vmem:[#allocation2 + $0x5c] sm:$0x1]  ;;  %v12632_v29 = vld [vmem:[#allocation2 + $0x78] sm:$0xf] }
 0x9e6   : > { %v12354_v23 = vrot.slane %v12352_v40, 7  ;;  %v16914_v11 = vpack.c.bf16 %v12134_v47, %v12134_v47  ;;  %12600 = vst [vmem:[#allocation2 + $0x40] sm:$0xf] %v12332_v36  ;;  %12603 = vst [vmem:[#allocation2 + $0x44] sm:$0x1] %v12602_v26  ;;  %v12619_v0 = vsel %vm21598_vm8, %v12374_v53, %v12618_v31  ;;  %v12139_v12 = vsel %vm12075_vm3, %v12043_v35, %v12107_v50  ;;  %v20941_v30 = vld [vmem:[#allocation11 + $0x38] sm:$0xff]  }
 0x9e7   : > { %v12377_v24 = vshrl.u32 %v16916_v60, 16  ;;  %v12380_v17 = vshll.u32 %v16916_v60, 16  ;;  %12620 = vst [vmem:[#allocation2 + $0x60] sm:$0xf] %v12619_v0  ;;  %19151 = vmatpush3.bf16.msra.mxu1 %v20932_v8  ;;  %v16919_v3 = vpack.c.bf16 %v12139_v12, %v12139_v12  ;;  %v12042_v14 = vadd.f32 %v24037_v46, %v24106_v58  ;;  %v12622_v8 = vld [vmem:[#allocation2 + $0x68] sm:$0x1] }
 0x9e8   : > { %v12357_v15 = vor.u32 %v12355_v62, %v12354_v23  ;;  %v12358_v45 = vrot.slane %v12354_v23, 4  ;;  %v12360_v44 = vshrl.u32 %v16914_v11, 16  ;;  %v12363_v48 = vshll.u32 %v16914_v11, 16  ;;  %v24148_v10 = vpop.f32.mrb[56].mxu0  ;;  %19152 = vmatprep.subr.bf16.mxu1 %v20935_v51  ;;  %v24176_v47 = vld [vmem:[#allocation2 + $0x48] sm:$0xff]  }
 0x9e9   : > { %v12379_v16 = vrot.slane %v12377_v24, 7  ;;  %v12047_v61 = vadd.f32 %v19084_v18, %v24037_v46  ;;  %v24155_v1 = vpop.f32.mrb[57].mxu0  ;;  %v12403_v42 = vshrl.u32 %v16919_v3, 16  ;;  %v12406_v57 = vshll.u32 %v16919_v3, 16 }
 0x9ea   : > { %v12612_v35 = vsel %vm21598_vm8, %v12357_v15, %v12611_v37  ;;  %v12362_v9 = vrot.slane %v12360_v44, 7  ;;  %v24157_v2 = vpop.f32.mrb[58].mxu0  ;;  %vm12073_vm4 = vcmp.ge.f32.partialorder %v12041_v25, 0.0  ;;  %v12105_v20 = vmul.f32 0.1, %v12041_v25 }
 0x9eb   : > { %12613 = vst [vmem:[#allocation2 + $0x54] sm:$0xf] %v12612_v35  ;;  %v12382_v52 = vor.u32 %v12380_v17, %v12379_v16  ;;  %v12384_v6 = vrot.slane %v12379_v16, 4  ;;  %v24159_v22 = vpop.f32.mrb[59].mxu0  ;;  %19153 = vmatpush3.bf16.msra.mxu1 %v20935_v51  ;;  %v24165_v43 = vrot.slane %v12403_v42, 7  ;;  %vm12076_vm5 = vcmp.ge.f32.partialorder %v12044_v32, 0.0 }
 0x9ec   : > { %v12365_v13 = vor.u32 %v12363_v48, %v12362_v9  ;;  %v12367_v39 = vrot.slane %v12362_v9, 4  ;;  %19154 = vmatprep.subr.bf16.mxu1 %v20938_v56  ;;  %v12137_v40 = vsel %vm12073_vm4, %v12041_v25, %v12105_v20  ;;  %v12108_v62 = vmul.f32 0.1, %v12044_v32  ;;  %v24185_v17 = vld [vmem:[#allocation11 + $0x180] sm:$0xff]  }
 0x9ed   : > { %v12383_v58 = vsel %vm21592_vm7, %v12375_v21, %v12382_v52  ;;  %v12623_v18 = vsel %vm21569_vm2, %v12384_v6, %v12622_v8  ;;  %v24172_v7 = vld [vmem:[#allocation2 + $0x3c] sm:$0xff]   ;;  %v12408_v53 = vor.u32 %v12406_v57, %v24165_v43  ;;  %v12409_v21 = vrot.slane %v24165_v43, 4 }
 0x9ee   : > { %12621 = vst [vmem:[#allocation2 + $0x64] sm:$0xf] %v12383_v58  ;;  %12624 = vst [vmem:[#allocation2 + $0x68] sm:$0x1] %v12623_v18  ;;  %v12366_v50 = vsel %vm21592_vm7, %v12358_v45, %v12365_v13  ;;  %v12616_v27 = vsel %vm21569_vm2, %v12367_v39, %v12615_v28  ;;  %v16917_v60 = vpack.c.bf16 %v12137_v40, %v12137_v40  ;;  %vm12074_vm6 = vcmp.ge.f32.partialorder %v12042_v14, 0.0 }
 0x9ef   : > { %12614 = vst [vmem:[#allocation2 + $0x58] sm:$0xf] %v12366_v50  ;;  %12617 = vst [vmem:[#allocation2 + $0x5c] sm:$0x1] %v12616_v27  ;;  %v12140_v51 = vsel %vm12076_vm5, %v12044_v32, %v12108_v62  ;;  %v12106_v36 = vmul.f32 0.1, %v12042_v14  ;;  %19118 = vmatprep.mubr.bf16.mxu1 %v24172_v7  ;;  %19155 = vmatpush3.bf16.msra.mxu1 %v20938_v56  ;;  %v12633_v31 = vsel %vm21598_vm8, %v12408_v53, %v12632_v29 }
 0x9f0   : > { %vm12079_vm9 = vcmp.ge.f32.partialorder %v12047_v61, 0.0  ;;  %v12111_v26 = vmul.f32 0.1, %v12047_v61  ;;  %v12386_v23 = vshrl.u32 %v16917_v60, 16  ;;  %v12389_v11 = vshll.u32 %v16917_v60, 16  ;;  %19119 = vmatmul.mubr.bf16.gmra.mrb[40].mxu1 %v24176_v47  ;;  %v24183_v24 = vpop.f32.mrb[60].mxu0  ;;  %19156 = vmatprep.subr.bf16.mxu1 %v20941_v30 }
 0x9f1   : > { %v16920_v0 = vpack.c.bf16 %v12140_v51, %v12140_v51  ;;  %12634 = vst [vmem:[#allocation2 + $0x78] sm:$0xf] %v12633_v31  ;;  %v12138_v12 = vsel %vm12074_vm6, %v12042_v14, %v12106_v36  ;;  %v12045_v45 = vadd.f32 %v24037_v46, %v24122_v59  ;;  %v12048_v44 = vadd.f32 %v24128_v54, %v24037_v46  ;;  %v24192_v48 = vpop.f32.mrb[61].mxu0  ;;  %v12625_v56 = vld [vmem:[#allocation2 + $0x6c] sm:$0xf] }
 0x9f2   : > { %v12143_v15 = vsel %vm12079_vm9, %v12047_v61, %v12111_v26  ;;  %v12388_v37 = vrot.slane %v12386_v23, 7  ;;  %v16918_v25 = vpack.c.bf16 %v12138_v12, %v12138_v12  ;;  %v24194_v32 = vpop.f32.mrb[62].mxu0  ;;  %v12636_v43 = vld [vmem:[#allocation2 + $0x80] sm:$0x1]  ;;  %v12046_v29 = vadd.f32 %v24037_v46, %v24130_v4  ;;  %v12629_v51 = vld [vmem:[#allocation2 + $0x74] sm:$0x1] }
 0x9f3   : > { %v12411_v16 = vshrl.u32 %v16920_v0, 16  ;;  %v12414_v3 = vshll.u32 %v16920_v0, 16  ;;  %v16923_v35 = vpack.c.bf16 %v12143_v15, %v12143_v15  ;;  %vm12077_vm10 = vcmp.ge.f32.partialorder %v12045_v45, 0.0  ;;  %v24196_v14 = vpop.f32.mrb[63].mxu0  ;;  %19157 = vmatpush3.bf16.msra.mxu1 %v20941_v30 }
 0x9f4   : > { %v12109_v9 = vmul.f32 0.1, %v12045_v45  ;;  %vm12080_vm12 = vcmp.ge.f32.partialorder %v12048_v44, 0.0  ;;  %v12391_v59 = vor.u32 %v12389_v11, %v12388_v37  ;;  %v12392_v61 = vrot.slane %v12388_v37, 4  ;;  %19190 = vmatprep.subr.bf16.mxu1 %v24185_v17  ;;  %v12646_v11 = vld [vmem:[#allocation2 + $0x90] sm:$0xf] }
 0x9f5   : > { %v12413_v52 = vrot.slane %v12411_v16, 7  ;;  %v12394_v54 = vshrl.u32 %v16918_v25, 16  ;;  %v12397_v6 = vshll.u32 %v16918_v25, 16  ;;  %v12437_v8 = vshrl.u32 %v16923_v35, 16  ;;  %v24203_v28 = vld [vmem:[#allocation2 + $0x60] sm:$0xff]  }
 0x9f6   : > { %v12440_v42 = vshll.u32 %v16923_v35, 16  ;;  %v12141_v57 = vsel %vm12077_vm10, %v12045_v45, %v12109_v9  ;;  %v24199_v13 = vld [vmem:[#allocation2 + $0x54] sm:$0xff]   ;;  %v12626_v39 = vsel %vm21598_vm8, %v12391_v59, %v12625_v56  ;;  %v12112_v27 = vmul.f32 0.1, %v12048_v44  ;;  %v12639_v9 = vld [vmem:[#allocation2 + $0x84] sm:$0xf] }
 0x9f7   : > { %v12416_v20 = vor.u32 %v12414_v3, %v12413_v52  ;;  %v12418_v58 = vrot.slane %v12413_v52, 4  ;;  %v12396_v18 = vrot.slane %v12394_v54, 7  ;;  %12627 = vst [vmem:[#allocation2 + $0x6c] sm:$0xf] %v12626_v39  ;;  %v24205_v30 = vrot.slane %v12437_v8, 7  ;;  %19122 = vmatprep.mubr.bf16.mxu1 %v24199_v13 }
 0x9f8   : > { %v16921_v50 = vpack.c.bf16 %v12141_v57, %v12141_v57  ;;  %19123 = vmatmul.mubr.bf16.gmra.mrb[44].mxu1 %v24203_v28  ;;  %v12144_v0 = vsel %vm12080_vm12, %v12048_v44, %v12112_v27  ;;  %vm12078_vm13 = vcmp.ge.f32.partialorder %v12046_v29, 0.0  ;;  %v12110_v37 = vmul.f32 0.1, %v12046_v29  ;;  %v12650_v39 = vld [vmem:[#allocation2 + $0x98] sm:$0x1] }
 0x9f9   : > { %v12417_v40 = vsel %vm21592_vm7, %v12409_v21, %v12416_v20  ;;  %v12637_v62 = vsel %vm21569_vm2, %v12418_v58, %v12636_v43  ;;  %v12399_v53 = vor.u32 %v12397_v6, %v12396_v18  ;;  %v12401_v60 = vrot.slane %v12396_v18, 4 }
 0x9fa   : > { %12635 = vst [vmem:[#allocation2 + $0x7c] sm:$0xf] %v12417_v40  ;;  %12638 = vst [vmem:[#allocation2 + $0x80] sm:$0x1] %v12637_v62  ;;  %v12442_v36 = vor.u32 %v12440_v42, %v24205_v30  ;;  %v12443_v26 = vrot.slane %v24205_v30, 4  ;;  %v12420_v4 = vshrl.u32 %v16921_v50, 16  ;;  %v16924_v45 = vpack.c.bf16 %v12144_v0, %v12144_v0 }
 0x9fb   : > { %v12423_v31 = vshll.u32 %v16921_v50, 16  ;;  %v12400_v23 = vsel %vm21592_vm7, %v12392_v61, %v12399_v53  ;;  %v12630_v21 = vsel %vm21569_vm2, %v12401_v60, %v12629_v51  ;;  %v12051_v16 = vadd.f32 %v24148_v10, %v24037_v46  ;;  %v12643_v0 = vld [vmem:[#allocation2 + $0x8c] sm:$0x1] }
 0x9fc   : > { %12628 = vst [vmem:[#allocation2 + $0x70] sm:$0xf] %v12400_v23  ;;  %12631 = vst [vmem:[#allocation2 + $0x74] sm:$0x1] %v12630_v21  ;;  %v12647_v12 = vsel %vm21598_vm8, %v12442_v36, %v12646_v11  ;;  %v12422_v15 = vrot.slane %v12420_v4, 7  ;;  %v12049_v3 = vadd.f32 %v24037_v46, %v24155_v1  ;;  %v12052_v25 = vadd.f32 %v24157_v2, %v24037_v46 }
 0x9fd   : > { %12648 = vst [vmem:[#allocation2 + $0x90] sm:$0xf] %v12647_v12  ;;  %v12050_v44 = vadd.f32 %v24037_v46, %v24159_v22  ;;  %v12445_v59 = vshrl.u32 %v16924_v45, 16  ;;  %v12448_v61 = vshll.u32 %v16924_v45, 16  ;;  %v12142_v52 = vsel %vm12078_vm13, %v12046_v29, %v12110_v37 }
 0x9fe   : > { %v12425_v56 = vor.u32 %v12423_v31, %v12422_v15  ;;  %v12426_v35 = vrot.slane %v12422_v15, 4  ;;  %vm12083_vm15 = vcmp.ge.f32.partialorder %v12051_v16, 0.0  ;;  %v12115_v54 = vmul.f32 0.1, %v12051_v16 }
 0x9ff   : > { %vm12081_vm0 = vcmp.ge.f32.partialorder %v12049_v3, 0.0  ;;  %v12447_v1 = vrot.slane %v12445_v59, 7  ;;  %v16922_v6 = vpack.c.bf16 %v12142_v52, %v12142_v52  ;;  %v12113_v8 = vmul.f32 0.1, %v12049_v3  ;;  %v12660_v52 = vld [vmem:[#allocation2 + $0xa8] sm:$0xf] }
 0xa00   : > { %v12640_v10 = vsel %vm21598_vm8, %v12425_v56, %v12639_v9  ;;  %v12147_v2 = vsel %vm12083_vm15, %v12051_v16, %v12115_v54  ;;  %vm12084_vm1 = vcmp.ge.f32.partialorder %v12052_v25, 0.0  ;;  %v12116_v22 = vmul.f32 0.1, %v12052_v25 }
 0xa01   : > { %12641 = vst [vmem:[#allocation2 + $0x84] sm:$0xf] %v12640_v10  ;;  %vm12082_vm3 = vcmp.ge.f32.partialorder %v12050_v44, 0.0  ;;  %v12450_v42 = vor.u32 %v12448_v61, %v12447_v1  ;;  %v12452_v57 = vrot.slane %v12447_v1, 4  ;;  %v12428_v20 = vshrl.u32 %v16922_v6, 16  ;;  %v24242_v60 = vld [vmem:[#allocation2 + $0x78] sm:$0xff]  }
 0xa02   : > { %v12431_v58 = vshll.u32 %v16922_v6, 16  ;;  %v16927_v18 = vpack.c.bf16 %v12147_v2, %v12147_v2  ;;  %v12145_v43 = vsel %vm12081_vm0, %v12049_v3, %v12113_v8  ;;  %v12148_v30 = vsel %vm12084_vm1, %v12052_v25, %v12116_v22  ;;  %v12653_v6 = vld [vmem:[#allocation2 + $0x9c] sm:$0xf] }
 0xa03   : > { %v12114_v50 = vmul.f32 0.1, %v12050_v44  ;;  %v24236_v27 = vld [vmem:[#allocation2 + $0x6c] sm:$0xff]   ;;  %v12451_v29 = vsel %vm21592_vm7, %v12443_v26, %v12450_v42  ;;  %v12651_v40 = vsel %vm21569_vm2, %v12452_v57, %v12650_v39  ;;  %v12430_v62 = vrot.slane %v12428_v20, 7 }
 0xa04   : > { %v16925_v53 = vpack.c.bf16 %v12145_v43, %v12145_v43  ;;  %12649 = vst [vmem:[#allocation2 + $0x94] sm:$0xf] %v12451_v29  ;;  %12652 = vst [vmem:[#allocation2 + $0x98] sm:$0x1] %v12651_v40  ;;  %v12471_v51 = vshrl.u32 %v16927_v18, 16  ;;  %v12474_v36 = vshll.u32 %v16927_v18, 16  ;;  %v16928_v4 = vpack.c.bf16 %v12148_v30, %v12148_v30  ;;  %19126 = vmatprep.mubr.bf16.mxu1 %v24236_v27 }
 0xa05   : > { %v12146_v31 = vsel %vm12082_vm3, %v12050_v44, %v12114_v50  ;;  %v12433_v23 = vor.u32 %v12431_v58, %v12430_v62  ;;  %v12435_v21 = vrot.slane %v12430_v62, 4  ;;  %19127 = vmatmul.mubr.bf16.gmra.mrb[48].mxu1 %v24242_v60  ;;  %v12055_v44 = vadd.f32 %v24183_v24, %v24037_v46  ;;  %v12664_v42 = vld [vmem:[#allocation2 + $0xb0] sm:$0x1]  ;;  %v12657_v50 = vld [vmem:[#allocation2 + $0xa4] sm:$0x1] }
 0xa06   : > { %v12454_v11 = vshrl.u32 %v16925_v53, 16  ;;  %v12457_v26 = vshll.u32 %v16925_v53, 16  ;;  %v12473_v12 = vrot.slane %v12471_v51, 7  ;;  %v12479_v15 = vshrl.u32 %v16928_v4, 16 }
 0xa07   : > { %v12482_v45 = vshll.u32 %v16928_v4, 16  ;;  %v16926_v37 = vpack.c.bf16 %v12146_v31, %v12146_v31  ;;  %v12434_v16 = vsel %vm21592_vm7, %v12426_v35, %v12433_v23  ;;  %v12644_v3 = vsel %vm21569_vm2, %v12435_v21, %v12643_v0 }
 0xa08   : > { %v12456_v25 = vrot.slane %v12454_v11, 7  ;;  %12642 = vst [vmem:[#allocation2 + $0x88] sm:$0xf] %v12434_v16  ;;  %12645 = vst [vmem:[#allocation2 + $0x8c] sm:$0x1] %v12644_v3  ;;  %v12476_v56 = vor.u32 %v12474_v36, %v12473_v12  ;;  %v12477_v9 = vrot.slane %v12473_v12, 4  ;;  %v12053_v39 = vadd.f32 %v24037_v46, %v24192_v48 }
 0xa09   : > { %v12481_v59 = vrot.slane %v12479_v15, 7  ;;  %v12462_v61 = vshrl.u32 %v16926_v37, 16  ;;  %v12465_v1 = vshll.u32 %v16926_v37, 16  ;;  %vm12087_vm4 = vcmp.ge.f32.partialorder %v12055_v44, 0.0 }
 0xa0a   : > { %v12459_v54 = vor.u32 %v12457_v26, %v12456_v25  ;;  %v12460_v10 = vrot.slane %v12456_v25, 4  ;;  %v12661_v35 = vsel %vm21598_vm8, %v12476_v56, %v12660_v52  ;;  %v12119_v57 = vmul.f32 0.1, %v12055_v44 }
 0xa0b   : > { %v12484_v8 = vor.u32 %v12482_v45, %v12481_v59  ;;  %v12486_v2 = vrot.slane %v12481_v59, 4  ;;  %v12464_v22 = vrot.slane %v12462_v61, 7  ;;  %12662 = vst [vmem:[#allocation2 + $0xa8] sm:$0xf] %v12661_v35  ;;  %v12056_v20 = vadd.f32 %v24194_v32, %v24037_v46  ;;  %v24274_v11 = vld [vmem:[#allocation2 + $0x90] sm:$0xff]  }
 0xa0c   : > { %v12654_v24 = vsel %vm21598_vm8, %v12459_v54, %v12653_v6  ;;  %v12151_v29 = vsel %vm12087_vm4, %v12055_v44, %v12119_v57  ;;  %vm12085_vm5 = vcmp.ge.f32.partialorder %v12053_v39, 0.0  ;;  %v12117_v40 = vmul.f32 0.1, %v12053_v39  ;;  %v12674_v44 = vld [vmem:[#allocation2 + $0xc0] sm:$0xf] }
 0xa0d   : > { %12655 = vst [vmem:[#allocation2 + $0x9c] sm:$0xf] %v12654_v24  ;;  %v12485_v58 = vsel %vm21592_vm7, %v12477_v9, %v12484_v8  ;;  %v12665_v18 = vsel %vm21569_vm2, %v12486_v2, %v12664_v42  ;;  %v12467_v43 = vor.u32 %v12465_v1, %v12464_v22  ;;  %v12469_v30 = vrot.slane %v12464_v22, 4  ;;  %v12667_v1 = vld [vmem:[#allocation2 + $0xb4] sm:$0xf] }
 0xa0e   : > { %12663 = vst [vmem:[#allocation2 + $0xac] sm:$0xf] %v12485_v58  ;;  %12666 = vst [vmem:[#allocation2 + $0xb0] sm:$0x1] %v12665_v18  ;;  %vm12088_vm6 = vcmp.ge.f32.partialorder %v12056_v20, 0.0  ;;  %v16931_v62 = vpack.c.bf16 %v12151_v29, %v12151_v29  ;;  %v12149_v51 = vsel %vm12085_vm5, %v12053_v39, %v12117_v40  ;;  %v12054_v36 = vadd.f32 %v24037_v46, %v24196_v14  ;;  %v20942_v29 = vld [vmem:[#allocation2] sm:$0xff]  }
 0xa0f   : > { %v12468_v48 = vsel %vm21592_vm7, %v12460_v10, %v12467_v43  ;;  %v12658_v32 = vsel %vm21569_vm2, %v12469_v30, %v12657_v50  ;;  %v12120_v53 = vmul.f32 0.1, %v12056_v20  ;;  %v24272_v4 = vld [vmem:[#allocation2 + $0x84] sm:$0xff]   ;;  %v16929_v23 = vpack.c.bf16 %v12149_v51, %v12149_v51  ;;  %v12671_v18 = vld [vmem:[#allocation2 + $0xbc] sm:$0x1] }
 0xa10   : > { %12656 = vst [vmem:[#allocation2 + $0xa0] sm:$0xf] %v12468_v48  ;;  %12659 = vst [vmem:[#allocation2 + $0xa4] sm:$0x1] %v12658_v32  ;;  %v12505_v31 = vshrl.u32 %v16931_v62, 16  ;;  %vm12086_vm9 = vcmp.ge.f32.partialorder %v12054_v36, 0.0  ;;  %19130 = vmatprep.mubr.bf16.mxu1 %v24272_v4 }
 0xa11   : > { %v12152_v21 = vsel %vm12088_vm6, %v12056_v20, %v12120_v53  ;;  %v12118_v0 = vmul.f32 0.1, %v12054_v36  ;;  %v12508_v15 = vshll.u32 %v16931_v62, 16  ;;  %v12488_v45 = vshrl.u32 %v16929_v23, 16  ;;  %19131 = vmatmul.mubr.bf16.gmra.mrb[52].mxu1 %v24274_v11  ;;  %v12678_v2 = vld [vmem:[#allocation2 + $0xc8] sm:$0x1] }
 0xa12   : > { %v16932_v26 = vpack.c.bf16 %v12152_v21, %v12152_v21  ;;  %v12507_v12 = vrot.slane %v12505_v31, 7  ;;  %v12491_v3 = vshll.u32 %v16929_v23, 16  ;;  %v20944_v48 = vld [vmem:[#allocation11 + $0x188] sm:$0xff]   ;;  %v20947_v32 = vld [vmem:[#allocation11 + $0x1a0] sm:$0xff]   ;;  %v24326_v21 = vld [vmem:[#allocation2 + $0x50] sm:$0x1] }
 0xa13   : > { %v12150_v16 = vsel %vm12086_vm9, %v12054_v36, %v12118_v0  ;;  %v12490_v14 = vrot.slane %v12488_v45, 7  ;;  %v20948_v62 = vld [vmem:[#allocation11 + $0x1a8] sm:$0xff]   ;;  %v24311_v53 = vld [vmem:[#allocation11 + $0x40] sm:$0xff]   ;;  %v24322_v36 = vld [vmem:[#allocation2 + $0x4c] sm:$0xf] }
 0xa14   : > { %v12513_v37 = vshrl.u32 %v16932_v26, 16  ;;  %v12510_v46 = vor.u32 %v12508_v15, %v12507_v12  ;;  %v16930_v25 = vpack.c.bf16 %v12150_v16, %v12150_v16  ;;  %v12516_v9 = vshll.u32 %v16932_v26, 16  ;;  %v24320_v51 = vld [vmem:[#allocation2 + $0x40] sm:$0xf]  ;;  %v14871_v31 = vld [vmem:[#allocation2 + $0x3c] sm:$0xe] }
 0xa15   : > { %v12493_v61 = vor.u32 %v12491_v3, %v12490_v14  ;;  %v12511_v10 = vrot.slane %v12507_v12, 4  ;;  %v24285_v42 = vld [vmem:[#allocation2 + $0xa8] sm:$0xff]   ;;  %v12494_v20 = vrot.slane %v12490_v14, 4  ;;  %v24324_v23 = vld [vmem:[#allocation2 + $0x44] sm:$0x1]  ;;  %v14969_v12 = vrot.slane %v24320_v51, 5 }
 0xa16   : > { %v12515_v56 = vrot.slane %v12513_v37, 7  ;;  %v12675_v59 = vsel %vm21598_vm8, %v12510_v46, %v12674_v44  ;;  %v12496_v52 = vshrl.u32 %v16930_v25, 16  ;;  %v12499_v24 = vshll.u32 %v16930_v25, 16  ;;  %v14872_v26 = vld [vmem:[#allocation2 + $0x48] sm:$0xe] }
 0xa17   : > { %v24280_v54 = vld [vmem:[#allocation2 + $0x9c] sm:$0xff]   ;;  %12676 = vst [vmem:[#allocation2 + $0xc0] sm:$0xf] %v12675_v59  ;;  %v12668_v8 = vsel %vm21598_vm8, %v12493_v61, %v12667_v1  ;;  %v24329_v0 = vld [vmem:[#allocation2 + $0x58] sm:$0xf]  ;;  %v16775_v16 = vrot.slane %v14871_v31, 9 }
 0xa18   : > { %v12518_v35 = vor.u32 %v12516_v9, %v12515_v56  ;;  %v12520_v6 = vrot.slane %v12515_v56, 4  ;;  %v12498_v22 = vrot.slane %v12496_v52, 7  ;;  %19134 = vmatprep.mubr.bf16.mxu1 %v24280_v54  ;;  %12669 = vst [vmem:[#allocation2 + $0xb4] sm:$0xf] %v12668_v8  ;;  %v14873_v15 = vld [vmem:[#allocation2 + $0x54] sm:$0xe] }
 0xa19   : > { %19135 = vmatmul.mubr.bf16.gmra.mrb[56].mxu1 %v24285_v42  ;;  %v24333_v45 = vld [vmem:[#allocation2 + $0x5c] sm:$0x1]  ;;  %v24335_v37 = vld [vmem:[#allocation2 + $0x64] sm:$0xf]  ;;  %v14976_v46 = vrot.slane %v24322_v36, 5  ;;  %v14971_v14 = vrot.slane %v14969_v12, 4  ;;  %v14970_v59 = vsel %vm22237_vm14, %v16775_v16, %v14969_v12 }
 0xa1a   : > { %v12519_v57 = vsel %vm21592_vm7, %v12511_v10, %v12518_v35  ;;  %v12679_v39 = vsel %vm21569_vm2, %v12520_v6, %v12678_v2  ;;  %v12501_v58 = vor.u32 %v12499_v24, %v12498_v22  ;;  %v12503_v5 = vrot.slane %v12498_v22, 4  ;;  %v14874_v56 = vld [vmem:[#allocation2 + $0x60] sm:$0xe]  ;;  %v24340_v9 = vld [vmem:[#allocation2 + $0x68] sm:$0x1] }
 0xa1b   : > { %12677 = vst [vmem:[#allocation2 + $0xc4] sm:$0xf] %v12519_v57  ;;  %12680 = vst [vmem:[#allocation2 + $0xc8] sm:$0x1] %v12679_v39  ;;  %v14972_v3 = vrot.slane %v24324_v23, 5  ;;  %v16776_v25 = vrot.slane %v14872_v26, 9 }
 0xa1c   : > { %v12502_v43 = vsel %vm21592_vm7, %v12494_v20, %v12501_v58  ;;  %v12672_v30 = vsel %vm21569_vm2, %v12503_v5, %v12671_v18  ;;  %v14979_v44 = vrot.slane %v24326_v21, 5  ;;  %v16777_v61 = vrot.slane %v14873_v15, 9  ;;  %v20952_v10 = vld [vmem:[#allocation11 + $0x48] sm:$0xff]   ;;  %v24345_v1 = vld [vmem:[#allocation2 + $0x70] sm:$0xf] }
 0xa1d   : > { %12670 = vst [vmem:[#allocation2 + $0xb8] sm:$0xf] %v12502_v43  ;;  %12673 = vst [vmem:[#allocation2 + $0xbc] sm:$0x1] %v12672_v30  ;;  %v14983_v52 = vrot.slane %v24329_v0, 5  ;;  %v14973_v35 = vsel %vm22237_vm14, %v14971_v14, %v14972_v3  ;;  %v14977_v6 = vsel %vm22237_vm14, %v16776_v25, %v14976_v46  ;;  %v14986_v8 = vrot.slane %v24333_v45, 5 }
 0xa1e   : > { %v14990_v2 = vrot.slane %v24335_v37, 5  ;;  %v14875_v22 = vld [vmem:[#allocation2 + $0x6c] sm:$0xe]  ;;  %v24353_v24 = vld [vmem:[#allocation2 + $0x7c] sm:$0xf]  ;;  %v24355_v57 = vcombine.low %v14970_v59, %v14973_v35  ;;  %v16778_v58 = vrot.slane %v14874_v56, 9 }
 0xa1f   : > { %v14985_v20 = vrot.slane %v14983_v52, 4  ;;  %v14876_v5 = vld [vmem:[#allocation2 + $0x78] sm:$0xe]  ;;  %v24359_v18 = vld [vmem:[#allocation2 + $0x74] sm:$0x1]  ;;  %v15004_v14 = vrot.slane %v24353_v24, 5 }
 0xa20   : > { %25115 = vst [vmem:[#allocation29_spill] sm:$0xff] %v24355_v57  ;;  %v24361_v43 = vld [vmem:[#allocation2 + $0x80] sm:$0x1]  ;;  %v14877_v31 = vld [vmem:[#allocation2 + $0x84] sm:$0xe]  ;;  %v20953_v59 = vld [vmem:[#allocation11 + $0x50] sm:$0xff]  }
 0xa21   : > { %v24376_v26 = vld [vmem:[#allocation2 + $0x8c] sm:$0x1]  ;;  %v24378_v12 = vld [vmem:[#allocation2 + $0x94] sm:$0xf]  ;;  %v14878_v56 = vld [vmem:[#allocation2 + $0x90] sm:$0xe] }
 0xa22   : > { %v24298_v40 = vld [vmem:[#allocation2 + $0xc0] sm:$0xff]  }
 0xa23   : > { %v24398_v35 = vld [vmem:[#allocation2 + $0xa0] sm:$0xf] }
 0xa24   : > { %v24296_v50 = vld [vmem:[#allocation2 + $0xb4] sm:$0xff]  }
 0xa25   : > { %19138 = vmatprep.mubr.bf16.mxu1 %v24296_v50 }
 0xa26   : > { %19139 = vmatmul.mubr.bf16.gmra.mrb[60].mxu1 %v24298_v40 }
 0xa27   : > { %19158 = vmatprep.mubr.bf16.mxu1 %v20942_v29  ;;  %v14984_v29 = vsel %vm22237_vm14, %v16777_v61, %v14983_v52  ;;  %v15006_v52 = vrot.slane %v15004_v14, 4 }
 0xa2e   : > { %19159 = vmatmul.mubr.bf16.vlgmr.msra.gmra.mrb[32].mxu1 %v24071_v55  ;;  %v20949_v55 = vld [vmem:[#allocation11 + $0x1b0] sm:$0xff]  }
 0xa2f   : > { %19162 = vmatprep.mubr.bf16.mxu1 %v24075_v41  ;;  %19191 = vmatpush3.bf16.msra.mxu1 %v24185_v17  ;;  %v20950_v17 = vld [vmem:[#allocation11 + $0x1b8] sm:$0xff]  }
 0xa30   : > { %19192 = vmatprep.subr.bf16.mxu1 %v20944_v48 }
 0xa33   : > { %19193 = vmatpush3.bf16.msra.mxu1 %v20944_v48  ;;  %v14992_v48 = vrot.slane %v14990_v2, 4 }
 0xa34   : > { %19194 = vmatprep.subr.bf16.mxu1 %v20945_v19 }
 0xa36   : > { %19163 = vmatmul.mubr.bf16.gmra.mrb[36].mxu1 %v24117_v38 }
 0xa37   : > { %19166 = vmatprep.mubr.bf16.mxu1 %v24119_v33  ;;  %19195 = vmatpush3.bf16.msra.mxu1 %v20945_v19  ;;  %v14993_v19 = vrot.slane %v24340_v9, 5 }
 0xa38   : > { %19196 = vmatprep.subr.bf16.mxu1 %v20946_v63 }
 0xa39   : > { %v14994_v16 = vsel %vm22237_vm14, %v14992_v48, %v14993_v19  ;;  %v14879_v48 = vld [vmem:[#allocation2 + $0x9c] sm:$0xe]  ;;  %v24410_v19 = vld [vmem:[#allocation2 + $0xa4] sm:$0x1] }
 0xa3b   : > { %19197 = vmatpush3.bf16.msra.mxu1 %v20946_v63  ;;  %v24368_v63 = vld [vmem:[#allocation2 + $0x88] sm:$0xf] }
 0xa3c   : > { %19198 = vmatprep.subr.bf16.mxu1 %v20947_v32 }
 0xa3e   : > { %19167 = vmatmul.mubr.bf16.gmra.mrb[40].mxu1 %v24172_v7 }
 0xa3f   : > { %19170 = vmatprep.mubr.bf16.mxu1 %v24176_v47  ;;  %19199 = vmatpush3.bf16.msra.mxu1 %v20947_v32  ;;  %v14987_v32 = vsel %vm22237_vm14, %v14985_v20, %v14986_v8  ;;  %v16781_v8 = vrot.slane %v14877_v31, 9  ;;  %v20954_v31 = vld [vmem:[#allocation11 + $0x58] sm:$0xff]  }
 0xa40   : > { %19200 = vmatprep.subr.bf16.mxu1 %v20948_v62  ;;  %v24380_v15 = vcombine.low %v14984_v29, %v14987_v32  ;;  %v16782_v29 = vrot.slane %v14878_v56, 9 }
 0xa42   : > { %25117 = vst [vmem:[#allocation32_spill] sm:$0xff] %v24380_v15 }
 0xa43   : > { %19201 = vmatpush3.bf16.msra.mxu1 %v20948_v62  ;;  %v14991_v62 = vsel %vm22237_vm14, %v16778_v58, %v14990_v2  ;;  %v15014_v2 = vrot.slane %v24376_v26, 5 }
 0xa44   : > { %19202 = vmatprep.subr.bf16.mxu1 %v20949_v55  ;;  %v24387_v3 = vcombine.low %v14991_v62, %v14994_v16  ;;  %v24415_v16 = vld [vmem:[#allocation2 + $0xb0] sm:$0x1] }
 0xa46   : > { %19171 = vmatmul.mubr.bf16.gmra.mrb[44].mxu1 %v24199_v13  ;;  %25118 = vst [vmem:[#allocation33_spill] sm:$0xff] %v24387_v3 }
 0xa47   : > { %19174 = vmatprep.mubr.bf16.mxu1 %v24203_v28  ;;  %19203 = vmatpush3.bf16.msra.mxu1 %v20949_v55  ;;  %v16779_v55 = vrot.slane %v14875_v22, 9  ;;  %v15018_v22 = vrot.slane %v24378_v12, 5 }
 0xa48   : > { %19204 = vmatprep.subr.bf16.mxu1 %v20950_v17 }
 0xa49   : > { %v15020_v62 = vrot.slane %v15018_v22, 4 }
 0xa4b   : > { %19205 = vmatpush3.bf16.msra.mxu1 %v20950_v17  ;;  %v14997_v17 = vrot.slane %v24345_v1, 5 }
 0xa4c   : > { %19238 = vmatprep.subr.bf16.mxu1 %v24311_v53 }
 0xa4d   : > { %v14999_v25 = vrot.slane %v14997_v17, 4 }
 0xa4e   : > { %19175 = vmatmul.mubr.bf16.gmra.mrb[48].mxu1 %v24236_v27 }
 0xa4f   : > { %19178 = vmatprep.mubr.bf16.mxu1 %v24242_v60 }
 0xa56   : > { %19179 = vmatmul.mubr.bf16.gmra.mrb[52].mxu1 %v24272_v4 }
 0xa57   : > { %19182 = vmatprep.mubr.bf16.mxu1 %v24274_v11 }
 0xa5e   : > { %19183 = vmatmul.mubr.bf16.gmra.mrb[56].mxu1 %v24280_v54 }
 0xa5f   : > { %19186 = vmatprep.mubr.bf16.mxu1 %v24285_v42 }
 0xa66   : > { %19187 = vmatmul.mubr.bf16.gmra.mrb[60].mxu1 %v24296_v50 }
 0xa67   : > { %19206 = vmatprep.mubr.bf16.mxu1 %v24075_v41  ;;  %v14978_v41 = vrot.slane %v14976_v46, 4  ;;  %v16780_v46 = vrot.slane %v14876_v5, 9 }
 0xa69   : > { %v14980_v39 = vsel %vm22237_vm14, %v14978_v41, %v14979_v44  ;;  %v15000_v44 = vrot.slane %v24359_v18, 5  ;;  %v24392_v41 = vld [vmem:[#allocation2 + $0x98] sm:$0x1]  ;;  %v15005_v61 = vsel %vm22237_vm14, %v16780_v46, %v15004_v14 }
 0xa6a   : > { %v24363_v30 = vcombine.low %v14977_v6, %v14980_v39  ;;  %v24404_v39 = vld [vmem:[#allocation2 + $0xac] sm:$0xf]  ;;  %v24417_v46 = vld [vmem:[#allocation2 + $0xb8] sm:$0xf] }
 0xa6b   : > { %v15001_v6 = vsel %vm22237_vm14, %v14999_v25, %v15000_v44  ;;  %v15025_v25 = vrot.slane %v24398_v35, 5  ;;  %v24426_v44 = vld [vmem:[#allocation2 + $0xc4] sm:$0xf] }
 0xa6c   : > { %25116 = vst [vmem:[#allocation31_spill] sm:$0xff] %v24363_v30 }
 0xa6e   : > { %19207 = vmatmul.mubr.bf16.vlgmr.msra.gmra.mrb[32].mxu1 %v24117_v38  ;;  %v14998_v38 = vsel %vm22237_vm14, %v16779_v55, %v14997_v17  ;;  %v15021_v55 = vrot.slane %v24392_v41, 5  ;;  %v14880_v17 = vld [vmem:[#allocation2 + $0xa8] sm:$0xe] }
 0xa6f   : > { %19210 = vmatprep.mubr.bf16.mxu1 %v24119_v33  ;;  %19239 = vmatpush3.bf16.msra.mxu1 %v24311_v53  ;;  %v15007_v33 = vrot.slane %v24361_v43, 5  ;;  %v15011_v53 = vrot.slane %v24368_v63, 5  ;;  %v24406_v20 = vcombine.low %v14998_v38, %v15001_v6  ;;  %v15019_v38 = vsel %vm22237_vm14, %v16782_v29, %v15018_v22  ;;  %v14881_v6 = vld [vmem:[#allocation2 + $0xb4] sm:$0xe]  ;;  %v24440_v29 = vld [vmem:[#allocation2 + $0xc8] sm:$0x1] }
 0xa70   : > { %19240 = vmatprep.subr.bf16.mxu1 %v20952_v10  ;;  %v15027_v22 = vrot.slane %v15025_v25, 4 }
 0xa71   : > { %25119 = vst [vmem:[#allocation34_spill] sm:$0xff] %v24406_v20  ;;  %v15008_v58 = vsel %vm22237_vm14, %v15006_v52, %v15007_v33  ;;  %v15013_v5 = vrot.slane %v15011_v53, 4  ;;  %v15012_v14 = vsel %vm22237_vm14, %v16781_v8, %v15011_v53  ;;  %v16783_v52 = vrot.slane %v14879_v48, 9  ;;  %v14882_v53 = vld [vmem:[#allocation2 + $0xc0] sm:$0xe] }
 0xa72   : > { %v24412_v32 = vcombine.low %v15005_v61, %v15008_v58  ;;  %v15022_v61 = vsel %vm22237_vm14, %v15020_v62, %v15021_v55  ;;  %v15032_v33 = vrot.slane %v24404_v39, 5  ;;  %v24434_v8 = vld [vmem:[#allocation2 + $0xbc] sm:$0x1]  ;;  %v15028_v58 = vrot.slane %v24410_v19, 5 }
 0xa73   : > { %19241 = vmatpush3.bf16.msra.mxu1 %v20952_v10  ;;  %v15015_v10 = vsel %vm22237_vm14, %v15013_v5, %v15014_v2  ;;  %v24436_v2 = vcombine.low %v15019_v38, %v15022_v61  ;;  %v16784_v5 = vrot.slane %v14880_v17, 9  ;;  %v15026_v48 = vsel %vm22237_vm14, %v16783_v52, %v15025_v25 }
 0xa74   : > { %25120 = vst [vmem:[#allocation25_spill] sm:$0xff] %v24412_v32  ;;  %19242 = vmatprep.subr.bf16.mxu1 %v20953_v59  ;;  %v24428_v56 = vcombine.low %v15012_v14, %v15015_v10  ;;  %v15034_v62 = vrot.slane %v15032_v33, 4  ;;  %v15035_v55 = vrot.slane %v24415_v16, 5  ;;  %v20955_v14 = vld [vmem:[#allocation11 + $0x60] sm:$0xff]   ;;  %v15029_v10 = vsel %vm22237_vm14, %v15027_v22, %v15028_v58  ;;  %v20956_v58 = vld [vmem:[#allocation11 + $0x68] sm:$0xff]  }
 0xa75   : > { %25122 = vst [vmem:[#allocation23_spill] sm:$0xff] %v24436_v2  ;;  %v15033_v17 = vsel %vm22237_vm14, %v16784_v5, %v15032_v33  ;;  %v24451_v38 = vcombine.low %v15026_v48, %v15029_v10  ;;  %v15042_v52 = vrot.slane %v24434_v8, 5  ;;  %v15374_v22 = vrot.slane %v24440_v29, 5  ;;  %v24484_v10 = vld [vmem:[#allocation2 + $0x10] sm:$0xf] }
 0xa76   : > { %25121 = vst [vmem:[#allocation20_spill] sm:$0xff] %v24428_v56  ;;  %19211 = vmatmul.mubr.bf16.gmra.mrb[36].mxu1 %v24172_v7  ;;  %v15039_v7 = vrot.slane %v24417_v46, 5  ;;  %v15036_v25 = vsel %vm22237_vm14, %v15034_v62, %v15035_v55  ;;  %v16810_v56 = vrot.slane %v14882_v53, 9  ;;  %v20959_v55 = vld [vmem:[#allocation11 + $0x78] sm:$0xff]   ;;  %25127 = vst [vmem:[#allocation30_spill] sm:$0xff] %v24484_v10 }
 0xa77   : > { %19214 = vmatprep.mubr.bf16.mxu1 %v24176_v47  ;;  %19243 = vmatpush3.bf16.msra.mxu1 %v20953_v59  ;;  %v16785_v47 = vrot.slane %v14881_v6, 9  ;;  %v15371_v59 = vrot.slane %v24426_v44, 5  ;;  %25123 = vst [vmem:[#allocation26_spill] sm:$0xff] %v24451_v38  ;;  %v24456_v2 = vcombine.low %v15033_v17, %v15036_v25  ;;  %v13540_v17 = vld [vmem:[#allocation2 + $0x18] sm:$0xf] }
 0xa78   : > { %19244 = vmatprep.subr.bf16.mxu1 %v20954_v31  ;;  %v15041_v61 = vrot.slane %v15039_v7, 4 }
 0xa79   : > { %25124 = vst [vmem:[#allocation27_spill] sm:$0xff] %v24456_v2  ;;  %v15373_v32 = vrot.slane %v15371_v59, 4  ;;  %v15040_v33 = vsel %vm22237_vm14, %v16785_v47, %v15039_v7  ;;  %v15372_v48 = vsel %vm22237_vm14, %v16810_v56, %v15371_v59  ;;  %v24475_v56 = vld [vmem:[#allocation11 + $0x100] sm:$0xff]  }
 0xa7a   : > { %v15043_v6 = vsel %vm22237_vm14, %v15041_v61, %v15042_v52  ;;  %v24486_v59 = vld [vmem:[#allocation2 + $0x1c] sm:$0xf] }
 0xa7b   : > { %19245 = vmatpush3.bf16.msra.mxu1 %v20954_v31  ;;  %v24463_v5 = vcombine.low %v15040_v33, %v15043_v6  ;;  %v15375_v53 = vsel %vm22237_vm14, %v15373_v32, %v15374_v22  ;;  %v20957_v31 = vld [vmem:[#allocation11 + $0x70] sm:$0xff]   ;;  %v24478_v32 = vld [vmem:[#allocation2 + $0x4] sm:$0xf]  ;;  %25128 = vst [vmem:[#allocation22_spill] sm:$0xff] %v24486_v59  ;;  %v13622_v6 = vshll.u32 %v24484_v10, 16 }
 0xa7c   : > { %19246 = vmatprep.subr.bf16.mxu1 %v20955_v14  ;;  %v24469_v62 = vcombine.low %v15372_v48, %v15375_v53  ;;  %v24490_v22 = vld [vmem:[#allocation2 + $0x28] sm:$0xf]  ;;  %v13637_v48 = vshrl.u32 %v13540_v17, 16  ;;  %v13640_v53 = vshll.u32 %v13540_v17, 16 }
 0xa7d   : > { %25125 = vst [vmem:[#allocation28_spill] sm:$0xff] %v24463_v5  ;;  %25129 = vst [vmem:[#allocation21_spill] sm:$0xff] %v24490_v22 }
 0xa7e   : > { %25126 = vst [vmem:[#allocation24_spill] sm:$0xff] %v24469_v62  ;;  %19215 = vmatmul.mubr.bf16.gmra.mrb[40].mxu1 %v24199_v13  ;;  %v13534_v13 = vld [vmem:[#allocation2] sm:$0xf]  ;;  %v13674_v62 = vshrl.u32 %v24490_v22, 16  ;;  %v13639_v2 = vrot.slane %v13637_v48, 4  ;;  %v13642_v38 = vrot.slane %v13640_v53, 5 }
 0xa7f   : > { %19218 = vmatprep.mubr.bf16.mxu1 %v24203_v28  ;;  %19247 = vmatpush3.bf16.msra.mxu1 %v20955_v14  ;;  %v13589_v28 = vshrl.u32 %v13534_v13, 16  ;;  %v13592_v7 = vshll.u32 %v13534_v13, 16  ;;  %v13537_v14 = vld [vmem:[#allocation2 + $0xc] sm:$0xf]  ;;  %v24516_v48 = vld [vmem:[#allocation2 + $0x20] sm:$0x1] }
 0xa80   : > { %19248 = vmatprep.subr.bf16.mxu1 %v20956_v58  ;;  %v13613_v47 = vshrl.u32 %v13537_v14, 16  ;;  %v13616_v33 = vshll.u32 %v13537_v14, 16  ;;  %v13676_v57 = vrot.slane %v13674_v62, 4  ;;  %25132 = vst [vmem:[#allocation36_spill] sm:$0xff] %v24516_v48  ;;  %v13643_v53 = vor.u32 %v13642_v38, %v13639_v2 }
 0xa81   : > { %v13591_v25 = vrot.slane %v13589_v28, 4  ;;  %v13594_v61 = vrot.slane %v13592_v7, 5  ;;  %v13543_v28 = vld [vmem:[#allocation2 + $0x24] sm:$0xf]  ;;  %v13670_v7 = vshll.u32 %v24490_v22, 16 }
 0xa82   : > { %v13615_v13 = vrot.slane %v13613_v47, 4  ;;  %v13618_v5 = vrot.slane %v13616_v33, 5  ;;  %v13661_v47 = vshrl.u32 %v13543_v28, 16  ;;  %v13664_v3 = vshll.u32 %v13543_v28, 16  ;;  %v24520_v28 = vld [vmem:[#allocation2 + $0x2c] sm:$0x1] }
 0xa83   : > { %19249 = vmatpush3.bf16.msra.mxu1 %v20956_v58  ;;  %v13626_v58 = vshrl.u32 %v24484_v10, 16  ;;  %v24508_v15 = vrot.slane %v13670_v7, 5  ;;  %25133 = vst [vmem:[#allocation37_spill] sm:$0xff] %v24520_v28 }
 0xa84   : > { %19250 = vmatprep.subr.bf16.mxu1 %v20957_v31  ;;  %v13619_v33 = vor.u32 %v13618_v5, %v13615_v13  ;;  %v13666_v62 = vrot.slane %v13664_v3, 5  ;;  %v20958_v3 = vld [vmem:[#allocation2 + $0xcc] sm:$0xff]  }
 0xa85   : > { %v13628_v17 = vrot.slane %v13626_v58, 4  ;;  %v13677_v2 = vor.u32 %v13676_v57, %v24508_v15 }
 0xa86   : > { %19219 = vmatmul.mubr.bf16.gmra.mrb[44].mxu1 %v24236_v27  ;;  %v13598_v27 = vshll.u32 %v24478_v32, 16 }
 0xa87   : > { %19222 = vmatprep.mubr.bf16.mxu1 %v24242_v60  ;;  %19251 = vmatpush3.bf16.msra.mxu1 %v20957_v31  ;;  %v13602_v60 = vshrl.u32 %v24478_v32, 16  ;;  %v13646_v31 = vshll.u32 %v24486_v59, 16 }
 0xa88   : > { %19252 = vmatprep.subr.bf16.mxu1 %v20959_v55  ;;  %v24488_v52 = vrot.slane %v13598_v27, 5  ;;  %v13595_v27 = vor.u32 %v13594_v61, %v13591_v25  ;;  %v13546_v25 = vld [vmem:[#allocation2 + $0x30] sm:$0xf] }
 0xa89   : > { %v24506_v20 = vrot.slane %v13646_v31, 5  ;;  %v13685_v7 = vshrl.u32 %v13546_v25, 16 }
 0xa8a   : > { %v13596_v61 = vrot.slane %v13595_v27, 4  ;;  %v13688_v27 = vshll.u32 %v13546_v25, 16  ;;  %v13680_v25 = vshll.u32 %v24520_v28, 16 }
 0xa8b   : > { %19253 = vmatpush3.bf16.msra.mxu1 %v20959_v55  ;;  %v13650_v55 = vshrl.u32 %v24486_v59, 16  ;;  %v24510_v59 = vld [vmem:[#allocation2 + $0x34] sm:$0xf] }
 0xa8c   : > { %19286 = vmatprep.subr.bf16.mxu1 %v24475_v56  ;;  %25130 = vst [vmem:[#allocation19_spill] sm:$0xff] %v24510_v59  ;;  %v13694_v5 = vshll.u32 %v24510_v59, 16  ;;  %v13698_v38 = vshrl.u32 %v24510_v59, 16  ;;  %v13690_v10 = vrot.slane %v13688_v27, 5 }
 0xa8e   : > { %19223 = vmatmul.mubr.bf16.gmra.mrb[48].mxu1 %v24272_v4  ;;  %v13604_v4 = vrot.slane %v13602_v60, 4  ;;  %v24533_v57 = vrot.slane %v13694_v5, 5  ;;  %v13700_v59 = vrot.slane %v13698_v38, 4 }
 0xa8f   : > { %19226 = vmatprep.mubr.bf16.mxu1 %v24274_v11  ;;  %v24492_v11 = vld [vmem:[#allocation2 + $0x8] sm:$0x1] }
 0xa90   : > { %v13605_v60 = vor.u32 %v13604_v4, %v24488_v52  ;;  %v13608_v14 = vshll.u32 %v24492_v11, 16  ;;  %v13701_v38 = vor.u32 %v13700_v59, %v24533_v57 }
 0xa92   : > { %v13606_v4 = vrot.slane %v13605_v60, 4  ;;  %v13610_v30 = vrot.slane %v13608_v14, 5  ;;  %v13620_v60 = vrot.slane %v13619_v33, 4  ;;  %v13549_v14 = vld [vmem:[#allocation2 + $0x3c] sm:$0xf] }
 0xa94   : > { %v13611_v13 = vsel %vm21986_vm11, %v13606_v4, %v13610_v30  ;;  %v13678_v4 = vrot.slane %v13677_v2, 4 }
 0xa96   : > { %19227 = vmatmul.mubr.bf16.gmra.mrb[52].mxu1 %v24280_v54  ;;  %v24504_v54 = vrot.slane %v13622_v6, 5  ;;  %v24513_v6 = vld [vmem:[#allocation2 + $0x14] sm:$0x1] }
 0xa97   : > { %19230 = vmatprep.mubr.bf16.mxu1 %v24285_v42  ;;  %v13652_v42 = vrot.slane %v13650_v55, 4  ;;  %25131 = vst [vmem:[#allocation35_spill] sm:$0xff] %v24513_v6  ;;  %v13663_v55 = vrot.slane %v13661_v47, 4  ;;  %v13656_v47 = vshll.u32 %v24516_v48, 16  ;;  %v13712_v48 = vshll.u32 %v13549_v14, 16 }
 0xa98   : > { %v13629_v58 = vor.u32 %v13628_v17, %v24504_v54  ;;  %v13625_v33 = vsel %vm21986_vm11, %v13620_v60, %v24504_v54 }
 0xa99   : > { %v13653_v31 = vor.u32 %v13652_v42, %v24506_v20  ;;  %v13644_v42 = vrot.slane %v13643_v53, 4  ;;  %v13709_v53 = vshrl.u32 %v13549_v14, 16  ;;  %v13658_v28 = vrot.slane %v13656_v47, 5 }
 0xa9a   : > { %v13630_v17 = vrot.slane %v13629_v58, 4  ;;  %v24538_v58 = vld [vmem:[#allocation2 + $0x38] sm:$0x1]  ;;  %v13714_v60 = vrot.slane %v13712_v48, 5 }
 0xa9b   : > { %v13654_v30 = vrot.slane %v13653_v31, 4  ;;  %v13722_v31 = vshrl.u32 %v24320_v51, 16  ;;  %v13649_v54 = vsel %vm21986_vm11, %v13644_v42, %v24506_v20  ;;  %v13742_v20 = vshll.u32 %v24322_v36, 16 }
 0xa9e   : > { %19231 = vmatmul.mubr.bf16.gmra.mrb[56].mxu1 %v24296_v50  ;;  %v13601_v50 = vsel %vm21986_vm11, %v13596_v61, %v24488_v52  ;;  %v13667_v52 = vor.u32 %v13666_v62, %v13663_v55  ;;  %v13687_v61 = vrot.slane %v13685_v7, 4  ;;  %v13718_v55 = vshll.u32 %v24320_v51, 16  ;;  %v13552_v62 = vld [vmem:[#allocation2 + $0x48] sm:$0xf] }
 0xa9f   : > { %19234 = vmatprep.mubr.bf16.mxu1 %v24298_v40  ;;  %v13632_v40 = vshll.u32 %v24513_v6, 16  ;;  %v16728_v22 = vcombine.low %v13601_v50, %v13611_v13  ;;  %v13682_v50 = vrot.slane %v13680_v25, 5  ;;  %v13659_v13 = vsel %vm21986_vm11, %v13654_v30, %v13658_v28  ;;  %v20961_v25 = vld [vmem:[#allocation11 + $0x108] sm:$0xff]  }
 0xaa0   : > { %v13668_v27 = vrot.slane %v13667_v52, 4  ;;  %v13691_v5 = vor.u32 %v13690_v10, %v13687_v61  ;;  %v13704_v51 = vshll.u32 %v24538_v58, 16  ;;  %v24553_v14 = vrot.slane %v13718_v55, 5 }
 0xaa1   : > { %v13634_v6 = vrot.slane %v13632_v40, 5  ;;  %v13683_v2 = vsel %vm21986_vm11, %v13678_v4, %v13682_v50  ;;  %v13733_v40 = vshrl.u32 %v13552_v62, 16  ;;  %v13746_v10 = vshrl.u32 %v24322_v36, 16  ;;  %v13558_v4 = vld [vmem:[#allocation2 + $0x60] sm:$0xf] }
 0xaa2   : > { %v24559_v42 = vcombine.low %v13649_v54, %v13659_v13  ;;  %v13673_v59 = vsel %vm21986_vm11, %v13668_v27, %v24508_v15  ;;  %v13692_v47 = vrot.slane %v13691_v5, 4  ;;  %v13702_v52 = vrot.slane %v13701_v38, 4 }
 0xaa3   : > { %v13635_v7 = vsel %vm21986_vm11, %v13630_v17, %v13634_v6  ;;  %v13736_v6 = vshll.u32 %v13552_v62, 16  ;;  %v13555_v17 = vld [vmem:[#allocation2 + $0x54] sm:$0xf]  ;;  %v24564_v48 = vcombine.low %v13673_v59, %v13683_v2  ;;  %v13706_v61 = vrot.slane %v13704_v51, 5  ;;  %v20962_v2 = vld [vmem:[#allocation11 + $0x110] sm:$0xff]  }
 0xaa4   : > { %v24557_v28 = vcombine.low %v13625_v33, %v13635_v7  ;;  %v13728_v30 = vshll.u32 %v24324_v23, 16  ;;  %v13757_v50 = vshrl.u32 %v13555_v17, 16  ;;  %v13760_v33 = vshll.u32 %v13555_v17, 16 }
 0xaa5   : > { %v13738_v36 = vrot.slane %v13736_v6, 5  ;;  %v24569_v62 = vrot.slane %v13742_v20, 5  ;;  %v13748_v15 = vrot.slane %v13746_v10, 4  ;;  %v13766_v7 = vshll.u32 %v24329_v0, 16 }
 0xaa6   : > { %19235 = vmatmul.mubr.bf16.gmra.mrb[60].mxu1 %v20958_v3  ;;  %v13724_v3 = vrot.slane %v13722_v31, 4  ;;  %v13770_v23 = vshrl.u32 %v24329_v0, 16  ;;  %v13781_v54 = vshrl.u32 %v13558_v4, 16  ;;  %v13784_v27 = vshll.u32 %v13558_v4, 16 }
 0xaa7   : > { %19254 = vmatprep.mubr.bf16.mxu1 %v16728_v22  ;;  %v13711_v22 = vrot.slane %v13709_v53, 4  ;;  %v13735_v53 = vrot.slane %v13733_v40, 4  ;;  %v13697_v5 = vsel %vm21986_vm11, %v13692_v47, %v24533_v57  ;;  %v13707_v13 = vsel %vm21986_vm11, %v13702_v52, %v13706_v61  ;;  %v13561_v47 = vld [vmem:[#allocation2 + $0x6c] sm:$0xf]  ;;  %v20963_v52 = vld [vmem:[#allocation11 + $0x118] sm:$0xff]  }
 0xaa8   : > { %v13725_v31 = vor.u32 %v13724_v3, %v24553_v14  ;;  %v13790_v38 = vshll.u32 %v24335_v37, 16  ;;  %v13794_v51 = vshrl.u32 %v24335_v37, 16  ;;  %v13762_v40 = vrot.slane %v13760_v33, 5 }
 0xaa9   : > { %v13715_v55 = vor.u32 %v13714_v60, %v13711_v22  ;;  %v13739_v22 = vor.u32 %v13738_v36, %v13735_v53  ;;  %v13759_v60 = vrot.slane %v13757_v50, 4  ;;  %v13749_v3 = vor.u32 %v13748_v15, %v24569_v62 }
 0xaaa   : > { %v13726_v6 = vrot.slane %v13725_v31, 4  ;;  %v13752_v20 = vshll.u32 %v24326_v21, 16  ;;  %v24584_v57 = vrot.slane %v13766_v7, 5  ;;  %v13772_v10 = vrot.slane %v13770_v23, 4 }
 0xaab   : > { %v13716_v0 = vrot.slane %v13715_v55, 4  ;;  %v13783_v17 = vrot.slane %v13781_v54, 4  ;;  %v13786_v59 = vrot.slane %v13784_v27, 5  ;;  %v24586_v37 = vrot.slane %v13790_v38, 5 }
 0xaac   : > { %v13796_v61 = vrot.slane %v13794_v51, 4  ;;  %v13818_v4 = vshrl.u32 %v24345_v1, 16  ;;  %v24590_v53 = vcombine.low %v13697_v5, %v13707_v13  ;;  %v13740_v36 = vrot.slane %v13739_v22, 4  ;;  %v13564_v5 = vld [vmem:[#allocation2 + $0x78] sm:$0xf] }
 0xaad   : > { %v13763_v21 = vor.u32 %v13762_v40, %v13759_v60  ;;  %v13750_v33 = vrot.slane %v13749_v3, 4  ;;  %v13754_v55 = vrot.slane %v13752_v20, 5  ;;  %v13805_v31 = vshrl.u32 %v13561_v47, 16 }
 0xaae   : > { %19255 = vmatmul.mubr.bf16.vlgmr.msra.gmra.mrb[32].mxu1 %v24557_v28  ;;  %v13808_v15 = vshll.u32 %v13561_v47, 16  ;;  %v13787_v7 = vor.u32 %v13786_v59, %v13783_v17  ;;  %v13797_v23 = vor.u32 %v13796_v61, %v24586_v37  ;;  %v13820_v27 = vrot.slane %v13818_v4, 4  ;;  %v13567_v4 = vld [vmem:[#allocation2 + $0x84] sm:$0xf] }
 0xaaf   : > { %19258 = vmatprep.mubr.bf16.mxu1 %v24559_v42  ;;  %19287 = vmatpush3.bf16.msra.mxu1 %v24475_v56  ;;  %v13730_v56 = vrot.slane %v13728_v30, 5  ;;  %v13814_v30 = vshll.u32 %v24345_v1, 16  ;;  %v13773_v1 = vor.u32 %v13772_v10, %v24584_v57  ;;  %v13745_v38 = vsel %vm21986_vm11, %v13740_v36, %v24569_v62 }
 0xab0   : > { %19288 = vmatprep.subr.bf16.mxu1 %v20961_v25  ;;  %v13776_v51 = vshll.u32 %v24333_v45, 16  ;;  %v13800_v22 = vshll.u32 %v24340_v9, 16  ;;  %v13838_v60 = vshll.u32 %v24353_v24, 16  ;;  %v13842_v40 = vshrl.u32 %v24353_v24, 16  ;;  %v20965_v45 = vld [vmem:[#allocation11 + $0x128] sm:$0xff]  }
 0xab1   : > { %v13731_v50 = vsel %vm21986_vm11, %v13726_v6, %v13730_v56  ;;  %v24601_v54 = vrot.slane %v13814_v30, 5  ;;  %v13755_v56 = vsel %vm21986_vm11, %v13750_v33, %v13754_v55  ;;  %v13810_v6 = vrot.slane %v13808_v15, 5 }
 0xab2   : > { %v13829_v3 = vshrl.u32 %v13564_v5, 16  ;;  %v13832_v20 = vshll.u32 %v13564_v5, 16  ;;  %v13774_v10 = vrot.slane %v13773_v1, 4  ;;  %v13788_v17 = vrot.slane %v13787_v7, 4 }
 0xab3   : > { %19289 = vmatpush3.bf16.msra.mxu1 %v20961_v25  ;;  %v13721_v25 = vsel %vm21986_vm11, %v13716_v0, %v24553_v14  ;;  %v20964_v14 = vld [vmem:[#allocation11 + $0x120] sm:$0xff]   ;;  %v13807_v0 = vrot.slane %v13805_v31, 4  ;;  %v13798_v62 = vrot.slane %v13797_v23, 4  ;;  %v13821_v59 = vor.u32 %v13820_v27, %v24601_v54  ;;  %v20966_v31 = vld [vmem:[#allocation11 + $0x130] sm:$0xff]   ;;  %v13570_v27 = vld [vmem:[#allocation2 + $0x90] sm:$0xf] }
 0xab4   : > { %19290 = vmatprep.subr.bf16.mxu1 %v20962_v2  ;;  %v24603_v13 = vcombine.low %v13721_v25, %v13731_v50  ;;  %v24615_v47 = vcombine.low %v13745_v38, %v13755_v56  ;;  %v13778_v61 = vrot.slane %v13776_v51, 5  ;;  %v13802_v9 = vrot.slane %v13800_v22, 5 }
 0xab5   : > { %v13824_v24 = vshll.u32 %v24359_v18, 16  ;;  %v13844_v30 = vrot.slane %v13842_v40, 4  ;;  %v13831_v25 = vrot.slane %v13829_v3, 4  ;;  %v13834_v50 = vrot.slane %v13832_v20, 5 }
 0xab6   : > { %19259 = vmatmul.mubr.bf16.gmra.mrb[36].mxu1 %v24564_v48  ;;  %v13779_v33 = vsel %vm21986_vm11, %v13774_v10, %v13778_v61  ;;  %v13793_v18 = vsel %vm21986_vm11, %v13788_v17, %v24586_v37  ;;  %v13803_v55 = vsel %vm21986_vm11, %v13798_v62, %v13802_v9  ;;  %v13822_v1 = vrot.slane %v13821_v59, 4 }
 0xab7   : > { %19262 = vmatprep.mubr.bf16.mxu1 %v24590_v53  ;;  %19291 = vmatpush3.bf16.msra.mxu1 %v20962_v2  ;;  %v13764_v2 = vrot.slane %v13763_v21, 4  ;;  %v13811_v21 = vor.u32 %v13810_v6, %v13807_v0  ;;  %v13853_v15 = vshrl.u32 %v13567_v4, 16  ;;  %v13856_v7 = vshll.u32 %v13567_v4, 16  ;;  %v20967_v6 = vld [vmem:[#allocation11 + $0x138] sm:$0xff]   ;;  %v13573_v4 = vld [vmem:[#allocation2 + $0x9c] sm:$0xf] }
 0xab8   : > { %19292 = vmatprep.subr.bf16.mxu1 %v20963_v52  ;;  %v13866_v23 = vshrl.u32 %v24368_v63, 16  ;;  %v13886_v38 = vshll.u32 %v24378_v12, 16  ;;  %v13890_v37 = vshrl.u32 %v24378_v12, 16  ;;  %v24639_v51 = vcombine.low %v13793_v18, %v13803_v55  ;;  %v13576_v18 = vld [vmem:[#allocation2 + $0xa8] sm:$0xf] }
 0xab9   : > { %v13769_v36 = vsel %vm21986_vm11, %v13764_v2, %v24584_v57  ;;  %v13862_v57 = vshll.u32 %v24368_v63, 16  ;;  %v13812_v56 = vrot.slane %v13811_v21, 4  ;;  %v13835_v22 = vor.u32 %v13834_v50, %v13831_v25 }
 0xaba   : > { %v24637_v2 = vcombine.low %v13769_v36, %v13779_v33  ;;  %v13848_v63 = vshll.u32 %v24361_v43, 16  ;;  %v13877_v40 = vshrl.u32 %v13570_v27, 16  ;;  %v13880_v0 = vshll.u32 %v13570_v27, 16  ;;  %v24655_v36 = vld [vmem:[#allocation11 + $0x1c0] sm:$0xff]  }
 0xabb   : > { %19293 = vmatpush3.bf16.msra.mxu1 %v20963_v52  ;;  %v24619_v52 = vrot.slane %v13838_v60, 5  ;;  %v13855_v3 = vrot.slane %v13853_v15, 4  ;;  %v13858_v20 = vrot.slane %v13856_v7, 5  ;;  %v24644_v10 = vrot.slane %v13862_v57, 5 }
 0xabc   : > { %19294 = vmatprep.subr.bf16.mxu1 %v20964_v14  ;;  %v13868_v12 = vrot.slane %v13866_v23, 4  ;;  %v24647_v62 = vrot.slane %v13886_v38, 5  ;;  %v13892_v59 = vrot.slane %v13890_v37, 4  ;;  %v13817_v43 = vsel %vm21986_vm11, %v13812_v56, %v24601_v54 }
 0xabd   : > { %v13845_v5 = vor.u32 %v13844_v30, %v24619_v52  ;;  %v13850_v9 = vrot.slane %v13848_v63, 5  ;;  %v13882_v30 = vrot.slane %v13880_v0, 5  ;;  %v13859_v21 = vor.u32 %v13858_v20, %v13855_v3 }
 0xabe   : > { %19263 = vmatmul.mubr.bf16.gmra.mrb[40].mxu1 %v24603_v13  ;;  %v13869_v25 = vor.u32 %v13868_v12, %v24644_v10  ;;  %v13910_v50 = vshll.u32 %v24398_v35, 16  ;;  %v13914_v33 = vshrl.u32 %v24398_v35, 16  ;;  %v13893_v55 = vor.u32 %v13892_v59, %v24647_v62  ;;  %v13579_v12 = vld [vmem:[#allocation2 + $0xb4] sm:$0xf] }
 0xabf   : > { %19266 = vmatprep.mubr.bf16.mxu1 %v24615_v47  ;;  %19295 = vmatpush3.bf16.msra.mxu1 %v20964_v14  ;;  %v13826_v14 = vrot.slane %v13824_v24, 5  ;;  %v13846_v17 = vrot.slane %v13845_v5, 4  ;;  %v13879_v24 = vrot.slane %v13877_v40, 4  ;;  %v13872_v7 = vshll.u32 %v24376_v26, 16 }
 0xac0   : > { %19296 = vmatprep.subr.bf16.mxu1 %v20965_v45  ;;  %v13901_v57 = vshrl.u32 %v13573_v4, 16  ;;  %v13904_v23 = vshll.u32 %v13573_v4, 16  ;;  %v13896_v27 = vshll.u32 %v24392_v41, 16  ;;  %v13928_v5 = vshll.u32 %v13576_v18, 16 }
 0xac1   : > { %v13827_v60 = vsel %vm21986_vm11, %v13822_v1, %v13826_v14  ;;  %v13851_v54 = vsel %vm21986_vm11, %v13846_v17, %v13850_v9  ;;  %v13934_v1 = vshll.u32 %v24404_v39, 16  ;;  %v13883_v35 = vor.u32 %v13882_v30, %v13879_v24 }
 0xac2   : > { %v24653_v61 = vcombine.low %v13817_v43, %v13827_v60  ;;  %v13925_v14 = vshrl.u32 %v13576_v18, 16  ;;  %v13870_v37 = vrot.slane %v13869_v25, 4  ;;  %v13916_v56 = vrot.slane %v13914_v33, 4 }
 0xac3   : > { %19297 = vmatpush3.bf16.msra.mxu1 %v20965_v45  ;;  %v13836_v45 = vrot.slane %v13835_v22, 4  ;;  %v13894_v22 = vrot.slane %v13893_v55, 4  ;;  %v13936_v26 = vrot.slane %v13934_v1, 5  ;;  %v13874_v63 = vrot.slane %v13872_v7, 5 }
 0xac4   : > { %19298 = vmatprep.subr.bf16.mxu1 %v20966_v31  ;;  %v13903_v40 = vrot.slane %v13901_v57, 4  ;;  %v13906_v41 = vrot.slane %v13904_v23, 5  ;;  %v13884_v0 = vrot.slane %v13883_v35, 4  ;;  %v13927_v3 = vrot.slane %v13925_v14, 4 }
 0xac5   : > { %v13841_v15 = vsel %vm21986_vm11, %v13836_v45, %v24619_v52  ;;  %v13860_v52 = vrot.slane %v13859_v21, 4  ;;  %v13930_v20 = vrot.slane %v13928_v5, 5  ;;  %v13875_v17 = vsel %vm21986_vm11, %v13870_v37, %v13874_v63 }
 0xac6   : > { %19267 = vmatmul.mubr.bf16.gmra.mrb[44].mxu1 %v24637_v2  ;;  %v24671_v38 = vcombine.low %v13841_v15, %v13851_v54  ;;  %v13958_v43 = vshll.u32 %v24417_v46, 16  ;;  %v13962_v45 = vshrl.u32 %v24417_v46, 16  ;;  %v13907_v4 = vor.u32 %v13906_v41, %v13903_v40 }
 0xac7   : > { %19270 = vmatprep.mubr.bf16.mxu1 %v24639_v51  ;;  %19299 = vmatpush3.bf16.msra.mxu1 %v20966_v31  ;;  %v13938_v31 = vshrl.u32 %v24404_v39, 16  ;;  %v13912_v39 = vrot.slane %v13910_v50, 5  ;;  %v13865_v9 = vsel %vm21986_vm11, %v13860_v52, %v24644_v10  ;;  %v13920_v21 = vshll.u32 %v24410_v19, 16 }
 0xac8   : > { %19300 = vmatprep.subr.bf16.mxu1 %v20967_v6  ;;  %v13949_v25 = vshrl.u32 %v13579_v12, 16  ;;  %v13952_v50 = vshll.u32 %v13579_v12, 16  ;;  %v24685_v33 = vcombine.low %v13865_v9, %v13875_v17  ;;  %v13889_v18 = vsel %vm21986_vm11, %v13884_v0, %v24647_v62  ;;  %v20975_v12 = vld [vmem:[#allocation11 + $0x1f8] sm:$0xff]   ;;  %v20976_v17 = vld [vmem:[#allocation11 + $0x80] sm:$0xff]  }
 0xac9   : > { %v13940_v60 = vrot.slane %v13938_v31, 4  ;;  %v13917_v59 = vor.u32 %v13916_v56, %v13912_v39  ;;  %v13931_v46 = vor.u32 %v13930_v20, %v13927_v3  ;;  %v13944_v54 = vshll.u32 %v24415_v16, 16  ;;  %v20971_v3 = vld [vmem:[#allocation11 + $0x1d8] sm:$0xff]   ;;  %v20972_v20 = vld [vmem:[#allocation11 + $0x1e0] sm:$0xff]  }
 0xaca   : > { %v13960_v1 = vrot.slane %v13958_v43, 5  ;;  %v13964_v31 = vrot.slane %v13962_v45, 4  ;;  %v13908_v19 = vrot.slane %v13907_v4, 4  ;;  %v13922_v7 = vrot.slane %v13920_v21, 5 }
 0xacb   : > { %19301 = vmatpush3.bf16.msra.mxu1 %v20967_v6  ;;  %v13898_v6 = vrot.slane %v13896_v27, 5  ;;  %v13941_v30 = vor.u32 %v13940_v60, %v13936_v26  ;;  %v13918_v10 = vrot.slane %v13917_v59, 4  ;;  %v13951_v57 = vrot.slane %v13949_v25, 4  ;;  %v13582_v59 = vld [vmem:[#allocation2 + $0xc0] sm:$0xf] }
 0xacc   : > { %19334 = vmatprep.subr.bf16.mxu1 %v24655_v36  ;;  %v13954_v23 = vrot.slane %v13952_v50, 5  ;;  %v13932_v35 = vrot.slane %v13931_v46, 4  ;;  %v13946_v27 = vrot.slane %v13944_v54, 5  ;;  %v13965_v16 = vor.u32 %v13964_v31, %v13960_v1 }
 0xacd   : > { %v13899_v24 = vsel %vm21986_vm11, %v13894_v22, %v13898_v6  ;;  %v13942_v15 = vrot.slane %v13941_v30, 4  ;;  %v13923_v62 = vsel %vm21986_vm11, %v13918_v10, %v13922_v7  ;;  %v13913_v5 = vsel %vm21986_vm11, %v13908_v19, %v13912_v39  ;;  %v20970_v6 = vld [vmem:[#allocation11 + $0x1d0] sm:$0xff]   ;;  %v20977_v19 = vld [vmem:[#allocation11 + $0x88] sm:$0xff]   ;;  %v20979_v7 = vld [vmem:[#allocation11 + $0x98] sm:$0xff]  }
 0xace   : > { %19271 = vmatmul.mubr.bf16.gmra.mrb[48].mxu1 %v24653_v61  ;;  %v24691_v55 = vcombine.low %v13889_v18, %v13899_v24  ;;  %v13955_v37 = vor.u32 %v13954_v23, %v13951_v57  ;;  %v13968_v56 = vshll.u32 %v24434_v8, 16  ;;  %v24702_v52 = vcombine.low %v13913_v5, %v13923_v62  ;;  %v20980_v57 = vld [vmem:[#allocation11 + $0xa0] sm:$0xff]   ;;  %v24749_v23 = vld [vmem:[#allocation2 + $0xd0] sm:$0xf] }
 0xacf   : > { %19274 = vmatprep.mubr.bf16.mxu1 %v24671_v38  ;;  %v13947_v14 = vsel %vm21986_vm11, %v13942_v15, %v13946_v27  ;;  %v13937_v22 = vsel %vm21986_vm11, %v13932_v35, %v13936_v26  ;;  %v13966_v63 = vrot.slane %v13965_v16, 4  ;;  %v20969_v26 = vld [vmem:[#allocation11 + $0x1c8] sm:$0xff]   ;;  %v14304_v43 = vshll.u32 %v24426_v44, 16 }
 0xad0   : > { %v24706_v60 = vcombine.low %v13937_v22, %v13947_v14  ;;  %v13956_v40 = vrot.slane %v13955_v37, 4  ;;  %v13970_v41 = vrot.slane %v13968_v56, 5  ;;  %v14308_v45 = vshrl.u32 %v24426_v44, 16  ;;  %v24755_v14 = vld [vmem:[#allocation2 + $0xd4] sm:$0x1] }
 0xad1   : > { %v14295_v9 = vshrl.u32 %v13582_v59, 16  ;;  %v14298_v24 = vshll.u32 %v13582_v59, 16  ;;  %v14306_v30 = vrot.slane %v14304_v43, 5  ;;  %v14314_v46 = vshll.u32 %v24440_v29, 16  ;;  %v20978_v29 = vld [vmem:[#allocation11 + $0x90] sm:$0xff]   ;;  %v25136_v59 = vld [vmem:[#allocation35_spill] sm:$0xff] }
 0xad2   : > { %v13971_v39 = vsel %vm21986_vm11, %v13966_v63, %v13970_v41  ;;  %v13961_v8 = vsel %vm21986_vm11, %v13956_v40, %v13960_v1  ;;  %v14310_v4 = vrot.slane %v14308_v45, 4  ;;  %v14590_v35 = vshll.u32 %v24749_v23, 16  ;;  %v14866_v56 = vld [vmem:[#allocation2] sm:$0xe]  ;;  %v14868_v43 = vld [vmem:[#allocation2 + $0x18] sm:$0xe] }
 0xad3   : > { %v24714_v0 = vcombine.low %v13961_v8, %v13971_v39  ;;  %v14297_v21 = vrot.slane %v14295_v9, 4  ;;  %v14300_v25 = vrot.slane %v14298_v24, 5  ;;  %v14316_v10 = vrot.slane %v14314_v46, 5  ;;  %v25137_v45 = vld [vmem:[#allocation36_spill] sm:$0xff] }
 0xad4   : > { %v14311_v50 = vor.u32 %v14310_v4, %v14306_v30  ;;  %v14592_v62 = vrot.slane %v14590_v35, 5  ;;  %v14934_v37 = vrot.slane %v24478_v32, 5  ;;  %v16770_v41 = vrot.slane %v14866_v56, 9  ;;  %v25138_v4 = vld [vmem:[#allocation21_spill] sm:$0xff]  ;;  %v25143_v56 = vld [vmem:[#allocation32_spill] sm:$0xff] }
 0xad5   : > { %v14301_v18 = vor.u32 %v14300_v25, %v14297_v21  ;;  %v14937_v8 = vrot.slane %v24492_v11, 5  ;;  %v14944_v49 = vrot.slane %v25136_v59, 5  ;;  %v14951_v9 = vrot.slane %v25137_v45, 5 }
 0xad6   : > { %19275 = vmatmul.mubr.bf16.gmra.mrb[52].mxu1 %v24685_v33  ;;  %v14312_v54 = vrot.slane %v14311_v50, 4  ;;  %v14936_v39 = vrot.slane %v14934_v37, 4  ;;  %v14935_v32 = vsel %vm22237_vm14, %v16770_v41, %v14934_v37  ;;  %v14955_v21 = vrot.slane %v25138_v4, 5  ;;  %v20991_v37 = vld [vmem:[#allocation11 + $0x178] sm:$0xff]   ;;  %v25146_v41 = vld [vmem:[#allocation25_spill] sm:$0xff] }
 0xad7   : > { %19278 = vmatprep.mubr.bf16.mxu1 %v24691_v55  ;;  %v14302_v44 = vrot.slane %v14301_v18, 4  ;;  %v16772_v25 = vrot.slane %v14868_v43, 9  ;;  %v25139_v18 = vld [vmem:[#allocation19_spill] sm:$0xff]  ;;  %v15646_v43 = vrot.slane %v24755_v14, 5 }
 0xad8   : > { %v14317_v1 = vsel %vm21986_vm11, %v14312_v54, %v14316_v10  ;;  %v14962_v46 = vrot.slane %v25139_v18, 5 }
 0xad9   : > { %v14307_v31 = vsel %vm21986_vm11, %v14302_v44, %v14306_v30 }
 0xada   : > { %v16752_v15 = vcombine.low %v14307_v31, %v14317_v1  ;;  %v20985_v1 = vld [vmem:[#allocation11 + $0x148] sm:$0xff]  }
 0xade   : > { %19279 = vmatmul.mubr.bf16.gmra.mrb[56].mxu1 %v24702_v52 }
 0xadf   : > { %19282 = vmatprep.mubr.bf16.mxu1 %v24706_v60 }
 0xae6   : > { %19283 = vmatmul.mubr.bf16.gmra.mrb[60].mxu1 %v24714_v0 }
 0xae7   : > { %19302 = vmatprep.mubr.bf16.mxu1 %v24557_v28  ;;  %v20973_v28 = vld [vmem:[#allocation11 + $0x1e8] sm:$0xff]  }
 0xaee   : > { %19303 = vmatmul.mubr.bf16.vlgmr.msra.gmra.mrb[32].mxu1 %v24559_v42 }
 0xaef   : > { %19306 = vmatprep.mubr.bf16.mxu1 %v24564_v48  ;;  %19335 = vmatpush3.bf16.msra.mxu1 %v24655_v36  ;;  %v20974_v36 = vld [vmem:[#allocation11 + $0x1f0] sm:$0xff]  }
 0xaf0   : > { %19336 = vmatprep.subr.bf16.mxu1 %v20969_v26 }
 0xaf3   : > { %19337 = vmatpush3.bf16.msra.mxu1 %v20969_v26  ;;  %v14938_v26 = vsel %vm22237_vm14, %v14936_v39, %v14937_v8  ;;  %v25147_v39 = vld [vmem:[#allocation20_spill] sm:$0xff]  ;;  %v25148_v8 = vld [vmem:[#allocation23_spill] sm:$0xff] }
 0xaf4   : > { %19338 = vmatprep.subr.bf16.mxu1 %v20970_v6 }
 0xaf6   : > { %19307 = vmatmul.mubr.bf16.gmra.mrb[36].mxu1 %v24590_v53 }
 0xaf7   : > { %19310 = vmatprep.mubr.bf16.mxu1 %v24603_v13  ;;  %19339 = vmatpush3.bf16.msra.mxu1 %v20970_v6  ;;  %v25134_v6 = vld [vmem:[#allocation30_spill] sm:$0xff] }
 0xaf8   : > { %19340 = vmatprep.subr.bf16.mxu1 %v20971_v3 }
 0xafb   : > { %19341 = vmatpush3.bf16.msra.mxu1 %v20971_v3  ;;  %v14941_v3 = vrot.slane %v25134_v6, 5  ;;  %v20994_v6 = vld [vmem:[#allocation11 + $0x210] sm:$0xff]  }
 0xafc   : > { %19342 = vmatprep.subr.bf16.mxu1 %v20972_v20 }
 0xafe   : > { %19311 = vmatmul.mubr.bf16.gmra.mrb[40].mxu1 %v24615_v47 }
 0xaff   : > { %19314 = vmatprep.mubr.bf16.mxu1 %v24637_v2  ;;  %19343 = vmatpush3.bf16.msra.mxu1 %v20972_v20 }
 0xb00   : > { %19344 = vmatprep.subr.bf16.mxu1 %v20973_v28 }
 0xb03   : > { %19345 = vmatpush3.bf16.msra.mxu1 %v20973_v28  ;;  %v25135_v28 = vld [vmem:[#allocation22_spill] sm:$0xff] }
 0xb04   : > { %19346 = vmatprep.subr.bf16.mxu1 %v20974_v36  ;;  %v14948_v11 = vrot.slane %v25135_v28, 5  ;;  %v20997_v28 = vld [vmem:[#allocation11 + $0x228] sm:$0xff]  }
 0xb06   : > { %19315 = vmatmul.mubr.bf16.gmra.mrb[44].mxu1 %v24639_v51  ;;  %v14949_v10 = vsel %vm22237_vm14, %v16772_v25, %v14948_v11 }
 0xb07   : > { %19318 = vmatprep.mubr.bf16.mxu1 %v24653_v61  ;;  %19347 = vmatpush3.bf16.msra.mxu1 %v20974_v36  ;;  %v16786_v36 = vcombine.low %v14935_v32, %v14938_v26  ;;  %v25151_v32 = vld [vmem:[#allocation28_spill] sm:$0xff] }
 0xb08   : > { %19348 = vmatprep.subr.bf16.mxu1 %v20975_v12  ;;  %v20993_v26 = vld [vmem:[#allocation11 + $0x208] sm:$0xff]  }
 0xb0b   : > { %19349 = vmatpush3.bf16.msra.mxu1 %v20975_v12  ;;  %v14867_v12 = vld [vmem:[#allocation2 + $0xc] sm:$0xe] }
 0xb0c   : > { %19382 = vmatprep.subr.bf16.mxu1 %v20976_v17  ;;  %v16771_v24 = vrot.slane %v14867_v12, 9  ;;  %v15643_v12 = vrot.slane %v24749_v23, 5 }
 0xb0e   : > { %19319 = vmatmul.mubr.bf16.gmra.mrb[48].mxu1 %v24671_v38  ;;  %v14942_v54 = vsel %vm22237_vm14, %v16771_v24, %v14941_v3 }
 0xb0f   : > { %19322 = vmatprep.mubr.bf16.mxu1 %v24685_v33 }
 0xb16   : > { %19323 = vmatmul.mubr.bf16.gmra.mrb[52].mxu1 %v24691_v55 }
 0xb17   : > { %19326 = vmatprep.mubr.bf16.mxu1 %v24702_v52 }
 0xb1e   : > { %19327 = vmatmul.mubr.bf16.gmra.mrb[56].mxu1 %v24706_v60 }
 0xb1f   : > { %19330 = vmatprep.mubr.bf16.mxu1 %v24714_v0 }
 0xb26   : > { %19331 = vmatmul.mubr.bf16.gmra.mrb[60].mxu1 %v16752_v15 }
 0xb27   : > { %19350 = vmatprep.mubr.bf16.mxu1 %v24559_v42  ;;  %v20981_v42 = vld [vmem:[#allocation11 + $0xa8] sm:$0xff]  }
 0xb2e   : > { %19351 = vmatmul.mubr.bf16.vlgmr.msra.gmra.mrb[32].mxu1 %v24564_v48  ;;  %v20982_v48 = vld [vmem:[#allocation11 + $0xb0] sm:$0xff]  }
 0xb2f   : > { %19354 = vmatprep.mubr.bf16.mxu1 %v24590_v53  ;;  %19383 = vmatpush3.bf16.msra.mxu1 %v20976_v17  ;;  %v20983_v53 = vld [vmem:[#allocation11 + $0xb8] sm:$0xff]   ;;  %v14950_v17 = vrot.slane %v14948_v11, 4  ;;  %v20998_v11 = vld [vmem:[#allocation11 + $0x230] sm:$0xff]  }
 0xb30   : > { %19384 = vmatprep.subr.bf16.mxu1 %v20977_v19 }
 0xb31   : > { %v14952_v50 = vsel %vm22237_vm14, %v14950_v17, %v14951_v9  ;;  %v14883_v17 = vld [vmem:[#allocation2 + $0xcc] sm:$0xe] }
 0xb32   : > { %v24785_v31 = vcombine.low %v14949_v10, %v14952_v50  ;;  %v16820_v59 = vrot.slane %v14883_v17, 9 }
 0xb33   : > { %19385 = vmatpush3.bf16.msra.mxu1 %v20977_v19  ;;  %v14869_v19 = vld [vmem:[#allocation2 + $0x24] sm:$0xe] }
 0xb34   : > { %19386 = vmatprep.subr.bf16.mxu1 %v20978_v29  ;;  %v15644_v45 = vsel %vm22237_vm14, %v16820_v59, %v15643_v12 }
 0xb36   : > { %19355 = vmatmul.mubr.bf16.gmra.mrb[36].mxu1 %v24603_v13  ;;  %v20984_v13 = vld [vmem:[#allocation11 + $0x140] sm:$0xff]  }
 0xb37   : > { %19358 = vmatprep.mubr.bf16.mxu1 %v24615_v47  ;;  %19387 = vmatpush3.bf16.msra.mxu1 %v20978_v29  ;;  %v13585_v47 = vld [vmem:[#allocation2 + $0xcc] sm:$0xf]  ;;  %v14964_v29 = vrot.slane %v14962_v46, 4 }
 0xb38   : > { %19388 = vmatprep.subr.bf16.mxu1 %v20979_v7 }
 0xb3b   : > { %19389 = vmatpush3.bf16.msra.mxu1 %v20979_v7  ;;  %v25140_v7 = vld [vmem:[#allocation37_spill] sm:$0xff] }
 0xb3c   : > { %19390 = vmatprep.subr.bf16.mxu1 %v20980_v57 }
 0xb3e   : > { %19359 = vmatmul.mubr.bf16.gmra.mrb[40].mxu1 %v24637_v2  ;;  %v14581_v2 = vshrl.u32 %v13585_v47, 16 }
 0xb3f   : > { %19362 = vmatprep.mubr.bf16.mxu1 %v24639_v51  ;;  %19391 = vmatpush3.bf16.msra.mxu1 %v20980_v57  ;;  %v14584_v51 = vshll.u32 %v13585_v47, 16  ;;  %v14958_v57 = vrot.slane %v25140_v7, 5  ;;  %v16773_v47 = vrot.slane %v14869_v19, 9 }
 0xb40   : > { %19392 = vmatprep.subr.bf16.mxu1 %v20981_v42  ;;  %v14583_v27 = vrot.slane %v14581_v2, 4 }
 0xb43   : > { %19393 = vmatpush3.bf16.msra.mxu1 %v20981_v42  ;;  %v14870_v42 = vld [vmem:[#allocation2 + $0x30] sm:$0xe] }
 0xb44   : > { %19394 = vmatprep.subr.bf16.mxu1 %v20982_v48 }
 0xb46   : > { %19363 = vmatmul.mubr.bf16.gmra.mrb[44].mxu1 %v24653_v61  ;;  %v14594_v61 = vshrl.u32 %v24749_v23, 16  ;;  %v24854_v23 = vld [vmem:[%s24945_s8] ss:$0 sm:$0xff] }
 0xb47   : > { %19366 = vmatprep.mubr.bf16.mxu1 %v24671_v38  ;;  %19395 = vmatpush3.bf16.msra.mxu1 %v20982_v48  ;;  %v14586_v38 = vrot.slane %v14584_v51, 5  ;;  %v14965_v48 = vrot.slane %v24538_v58, 5  ;;  %v16774_v51 = vrot.slane %v14870_v42, 9  ;;  %v20987_v58 = vld [vmem:[#allocation11 + $0x158] sm:$0xff]  }
 0xb48   : > { %19396 = vmatprep.subr.bf16.mxu1 %v20983_v53  ;;  %v14596_v16 = vrot.slane %v14594_v61, 4  ;;  %v14956_v61 = vsel %vm22237_vm14, %v16773_v47, %v14955_v21 }
 0xb49   : > { %v14587_v5 = vor.u32 %v14586_v38, %v14583_v27  ;;  %v14966_v35 = vsel %vm22237_vm14, %v14964_v29, %v14965_v48  ;;  %v14963_v27 = vsel %vm22237_vm14, %v16774_v51, %v14962_v46 }
 0xb4a   : > { %v24800_v38 = vcombine.low %v14963_v27, %v14966_v35 }
 0xb4b   : > { %19397 = vmatpush3.bf16.msra.mxu1 %v20983_v53  ;;  %v14588_v22 = vrot.slane %v14587_v5, 4  ;;  %v20986_v53 = vld [vmem:[#allocation11 + $0x150] sm:$0xff]  }
 0xb4c   : > { %19430 = vmatprep.subr.bf16.mxu1 %v20984_v13  ;;  %v25141_v5 = vld [vmem:[#allocation29_spill] sm:$0xff] }
 0xb4e   : > { %19367 = vmatmul.mubr.bf16.gmra.mrb[48].mxu1 %v24685_v33  ;;  %v14597_v33 = vor.u32 %v14596_v16, %v14592_v62  ;;  %v20989_v16 = vld [vmem:[#allocation11 + $0x168] sm:$0xff]  }
 0xb4f   : > { %19370 = vmatprep.mubr.bf16.mxu1 %v24691_v55  ;;  %v14600_v55 = vshll.u32 %v24755_v14, 16 }
 0xb50   : > { %v14598_v63 = vrot.slane %v14597_v33, 4  ;;  %v25142_v33 = vld [vmem:[#allocation31_spill] sm:$0xff] }
 0xb51   : > { %v14602_v40 = vrot.slane %v14600_v55, 5  ;;  %v20990_v55 = vld [vmem:[#allocation11 + $0x170] sm:$0xff]  }
 0xb56   : > { %19371 = vmatmul.mubr.bf16.gmra.mrb[52].mxu1 %v24702_v52  ;;  %v14593_v52 = vsel %vm21986_vm11, %v14588_v22, %v14592_v62  ;;  %v20988_v62 = vld [vmem:[#allocation11 + $0x160] sm:$0xff]   ;;  %v25144_v22 = vld [vmem:[#allocation33_spill] sm:$0xff] }
 0xb57   : > { %19374 = vmatprep.mubr.bf16.mxu1 %v24706_v60  ;;  %v14603_v60 = vsel %vm21986_vm11, %v14598_v63, %v14602_v40  ;;  %v20992_v63 = vld [vmem:[#allocation11 + $0x200] sm:$0xff]   ;;  %v25145_v40 = vld [vmem:[#allocation34_spill] sm:$0xff] }
 0xb58   : > { %v16761_v20 = vcombine.low %v14593_v52, %v14603_v60  ;;  %v25149_v52 = vld [vmem:[#allocation26_spill] sm:$0xff]  ;;  %v25150_v60 = vld [vmem:[#allocation27_spill] sm:$0xff] }
 0xb5e   : > { %19375 = vmatmul.mubr.bf16.gmra.mrb[56].mxu1 %v24714_v0  ;;  %v14943_v0 = vrot.slane %v14941_v3, 4  ;;  %v20995_v3 = vld [vmem:[#allocation11 + $0x218] sm:$0xff]  }
 0xb5f   : > { %19378 = vmatprep.mubr.bf16.mxu1 %v16752_v15  ;;  %v14957_v15 = vrot.slane %v14955_v21, 4 }
 0xb60   : > { %v14945_v30 = vsel %vm22237_vm14, %v14943_v0, %v14944_v49  ;;  %v25152_v0 = vld [vmem:[#allocation24_spill] sm:$0xff]  ;;  %v15645_v49 = vrot.slane %v15643_v12, 4 }
 0xb61   : > { %v16787_v44 = vcombine.low %v14942_v54, %v14945_v30  ;;  %v14959_v2 = vsel %vm22237_vm14, %v14957_v15, %v14958_v57 }
 0xb62   : > { %v15647_v9 = vsel %vm22237_vm14, %v15645_v49, %v15646_v43 }
 0xb63   : > { %v16821_v24 = vcombine.low %v15644_v45, %v15647_v9 }
 0xb66   : > { %19379 = vmatmul.mubr.bf16.gmra.mrb[60].mxu1 %v16761_v20  ;;  %v20996_v20 = vld [vmem:[#allocation11 + $0x220] sm:$0xff]  }
 0xb67   : > { %19398 = vmatprep.mubr.bf16.mxu1 %v16786_v36  ;;  %v20999_v36 = vld [vmem:[#allocation11 + $0x238] sm:$0xff]  }
 0xb6e   : > { %19399 = vmatmul.mubr.bf16.vlgmr.msra.gmra.mrb[32].mxu1 %v16787_v44 }
 0xb6f   : > { %19402 = vmatprep.mubr.bf16.mxu1 %v24785_v31  ;;  %19431 = vmatpush3.bf16.msra.mxu1 %v20984_v13  ;;  %v24796_v13 = vcombine.low %v14956_v61, %v14959_v2 }
 0xb70   : > { %19432 = vmatprep.subr.bf16.mxu1 %v20985_v1 }
 0xb73   : > { %19433 = vmatpush3.bf16.msra.mxu1 %v20985_v1 }
 0xb74   : > { %19434 = vmatprep.subr.bf16.mxu1 %v20986_v53 }
 0xb76   : > { %19403 = vmatmul.mubr.bf16.gmra.mrb[36].mxu1 %v24796_v13 }
 0xb77   : > { %19406 = vmatprep.mubr.bf16.mxu1 %v24800_v38  ;;  %19435 = vmatpush3.bf16.msra.mxu1 %v20986_v53 }
 0xb78   : > { %19436 = vmatprep.subr.bf16.mxu1 %v20987_v58 }
 0xb7b   : > { %19437 = vmatpush3.bf16.msra.mxu1 %v20987_v58 }
 0xb7c   : > { %19438 = vmatprep.subr.bf16.mxu1 %v20988_v62 }
 0xb7e   : > { %19407 = vmatmul.mubr.bf16.gmra.mrb[40].mxu1 %v25141_v5 }
 0xb7f   : > { %19410 = vmatprep.mubr.bf16.mxu1 %v25142_v33  ;;  %19439 = vmatpush3.bf16.msra.mxu1 %v20988_v62 }
 0xb80   : > { %19440 = vmatprep.subr.bf16.mxu1 %v20989_v16 }
 0xb83   : > { %19441 = vmatpush3.bf16.msra.mxu1 %v20989_v16 }
 0xb84   : > { %19442 = vmatprep.subr.bf16.mxu1 %v20990_v55 }
 0xb86   : > { %19411 = vmatmul.mubr.bf16.gmra.mrb[44].mxu1 %v25143_v56 }
 0xb87   : > { %19414 = vmatprep.mubr.bf16.mxu1 %v25144_v22  ;;  %19443 = vmatpush3.bf16.msra.mxu1 %v20990_v55 }
 0xb88   : > { %19444 = vmatprep.subr.bf16.mxu1 %v20991_v37 }
 0xb8b   : > { %19445 = vmatpush3.bf16.msra.mxu1 %v20991_v37 }
 0xb8c   : > { %19478 = vmatprep.subr.bf16.mxu1 %v20992_v63 }
 0xb8e   : > { %19415 = vmatmul.mubr.bf16.gmra.mrb[48].mxu1 %v25145_v40 }
 0xb8f   : > { %19418 = vmatprep.mubr.bf16.mxu1 %v25146_v41 }
 0xb96   : > { %19419 = vmatmul.mubr.bf16.gmra.mrb[52].mxu1 %v25147_v39 }
 0xb97   : > { %19422 = vmatprep.mubr.bf16.mxu1 %v25148_v8 }
 0xb9e   : > { %19423 = vmatmul.mubr.bf16.gmra.mrb[56].mxu1 %v25149_v52 }
 0xb9f   : > { %19426 = vmatprep.mubr.bf16.mxu1 %v25150_v60 }
 0xba6   : > { %19427 = vmatmul.mubr.bf16.gmra.mrb[60].mxu1 %v25151_v32 }
 0xba7   : > { %19446 = vmatprep.mubr.bf16.mxu1 %v16787_v44 }
 0xbae   : > { %19447 = vmatmul.mubr.bf16.vlgmr.msra.gmra.mrb[32].mxu1 %v24785_v31 }
 0xbaf   : > { %19450 = vmatprep.mubr.bf16.mxu1 %v24796_v13  ;;  %19479 = vmatpush3.bf16.msra.mxu1 %v20992_v63 }
 0xbb0   : > { %19480 = vmatprep.subr.bf16.mxu1 %v20993_v26 }
 0xbb3   : > { %19481 = vmatpush3.bf16.msra.mxu1 %v20993_v26 }
 0xbb4   : > { %19482 = vmatprep.subr.bf16.mxu1 %v20994_v6 }
 0xbb6   : > { %19451 = vmatmul.mubr.bf16.gmra.mrb[36].mxu1 %v24800_v38 }
 0xbb7   : > { %19454 = vmatprep.mubr.bf16.mxu1 %v25141_v5  ;;  %19483 = vmatpush3.bf16.msra.mxu1 %v20994_v6 }
 0xbb8   : > { %19484 = vmatprep.subr.bf16.mxu1 %v20995_v3 }
 0xbbb   : > { %19485 = vmatpush3.bf16.msra.mxu1 %v20995_v3 }
 0xbbc   : > { %19486 = vmatprep.subr.bf16.mxu1 %v20996_v20 }
 0xbbe   : > { %19455 = vmatmul.mubr.bf16.gmra.mrb[40].mxu1 %v25142_v33 }
 0xbbf   : > { %19458 = vmatprep.mubr.bf16.mxu1 %v25143_v56  ;;  %19487 = vmatpush3.bf16.msra.mxu1 %v20996_v20 }
 0xbc0   : > { %19488 = vmatprep.subr.bf16.mxu1 %v20997_v28 }
 0xbc3   : > { %19489 = vmatpush3.bf16.msra.mxu1 %v20997_v28 }
 0xbc4   : > { %19490 = vmatprep.subr.bf16.mxu1 %v20998_v11 }
 0xbc6   : > { %19459 = vmatmul.mubr.bf16.gmra.mrb[44].mxu1 %v25144_v22 }
 0xbc7   : > { %19462 = vmatprep.mubr.bf16.mxu1 %v25145_v40  ;;  %19491 = vmatpush3.bf16.msra.mxu1 %v20998_v11 }
 0xbc8   : > { %19492 = vmatprep.subr.bf16.mxu1 %v20999_v36 }
 0xbcb   : > { %19493 = vmatpush3.bf16.msra.mxu1 %v20999_v36 }
 0xbce   : > { %19463 = vmatmul.mubr.bf16.gmra.mrb[48].mxu1 %v25146_v41 }
 0xbcf   : > { %19466 = vmatprep.mubr.bf16.mxu1 %v25147_v39 }
 0xbd6   : > { %19467 = vmatmul.mubr.bf16.gmra.mrb[52].mxu1 %v25148_v8 }
 0xbd7   : > { %19470 = vmatprep.mubr.bf16.mxu1 %v25149_v52 }
 0xbde   : > { %19471 = vmatmul.mubr.bf16.gmra.mrb[56].mxu1 %v25150_v60 }
 0xbdf   : > { %19474 = vmatprep.mubr.bf16.mxu1 %v25151_v32 }
 0xbe6   : > { %19475 = vmatmul.mubr.bf16.gmra.mrb[60].mxu1 %v25152_v0 }
 0xbe7   : > { %19494 = vmatprep.mubr.bf16.mxu1 %v24785_v31 }
 0xbee   : > { %19495 = vmatmul.mubr.bf16.vlgmr.msra.gmra.mrb[32].mxu1 %v24796_v13 }
 0xbef   : > { %19498 = vmatprep.mubr.bf16.mxu1 %v24800_v38 }
 0xbf6   : > { %19499 = vmatmul.mubr.bf16.gmra.mrb[36].mxu1 %v25141_v5 }
 0xbf7   : > { %19502 = vmatprep.mubr.bf16.mxu1 %v25142_v33 }
 0xbfe   : > { %19503 = vmatmul.mubr.bf16.gmra.mrb[40].mxu1 %v25143_v56 }
 0xbff   : > { %19506 = vmatprep.mubr.bf16.mxu1 %v25144_v22 }
 0xc06   : > { %19507 = vmatmul.mubr.bf16.gmra.mrb[44].mxu1 %v25145_v40 }
 0xc07   : > { %19510 = vmatprep.mubr.bf16.mxu1 %v25146_v41 }
 0xc0e   : > { %19511 = vmatmul.mubr.bf16.gmra.mrb[48].mxu1 %v25147_v39 }
 0xc0f   : > { %19514 = vmatprep.mubr.bf16.mxu1 %v25148_v8 }
 0xc16   : > { %19515 = vmatmul.mubr.bf16.gmra.mrb[52].mxu1 %v25149_v52 }
 0xc17   : > { %19518 = vmatprep.mubr.bf16.mxu1 %v25150_v60 }
 0xc1e   : > { %19519 = vmatmul.mubr.bf16.gmra.mrb[56].mxu1 %v25151_v32 }
 0xc1f   : > { %19522 = vmatprep.mubr.bf16.mxu1 %v25152_v0 }
 0xc26   : > { %19523 = vmatmul.mubr.bf16.gmra.mrb[60].mxu1 %v16821_v24 }
 0xcc1   : > { %v19496_v30 = vpop.f32.mrb[32].mxu1 }
 0xcc2   : > { %v15751_v4 = vpop.f32.mrb[33].mxu1  ;;  %v15919_v46 = vadd.f32 %v19496_v30, %v24854_v23 }
 0xcc3   : > { %v19497_v14 = vpop.f32.mrb[34].mxu1  ;;  %v15917_v21 = vadd.f32 %v24854_v23, %v15751_v4 }
 0xcc4   : > { %v15754_v25 = vpop.f32.mrb[35].mxu1  ;;  %v15920_v10 = vadd.f32 %v19497_v14, %v24854_v23 }
 0xcc5   : > { %15949 = vxpose.xlu0.b32.start [1/16] (narrow) %v15917_v21, 8  ;;  %v15918_v50 = vadd.f32 %v24854_v23, %v15754_v25 }
 0xcc9   : > { %15950 = vxpose.xlu0.b32.cont [2/16] (narrow) %v15918_v50, 8  ;;  %v19500_v18 = vpop.f32.mrb[36].mxu1 }
 0xcca   : > { %v15767_v34 = vpop.f32.mrb[37].mxu1  ;;  %v15923_v48 = vadd.f32 %v19500_v18, %v24854_v23 }
 0xccb   : > { %v19501_v54 = vpop.f32.mrb[38].mxu1  ;;  %v15921_v15 = vadd.f32 %v24854_v23, %v15767_v34 }
 0xccc   : > { %v15770_v44 = vpop.f32.mrb[39].mxu1  ;;  %v15924_v2 = vadd.f32 %v19501_v54, %v24854_v23 }
 0xccd   : > { %15951 = vxpose.xlu0.b32.cont [3/16] (narrow) %v15919_v46, 8  ;;  %v15922_v7 = vadd.f32 %v24854_v23, %v15770_v44 }
 0xcd1   : > { %15952 = vxpose.xlu0.b32.cont [4/16] (narrow) %v15920_v10, 8  ;;  %v19504_v1 = vpop.f32.mrb[40].mxu1 }
 0xcd2   : > { %v15783_v31 = vpop.f32.mrb[41].mxu1  ;;  %v15927_v33 = vadd.f32 %v19504_v1, %v24854_v23 }
 0xcd3   : > { %v19505_v19 = vpop.f32.mrb[42].mxu1  ;;  %v15925_v61 = vadd.f32 %v24854_v23, %v15783_v31 }
 0xcd4   : > { %v15786_v29 = vpop.f32.mrb[43].mxu1  ;;  %v15928_v22 = vadd.f32 %v19505_v19, %v24854_v23 }
 0xcd5   : > { %15953 = vxpose.xlu0.b32.cont [5/16] (narrow) %v15921_v15, 8  ;;  %v15926_v38 = vadd.f32 %v24854_v23, %v15786_v29 }
 0xcd9   : > { %15954 = vxpose.xlu0.b32.cont [6/16] (narrow) %v15922_v7, 8  ;;  %v19508_v57 = vpop.f32.mrb[44].mxu1 }
 0xcda   : > { %v15799_v42 = vpop.f32.mrb[45].mxu1  ;;  %v15931_v12 = vadd.f32 %v19508_v57, %v24854_v23 }
 0xcdb   : > { %v19509_v53 = vpop.f32.mrb[46].mxu1  ;;  %v15929_v8 = vadd.f32 %v24854_v23, %v15799_v42 }
 0xcdc   : > { %v15802_v47 = vpop.f32.mrb[47].mxu1  ;;  %v15932_v24 = vadd.f32 %v19509_v53, %v24854_v23 }
 0xcdd   : > { %15955 = vxpose.xlu0.b32.cont [7/16] (narrow) %v15923_v48, 8  ;;  %v15930_v20 = vadd.f32 %v24854_v23, %v15802_v47 }
 0xce1   : > { %15956 = vxpose.xlu0.b32.cont [8/16] (narrow) %v15924_v2, 8  ;;  %v19512_v51 = vpop.f32.mrb[48].mxu1 }
 0xce2   : > { %v15815_v35 = vpop.f32.mrb[49].mxu1  ;;  %v15935_v55 = vadd.f32 %v19512_v51, %v24854_v23 }
 0xce3   : > { %v19513_v13 = vpop.f32.mrb[50].mxu1  ;;  %v15933_v27 = vadd.f32 %v24854_v23, %v15815_v35 }
 0xce4   : > { %v15818_v58 = vpop.f32.mrb[51].mxu1  ;;  %v15936_v63 = vadd.f32 %v19513_v13, %v24854_v23 }
 0xce5   : > { %15957 = vxpose.xlu0.b32.cont [9/16] (narrow) %v15925_v61, 8  ;;  %15981 = vxpose.xlu1.b32.start [1/16] (narrow) %v15933_v27, 8  ;;  %v15934_v62 = vadd.f32 %v24854_v23, %v15818_v58 }
 0xce9   : > { %15958 = vxpose.xlu0.b32.cont [10/16] (narrow) %v15926_v38, 8  ;;  %15982 = vxpose.xlu1.b32.cont [2/16] (narrow) %v15934_v62, 8  ;;  %v19516_v16 = vpop.f32.mrb[52].mxu1 }
 0xcea   : > { %v15831_v5 = vpop.f32.mrb[53].mxu1  ;;  %v15939_v17 = vadd.f32 %v19516_v16, %v24854_v23 }
 0xceb   : > { %v19517_v37 = vpop.f32.mrb[54].mxu1  ;;  %v15937_v52 = vadd.f32 %v24854_v23, %v15831_v5 }
 0xcec   : > { %v15834_v56 = vpop.f32.mrb[55].mxu1  ;;  %v15940_v30 = vadd.f32 %v19517_v37, %v24854_v23 }
 0xced   : > { %15959 = vxpose.xlu0.b32.cont [11/16] (narrow) %v15927_v33, 8  ;;  %15983 = vxpose.xlu1.b32.cont [3/16] (narrow) %v15935_v55, 8  ;;  %v15938_v28 = vadd.f32 %v24854_v23, %v15834_v56 }
 0xcf1   : > { %15960 = vxpose.xlu0.b32.cont [12/16] (narrow) %v15928_v22, 8  ;;  %15984 = vxpose.xlu1.b32.cont [4/16] (narrow) %v15936_v63, 8  ;;  %v19520_v40 = vpop.f32.mrb[56].mxu1 }
 0xcf2   : > { %v15943_v41 = vadd.f32 %v19520_v40, %v24854_v23  ;;  %v15847_v39 = vpop.f32.mrb[57].mxu1 }
 0xcf3   : > { %v15941_v60 = vadd.f32 %v24854_v23, %v15847_v39  ;;  %v19521_v32 = vpop.f32.mrb[58].mxu1 }
 0xcf4   : > { %v15944_v26 = vadd.f32 %v19521_v32, %v24854_v23  ;;  %v15850_v6 = vpop.f32.mrb[59].mxu1 }
 0xcf5   : > { %v15942_v3 = vadd.f32 %v24854_v23, %v15850_v6  ;;  %15961 = vxpose.xlu0.b32.cont [13/16] (narrow) %v15929_v8, 8  ;;  %15985 = vxpose.xlu1.b32.cont [5/16] (narrow) %v15937_v52, 8 }
 0xcf9   : > { %15962 = vxpose.xlu0.b32.cont [14/16] (narrow) %v15930_v20, 8  ;;  %15986 = vxpose.xlu1.b32.cont [6/16] (narrow) %v15938_v28, 8  ;;  %v19524_v11 = vpop.f32.mrb[60].mxu1 }
 0xcfa   : > { %v15947_v36 = vadd.f32 %v19524_v11, %v24854_v23  ;;  %v15863_v0 = vpop.f32.mrb[61].mxu1 }
 0xcfb   : > { %v15945_v59 = vadd.f32 %v24854_v23, %v15863_v0  ;;  %v19525_v49 = vpop.f32.mrb[62].mxu1 }
 0xcfc   : > { %v15948_v43 = vadd.f32 %v19525_v49, %v24854_v23  ;;  %v15866_v45 = vpop.f32.mrb[63].mxu1 }
 0xcfd   : > { %v15946_v9 = vadd.f32 %v24854_v23, %v15866_v45  ;;  %15963 = vxpose.xlu0.b32.cont [15/16] (narrow) %v15931_v12, 8  ;;  %15987 = vxpose.xlu1.b32.cont [7/16] (narrow) %v15939_v17, 8 }
 0xd01   : > { %15964 = vxpose.xlu0.b32.end [16/16] (narrow) %v15932_v24, 8  ;;  %15988 = vxpose.xlu1.b32.cont [8/16] (narrow) %v15940_v30, 8 }
 0xd05   : > { %15989 = vxpose.xlu1.b32.cont [9/16] (narrow) %v15941_v60, 8 }
 0xd09   : > { %15990 = vxpose.xlu1.b32.cont [10/16] (narrow) %v15942_v3, 8 }
 0xd0d   : > { %15991 = vxpose.xlu1.b32.cont [11/16] (narrow) %v15943_v41, 8 }
 0xd11   : > { %15992 = vxpose.xlu1.b32.cont [12/16] (narrow) %v15944_v26, 8 }
 0xd15   : > { %15993 = vxpose.xlu1.b32.cont [13/16] (narrow) %v15945_v59, 8 }
 0xd19   : > { %15994 = vxpose.xlu1.b32.cont [14/16] (narrow) %v15946_v9, 8 }
 0xd1d   : > { %15995 = vxpose.xlu1.b32.cont [15/16] (narrow) %v15947_v36, 8 }
 0xd21   : > { %15996 = vxpose.xlu1.b32.end [16/16] (narrow) %v15948_v43, 8 }
 0xd45   : > { %v15965_v4 = vpop.trf.xlu0 }
 0xd46   : > { %16013 = vst [vmem:[%s408_s16] sm:$0xff] %v15965_v4 }
 0xd65   : > { %v15997_v23 = vpop.trf.xlu1 }
 0xd66   : > { %16014 = vst [vmem:[%s408_s16 + $0x8] sm:$0xff] %v15997_v23 }
 0xd67   : > { %21202 = shalt.err (!%p21199_p13)
}
 0xd68   : > { %s21203_s30 = scalar_lea.hbm %s24895_s17, 256  ;;  %s21207_s18 = scalar_lea.hbm %s25153_s15, 512 }
 0xd69   : > { %p21204_p9 = scmp.ne.s32.totalorder %s24895_s17, %s21203_s30  ;;  %p21208_p4 = scmp.lt.u32.totalorder %s24895_s17, %s25153_s15 }
 0xd6a   : > { %p21209_p8 = scmp.lt.u32.totalorder %s21207_s18, %s21203_s30  ;;  %p21211_p3 = scmp.lt.u32.totalorder %s21203_s30, %s24895_s17 }
 0xd6b   : > { %p21205_p0 = pnand %p21204_p9, %p21495_p10 }
 0xd6c   : > { %p21210_p6 = por %p21209_p8, %p21208_p4 }
 0xd6d   : > { %p21206_p11 = pneg %p21205_p0 }
 0xd6e   : > { %p21212_p5 = por %p21211_p3, %p21210_p6 }
 0xd70   : > { %p21213_p7 = pnand %p21212_p5, %p21206_p11 }
 0xd72   : > { %21216 = shalt.err (!%p21213_p7)
}
 0xd73   : > { %20568 = dma.vmem_to_hbm [thread:$0]  (%p21495_p10), %s24890_s23, 256, %s24895_s17, %s16016_s25  }
 0xd74 PF: > { %s25154_s24 = sld [smem:[#allocation17_spill]]  ;;  %s25155_s29 = sld [smem:[#allocation18_spill]] }
 0xd75   : > { %p25157_p1 = scmp.ge.s32.totalorder %s21263_s12, 2 }
 0xd7a   : > { %s16042_s26 = sand.u32 1, %s25154_s24   ;;  %p25156_p12 = scmp.ne.s32.totalorder %s25155_s29, 0 }
 0xd7b   : > { %s16043_s19 = scalar_lea.sflag [#allocation5], %s16042_s26 }
 0xd7c   : > { %p20588_p2 = pnand %p25157_p1, %p25156_p12 }
 0xd7e   : > { %21246 = dma.done.wait (!%p20588_p2), %s16043_s19, 256  }
 0xd7f   : > { %21248 = vsyncadd (!%p20588_p2), %s16043_s19, 4294967040  ;;  %p24_p13 = scmp.ge.s32.totalorder %s21485_s14, 4   ;;  %s25158_s30 = smov %s21255_s10 }
 0xd80   : > { %s25159_s10 = smov %s21259_s11  ;;  %s25160_s11 = smov %s21501_s28 }
 0xd81   : > { %s25161_s12 = smov %s21485_s14  ;;  %26 = sbr.rel (!%p24_p13) target bundleno = 9 (0x9), region = 151 }
 0xd88   :  { %16048 = vsyncpa [#allocation4], 1 }
 0xd89   :  { %16050 = vsyncpa [#allocation4 + $0x1], 1 }
 0xd8a   :  { %16051 = vsyncpa [#allocation7], 1 }
 0xd8b   :  { %16052 = vsyncpa [#allocation10], 1 }
 0xd8c   :  { %16053 = vsyncpa [#allocation5], 1 }
 0xd8d   :  { %16055 = vsyncpa [#allocation5 + $0x1], 1 }

</bundles_post_ra>
